<compile_context>
chip_gen: v6e
topology: v6e:2x2x1
jax: 0.10.0
libtpu: 0.0.40
codegen_flags: <defaults>
</compile_context>

<pallas_src>
import math

import jax
import jax.numpy as jnp
from jax import lax
from jax.experimental import pallas as pl
from jax.experimental.pallas import tpu as pltpu

# ----------------------- model configuration (small) -----------------------
HIDDEN = 32             # common.HIDDEN (divisible by nhead=8)
BLOCKS = 16             # common.BLOCKS
N = 4                   # common.N
M_REAL = 12             # common.M_REAL  (N*M_REAL divisible by 6)
GROUPS = 6
SEQ = N * M_REAL // GROUPS   # transformer sequence length = 8
NHEAD = 8               # nn.Transformer default
HEAD_DIM = HIDDEN // NHEAD
FFN = 2048              # nn.Transformer default dim_feedforward
NLAYERS = 12            # num_encoder_layers = num_decoder_layers = 12
LN_EPS = 1e-5
RANGE = 4.0             # self.range


# ----------------------------- in-kernel helpers -----------------------------
def _layernorm(x, g, b):
    # LayerNorm over last dim, biased variance (matches torch), f32 math.
    mu = jnp.mean(x, axis=-1, keepdims=True)
    xc = x - mu
    var = jnp.mean(xc * xc, axis=-1, keepdims=True)
    return xc * lax.rsqrt(var + LN_EPS) * g + b


# ------------------------------ the fused kernel -----------------------------
def _denoiser_kernel(coords_ref, time_ref, hmask_ref, bbias_ref, wcoords_ref,
                     e_aw_ref, e_ab_ref, e_ln_ref, e_f1w_ref, e_f1b_ref,
                     e_f2w_ref, e_f2b_ref, e_nrm_ref,
                     d_saw_ref, d_sab_ref, d_caw_ref, d_cab_ref, d_ln_ref,
                     d_f1w_ref, d_f1b_ref, d_f2w_ref, d_f2b_ref, d_nrm_ref,
                     ce0w_ref, ce0b_ref, cew_ref, ceb_ref,
                     nrw_ref, nrb_ref, nrow_ref, nrob_ref,
                     out_ref):
    rows = coords_ref.shape[0]
    hmask = hmask_ref[...]            # (NHEAD, 1, HIDDEN)  0/1 head-column mask
    bbias = bbias_ref[...]            # (rows, rows)        0 / -1e30 batch mask
    scale = 1.0 / math.sqrt(HEAD_DIM)

    def lin(x, w, b):
        # bf16 matmul, f32 accumulation, f32 bias add.
        return jnp.dot(x.astype(jnp.bfloat16), w,
                       preferred_element_type=jnp.float32) + b

    def attention(q, k, v):
        # Head-batched attention without any relayout:
        #  - q and v are masked to each head's columns (disjoint 4-lane groups),
        #  - the head axis becomes the einsum batch dim,
        #  - cross-batch score entries are masked with bbias before softmax,
        #  - per-head outputs occupy disjoint columns, so summing over heads
        #    reassembles the full (rows, HIDDEN) result in one shot.
        qh = (q[None, :, :] * hmask).astype(jnp.bfloat16)            # (NH, rows, H)
        vh = (v[None, :, :] * hmask).astype(jnp.bfloat16)            # (NH, rows, H)
        kb = jnp.broadcast_to(k.astype(jnp.bfloat16)[None, :, :],
                              (NHEAD, rows, HIDDEN))                  # (NH, rows, H)
        s = jnp.einsum("hqd,hkd->hqk", qh, kb,
                       preferred_element_type=jnp.float32) * scale + bbias
        s = s - jnp.max(s, axis=-1, keepdims=True)
        p = jnp.exp(s)
        p = p * pl.reciprocal(jnp.sum(p, axis=-1, keepdims=True), approx=True)
        o = jnp.einsum("hqk,hkd->hqd", p.astype(jnp.bfloat16), vh,
                       preferred_element_type=jnp.float32)            # (NH, rows, H)
        acc = o[0]
        for h in range(1, NHEAD):
            acc = acc + o[h]
        return acc                                                    # (rows, H)

    def ffn(x, w1, b1, w2, b2):
        h = jnp.maximum(lin(x, w1, b1), 0.0)
        return lin(h, w2, b2)

    def enc_layer(l, x):
        aw = e_aw_ref[l]       # (4, H, H) bf16 : wq, wk, wv, wo
        ab = e_ab_ref[l]       # (4, 1, H) f32
        ln = e_ln_ref[l]       # (4, 1, H) f32  : ln1_g, ln1_b, ln2_g, ln2_b
        sa = attention(lin(x, aw[0], ab[0]), lin(x, aw[1], ab[1]),
                       lin(x, aw[2], ab[2]))
        x = _layernorm(x + lin(sa, aw[3], ab[3]), ln[0], ln[1])
        ff = ffn(x, e_f1w_ref[l], e_f1b_ref[l], e_f2w_ref[l], e_f2b_ref[l])
        return _layernorm(x + ff, ln[2], ln[3])

    def dec_layer(l, x):
        saw = d_saw_ref[l]; sab = d_sab_ref[l]      # self-attn weights/biases
        caw = d_caw_ref[l]; cab = d_cab_ref[l]      # cross-attn weights/biases
        ln = d_ln_ref[l]                            # (6, 1, H)
        sa = attention(lin(x, saw[0], sab[0]), lin(x, saw[1], sab[1]),
                       lin(x, saw[2], sab[2]))
        x = _layernorm(x + lin(sa, saw[3], sab[3]), ln[0], ln[1])
        kc = jnp.dot(mem_bf, caw[1], preferred_element_type=jnp.float32) + cab[1]
        vc = jnp.dot(mem_bf, caw[2], preferred_element_type=jnp.float32) + cab[2]
        ca = attention(lin(x, caw[0], cab[0]), kc, vc)
        x = _layernorm(x + lin(ca, caw[3], cab[3]), ln[2], ln[3])
        ff = ffn(x, d_f1w_ref[l], d_f1b_ref[l], d_f2w_ref[l], d_f2b_ref[l])
        return _layernorm(x + ff, ln[4], ln[5])

    # ---- embedding projection + encoder stack + final encoder norm ----
    emb = jnp.dot(coords_ref[...].astype(jnp.bfloat16), wcoords_ref[...],
                  preferred_element_type=jnp.float32)                 # (rows, H)
    x = lax.fori_loop(0, NLAYERS, enc_layer, emb + time_ref[...])
    memory = _layernorm(x, e_nrm_ref[0], e_nrm_ref[1])
    mem_bf = memory.astype(jnp.bfloat16)

    # ---- decoder stack (tgt = embeds, without time) + final decoder norm ----
    x = lax.fori_loop(0, NLAYERS, dec_layer, emb)
    dec_out = _layernorm(x, d_nrm_ref[0], d_nrm_ref[1])

    # ---- make_coord_embed: Linear(H,6H) then 4x [Linear(6H,6H), ReLU] ----
    y = lin(dec_out, ce0w_ref[...], ce0b_ref[...])
    for i in range(4):
        y = jnp.maximum(lin(y, cew_ref[i], ceb_ref[i]), 0.0)

    # ---- make_noise_result in grouped (block-diagonal) layout ----
    # 4x [Linear(H,H), ReLU] + Linear(H,1), applied per 32-lane group of y.
    for i in range(4):
        y = jnp.maximum(lin(y, nrw_ref[i], nrb_ref[i]), 0.0)
    out_ref[...] = lin(y, nrow_ref[...], nrob_ref[...])               # (rows, 6)


# ------------------------------ wrapper helpers ------------------------------
def sinusoidal_time_embed(t):
    half = HIDDEN // 2
    freq = math.log(1000.0) / (half - 1)
    e = jnp.exp(jnp.arange(half, dtype=jnp.float32) * -freq)
    emb = t[:, None] * e[None, :]
    return jnp.concatenate([jnp.sin(emb), jnp.cos(emb)], axis=-1)     # (B, HIDDEN)


def _block_diag6(w):
    """kron(I_6, w): block-diagonal weight that applies w independently per group."""
    eye = jnp.eye(GROUPS, dtype=w.dtype)
    out = jnp.einsum("ab,...io->...aibo", eye, w)
    return out.reshape(w.shape[:-2] + (GROUPS * w.shape[-2], GROUPS * w.shape[-1]))


def simple_denoiser_forward(params, svg, timestamp):
    b = svg.shape[0]
    rows = b * SEQ

    # quantize coordinates -> indices -> embedding table gather (tiny table; plain JAX)
    idx = svg.reshape(b, SEQ, GROUPS)
    idx = jnp.clip((idx + RANGE) / (2.0 * RANGE) * BLOCKS, 0.0, BLOCKS - 1).astype(jnp.int32)
    coords = params["w_x"][idx].reshape(rows, GROUPS * HIDDEN)        # (rows, 192)

    # time embedding broadcast to every sequence position
    time_b = jnp.repeat(sinusoidal_time_embed(timestamp), SEQ, axis=0)  # (rows, H)

    # static masks for head-batched attention
    head_mask = (jnp.arange(HIDDEN, dtype=jnp.int32)[None, :] // HEAD_DIM
                 == jnp.arange(NHEAD, dtype=jnp.int32)[:, None]
                 ).astype(jnp.float32)[:, None, :]                     # (NH, 1, H)
    rb = jnp.arange(rows, dtype=jnp.int32) // SEQ
    bat_bias = jnp.where(rb[:, None] == rb[None, :], 0.0, -1e30).astype(jnp.float32)

    # make_noise_result weights in block-diagonal layout (shared across groups)
    nrw_bd = _block_diag6(params["nr_w"]).astype(jnp.bfloat16)         # (4, 192, 192)
    nrb_bd = jnp.tile(params["nr_b"], (1, 1, GROUPS))                  # (4, 1, 192)
    nrow_bd = _block_diag6(params["nr_out_w"]).astype(jnp.bfloat16)    # (192, 6)
    nrob_bd = jnp.tile(params["nr_out_b"], (1, GROUPS))                # (1, 6)

    out2 = pl.pallas_call(
        _denoiser_kernel,
        out_shape=jax.ShapeDtypeStruct((rows, GROUPS), jnp.float32),
        compiler_params=pltpu.CompilerParams(vmem_limit_bytes=32 * 1024 * 1024),
    )(coords, time_b, head_mask, bat_bias, params["w_coords"],
      params["enc_attn_w"], params["enc_attn_b"], params["enc_ln"],
      params["enc_ff1_w"], params["enc_ff1_b"], params["enc_ff2_w"],
      params["enc_ff2_b"], params["enc_norm"],
      params["dec_sa_w"], params["dec_sa_b"], params["dec_ca_w"],
      params["dec_ca_b"], params["dec_ln"], params["dec_ff1_w"],
      params["dec_ff1_b"], params["dec_ff2_w"], params["dec_ff2_b"],
      params["dec_norm"],
      params["ce0_w"], params["ce0_b"], params["ce_w"], params["ce_b"],
      nrw_bd, nrb_bd, nrow_bd, nrob_bd)

    # out2[b*SEQ + s, g] is the noise result for coordinate s*6+g of batch b.
    return out2.reshape(b, N, M_REAL)


# --------------------------- deterministic params ---------------------------
def init_params(key):
    keys = iter(jax.random.split(key, 32))

    def nk():
        return next(keys)

    def w(shape, fan_in, dtype=jnp.bfloat16):
        return (jax.random.normal(nk(), shape, jnp.float32) / math.sqrt(fan_in)).astype(dtype)

    L, H = NLAYERS, HIDDEN
    p = {}
    p["w_x"] = jax.random.normal(nk(), (BLOCKS, H), jnp.float32) * 0.02
    p["w_coords"] = w((GROUPS * H, H), GROUPS * H)

    # encoder (stacked over layers; attention packed as [wq, wk, wv, wo])
    p["enc_attn_w"] = w((L, 4, H, H), H)
    p["enc_attn_b"] = jnp.zeros((L, 4, 1, H), jnp.float32)
    p["enc_ln"] = jnp.tile(jnp.array([1.0, 0.0, 1.0, 0.0], jnp.float32)[None, :, None, None],
                           (L, 1, 1, H))
    p["enc_ff1_w"] = w((L, H, FFN), H)
    p["enc_ff1_b"] = jnp.zeros((L, 1, FFN), jnp.float32)
    p["enc_ff2_w"] = w((L, FFN, H), FFN)
    p["enc_ff2_b"] = jnp.zeros((L, 1, H), jnp.float32)
    p["enc_norm"] = jnp.stack([jnp.ones((1, H), jnp.float32),
                               jnp.zeros((1, H), jnp.float32)])        # (2, 1, H)

    # decoder (self-attn, cross-attn, ffn, 3 layernorms)
    p["dec_sa_w"] = w((L, 4, H, H), H)
    p["dec_sa_b"] = jnp.zeros((L, 4, 1, H), jnp.float32)
    p["dec_ca_w"] = w((L, 4, H, H), H)
    p["dec_ca_b"] = jnp.zeros((L, 4, 1, H), jnp.float32)
    p["dec_ln"] = jnp.tile(jnp.array([1.0, 0.0, 1.0, 0.0, 1.0, 0.0],
                                     jnp.float32)[None, :, None, None], (L, 1, 1, H))
    p["dec_ff1_w"] = w((L, H, FFN), H)
    p["dec_ff1_b"] = jnp.zeros((L, 1, FFN), jnp.float32)
    p["dec_ff2_w"] = w((L, FFN, H), FFN)
    p["dec_ff2_b"] = jnp.zeros((L, 1, H), jnp.float32)
    p["dec_norm"] = jnp.stack([jnp.ones((1, H), jnp.float32),
                               jnp.zeros((1, H), jnp.float32)])        # (2, 1, H)

    # make_coord_embed head
    p["ce0_w"] = w((H, GROUPS * H), H)
    p["ce0_b"] = jnp.zeros((1, GROUPS * H), jnp.float32)
    p["ce_w"] = w((4, GROUPS * H, GROUPS * H), GROUPS * H)
    p["ce_b"] = jnp.zeros((4, 1, GROUPS * H), jnp.float32)

    # make_noise_result head (raw per-group weights; block-diag built in wrapper)
    p["nr_w"] = w((4, H, H), H, dtype=jnp.float32)
    p["nr_b"] = jnp.zeros((4, 1, H), jnp.float32)
    p["nr_out_w"] = w((H, 1), H, dtype=jnp.float32)
    p["nr_out_b"] = jnp.zeros((1, 1), jnp.float32)
    return p


# ---------------------------------- main ------------------------------------
if __name__ == "__main__":
    key = jax.random.PRNGKey(0)
    pkey, xkey, tkey = jax.random.split(key, 3)

    params = init_params(pkey)
    svg = jax.random.normal(xkey, (2, N, M_REAL), jnp.float32)          # (B, N, M_REAL)
    timestamp = jax.random.uniform(tkey, (2,), jnp.float32, 0.0, 1000.0)

    fwd = jax.jit(simple_denoiser_forward)
    out = fwd(params, svg, timestamp)
    jax.block_until_ready(out)

    assert out.shape == (2, N, M_REAL), out.shape
    assert jnp.all(jnp.isfinite(out))
    print("KERNEL_OK")
</pallas_src>

<mosaic_0001>
module attributes {stable_mosaic.version = 11 : i64} {
  func.func @_denoiser_kernel(%arg0: memref<16x192xf32, #tpu.memory_space<vmem>>, %arg1: memref<16x32xf32, #tpu.memory_space<vmem>>, %arg2: memref<8x1x32xf32, #tpu.memory_space<vmem>>, %arg3: memref<16x16xf32, #tpu.memory_space<vmem>>, %arg4: memref<192x32xbf16, #tpu.memory_space<vmem>>, %arg5: memref<12x4x32x32xbf16, #tpu.memory_space<vmem>>, %arg6: memref<12x4x1x32xf32, #tpu.memory_space<vmem>>, %arg7: memref<12x4x1x32xf32, #tpu.memory_space<vmem>>, %arg8: memref<12x32x2048xbf16, #tpu.memory_space<vmem>>, %arg9: memref<12x1x2048xf32, #tpu.memory_space<vmem>>, %arg10: memref<12x2048x32xbf16, #tpu.memory_space<vmem>>, %arg11: memref<12x1x32xf32, #tpu.memory_space<vmem>>, %arg12: memref<2x1x32xf32, #tpu.memory_space<vmem>>, %arg13: memref<12x4x32x32xbf16, #tpu.memory_space<vmem>>, %arg14: memref<12x4x1x32xf32, #tpu.memory_space<vmem>>, %arg15: memref<12x4x32x32xbf16, #tpu.memory_space<vmem>>, %arg16: memref<12x4x1x32xf32, #tpu.memory_space<vmem>>, %arg17: memref<12x6x1x32xf32, #tpu.memory_space<vmem>>, %arg18: memref<12x32x2048xbf16, #tpu.memory_space<vmem>>, %arg19: memref<12x1x2048xf32, #tpu.memory_space<vmem>>, %arg20: memref<12x2048x32xbf16, #tpu.memory_space<vmem>>, %arg21: memref<12x1x32xf32, #tpu.memory_space<vmem>>, %arg22: memref<2x1x32xf32, #tpu.memory_space<vmem>>, %arg23: memref<32x192xbf16, #tpu.memory_space<vmem>>, %arg24: memref<1x192xf32, #tpu.memory_space<vmem>>, %arg25: memref<4x192x192xbf16, #tpu.memory_space<vmem>>, %arg26: memref<4x1x192xf32, #tpu.memory_space<vmem>>, %arg27: memref<4x192x192xbf16, #tpu.memory_space<vmem>>, %arg28: memref<4x1x192xf32, #tpu.memory_space<vmem>>, %arg29: memref<192x6xbf16, #tpu.memory_space<vmem>>, %arg30: memref<1x6xf32, #tpu.memory_space<vmem>>, %arg31: memref<16x6xf32, #tpu.memory_space<vmem>>) attributes {dimension_semantics = [], scalar_prefetch = 0 : i64, scratch_operands = 0 : i64, tpu.core_type = #tpu.core_type<tc>} {
    %c0 = arith.constant 0 : index
    %c0_0 = arith.constant 0 : index
    %c0_1 = arith.constant 0 : index
    %0 = vector.load %arg2[%c0, %c0_0, %c0_1] : memref<8x1x32xf32, #tpu.memory_space<vmem>>, vector<8x1x32xf32>
    %c0_2 = arith.constant 0 : index
    %c0_3 = arith.constant 0 : index
    %1 = vector.load %arg3[%c0_2, %c0_3] : memref<16x16xf32, #tpu.memory_space<vmem>>, vector<16x16xf32>
    %c0_4 = arith.constant 0 : index
    %c0_5 = arith.constant 0 : index
    %2 = vector.load %arg0[%c0_4, %c0_5] : memref<16x192xf32, #tpu.memory_space<vmem>>, vector<16x192xf32>
    %3 = arith.truncf %2 : vector<16x192xf32> to vector<16x192xbf16>
    %c0_6 = arith.constant 0 : index
    %c0_7 = arith.constant 0 : index
    %4 = vector.load %arg4[%c0_6, %c0_7] : memref<192x32xbf16, #tpu.memory_space<vmem>>, vector<192x32xbf16>
    %cst = arith.constant dense<0.000000e+00> : vector<16x32xf32>
    %5 = tpu.matmul %3, %4, %cst {dimension_numbers = #tpu.dot_dimension_numbers<[1], [0], [0], [1], [0, 0, 1, 1], [], []>} : vector<16x192xbf16>, vector<192x32xbf16>, vector<16x32xf32> -> vector<16x32xf32>
    %c0_8 = arith.constant 0 : index
    %c0_9 = arith.constant 0 : index
    %6 = vector.load %arg1[%c0_8, %c0_9] : memref<16x32xf32, #tpu.memory_space<vmem>>, vector<16x32xf32>
    %7 = arith.addf %5, %6 : vector<16x32xf32>
    %c0_i32 = arith.constant 0 : i32
    %c12_i32 = arith.constant 12 : i32
    %8 = arith.addi %c0_i32, %c12_i32 : i32
    %c1_i32 = arith.constant 1 : i32
    %9 = scf.for %arg32 = %c0_i32 to %8 step %c1_i32 iter_args(%arg33 = %7) -> (vector<16x32xf32>)  : i32 {
      %154 = arith.index_cast %arg32 : i32 to index
      %c0_110 = arith.constant 0 : index
      %c0_111 = arith.constant 0 : index
      %c0_112 = arith.constant 0 : index
      %155 = vector.load %arg5[%154, %c0_110, %c0_111, %c0_112] : memref<12x4x32x32xbf16, #tpu.memory_space<vmem>>, vector<1x4x32x32xbf16>
      %156 = vector.shape_cast %155 : vector<1x4x32x32xbf16> to vector<4x32x32xbf16>
      %157 = arith.index_cast %arg32 : i32 to index
      %c0_113 = arith.constant 0 : index
      %c0_114 = arith.constant 0 : index
      %c0_115 = arith.constant 0 : index
      %158 = vector.load %arg6[%157, %c0_113, %c0_114, %c0_115] : memref<12x4x1x32xf32, #tpu.memory_space<vmem>>, vector<1x4x1x32xf32>
      %159 = vector.shape_cast %158 : vector<1x4x1x32xf32> to vector<4x1x32xf32>
      %160 = arith.index_cast %arg32 : i32 to index
      %c0_116 = arith.constant 0 : index
      %c0_117 = arith.constant 0 : index
      %c0_118 = arith.constant 0 : index
      %161 = vector.load %arg7[%160, %c0_116, %c0_117, %c0_118] : memref<12x4x1x32xf32, #tpu.memory_space<vmem>>, vector<1x4x1x32xf32>
      %162 = vector.shape_cast %161 : vector<1x4x1x32xf32> to vector<4x1x32xf32>
      %163 = vector.extract_strided_slice %156 {offsets = [0, 0, 0], sizes = [1, 32, 32], strides = [1, 1, 1]} : vector<4x32x32xbf16> to vector<1x32x32xbf16>
      %164 = vector.shape_cast %163 : vector<1x32x32xbf16> to vector<32x32xbf16>
      %165 = vector.extract_strided_slice %159 {offsets = [0, 0, 0], sizes = [1, 1, 32], strides = [1, 1, 1]} : vector<4x1x32xf32> to vector<1x1x32xf32>
      %166 = vector.shape_cast %165 : vector<1x1x32xf32> to vector<1x32xf32>
      %167 = arith.truncf %arg33 : vector<16x32xf32> to vector<16x32xbf16>
      %cst_119 = arith.constant dense<0.000000e+00> : vector<16x32xf32>
      %168 = tpu.matmul %167, %164, %cst_119 {dimension_numbers = #tpu.dot_dimension_numbers<[1], [0], [0], [1], [0, 0, 1, 1], [], []>} : vector<16x32xbf16>, vector<32x32xbf16>, vector<16x32xf32> -> vector<16x32xf32>
      %169 = vector.broadcast %166 : vector<1x32xf32> to vector<16x32xf32>
      %170 = arith.addf %168, %169 : vector<16x32xf32>
      %171 = vector.extract_strided_slice %156 {offsets = [1, 0, 0], sizes = [1, 32, 32], strides = [1, 1, 1]} : vector<4x32x32xbf16> to vector<1x32x32xbf16>
      %172 = vector.shape_cast %171 : vector<1x32x32xbf16> to vector<32x32xbf16>
      %173 = vector.extract_strided_slice %159 {offsets = [1, 0, 0], sizes = [1, 1, 32], strides = [1, 1, 1]} : vector<4x1x32xf32> to vector<1x1x32xf32>
      %174 = vector.shape_cast %173 : vector<1x1x32xf32> to vector<1x32xf32>
      %175 = arith.truncf %arg33 : vector<16x32xf32> to vector<16x32xbf16>
      %cst_120 = arith.constant dense<0.000000e+00> : vector<16x32xf32>
      %176 = tpu.matmul %175, %172, %cst_120 {dimension_numbers = #tpu.dot_dimension_numbers<[1], [0], [0], [1], [0, 0, 1, 1], [], []>} : vector<16x32xbf16>, vector<32x32xbf16>, vector<16x32xf32> -> vector<16x32xf32>
      %177 = vector.broadcast %174 : vector<1x32xf32> to vector<16x32xf32>
      %178 = arith.addf %176, %177 : vector<16x32xf32>
      %179 = vector.extract_strided_slice %156 {offsets = [2, 0, 0], sizes = [1, 32, 32], strides = [1, 1, 1]} : vector<4x32x32xbf16> to vector<1x32x32xbf16>
      %180 = vector.shape_cast %179 : vector<1x32x32xbf16> to vector<32x32xbf16>
      %181 = vector.extract_strided_slice %159 {offsets = [2, 0, 0], sizes = [1, 1, 32], strides = [1, 1, 1]} : vector<4x1x32xf32> to vector<1x1x32xf32>
      %182 = vector.shape_cast %181 : vector<1x1x32xf32> to vector<1x32xf32>
      %183 = arith.truncf %arg33 : vector<16x32xf32> to vector<16x32xbf16>
      %cst_121 = arith.constant dense<0.000000e+00> : vector<16x32xf32>
      %184 = tpu.matmul %183, %180, %cst_121 {dimension_numbers = #tpu.dot_dimension_numbers<[1], [0], [0], [1], [0, 0, 1, 1], [], []>} : vector<16x32xbf16>, vector<32x32xbf16>, vector<16x32xf32> -> vector<16x32xf32>
      %185 = vector.broadcast %182 : vector<1x32xf32> to vector<16x32xf32>
      %186 = arith.addf %184, %185 : vector<16x32xf32>
      %187 = vector.shape_cast %170 : vector<16x32xf32> to vector<1x16x32xf32>
      %188 = vector.broadcast %187 : vector<1x16x32xf32> to vector<8x16x32xf32>
      %189 = vector.broadcast %0 : vector<8x1x32xf32> to vector<8x16x32xf32>
      %190 = arith.mulf %188, %189 : vector<8x16x32xf32>
      %191 = arith.truncf %190 : vector<8x16x32xf32> to vector<8x16x32xbf16>
      %192 = vector.shape_cast %186 : vector<16x32xf32> to vector<1x16x32xf32>
      %193 = vector.broadcast %192 : vector<1x16x32xf32> to vector<8x16x32xf32>
      %194 = vector.broadcast %0 : vector<8x1x32xf32> to vector<8x16x32xf32>
      %195 = arith.mulf %193, %194 : vector<8x16x32xf32>
      %196 = arith.truncf %195 : vector<8x16x32xf32> to vector<8x16x32xbf16>
      %197 = arith.truncf %178 : vector<16x32xf32> to vector<16x32xbf16>
      %198 = vector.shape_cast %197 : vector<16x32xbf16> to vector<1x16x32xbf16>
      %199 = vector.shape_cast %198 : vector<1x16x32xbf16> to vector<1x16x32xbf16>
      %200 = vector.broadcast %199 : vector<1x16x32xbf16> to vector<8x16x32xbf16>
      "tpu.trace_start"() <{level = 10 : i32, message = "hqd,hkd->hqk"}> : () -> ()
      %cst_122 = arith.constant dense<0.000000e+00> : vector<8x16x16xf32>
      %201 = tpu.matmul %191, %200, %cst_122 {dimension_numbers = #tpu.dot_dimension_numbers<[2], [2], [1], [1], [0, 0, 0, 1, 1, 1], [0], [0]>} : vector<8x16x32xbf16>, vector<8x16x32xbf16>, vector<8x16x16xf32> -> vector<8x16x16xf32>
      "tpu.trace_stop"() : () -> ()
      %cst_123 = arith.constant 5.000000e-01 : f32
      %202 = vector.broadcast %cst_123 : f32 to vector<8x16x16xf32>
      %203 = arith.mulf %201, %202 : vector<8x16x16xf32>
      %204 = vector.shape_cast %1 : vector<16x16xf32> to vector<1x16x16xf32>
      %205 = vector.broadcast %204 : vector<1x16x16xf32> to vector<8x16x16xf32>
      %206 = arith.addf %203, %205 : vector<8x16x16xf32>
      %cst_124 = arith.constant dense<0xFF800000> : vector<8x16xf32>
      %207 = vector.multi_reduction <maximumf>, %206, %cst_124 [2] : vector<8x16x16xf32> to vector<8x16xf32>
      %208 = vector.shape_cast %207 : vector<8x16xf32> to vector<8x16x1xf32>
      %209 = vector.broadcast %208 : vector<8x16x1xf32> to vector<8x16x16xf32>
      %210 = arith.subf %206, %209 : vector<8x16x16xf32>
      %211 = math.exp %210 : vector<8x16x16xf32>
      %cst_125 = arith.constant dense<0.000000e+00> : vector<8x16xf32>
      %212 = vector.multi_reduction <add>, %211, %cst_125 [2] : vector<8x16x16xf32> to vector<8x16xf32>
      %213 = vector.shape_cast %212 : vector<8x16xf32> to vector<8x16x1xf32>
      %214 = tpu.reciprocal %213 {approx = true} : vector<8x16x1xf32> -> vector<8x16x1xf32>
      %215 = vector.broadcast %214 : vector<8x16x1xf32> to vector<8x16x16xf32>
      %216 = arith.mulf %211, %215 : vector<8x16x16xf32>
      %217 = arith.truncf %216 : vector<8x16x16xf32> to vector<8x16x16xbf16>
      "tpu.trace_start"() <{level = 10 : i32, message = "hqk,hkd->hqd"}> : () -> ()
      %cst_126 = arith.constant dense<0.000000e+00> : vector<8x16x32xf32>
      %218 = tpu.matmul %217, %196, %cst_126 {dimension_numbers = #tpu.dot_dimension_numbers<[2], [1], [1], [2], [0, 0, 0, 1, 1, 2], [0], [0]>} : vector<8x16x16xbf16>, vector<8x16x32xbf16>, vector<8x16x32xf32> -> vector<8x16x32xf32>
      "tpu.trace_stop"() : () -> ()
      %219 = vector.extract_strided_slice %218 {offsets = [0, 0, 0], sizes = [1, 16, 32], strides = [1, 1, 1]} : vector<8x16x32xf32> to vector<1x16x32xf32>
      %220 = vector.shape_cast %219 : vector<1x16x32xf32> to vector<16x32xf32>
      %221 = vector.extract_strided_slice %218 {offsets = [1, 0, 0], sizes = [1, 16, 32], strides = [1, 1, 1]} : vector<8x16x32xf32> to vector<1x16x32xf32>
      %222 = vector.shape_cast %221 : vector<1x16x32xf32> to vector<16x32xf32>
      %223 = arith.addf %220, %222 : vector<16x32xf32>
      %224 = vector.extract_strided_slice %218 {offsets = [2, 0, 0], sizes = [1, 16, 32], strides = [1, 1, 1]} : vector<8x16x32xf32> to vector<1x16x32xf32>
      %225 = vector.shape_cast %224 : vector<1x16x32xf32> to vector<16x32xf32>
      %226 = arith.addf %223, %225 : vector<16x32xf32>
      %227 = vector.extract_strided_slice %218 {offsets = [3, 0, 0], sizes = [1, 16, 32], strides = [1, 1, 1]} : vector<8x16x32xf32> to vector<1x16x32xf32>
      %228 = vector.shape_cast %227 : vector<1x16x32xf32> to vector<16x32xf32>
      %229 = arith.addf %226, %228 : vector<16x32xf32>
      %230 = vector.extract_strided_slice %218 {offsets = [4, 0, 0], sizes = [1, 16, 32], strides = [1, 1, 1]} : vector<8x16x32xf32> to vector<1x16x32xf32>
      %231 = vector.shape_cast %230 : vector<1x16x32xf32> to vector<16x32xf32>
      %232 = arith.addf %229, %231 : vector<16x32xf32>
      %233 = vector.extract_strided_slice %218 {offsets = [5, 0, 0], sizes = [1, 16, 32], strides = [1, 1, 1]} : vector<8x16x32xf32> to vector<1x16x32xf32>
      %234 = vector.shape_cast %233 : vector<1x16x32xf32> to vector<16x32xf32>
      %235 = arith.addf %232, %234 : vector<16x32xf32>
      %236 = vector.extract_strided_slice %218 {offsets = [6, 0, 0], sizes = [1, 16, 32], strides = [1, 1, 1]} : vector<8x16x32xf32> to vector<1x16x32xf32>
      %237 = vector.shape_cast %236 : vector<1x16x32xf32> to vector<16x32xf32>
      %238 = arith.addf %235, %237 : vector<16x32xf32>
      %239 = vector.extract_strided_slice %218 {offsets = [7, 0, 0], sizes = [1, 16, 32], strides = [1, 1, 1]} : vector<8x16x32xf32> to vector<1x16x32xf32>
      %240 = vector.shape_cast %239 : vector<1x16x32xf32> to vector<16x32xf32>
      %241 = arith.addf %238, %240 : vector<16x32xf32>
      %242 = vector.extract_strided_slice %156 {offsets = [3, 0, 0], sizes = [1, 32, 32], strides = [1, 1, 1]} : vector<4x32x32xbf16> to vector<1x32x32xbf16>
      %243 = vector.shape_cast %242 : vector<1x32x32xbf16> to vector<32x32xbf16>
      %244 = vector.extract_strided_slice %159 {offsets = [3, 0, 0], sizes = [1, 1, 32], strides = [1, 1, 1]} : vector<4x1x32xf32> to vector<1x1x32xf32>
      %245 = vector.shape_cast %244 : vector<1x1x32xf32> to vector<1x32xf32>
      %246 = arith.truncf %241 : vector<16x32xf32> to vector<16x32xbf16>
      %cst_127 = arith.constant dense<0.000000e+00> : vector<16x32xf32>
      %247 = tpu.matmul %246, %243, %cst_127 {dimension_numbers = #tpu.dot_dimension_numbers<[1], [0], [0], [1], [0, 0, 1, 1], [], []>} : vector<16x32xbf16>, vector<32x32xbf16>, vector<16x32xf32> -> vector<16x32xf32>
      %248 = vector.broadcast %245 : vector<1x32xf32> to vector<16x32xf32>
      %249 = arith.addf %247, %248 : vector<16x32xf32>
      %250 = arith.addf %arg33, %249 : vector<16x32xf32>
      %251 = vector.extract_strided_slice %162 {offsets = [0, 0, 0], sizes = [1, 1, 32], strides = [1, 1, 1]} : vector<4x1x32xf32> to vector<1x1x32xf32>
      %252 = vector.shape_cast %251 : vector<1x1x32xf32> to vector<1x32xf32>
      %253 = vector.extract_strided_slice %162 {offsets = [1, 0, 0], sizes = [1, 1, 32], strides = [1, 1, 1]} : vector<4x1x32xf32> to vector<1x1x32xf32>
      %254 = vector.shape_cast %253 : vector<1x1x32xf32> to vector<1x32xf32>
      %cst_128 = arith.constant dense<0.000000e+00> : vector<16xf32>
      %255 = vector.multi_reduction <add>, %250, %cst_128 [1] : vector<16x32xf32> to vector<16xf32>
      %256 = vector.shape_cast %255 : vector<16xf32> to vector<16x1xf32>
      %cst_129 = arith.constant 3.200000e+01 : f32
      %257 = vector.broadcast %cst_129 : f32 to vector<16x1xf32>
      %258 = arith.divf %256, %257 : vector<16x1xf32>
      %259 = vector.broadcast %258 : vector<16x1xf32> to vector<16x32xf32>
      %260 = arith.subf %250, %259 : vector<16x32xf32>
      %261 = arith.mulf %260, %260 : vector<16x32xf32>
      %cst_130 = arith.constant dense<0.000000e+00> : vector<16xf32>
      %262 = vector.multi_reduction <add>, %261, %cst_130 [1] : vector<16x32xf32> to vector<16xf32>
      %263 = vector.shape_cast %262 : vector<16xf32> to vector<16x1xf32>
      %cst_131 = arith.constant 3.200000e+01 : f32
      %264 = vector.broadcast %cst_131 : f32 to vector<16x1xf32>
      %265 = arith.divf %263, %264 : vector<16x1xf32>
      %cst_132 = arith.constant 9.99999974E-6 : f32
      %266 = vector.broadcast %cst_132 : f32 to vector<16x1xf32>
      %267 = arith.addf %265, %266 : vector<16x1xf32>
      %268 = math.rsqrt %267 : vector<16x1xf32>
      %269 = vector.broadcast %268 : vector<16x1xf32> to vector<16x32xf32>
      %270 = arith.mulf %260, %269 : vector<16x32xf32>
      %271 = vector.broadcast %252 : vector<1x32xf32> to vector<16x32xf32>
      %272 = arith.mulf %270, %271 : vector<16x32xf32>
      %273 = vector.broadcast %254 : vector<1x32xf32> to vector<16x32xf32>
      %274 = arith.addf %272, %273 : vector<16x32xf32>
      %275 = arith.index_cast %arg32 : i32 to index
      %c0_133 = arith.constant 0 : index
      %c0_134 = arith.constant 0 : index
      %276 = vector.load %arg8[%275, %c0_133, %c0_134] : memref<12x32x2048xbf16, #tpu.memory_space<vmem>>, vector<1x32x2048xbf16>
      %277 = vector.shape_cast %276 : vector<1x32x2048xbf16> to vector<32x2048xbf16>
      %278 = arith.index_cast %arg32 : i32 to index
      %c0_135 = arith.constant 0 : index
      %c0_136 = arith.constant 0 : index
      %279 = vector.load %arg9[%278, %c0_135, %c0_136] : memref<12x1x2048xf32, #tpu.memory_space<vmem>>, vector<1x1x2048xf32>
      %280 = vector.shape_cast %279 : vector<1x1x2048xf32> to vector<1x2048xf32>
      %281 = arith.index_cast %arg32 : i32 to index
      %c0_137 = arith.constant 0 : index
      %c0_138 = arith.constant 0 : index
      %282 = vector.load %arg10[%281, %c0_137, %c0_138] : memref<12x2048x32xbf16, #tpu.memory_space<vmem>>, vector<1x2048x32xbf16>
      %283 = vector.shape_cast %282 : vector<1x2048x32xbf16> to vector<2048x32xbf16>
      %284 = arith.index_cast %arg32 : i32 to index
      %c0_139 = arith.constant 0 : index
      %c0_140 = arith.constant 0 : index
      %285 = vector.load %arg11[%284, %c0_139, %c0_140] : memref<12x1x32xf32, #tpu.memory_space<vmem>>, vector<1x1x32xf32>
      %286 = vector.shape_cast %285 : vector<1x1x32xf32> to vector<1x32xf32>
      %287 = arith.truncf %274 : vector<16x32xf32> to vector<16x32xbf16>
      %cst_141 = arith.constant dense<0.000000e+00> : vector<16x2048xf32>
      %288 = tpu.matmul %287, %277, %cst_141 {dimension_numbers = #tpu.dot_dimension_numbers<[1], [0], [0], [1], [0, 0, 1, 1], [], []>} : vector<16x32xbf16>, vector<32x2048xbf16>, vector<16x2048xf32> -> vector<16x2048xf32>
      %289 = vector.broadcast %280 : vector<1x2048xf32> to vector<16x2048xf32>
      %290 = arith.addf %288, %289 : vector<16x2048xf32>
      %cst_142 = arith.constant 0.000000e+00 : f32
      %291 = vector.broadcast %cst_142 : f32 to vector<16x2048xf32>
      %292 = arith.maximumf %290, %291 : vector<16x2048xf32>
      %293 = arith.truncf %292 : vector<16x2048xf32> to vector<16x2048xbf16>
      %cst_143 = arith.constant dense<0.000000e+00> : vector<16x32xf32>
      %294 = tpu.matmul %293, %283, %cst_143 {dimension_numbers = #tpu.dot_dimension_numbers<[1], [0], [0], [1], [0, 0, 1, 1], [], []>} : vector<16x2048xbf16>, vector<2048x32xbf16>, vector<16x32xf32> -> vector<16x32xf32>
      %295 = vector.broadcast %286 : vector<1x32xf32> to vector<16x32xf32>
      %296 = arith.addf %294, %295 : vector<16x32xf32>
      %297 = arith.addf %274, %296 : vector<16x32xf32>
      %298 = vector.extract_strided_slice %162 {offsets = [2, 0, 0], sizes = [1, 1, 32], strides = [1, 1, 1]} : vector<4x1x32xf32> to vector<1x1x32xf32>
      %299 = vector.shape_cast %298 : vector<1x1x32xf32> to vector<1x32xf32>
      %300 = vector.extract_strided_slice %162 {offsets = [3, 0, 0], sizes = [1, 1, 32], strides = [1, 1, 1]} : vector<4x1x32xf32> to vector<1x1x32xf32>
      %301 = vector.shape_cast %300 : vector<1x1x32xf32> to vector<1x32xf32>
      %cst_144 = arith.constant dense<0.000000e+00> : vector<16xf32>
      %302 = vector.multi_reduction <add>, %297, %cst_144 [1] : vector<16x32xf32> to vector<16xf32>
      %303 = vector.shape_cast %302 : vector<16xf32> to vector<16x1xf32>
      %cst_145 = arith.constant 3.200000e+01 : f32
      %304 = vector.broadcast %cst_145 : f32 to vector<16x1xf32>
      %305 = arith.divf %303, %304 : vector<16x1xf32>
      %306 = vector.broadcast %305 : vector<16x1xf32> to vector<16x32xf32>
      %307 = arith.subf %297, %306 : vector<16x32xf32>
      %308 = arith.mulf %307, %307 : vector<16x32xf32>
      %cst_146 = arith.constant dense<0.000000e+00> : vector<16xf32>
      %309 = vector.multi_reduction <add>, %308, %cst_146 [1] : vector<16x32xf32> to vector<16xf32>
      %310 = vector.shape_cast %309 : vector<16xf32> to vector<16x1xf32>
      %cst_147 = arith.constant 3.200000e+01 : f32
      %311 = vector.broadcast %cst_147 : f32 to vector<16x1xf32>
      %312 = arith.divf %310, %311 : vector<16x1xf32>
      %cst_148 = arith.constant 9.99999974E-6 : f32
      %313 = vector.broadcast %cst_148 : f32 to vector<16x1xf32>
      %314 = arith.addf %312, %313 : vector<16x1xf32>
      %315 = math.rsqrt %314 : vector<16x1xf32>
      %316 = vector.broadcast %315 : vector<16x1xf32> to vector<16x32xf32>
      %317 = arith.mulf %307, %316 : vector<16x32xf32>
      %318 = vector.broadcast %299 : vector<1x32xf32> to vector<16x32xf32>
      %319 = arith.mulf %317, %318 : vector<16x32xf32>
      %320 = vector.broadcast %301 : vector<1x32xf32> to vector<16x32xf32>
      %321 = arith.addf %319, %320 : vector<16x32xf32>
      scf.yield %321 : vector<16x32xf32>
    }
    %c12_i32_10 = arith.constant 12 : i32
    %c0_11 = arith.constant 0 : index
    %c0_12 = arith.constant 0 : index
    %c0_13 = arith.constant 0 : index
    %10 = vector.load %arg12[%c0_11, %c0_12, %c0_13] : memref<2x1x32xf32, #tpu.memory_space<vmem>>, vector<1x1x32xf32>
    %11 = vector.shape_cast %10 : vector<1x1x32xf32> to vector<1x32xf32>
    %c1 = arith.constant 1 : index
    %c0_14 = arith.constant 0 : index
    %c0_15 = arith.constant 0 : index
    %12 = vector.load %arg12[%c1, %c0_14, %c0_15] : memref<2x1x32xf32, #tpu.memory_space<vmem>>, vector<1x1x32xf32>
    %13 = vector.shape_cast %12 : vector<1x1x32xf32> to vector<1x32xf32>
    %cst_16 = arith.constant dense<0.000000e+00> : vector<16xf32>
    %14 = vector.multi_reduction <add>, %9, %cst_16 [1] : vector<16x32xf32> to vector<16xf32>
    %15 = vector.shape_cast %14 : vector<16xf32> to vector<16x1xf32>
    %cst_17 = arith.constant 3.200000e+01 : f32
    %16 = vector.broadcast %cst_17 : f32 to vector<16x1xf32>
    %17 = arith.divf %15, %16 : vector<16x1xf32>
    %18 = vector.broadcast %17 : vector<16x1xf32> to vector<16x32xf32>
    %19 = arith.subf %9, %18 : vector<16x32xf32>
    %20 = arith.mulf %19, %19 : vector<16x32xf32>
    %cst_18 = arith.constant dense<0.000000e+00> : vector<16xf32>
    %21 = vector.multi_reduction <add>, %20, %cst_18 [1] : vector<16x32xf32> to vector<16xf32>
    %22 = vector.shape_cast %21 : vector<16xf32> to vector<16x1xf32>
    %cst_19 = arith.constant 3.200000e+01 : f32
    %23 = vector.broadcast %cst_19 : f32 to vector<16x1xf32>
    %24 = arith.divf %22, %23 : vector<16x1xf32>
    %cst_20 = arith.constant 9.99999974E-6 : f32
    %25 = vector.broadcast %cst_20 : f32 to vector<16x1xf32>
    %26 = arith.addf %24, %25 : vector<16x1xf32>
    %27 = math.rsqrt %26 : vector<16x1xf32>
    %28 = vector.broadcast %27 : vector<16x1xf32> to vector<16x32xf32>
    %29 = arith.mulf %19, %28 : vector<16x32xf32>
    %30 = vector.broadcast %11 : vector<1x32xf32> to vector<16x32xf32>
    %31 = arith.mulf %29, %30 : vector<16x32xf32>
    %32 = vector.broadcast %13 : vector<1x32xf32> to vector<16x32xf32>
    %33 = arith.addf %31, %32 : vector<16x32xf32>
    %34 = arith.truncf %33 : vector<16x32xf32> to vector<16x32xbf16>
    %c0_i32_21 = arith.constant 0 : i32
    %c12_i32_22 = arith.constant 12 : i32
    %35 = arith.addi %c0_i32_21, %c12_i32_22 : i32
    %c1_i32_23 = arith.constant 1 : i32
    %36 = scf.for %arg32 = %c0_i32_21 to %35 step %c1_i32_23 iter_args(%arg33 = %5) -> (vector<16x32xf32>)  : i32 {
      %154 = arith.index_cast %arg32 : i32 to index
      %c0_110 = arith.constant 0 : index
      %c0_111 = arith.constant 0 : index
      %c0_112 = arith.constant 0 : index
      %155 = vector.load %arg13[%154, %c0_110, %c0_111, %c0_112] : memref<12x4x32x32xbf16, #tpu.memory_space<vmem>>, vector<1x4x32x32xbf16>
      %156 = vector.shape_cast %155 : vector<1x4x32x32xbf16> to vector<4x32x32xbf16>
      %157 = arith.index_cast %arg32 : i32 to index
      %c0_113 = arith.constant 0 : index
      %c0_114 = arith.constant 0 : index
      %c0_115 = arith.constant 0 : index
      %158 = vector.load %arg14[%157, %c0_113, %c0_114, %c0_115] : memref<12x4x1x32xf32, #tpu.memory_space<vmem>>, vector<1x4x1x32xf32>
      %159 = vector.shape_cast %158 : vector<1x4x1x32xf32> to vector<4x1x32xf32>
      %160 = arith.index_cast %arg32 : i32 to index
      %c0_116 = arith.constant 0 : index
      %c0_117 = arith.constant 0 : index
      %c0_118 = arith.constant 0 : index
      %161 = vector.load %arg15[%160, %c0_116, %c0_117, %c0_118] : memref<12x4x32x32xbf16, #tpu.memory_space<vmem>>, vector<1x4x32x32xbf16>
      %162 = vector.shape_cast %161 : vector<1x4x32x32xbf16> to vector<4x32x32xbf16>
      %163 = arith.index_cast %arg32 : i32 to index
      %c0_119 = arith.constant 0 : index
      %c0_120 = arith.constant 0 : index
      %c0_121 = arith.constant 0 : index
      %164 = vector.load %arg16[%163, %c0_119, %c0_120, %c0_121] : memref<12x4x1x32xf32, #tpu.memory_space<vmem>>, vector<1x4x1x32xf32>
      %165 = vector.shape_cast %164 : vector<1x4x1x32xf32> to vector<4x1x32xf32>
      %166 = arith.index_cast %arg32 : i32 to index
      %c0_122 = arith.constant 0 : index
      %c0_123 = arith.constant 0 : index
      %c0_124 = arith.constant 0 : index
      %167 = vector.load %arg17[%166, %c0_122, %c0_123, %c0_124] : memref<12x6x1x32xf32, #tpu.memory_space<vmem>>, vector<1x6x1x32xf32>
      %168 = vector.shape_cast %167 : vector<1x6x1x32xf32> to vector<6x1x32xf32>
      %169 = vector.extract_strided_slice %156 {offsets = [0, 0, 0], sizes = [1, 32, 32], strides = [1, 1, 1]} : vector<4x32x32xbf16> to vector<1x32x32xbf16>
      %170 = vector.shape_cast %169 : vector<1x32x32xbf16> to vector<32x32xbf16>
      %171 = vector.extract_strided_slice %159 {offsets = [0, 0, 0], sizes = [1, 1, 32], strides = [1, 1, 1]} : vector<4x1x32xf32> to vector<1x1x32xf32>
      %172 = vector.shape_cast %171 : vector<1x1x32xf32> to vector<1x32xf32>
      %173 = arith.truncf %arg33 : vector<16x32xf32> to vector<16x32xbf16>
      %cst_125 = arith.constant dense<0.000000e+00> : vector<16x32xf32>
      %174 = tpu.matmul %173, %170, %cst_125 {dimension_numbers = #tpu.dot_dimension_numbers<[1], [0], [0], [1], [0, 0, 1, 1], [], []>} : vector<16x32xbf16>, vector<32x32xbf16>, vector<16x32xf32> -> vector<16x32xf32>
      %175 = vector.broadcast %172 : vector<1x32xf32> to vector<16x32xf32>
      %176 = arith.addf %174, %175 : vector<16x32xf32>
      %177 = vector.extract_strided_slice %156 {offsets = [1, 0, 0], sizes = [1, 32, 32], strides = [1, 1, 1]} : vector<4x32x32xbf16> to vector<1x32x32xbf16>
      %178 = vector.shape_cast %177 : vector<1x32x32xbf16> to vector<32x32xbf16>
      %179 = vector.extract_strided_slice %159 {offsets = [1, 0, 0], sizes = [1, 1, 32], strides = [1, 1, 1]} : vector<4x1x32xf32> to vector<1x1x32xf32>
      %180 = vector.shape_cast %179 : vector<1x1x32xf32> to vector<1x32xf32>
      %181 = arith.truncf %arg33 : vector<16x32xf32> to vector<16x32xbf16>
      %cst_126 = arith.constant dense<0.000000e+00> : vector<16x32xf32>
      %182 = tpu.matmul %181, %178, %cst_126 {dimension_numbers = #tpu.dot_dimension_numbers<[1], [0], [0], [1], [0, 0, 1, 1], [], []>} : vector<16x32xbf16>, vector<32x32xbf16>, vector<16x32xf32> -> vector<16x32xf32>
      %183 = vector.broadcast %180 : vector<1x32xf32> to vector<16x32xf32>
      %184 = arith.addf %182, %183 : vector<16x32xf32>
      %185 = vector.extract_strided_slice %156 {offsets = [2, 0, 0], sizes = [1, 32, 32], strides = [1, 1, 1]} : vector<4x32x32xbf16> to vector<1x32x32xbf16>
      %186 = vector.shape_cast %185 : vector<1x32x32xbf16> to vector<32x32xbf16>
      %187 = vector.extract_strided_slice %159 {offsets = [2, 0, 0], sizes = [1, 1, 32], strides = [1, 1, 1]} : vector<4x1x32xf32> to vector<1x1x32xf32>
      %188 = vector.shape_cast %187 : vector<1x1x32xf32> to vector<1x32xf32>
      %189 = arith.truncf %arg33 : vector<16x32xf32> to vector<16x32xbf16>
      %cst_127 = arith.constant dense<0.000000e+00> : vector<16x32xf32>
      %190 = tpu.matmul %189, %186, %cst_127 {dimension_numbers = #tpu.dot_dimension_numbers<[1], [0], [0], [1], [0, 0, 1, 1], [], []>} : vector<16x32xbf16>, vector<32x32xbf16>, vector<16x32xf32> -> vector<16x32xf32>
      %191 = vector.broadcast %188 : vector<1x32xf32> to vector<16x32xf32>
      %192 = arith.addf %190, %191 : vector<16x32xf32>
      %193 = vector.shape_cast %176 : vector<16x32xf32> to vector<1x16x32xf32>
      %194 = vector.broadcast %193 : vector<1x16x32xf32> to vector<8x16x32xf32>
      %195 = vector.broadcast %0 : vector<8x1x32xf32> to vector<8x16x32xf32>
      %196 = arith.mulf %194, %195 : vector<8x16x32xf32>
      %197 = arith.truncf %196 : vector<8x16x32xf32> to vector<8x16x32xbf16>
      %198 = vector.shape_cast %192 : vector<16x32xf32> to vector<1x16x32xf32>
      %199 = vector.broadcast %198 : vector<1x16x32xf32> to vector<8x16x32xf32>
      %200 = vector.broadcast %0 : vector<8x1x32xf32> to vector<8x16x32xf32>
      %201 = arith.mulf %199, %200 : vector<8x16x32xf32>
      %202 = arith.truncf %201 : vector<8x16x32xf32> to vector<8x16x32xbf16>
      %203 = arith.truncf %184 : vector<16x32xf32> to vector<16x32xbf16>
      %204 = vector.shape_cast %203 : vector<16x32xbf16> to vector<1x16x32xbf16>
      %205 = vector.shape_cast %204 : vector<1x16x32xbf16> to vector<1x16x32xbf16>
      %206 = vector.broadcast %205 : vector<1x16x32xbf16> to vector<8x16x32xbf16>
      "tpu.trace_start"() <{level = 10 : i32, message = "hqd,hkd->hqk"}> : () -> ()
      %cst_128 = arith.constant dense<0.000000e+00> : vector<8x16x16xf32>
      %207 = tpu.matmul %197, %206, %cst_128 {dimension_numbers = #tpu.dot_dimension_numbers<[2], [2], [1], [1], [0, 0, 0, 1, 1, 1], [0], [0]>} : vector<8x16x32xbf16>, vector<8x16x32xbf16>, vector<8x16x16xf32> -> vector<8x16x16xf32>
      "tpu.trace_stop"() : () -> ()
      %cst_129 = arith.constant 5.000000e-01 : f32
      %208 = vector.broadcast %cst_129 : f32 to vector<8x16x16xf32>
      %209 = arith.mulf %207, %208 : vector<8x16x16xf32>
      %210 = vector.shape_cast %1 : vector<16x16xf32> to vector<1x16x16xf32>
      %211 = vector.broadcast %210 : vector<1x16x16xf32> to vector<8x16x16xf32>
      %212 = arith.addf %209, %211 : vector<8x16x16xf32>
      %cst_130 = arith.constant dense<0xFF800000> : vector<8x16xf32>
      %213 = vector.multi_reduction <maximumf>, %212, %cst_130 [2] : vector<8x16x16xf32> to vector<8x16xf32>
      %214 = vector.shape_cast %213 : vector<8x16xf32> to vector<8x16x1xf32>
      %215 = vector.broadcast %214 : vector<8x16x1xf32> to vector<8x16x16xf32>
      %216 = arith.subf %212, %215 : vector<8x16x16xf32>
      %217 = math.exp %216 : vector<8x16x16xf32>
      %cst_131 = arith.constant dense<0.000000e+00> : vector<8x16xf32>
      %218 = vector.multi_reduction <add>, %217, %cst_131 [2] : vector<8x16x16xf32> to vector<8x16xf32>
      %219 = vector.shape_cast %218 : vector<8x16xf32> to vector<8x16x1xf32>
      %220 = tpu.reciprocal %219 {approx = true} : vector<8x16x1xf32> -> vector<8x16x1xf32>
      %221 = vector.broadcast %220 : vector<8x16x1xf32> to vector<8x16x16xf32>
      %222 = arith.mulf %217, %221 : vector<8x16x16xf32>
      %223 = arith.truncf %222 : vector<8x16x16xf32> to vector<8x16x16xbf16>
      "tpu.trace_start"() <{level = 10 : i32, message = "hqk,hkd->hqd"}> : () -> ()
      %cst_132 = arith.constant dense<0.000000e+00> : vector<8x16x32xf32>
      %224 = tpu.matmul %223, %202, %cst_132 {dimension_numbers = #tpu.dot_dimension_numbers<[2], [1], [1], [2], [0, 0, 0, 1, 1, 2], [0], [0]>} : vector<8x16x16xbf16>, vector<8x16x32xbf16>, vector<8x16x32xf32> -> vector<8x16x32xf32>
      "tpu.trace_stop"() : () -> ()
      %225 = vector.extract_strided_slice %224 {offsets = [0, 0, 0], sizes = [1, 16, 32], strides = [1, 1, 1]} : vector<8x16x32xf32> to vector<1x16x32xf32>
      %226 = vector.shape_cast %225 : vector<1x16x32xf32> to vector<16x32xf32>
      %227 = vector.extract_strided_slice %224 {offsets = [1, 0, 0], sizes = [1, 16, 32], strides = [1, 1, 1]} : vector<8x16x32xf32> to vector<1x16x32xf32>
      %228 = vector.shape_cast %227 : vector<1x16x32xf32> to vector<16x32xf32>
      %229 = arith.addf %226, %228 : vector<16x32xf32>
      %230 = vector.extract_strided_slice %224 {offsets = [2, 0, 0], sizes = [1, 16, 32], strides = [1, 1, 1]} : vector<8x16x32xf32> to vector<1x16x32xf32>
      %231 = vector.shape_cast %230 : vector<1x16x32xf32> to vector<16x32xf32>
      %232 = arith.addf %229, %231 : vector<16x32xf32>
      %233 = vector.extract_strided_slice %224 {offsets = [3, 0, 0], sizes = [1, 16, 32], strides = [1, 1, 1]} : vector<8x16x32xf32> to vector<1x16x32xf32>
      %234 = vector.shape_cast %233 : vector<1x16x32xf32> to vector<16x32xf32>
      %235 = arith.addf %232, %234 : vector<16x32xf32>
      %236 = vector.extract_strided_slice %224 {offsets = [4, 0, 0], sizes = [1, 16, 32], strides = [1, 1, 1]} : vector<8x16x32xf32> to vector<1x16x32xf32>
      %237 = vector.shape_cast %236 : vector<1x16x32xf32> to vector<16x32xf32>
      %238 = arith.addf %235, %237 : vector<16x32xf32>
      %239 = vector.extract_strided_slice %224 {offsets = [5, 0, 0], sizes = [1, 16, 32], strides = [1, 1, 1]} : vector<8x16x32xf32> to vector<1x16x32xf32>
      %240 = vector.shape_cast %239 : vector<1x16x32xf32> to vector<16x32xf32>
      %241 = arith.addf %238, %240 : vector<16x32xf32>
      %242 = vector.extract_strided_slice %224 {offsets = [6, 0, 0], sizes = [1, 16, 32], strides = [1, 1, 1]} : vector<8x16x32xf32> to vector<1x16x32xf32>
      %243 = vector.shape_cast %242 : vector<1x16x32xf32> to vector<16x32xf32>
      %244 = arith.addf %241, %243 : vector<16x32xf32>
      %245 = vector.extract_strided_slice %224 {offsets = [7, 0, 0], sizes = [1, 16, 32], strides = [1, 1, 1]} : vector<8x16x32xf32> to vector<1x16x32xf32>
      %246 = vector.shape_cast %245 : vector<1x16x32xf32> to vector<16x32xf32>
      %247 = arith.addf %244, %246 : vector<16x32xf32>
      %248 = vector.extract_strided_slice %156 {offsets = [3, 0, 0], sizes = [1, 32, 32], strides = [1, 1, 1]} : vector<4x32x32xbf16> to vector<1x32x32xbf16>
      %249 = vector.shape_cast %248 : vector<1x32x32xbf16> to vector<32x32xbf16>
      %250 = vector.extract_strided_slice %159 {offsets = [3, 0, 0], sizes = [1, 1, 32], strides = [1, 1, 1]} : vector<4x1x32xf32> to vector<1x1x32xf32>
      %251 = vector.shape_cast %250 : vector<1x1x32xf32> to vector<1x32xf32>
      %252 = arith.truncf %247 : vector<16x32xf32> to vector<16x32xbf16>
      %cst_133 = arith.constant dense<0.000000e+00> : vector<16x32xf32>
      %253 = tpu.matmul %252, %249, %cst_133 {dimension_numbers = #tpu.dot_dimension_numbers<[1], [0], [0], [1], [0, 0, 1, 1], [], []>} : vector<16x32xbf16>, vector<32x32xbf16>, vector<16x32xf32> -> vector<16x32xf32>
      %254 = vector.broadcast %251 : vector<1x32xf32> to vector<16x32xf32>
      %255 = arith.addf %253, %254 : vector<16x32xf32>
      %256 = arith.addf %arg33, %255 : vector<16x32xf32>
      %257 = vector.extract_strided_slice %168 {offsets = [0, 0, 0], sizes = [1, 1, 32], strides = [1, 1, 1]} : vector<6x1x32xf32> to vector<1x1x32xf32>
      %258 = vector.shape_cast %257 : vector<1x1x32xf32> to vector<1x32xf32>
      %259 = vector.extract_strided_slice %168 {offsets = [1, 0, 0], sizes = [1, 1, 32], strides = [1, 1, 1]} : vector<6x1x32xf32> to vector<1x1x32xf32>
      %260 = vector.shape_cast %259 : vector<1x1x32xf32> to vector<1x32xf32>
      %cst_134 = arith.constant dense<0.000000e+00> : vector<16xf32>
      %261 = vector.multi_reduction <add>, %256, %cst_134 [1] : vector<16x32xf32> to vector<16xf32>
      %262 = vector.shape_cast %261 : vector<16xf32> to vector<16x1xf32>
      %cst_135 = arith.constant 3.200000e+01 : f32
      %263 = vector.broadcast %cst_135 : f32 to vector<16x1xf32>
      %264 = arith.divf %262, %263 : vector<16x1xf32>
      %265 = vector.broadcast %264 : vector<16x1xf32> to vector<16x32xf32>
      %266 = arith.subf %256, %265 : vector<16x32xf32>
      %267 = arith.mulf %266, %266 : vector<16x32xf32>
      %cst_136 = arith.constant dense<0.000000e+00> : vector<16xf32>
      %268 = vector.multi_reduction <add>, %267, %cst_136 [1] : vector<16x32xf32> to vector<16xf32>
      %269 = vector.shape_cast %268 : vector<16xf32> to vector<16x1xf32>
      %cst_137 = arith.constant 3.200000e+01 : f32
      %270 = vector.broadcast %cst_137 : f32 to vector<16x1xf32>
      %271 = arith.divf %269, %270 : vector<16x1xf32>
      %cst_138 = arith.constant 9.99999974E-6 : f32
      %272 = vector.broadcast %cst_138 : f32 to vector<16x1xf32>
      %273 = arith.addf %271, %272 : vector<16x1xf32>
      %274 = math.rsqrt %273 : vector<16x1xf32>
      %275 = vector.broadcast %274 : vector<16x1xf32> to vector<16x32xf32>
      %276 = arith.mulf %266, %275 : vector<16x32xf32>
      %277 = vector.broadcast %258 : vector<1x32xf32> to vector<16x32xf32>
      %278 = arith.mulf %276, %277 : vector<16x32xf32>
      %279 = vector.broadcast %260 : vector<1x32xf32> to vector<16x32xf32>
      %280 = arith.addf %278, %279 : vector<16x32xf32>
      %281 = vector.extract_strided_slice %162 {offsets = [1, 0, 0], sizes = [1, 32, 32], strides = [1, 1, 1]} : vector<4x32x32xbf16> to vector<1x32x32xbf16>
      %282 = vector.shape_cast %281 : vector<1x32x32xbf16> to vector<32x32xbf16>
      %cst_139 = arith.constant dense<0.000000e+00> : vector<16x32xf32>
      %283 = tpu.matmul %34, %282, %cst_139 {dimension_numbers = #tpu.dot_dimension_numbers<[1], [0], [0], [1], [0, 0, 1, 1], [], []>} : vector<16x32xbf16>, vector<32x32xbf16>, vector<16x32xf32> -> vector<16x32xf32>
      %284 = vector.extract_strided_slice %165 {offsets = [1, 0, 0], sizes = [1, 1, 32], strides = [1, 1, 1]} : vector<4x1x32xf32> to vector<1x1x32xf32>
      %285 = vector.shape_cast %284 : vector<1x1x32xf32> to vector<1x32xf32>
      %286 = vector.broadcast %285 : vector<1x32xf32> to vector<16x32xf32>
      %287 = arith.addf %283, %286 : vector<16x32xf32>
      %288 = vector.extract_strided_slice %162 {offsets = [2, 0, 0], sizes = [1, 32, 32], strides = [1, 1, 1]} : vector<4x32x32xbf16> to vector<1x32x32xbf16>
      %289 = vector.shape_cast %288 : vector<1x32x32xbf16> to vector<32x32xbf16>
      %cst_140 = arith.constant dense<0.000000e+00> : vector<16x32xf32>
      %290 = tpu.matmul %34, %289, %cst_140 {dimension_numbers = #tpu.dot_dimension_numbers<[1], [0], [0], [1], [0, 0, 1, 1], [], []>} : vector<16x32xbf16>, vector<32x32xbf16>, vector<16x32xf32> -> vector<16x32xf32>
      %291 = vector.extract_strided_slice %165 {offsets = [2, 0, 0], sizes = [1, 1, 32], strides = [1, 1, 1]} : vector<4x1x32xf32> to vector<1x1x32xf32>
      %292 = vector.shape_cast %291 : vector<1x1x32xf32> to vector<1x32xf32>
      %293 = vector.broadcast %292 : vector<1x32xf32> to vector<16x32xf32>
      %294 = arith.addf %290, %293 : vector<16x32xf32>
      %295 = vector.extract_strided_slice %162 {offsets = [0, 0, 0], sizes = [1, 32, 32], strides = [1, 1, 1]} : vector<4x32x32xbf16> to vector<1x32x32xbf16>
      %296 = vector.shape_cast %295 : vector<1x32x32xbf16> to vector<32x32xbf16>
      %297 = vector.extract_strided_slice %165 {offsets = [0, 0, 0], sizes = [1, 1, 32], strides = [1, 1, 1]} : vector<4x1x32xf32> to vector<1x1x32xf32>
      %298 = vector.shape_cast %297 : vector<1x1x32xf32> to vector<1x32xf32>
      %299 = arith.truncf %280 : vector<16x32xf32> to vector<16x32xbf16>
      %cst_141 = arith.constant dense<0.000000e+00> : vector<16x32xf32>
      %300 = tpu.matmul %299, %296, %cst_141 {dimension_numbers = #tpu.dot_dimension_numbers<[1], [0], [0], [1], [0, 0, 1, 1], [], []>} : vector<16x32xbf16>, vector<32x32xbf16>, vector<16x32xf32> -> vector<16x32xf32>
      %301 = vector.broadcast %298 : vector<1x32xf32> to vector<16x32xf32>
      %302 = arith.addf %300, %301 : vector<16x32xf32>
      %303 = vector.shape_cast %302 : vector<16x32xf32> to vector<1x16x32xf32>
      %304 = vector.broadcast %303 : vector<1x16x32xf32> to vector<8x16x32xf32>
      %305 = vector.broadcast %0 : vector<8x1x32xf32> to vector<8x16x32xf32>
      %306 = arith.mulf %304, %305 : vector<8x16x32xf32>
      %307 = arith.truncf %306 : vector<8x16x32xf32> to vector<8x16x32xbf16>
      %308 = vector.shape_cast %294 : vector<16x32xf32> to vector<1x16x32xf32>
      %309 = vector.broadcast %308 : vector<1x16x32xf32> to vector<8x16x32xf32>
      %310 = vector.broadcast %0 : vector<8x1x32xf32> to vector<8x16x32xf32>
      %311 = arith.mulf %309, %310 : vector<8x16x32xf32>
      %312 = arith.truncf %311 : vector<8x16x32xf32> to vector<8x16x32xbf16>
      %313 = arith.truncf %287 : vector<16x32xf32> to vector<16x32xbf16>
      %314 = vector.shape_cast %313 : vector<16x32xbf16> to vector<1x16x32xbf16>
      %315 = vector.shape_cast %314 : vector<1x16x32xbf16> to vector<1x16x32xbf16>
      %316 = vector.broadcast %315 : vector<1x16x32xbf16> to vector<8x16x32xbf16>
      "tpu.trace_start"() <{level = 10 : i32, message = "hqd,hkd->hqk"}> : () -> ()
      %cst_142 = arith.constant dense<0.000000e+00> : vector<8x16x16xf32>
      %317 = tpu.matmul %307, %316, %cst_142 {dimension_numbers = #tpu.dot_dimension_numbers<[2], [2], [1], [1], [0, 0, 0, 1, 1, 1], [0], [0]>} : vector<8x16x32xbf16>, vector<8x16x32xbf16>, vector<8x16x16xf32> -> vector<8x16x16xf32>
      "tpu.trace_stop"() : () -> ()
      %cst_143 = arith.constant 5.000000e-01 : f32
      %318 = vector.broadcast %cst_143 : f32 to vector<8x16x16xf32>
      %319 = arith.mulf %317, %318 : vector<8x16x16xf32>
      %320 = vector.shape_cast %1 : vector<16x16xf32> to vector<1x16x16xf32>
      %321 = vector.broadcast %320 : vector<1x16x16xf32> to vector<8x16x16xf32>
      %322 = arith.addf %319, %321 : vector<8x16x16xf32>
      %cst_144 = arith.constant dense<0xFF800000> : vector<8x16xf32>
      %323 = vector.multi_reduction <maximumf>, %322, %cst_144 [2] : vector<8x16x16xf32> to vector<8x16xf32>
      %324 = vector.shape_cast %323 : vector<8x16xf32> to vector<8x16x1xf32>
      %325 = vector.broadcast %324 : vector<8x16x1xf32> to vector<8x16x16xf32>
      %326 = arith.subf %322, %325 : vector<8x16x16xf32>
      %327 = math.exp %326 : vector<8x16x16xf32>
      %cst_145 = arith.constant dense<0.000000e+00> : vector<8x16xf32>
      %328 = vector.multi_reduction <add>, %327, %cst_145 [2] : vector<8x16x16xf32> to vector<8x16xf32>
      %329 = vector.shape_cast %328 : vector<8x16xf32> to vector<8x16x1xf32>
      %330 = tpu.reciprocal %329 {approx = true} : vector<8x16x1xf32> -> vector<8x16x1xf32>
      %331 = vector.broadcast %330 : vector<8x16x1xf32> to vector<8x16x16xf32>
      %332 = arith.mulf %327, %331 : vector<8x16x16xf32>
      %333 = arith.truncf %332 : vector<8x16x16xf32> to vector<8x16x16xbf16>
      "tpu.trace_start"() <{level = 10 : i32, message = "hqk,hkd->hqd"}> : () -> ()
      %cst_146 = arith.constant dense<0.000000e+00> : vector<8x16x32xf32>
      %334 = tpu.matmul %333, %312, %cst_146 {dimension_numbers = #tpu.dot_dimension_numbers<[2], [1], [1], [2], [0, 0, 0, 1, 1, 2], [0], [0]>} : vector<8x16x16xbf16>, vector<8x16x32xbf16>, vector<8x16x32xf32> -> vector<8x16x32xf32>
      "tpu.trace_stop"() : () -> ()
      %335 = vector.extract_strided_slice %334 {offsets = [0, 0, 0], sizes = [1, 16, 32], strides = [1, 1, 1]} : vector<8x16x32xf32> to vector<1x16x32xf32>
      %336 = vector.shape_cast %335 : vector<1x16x32xf32> to vector<16x32xf32>
      %337 = vector.extract_strided_slice %334 {offsets = [1, 0, 0], sizes = [1, 16, 32], strides = [1, 1, 1]} : vector<8x16x32xf32> to vector<1x16x32xf32>
      %338 = vector.shape_cast %337 : vector<1x16x32xf32> to vector<16x32xf32>
      %339 = arith.addf %336, %338 : vector<16x32xf32>
      %340 = vector.extract_strided_slice %334 {offsets = [2, 0, 0], sizes = [1, 16, 32], strides = [1, 1, 1]} : vector<8x16x32xf32> to vector<1x16x32xf32>
      %341 = vector.shape_cast %340 : vector<1x16x32xf32> to vector<16x32xf32>
      %342 = arith.addf %339, %341 : vector<16x32xf32>
      %343 = vector.extract_strided_slice %334 {offsets = [3, 0, 0], sizes = [1, 16, 32], strides = [1, 1, 1]} : vector<8x16x32xf32> to vector<1x16x32xf32>
      %344 = vector.shape_cast %343 : vector<1x16x32xf32> to vector<16x32xf32>
      %345 = arith.addf %342, %344 : vector<16x32xf32>
      %346 = vector.extract_strided_slice %334 {offsets = [4, 0, 0], sizes = [1, 16, 32], strides = [1, 1, 1]} : vector<8x16x32xf32> to vector<1x16x32xf32>
      %347 = vector.shape_cast %346 : vector<1x16x32xf32> to vector<16x32xf32>
      %348 = arith.addf %345, %347 : vector<16x32xf32>
      %349 = vector.extract_strided_slice %334 {offsets = [5, 0, 0], sizes = [1, 16, 32], strides = [1, 1, 1]} : vector<8x16x32xf32> to vector<1x16x32xf32>
      %350 = vector.shape_cast %349 : vector<1x16x32xf32> to vector<16x32xf32>
      %351 = arith.addf %348, %350 : vector<16x32xf32>
      %352 = vector.extract_strided_slice %334 {offsets = [6, 0, 0], sizes = [1, 16, 32], strides = [1, 1, 1]} : vector<8x16x32xf32> to vector<1x16x32xf32>
      %353 = vector.shape_cast %352 : vector<1x16x32xf32> to vector<16x32xf32>
      %354 = arith.addf %351, %353 : vector<16x32xf32>
      %355 = vector.extract_strided_slice %334 {offsets = [7, 0, 0], sizes = [1, 16, 32], strides = [1, 1, 1]} : vector<8x16x32xf32> to vector<1x16x32xf32>
      %356 = vector.shape_cast %355 : vector<1x16x32xf32> to vector<16x32xf32>
      %357 = arith.addf %354, %356 : vector<16x32xf32>
      %358 = vector.extract_strided_slice %162 {offsets = [3, 0, 0], sizes = [1, 32, 32], strides = [1, 1, 1]} : vector<4x32x32xbf16> to vector<1x32x32xbf16>
      %359 = vector.shape_cast %358 : vector<1x32x32xbf16> to vector<32x32xbf16>
      %360 = vector.extract_strided_slice %165 {offsets = [3, 0, 0], sizes = [1, 1, 32], strides = [1, 1, 1]} : vector<4x1x32xf32> to vector<1x1x32xf32>
      %361 = vector.shape_cast %360 : vector<1x1x32xf32> to vector<1x32xf32>
      %362 = arith.truncf %357 : vector<16x32xf32> to vector<16x32xbf16>
      %cst_147 = arith.constant dense<0.000000e+00> : vector<16x32xf32>
      %363 = tpu.matmul %362, %359, %cst_147 {dimension_numbers = #tpu.dot_dimension_numbers<[1], [0], [0], [1], [0, 0, 1, 1], [], []>} : vector<16x32xbf16>, vector<32x32xbf16>, vector<16x32xf32> -> vector<16x32xf32>
      %364 = vector.broadcast %361 : vector<1x32xf32> to vector<16x32xf32>
      %365 = arith.addf %363, %364 : vector<16x32xf32>
      %366 = arith.addf %280, %365 : vector<16x32xf32>
      %367 = vector.extract_strided_slice %168 {offsets = [2, 0, 0], sizes = [1, 1, 32], strides = [1, 1, 1]} : vector<6x1x32xf32> to vector<1x1x32xf32>
      %368 = vector.shape_cast %367 : vector<1x1x32xf32> to vector<1x32xf32>
      %369 = vector.extract_strided_slice %168 {offsets = [3, 0, 0], sizes = [1, 1, 32], strides = [1, 1, 1]} : vector<6x1x32xf32> to vector<1x1x32xf32>
      %370 = vector.shape_cast %369 : vector<1x1x32xf32> to vector<1x32xf32>
      %cst_148 = arith.constant dense<0.000000e+00> : vector<16xf32>
      %371 = vector.multi_reduction <add>, %366, %cst_148 [1] : vector<16x32xf32> to vector<16xf32>
      %372 = vector.shape_cast %371 : vector<16xf32> to vector<16x1xf32>
      %cst_149 = arith.constant 3.200000e+01 : f32
      %373 = vector.broadcast %cst_149 : f32 to vector<16x1xf32>
      %374 = arith.divf %372, %373 : vector<16x1xf32>
      %375 = vector.broadcast %374 : vector<16x1xf32> to vector<16x32xf32>
      %376 = arith.subf %366, %375 : vector<16x32xf32>
      %377 = arith.mulf %376, %376 : vector<16x32xf32>
      %cst_150 = arith.constant dense<0.000000e+00> : vector<16xf32>
      %378 = vector.multi_reduction <add>, %377, %cst_150 [1] : vector<16x32xf32> to vector<16xf32>
      %379 = vector.shape_cast %378 : vector<16xf32> to vector<16x1xf32>
      %cst_151 = arith.constant 3.200000e+01 : f32
      %380 = vector.broadcast %cst_151 : f32 to vector<16x1xf32>
      %381 = arith.divf %379, %380 : vector<16x1xf32>
      %cst_152 = arith.constant 9.99999974E-6 : f32
      %382 = vector.broadcast %cst_152 : f32 to vector<16x1xf32>
      %383 = arith.addf %381, %382 : vector<16x1xf32>
      %384 = math.rsqrt %383 : vector<16x1xf32>
      %385 = vector.broadcast %384 : vector<16x1xf32> to vector<16x32xf32>
      %386 = arith.mulf %376, %385 : vector<16x32xf32>
      %387 = vector.broadcast %368 : vector<1x32xf32> to vector<16x32xf32>
      %388 = arith.mulf %386, %387 : vector<16x32xf32>
      %389 = vector.broadcast %370 : vector<1x32xf32> to vector<16x32xf32>
      %390 = arith.addf %388, %389 : vector<16x32xf32>
      %391 = arith.index_cast %arg32 : i32 to index
      %c0_153 = arith.constant 0 : index
      %c0_154 = arith.constant 0 : index
      %392 = vector.load %arg18[%391, %c0_153, %c0_154] : memref<12x32x2048xbf16, #tpu.memory_space<vmem>>, vector<1x32x2048xbf16>
      %393 = vector.shape_cast %392 : vector<1x32x2048xbf16> to vector<32x2048xbf16>
      %394 = arith.index_cast %arg32 : i32 to index
      %c0_155 = arith.constant 0 : index
      %c0_156 = arith.constant 0 : index
      %395 = vector.load %arg19[%394, %c0_155, %c0_156] : memref<12x1x2048xf32, #tpu.memory_space<vmem>>, vector<1x1x2048xf32>
      %396 = vector.shape_cast %395 : vector<1x1x2048xf32> to vector<1x2048xf32>
      %397 = arith.index_cast %arg32 : i32 to index
      %c0_157 = arith.constant 0 : index
      %c0_158 = arith.constant 0 : index
      %398 = vector.load %arg20[%397, %c0_157, %c0_158] : memref<12x2048x32xbf16, #tpu.memory_space<vmem>>, vector<1x2048x32xbf16>
      %399 = vector.shape_cast %398 : vector<1x2048x32xbf16> to vector<2048x32xbf16>
      %400 = arith.index_cast %arg32 : i32 to index
      %c0_159 = arith.constant 0 : index
      %c0_160 = arith.constant 0 : index
      %401 = vector.load %arg21[%400, %c0_159, %c0_160] : memref<12x1x32xf32, #tpu.memory_space<vmem>>, vector<1x1x32xf32>
      %402 = vector.shape_cast %401 : vector<1x1x32xf32> to vector<1x32xf32>
      %403 = arith.truncf %390 : vector<16x32xf32> to vector<16x32xbf16>
      %cst_161 = arith.constant dense<0.000000e+00> : vector<16x2048xf32>
      %404 = tpu.matmul %403, %393, %cst_161 {dimension_numbers = #tpu.dot_dimension_numbers<[1], [0], [0], [1], [0, 0, 1, 1], [], []>} : vector<16x32xbf16>, vector<32x2048xbf16>, vector<16x2048xf32> -> vector<16x2048xf32>
      %405 = vector.broadcast %396 : vector<1x2048xf32> to vector<16x2048xf32>
      %406 = arith.addf %404, %405 : vector<16x2048xf32>
      %cst_162 = arith.constant 0.000000e+00 : f32
      %407 = vector.broadcast %cst_162 : f32 to vector<16x2048xf32>
      %408 = arith.maximumf %406, %407 : vector<16x2048xf32>
      %409 = arith.truncf %408 : vector<16x2048xf32> to vector<16x2048xbf16>
      %cst_163 = arith.constant dense<0.000000e+00> : vector<16x32xf32>
      %410 = tpu.matmul %409, %399, %cst_163 {dimension_numbers = #tpu.dot_dimension_numbers<[1], [0], [0], [1], [0, 0, 1, 1], [], []>} : vector<16x2048xbf16>, vector<2048x32xbf16>, vector<16x32xf32> -> vector<16x32xf32>
      %411 = vector.broadcast %402 : vector<1x32xf32> to vector<16x32xf32>
      %412 = arith.addf %410, %411 : vector<16x32xf32>
      %413 = arith.addf %390, %412 : vector<16x32xf32>
      %414 = vector.extract_strided_slice %168 {offsets = [4, 0, 0], sizes = [1, 1, 32], strides = [1, 1, 1]} : vector<6x1x32xf32> to vector<1x1x32xf32>
      %415 = vector.shape_cast %414 : vector<1x1x32xf32> to vector<1x32xf32>
      %416 = vector.extract_strided_slice %168 {offsets = [5, 0, 0], sizes = [1, 1, 32], strides = [1, 1, 1]} : vector<6x1x32xf32> to vector<1x1x32xf32>
      %417 = vector.shape_cast %416 : vector<1x1x32xf32> to vector<1x32xf32>
      %cst_164 = arith.constant dense<0.000000e+00> : vector<16xf32>
      %418 = vector.multi_reduction <add>, %413, %cst_164 [1] : vector<16x32xf32> to vector<16xf32>
      %419 = vector.shape_cast %418 : vector<16xf32> to vector<16x1xf32>
      %cst_165 = arith.constant 3.200000e+01 : f32
      %420 = vector.broadcast %cst_165 : f32 to vector<16x1xf32>
      %421 = arith.divf %419, %420 : vector<16x1xf32>
      %422 = vector.broadcast %421 : vector<16x1xf32> to vector<16x32xf32>
      %423 = arith.subf %413, %422 : vector<16x32xf32>
      %424 = arith.mulf %423, %423 : vector<16x32xf32>
      %cst_166 = arith.constant dense<0.000000e+00> : vector<16xf32>
      %425 = vector.multi_reduction <add>, %424, %cst_166 [1] : vector<16x32xf32> to vector<16xf32>
      %426 = vector.shape_cast %425 : vector<16xf32> to vector<16x1xf32>
      %cst_167 = arith.constant 3.200000e+01 : f32
      %427 = vector.broadcast %cst_167 : f32 to vector<16x1xf32>
      %428 = arith.divf %426, %427 : vector<16x1xf32>
      %cst_168 = arith.constant 9.99999974E-6 : f32
      %429 = vector.broadcast %cst_168 : f32 to vector<16x1xf32>
      %430 = arith.addf %428, %429 : vector<16x1xf32>
      %431 = math.rsqrt %430 : vector<16x1xf32>
      %432 = vector.broadcast %431 : vector<16x1xf32> to vector<16x32xf32>
      %433 = arith.mulf %423, %432 : vector<16x32xf32>
      %434 = vector.broadcast %415 : vector<1x32xf32> to vector<16x32xf32>
      %435 = arith.mulf %433, %434 : vector<16x32xf32>
      %436 = vector.broadcast %417 : vector<1x32xf32> to vector<16x32xf32>
      %437 = arith.addf %435, %436 : vector<16x32xf32>
      scf.yield %437 : vector<16x32xf32>
    }
    %c12_i32_24 = arith.constant 12 : i32
    %c0_25 = arith.constant 0 : index
    %c0_26 = arith.constant 0 : index
    %c0_27 = arith.constant 0 : index
    %37 = vector.load %arg22[%c0_25, %c0_26, %c0_27] : memref<2x1x32xf32, #tpu.memory_space<vmem>>, vector<1x1x32xf32>
    %38 = vector.shape_cast %37 : vector<1x1x32xf32> to vector<1x32xf32>
    %c1_28 = arith.constant 1 : index
    %c0_29 = arith.constant 0 : index
    %c0_30 = arith.constant 0 : index
    %39 = vector.load %arg22[%c1_28, %c0_29, %c0_30] : memref<2x1x32xf32, #tpu.memory_space<vmem>>, vector<1x1x32xf32>
    %40 = vector.shape_cast %39 : vector<1x1x32xf32> to vector<1x32xf32>
    %cst_31 = arith.constant dense<0.000000e+00> : vector<16xf32>
    %41 = vector.multi_reduction <add>, %36, %cst_31 [1] : vector<16x32xf32> to vector<16xf32>
    %42 = vector.shape_cast %41 : vector<16xf32> to vector<16x1xf32>
    %cst_32 = arith.constant 3.200000e+01 : f32
    %43 = vector.broadcast %cst_32 : f32 to vector<16x1xf32>
    %44 = arith.divf %42, %43 : vector<16x1xf32>
    %45 = vector.broadcast %44 : vector<16x1xf32> to vector<16x32xf32>
    %46 = arith.subf %36, %45 : vector<16x32xf32>
    %47 = arith.mulf %46, %46 : vector<16x32xf32>
    %cst_33 = arith.constant dense<0.000000e+00> : vector<16xf32>
    %48 = vector.multi_reduction <add>, %47, %cst_33 [1] : vector<16x32xf32> to vector<16xf32>
    %49 = vector.shape_cast %48 : vector<16xf32> to vector<16x1xf32>
    %cst_34 = arith.constant 3.200000e+01 : f32
    %50 = vector.broadcast %cst_34 : f32 to vector<16x1xf32>
    %51 = arith.divf %49, %50 : vector<16x1xf32>
    %cst_35 = arith.constant 9.99999974E-6 : f32
    %52 = vector.broadcast %cst_35 : f32 to vector<16x1xf32>
    %53 = arith.addf %51, %52 : vector<16x1xf32>
    %54 = math.rsqrt %53 : vector<16x1xf32>
    %55 = vector.broadcast %54 : vector<16x1xf32> to vector<16x32xf32>
    %56 = arith.mulf %46, %55 : vector<16x32xf32>
    %57 = vector.broadcast %38 : vector<1x32xf32> to vector<16x32xf32>
    %58 = arith.mulf %56, %57 : vector<16x32xf32>
    %59 = vector.broadcast %40 : vector<1x32xf32> to vector<16x32xf32>
    %60 = arith.addf %58, %59 : vector<16x32xf32>
    %c0_36 = arith.constant 0 : index
    %c0_37 = arith.constant 0 : index
    %61 = vector.load %arg23[%c0_36, %c0_37] : memref<32x192xbf16, #tpu.memory_space<vmem>>, vector<32x192xbf16>
    %c0_38 = arith.constant 0 : index
    %c0_39 = arith.constant 0 : index
    %62 = vector.load %arg24[%c0_38, %c0_39] : memref<1x192xf32, #tpu.memory_space<vmem>>, vector<1x192xf32>
    %63 = arith.truncf %60 : vector<16x32xf32> to vector<16x32xbf16>
    %cst_40 = arith.constant dense<0.000000e+00> : vector<16x192xf32>
    %64 = tpu.matmul %63, %61, %cst_40 {dimension_numbers = #tpu.dot_dimension_numbers<[1], [0], [0], [1], [0, 0, 1, 1], [], []>} : vector<16x32xbf16>, vector<32x192xbf16>, vector<16x192xf32> -> vector<16x192xf32>
    %65 = vector.broadcast %62 : vector<1x192xf32> to vector<16x192xf32>
    %66 = arith.addf %64, %65 : vector<16x192xf32>
    %c0_41 = arith.constant 0 : index
    %c0_42 = arith.constant 0 : index
    %c0_43 = arith.constant 0 : index
    %67 = vector.load %arg25[%c0_41, %c0_42, %c0_43] : memref<4x192x192xbf16, #tpu.memory_space<vmem>>, vector<1x192x192xbf16>
    %68 = vector.shape_cast %67 : vector<1x192x192xbf16> to vector<192x192xbf16>
    %c0_44 = arith.constant 0 : index
    %c0_45 = arith.constant 0 : index
    %c0_46 = arith.constant 0 : index
    %69 = vector.load %arg26[%c0_44, %c0_45, %c0_46] : memref<4x1x192xf32, #tpu.memory_space<vmem>>, vector<1x1x192xf32>
    %70 = vector.shape_cast %69 : vector<1x1x192xf32> to vector<1x192xf32>
    %71 = arith.truncf %66 : vector<16x192xf32> to vector<16x192xbf16>
    %cst_47 = arith.constant dense<0.000000e+00> : vector<16x192xf32>
    %72 = tpu.matmul %71, %68, %cst_47 {dimension_numbers = #tpu.dot_dimension_numbers<[1], [0], [0], [1], [0, 0, 1, 1], [], []>} : vector<16x192xbf16>, vector<192x192xbf16>, vector<16x192xf32> -> vector<16x192xf32>
    %73 = vector.broadcast %70 : vector<1x192xf32> to vector<16x192xf32>
    %74 = arith.addf %72, %73 : vector<16x192xf32>
    %cst_48 = arith.constant 0.000000e+00 : f32
    %75 = vector.broadcast %cst_48 : f32 to vector<16x192xf32>
    %76 = arith.maximumf %74, %75 : vector<16x192xf32>
    %c1_49 = arith.constant 1 : index
    %c0_50 = arith.constant 0 : index
    %c0_51 = arith.constant 0 : index
    %77 = vector.load %arg25[%c1_49, %c0_50, %c0_51] : memref<4x192x192xbf16, #tpu.memory_space<vmem>>, vector<1x192x192xbf16>
    %78 = vector.shape_cast %77 : vector<1x192x192xbf16> to vector<192x192xbf16>
    %c1_52 = arith.constant 1 : index
    %c0_53 = arith.constant 0 : index
    %c0_54 = arith.constant 0 : index
    %79 = vector.load %arg26[%c1_52, %c0_53, %c0_54] : memref<4x1x192xf32, #tpu.memory_space<vmem>>, vector<1x1x192xf32>
    %80 = vector.shape_cast %79 : vector<1x1x192xf32> to vector<1x192xf32>
    %81 = arith.truncf %76 : vector<16x192xf32> to vector<16x192xbf16>
    %cst_55 = arith.constant dense<0.000000e+00> : vector<16x192xf32>
    %82 = tpu.matmul %81, %78, %cst_55 {dimension_numbers = #tpu.dot_dimension_numbers<[1], [0], [0], [1], [0, 0, 1, 1], [], []>} : vector<16x192xbf16>, vector<192x192xbf16>, vector<16x192xf32> -> vector<16x192xf32>
    %83 = vector.broadcast %80 : vector<1x192xf32> to vector<16x192xf32>
    %84 = arith.addf %82, %83 : vector<16x192xf32>
    %cst_56 = arith.constant 0.000000e+00 : f32
    %85 = vector.broadcast %cst_56 : f32 to vector<16x192xf32>
    %86 = arith.maximumf %84, %85 : vector<16x192xf32>
    %c2 = arith.constant 2 : index
    %c0_57 = arith.constant 0 : index
    %c0_58 = arith.constant 0 : index
    %87 = vector.load %arg25[%c2, %c0_57, %c0_58] : memref<4x192x192xbf16, #tpu.memory_space<vmem>>, vector<1x192x192xbf16>
    %88 = vector.shape_cast %87 : vector<1x192x192xbf16> to vector<192x192xbf16>
    %c2_59 = arith.constant 2 : index
    %c0_60 = arith.constant 0 : index
    %c0_61 = arith.constant 0 : index
    %89 = vector.load %arg26[%c2_59, %c0_60, %c0_61] : memref<4x1x192xf32, #tpu.memory_space<vmem>>, vector<1x1x192xf32>
    %90 = vector.shape_cast %89 : vector<1x1x192xf32> to vector<1x192xf32>
    %91 = arith.truncf %86 : vector<16x192xf32> to vector<16x192xbf16>
    %cst_62 = arith.constant dense<0.000000e+00> : vector<16x192xf32>
    %92 = tpu.matmul %91, %88, %cst_62 {dimension_numbers = #tpu.dot_dimension_numbers<[1], [0], [0], [1], [0, 0, 1, 1], [], []>} : vector<16x192xbf16>, vector<192x192xbf16>, vector<16x192xf32> -> vector<16x192xf32>
    %93 = vector.broadcast %90 : vector<1x192xf32> to vector<16x192xf32>
    %94 = arith.addf %92, %93 : vector<16x192xf32>
    %cst_63 = arith.constant 0.000000e+00 : f32
    %95 = vector.broadcast %cst_63 : f32 to vector<16x192xf32>
    %96 = arith.maximumf %94, %95 : vector<16x192xf32>
    %c3 = arith.constant 3 : index
    %c0_64 = arith.constant 0 : index
    %c0_65 = arith.constant 0 : index
    %97 = vector.load %arg25[%c3, %c0_64, %c0_65] : memref<4x192x192xbf16, #tpu.memory_space<vmem>>, vector<1x192x192xbf16>
    %98 = vector.shape_cast %97 : vector<1x192x192xbf16> to vector<192x192xbf16>
    %c3_66 = arith.constant 3 : index
    %c0_67 = arith.constant 0 : index
    %c0_68 = arith.constant 0 : index
    %99 = vector.load %arg26[%c3_66, %c0_67, %c0_68] : memref<4x1x192xf32, #tpu.memory_space<vmem>>, vector<1x1x192xf32>
    %100 = vector.shape_cast %99 : vector<1x1x192xf32> to vector<1x192xf32>
    %101 = arith.truncf %96 : vector<16x192xf32> to vector<16x192xbf16>
    %cst_69 = arith.constant dense<0.000000e+00> : vector<16x192xf32>
    %102 = tpu.matmul %101, %98, %cst_69 {dimension_numbers = #tpu.dot_dimension_numbers<[1], [0], [0], [1], [0, 0, 1, 1], [], []>} : vector<16x192xbf16>, vector<192x192xbf16>, vector<16x192xf32> -> vector<16x192xf32>
    %103 = vector.broadcast %100 : vector<1x192xf32> to vector<16x192xf32>
    %104 = arith.addf %102, %103 : vector<16x192xf32>
    %cst_70 = arith.constant 0.000000e+00 : f32
    %105 = vector.broadcast %cst_70 : f32 to vector<16x192xf32>
    %106 = arith.maximumf %104, %105 : vector<16x192xf32>
    %c0_71 = arith.constant 0 : index
    %c0_72 = arith.constant 0 : index
    %c0_73 = arith.constant 0 : index
    %107 = vector.load %arg27[%c0_71, %c0_72, %c0_73] : memref<4x192x192xbf16, #tpu.memory_space<vmem>>, vector<1x192x192xbf16>
    %108 = vector.shape_cast %107 : vector<1x192x192xbf16> to vector<192x192xbf16>
    %c0_74 = arith.constant 0 : index
    %c0_75 = arith.constant 0 : index
    %c0_76 = arith.constant 0 : index
    %109 = vector.load %arg28[%c0_74, %c0_75, %c0_76] : memref<4x1x192xf32, #tpu.memory_space<vmem>>, vector<1x1x192xf32>
    %110 = vector.shape_cast %109 : vector<1x1x192xf32> to vector<1x192xf32>
    %111 = arith.truncf %106 : vector<16x192xf32> to vector<16x192xbf16>
    %cst_77 = arith.constant dense<0.000000e+00> : vector<16x192xf32>
    %112 = tpu.matmul %111, %108, %cst_77 {dimension_numbers = #tpu.dot_dimension_numbers<[1], [0], [0], [1], [0, 0, 1, 1], [], []>} : vector<16x192xbf16>, vector<192x192xbf16>, vector<16x192xf32> -> vector<16x192xf32>
    %113 = vector.broadcast %110 : vector<1x192xf32> to vector<16x192xf32>
    %114 = arith.addf %112, %113 : vector<16x192xf32>
    %cst_78 = arith.constant 0.000000e+00 : f32
    %115 = vector.broadcast %cst_78 : f32 to vector<16x192xf32>
    %116 = arith.maximumf %114, %115 : vector<16x192xf32>
    %c1_79 = arith.constant 1 : index
    %c0_80 = arith.constant 0 : index
    %c0_81 = arith.constant 0 : index
    %117 = vector.load %arg27[%c1_79, %c0_80, %c0_81] : memref<4x192x192xbf16, #tpu.memory_space<vmem>>, vector<1x192x192xbf16>
    %118 = vector.shape_cast %117 : vector<1x192x192xbf16> to vector<192x192xbf16>
    %c1_82 = arith.constant 1 : index
    %c0_83 = arith.constant 0 : index
    %c0_84 = arith.constant 0 : index
    %119 = vector.load %arg28[%c1_82, %c0_83, %c0_84] : memref<4x1x192xf32, #tpu.memory_space<vmem>>, vector<1x1x192xf32>
    %120 = vector.shape_cast %119 : vector<1x1x192xf32> to vector<1x192xf32>
    %121 = arith.truncf %116 : vector<16x192xf32> to vector<16x192xbf16>
    %cst_85 = arith.constant dense<0.000000e+00> : vector<16x192xf32>
    %122 = tpu.matmul %121, %118, %cst_85 {dimension_numbers = #tpu.dot_dimension_numbers<[1], [0], [0], [1], [0, 0, 1, 1], [], []>} : vector<16x192xbf16>, vector<192x192xbf16>, vector<16x192xf32> -> vector<16x192xf32>
    %123 = vector.broadcast %120 : vector<1x192xf32> to vector<16x192xf32>
    %124 = arith.addf %122, %123 : vector<16x192xf32>
    %cst_86 = arith.constant 0.000000e+00 : f32
    %125 = vector.broadcast %cst_86 : f32 to vector<16x192xf32>
    %126 = arith.maximumf %124, %125 : vector<16x192xf32>
    %c2_87 = arith.constant 2 : index
    %c0_88 = arith.constant 0 : index
    %c0_89 = arith.constant 0 : index
    %127 = vector.load %arg27[%c2_87, %c0_88, %c0_89] : memref<4x192x192xbf16, #tpu.memory_space<vmem>>, vector<1x192x192xbf16>
    %128 = vector.shape_cast %127 : vector<1x192x192xbf16> to vector<192x192xbf16>
    %c2_90 = arith.constant 2 : index
    %c0_91 = arith.constant 0 : index
    %c0_92 = arith.constant 0 : index
    %129 = vector.load %arg28[%c2_90, %c0_91, %c0_92] : memref<4x1x192xf32, #tpu.memory_space<vmem>>, vector<1x1x192xf32>
    %130 = vector.shape_cast %129 : vector<1x1x192xf32> to vector<1x192xf32>
    %131 = arith.truncf %126 : vector<16x192xf32> to vector<16x192xbf16>
    %cst_93 = arith.constant dense<0.000000e+00> : vector<16x192xf32>
    %132 = tpu.matmul %131, %128, %cst_93 {dimension_numbers = #tpu.dot_dimension_numbers<[1], [0], [0], [1], [0, 0, 1, 1], [], []>} : vector<16x192xbf16>, vector<192x192xbf16>, vector<16x192xf32> -> vector<16x192xf32>
    %133 = vector.broadcast %130 : vector<1x192xf32> to vector<16x192xf32>
    %134 = arith.addf %132, %133 : vector<16x192xf32>
    %cst_94 = arith.constant 0.000000e+00 : f32
    %135 = vector.broadcast %cst_94 : f32 to vector<16x192xf32>
    %136 = arith.maximumf %134, %135 : vector<16x192xf32>
    %c3_95 = arith.constant 3 : index
    %c0_96 = arith.constant 0 : index
    %c0_97 = arith.constant 0 : index
    %137 = vector.load %arg27[%c3_95, %c0_96, %c0_97] : memref<4x192x192xbf16, #tpu.memory_space<vmem>>, vector<1x192x192xbf16>
    %138 = vector.shape_cast %137 : vector<1x192x192xbf16> to vector<192x192xbf16>
    %c3_98 = arith.constant 3 : index
    %c0_99 = arith.constant 0 : index
    %c0_100 = arith.constant 0 : index
    %139 = vector.load %arg28[%c3_98, %c0_99, %c0_100] : memref<4x1x192xf32, #tpu.memory_space<vmem>>, vector<1x1x192xf32>
    %140 = vector.shape_cast %139 : vector<1x1x192xf32> to vector<1x192xf32>
    %141 = arith.truncf %136 : vector<16x192xf32> to vector<16x192xbf16>
    %cst_101 = arith.constant dense<0.000000e+00> : vector<16x192xf32>
    %142 = tpu.matmul %141, %138, %cst_101 {dimension_numbers = #tpu.dot_dimension_numbers<[1], [0], [0], [1], [0, 0, 1, 1], [], []>} : vector<16x192xbf16>, vector<192x192xbf16>, vector<16x192xf32> -> vector<16x192xf32>
    %143 = vector.broadcast %140 : vector<1x192xf32> to vector<16x192xf32>
    %144 = arith.addf %142, %143 : vector<16x192xf32>
    %cst_102 = arith.constant 0.000000e+00 : f32
    %145 = vector.broadcast %cst_102 : f32 to vector<16x192xf32>
    %146 = arith.maximumf %144, %145 : vector<16x192xf32>
    %c0_103 = arith.constant 0 : index
    %c0_104 = arith.constant 0 : index
    %147 = vector.load %arg29[%c0_103, %c0_104] : memref<192x6xbf16, #tpu.memory_space<vmem>>, vector<192x6xbf16>
    %c0_105 = arith.constant 0 : index
    %c0_106 = arith.constant 0 : index
    %148 = vector.load %arg30[%c0_105, %c0_106] : memref<1x6xf32, #tpu.memory_space<vmem>>, vector<1x6xf32>
    %149 = arith.truncf %146 : vector<16x192xf32> to vector<16x192xbf16>
    %cst_107 = arith.constant dense<0.000000e+00> : vector<16x6xf32>
    %150 = tpu.matmul %149, %147, %cst_107 {dimension_numbers = #tpu.dot_dimension_numbers<[1], [0], [0], [1], [0, 0, 1, 1], [], []>} : vector<16x192xbf16>, vector<192x6xbf16>, vector<16x6xf32> -> vector<16x6xf32>
    %151 = vector.broadcast %148 : vector<1x6xf32> to vector<16x6xf32>
    %152 = arith.addf %150, %151 : vector<16x6xf32>
    %c0_108 = arith.constant 0 : index
    %c0_109 = arith.constant 0 : index
    %153 = vector.load %arg31[%c0_108, %c0_109] : memref<16x6xf32, #tpu.memory_space<vmem>>, vector<16x6xf32>
    tpu.vector_store %arg31[%c0_108, %c0_109], %152 {strides = array<i32>} : memref<16x6xf32, #tpu.memory_space<vmem>>, vector<16x6xf32>,
    return
  }
}

</mosaic_0001>

<bundles_post_ra>
// kernel: simple_denoiser_forward.1
= control target key start
LH: loop header
LB: loop body
LE: loop exit
PB: predicated region body
PF: predicated region fallthrough
CT: control target
= control target key end

     0   :  { %v15593_v0 = vmov 0   ;;  %s13259_s3 = smov 2   ;;  %s13260_s7 = smov 3   ;;  %vm243_vm0 = vcmask 523264   ;;  %s15588_s0 = inlined_call_operand.smem [shape: u32[32], index: -1, kind: input, shape index: {}] }
   0x1   :  { %247 = vmatprep.subr.bf16.mxu0 %v15593_v0  ;;  %s10546_s6 = sld [smem:[%s15588_s0 + %s13259_s3]]   ;;  %s13261_s11 = smov 4  }
   0x2   :  { %s10547_s10 = sld [smem:[%s15588_s0 + %s13260_s7]]   ;;  %s13262_s15 = smov 5  }
   0x3   :  { %s13311_s14 = sld [smem:[%s15588_s0 + %s13261_s11]]   ;;  %s13263_s19 = smov 6  }
   0x4   :  { %s13316_s18 = sld [smem:[%s15588_s0 + %s13262_s15]]   ;;  %s13264_s23 = smov 7  }
   0x5   :  { %s13321_s22 = sld [smem:[%s15588_s0 + %s13263_s19]]   ;;  %s13265_s27 = smov 8  }
   0x6   :  { %s13326_s26 = sld [smem:[%s15588_s0 + %s13264_s23]]   ;;  %s13266_s1 = smov 9  }
   0x7   :  { %s13331_s30 = sld [smem:[%s15588_s0 + %s13265_s27]]   ;;  %v13333_v1 = vld [vmem:[%s10546_s6] ss:$0 sm:$0xff]  ;;  %v13335_v2 = vld [vmem:[%s10546_s6 + $0x1] ss:$0 sm:$0xff]  ;;  %v13342_v3 = vld [vmem:[%s10546_s6 + $0x2] ss:$0 sm:$0xff] }
   0x8   :  { %s13340_s4 = sld [smem:[%s15588_s0 + %s13266_s1]]   ;;  %v13344_v4 = vld [vmem:[%s10546_s6 + $0x3] ss:$0 sm:$0xff]  ;;  %s13267_s5 = smov 10   ;;  %v13353_v6 = vld [vmem:[%s10546_s6 + $0x4] ss:$0 sm:$0xff]  ;;  %v13357_v8 = vld [vmem:[%s10547_s10 + $0x8] sm:$0xff] }
   0x9   :  { %v13346_v5 = vld [vmem:[%s10547_s10] sm:$0xff]  ;;  %s13351_s9 = sld [smem:[%s15588_s0 + %s13267_s5]]   ;;  %s13268_s11 = smov 11   ;;  %v12392_v11 = vld [vmem:[%s13311_s14 + $0x38] sm:$0xff]   ;;  %v12393_v12 = vld [vmem:[%s13311_s14 + $0x30] sm:$0xff]  }
   0xa   :  { %v13355_v7 = vld [vmem:[%s10546_s6 + $0x5] ss:$0 sm:$0xff]  ;;  %s13362_s15 = sld [smem:[%s15588_s0 + %s13268_s11]]   ;;  %v13364_v9 = vld [vmem:[%s10546_s6 + $0x6] ss:$0 sm:$0xff]  ;;  %v13366_v10 = vld [vmem:[%s10546_s6 + $0x7] ss:$0 sm:$0xff]  ;;  %248 = vmatpush1.bf16.msra.mxu0 %v12392_v11 }
   0xb   :  { %s13269_s16 = smov 12   ;;  %s13270_s10 = smov 13   ;;  %249 = vmatprep.subr.bf16.mxu0 %v15593_v0  ;;  %v12394_v13 = vld [vmem:[%s13311_s14 + $0x28] sm:$0xff]   ;;  %v12395_v14 = vld [vmem:[%s13311_s14 + $0x20] sm:$0xff]   ;;  %v12396_v15 = vld [vmem:[%s13311_s14 + $0x18] sm:$0xff]  }
   0xc   :  { %s13372_s20 = sld [smem:[%s15588_s0 + %s13269_s16]]   ;;  %s13271_s25 = smov 14   ;;  %v12397_v16 = vld [vmem:[%s13311_s14 + $0x10] sm:$0xff]   ;;  %v12398_v17 = vld [vmem:[%s13311_s14 + $0x8] sm:$0xff]   ;;  %v12399_v18 = vld [vmem:[%s13311_s14] sm:$0xff]  }
   0xd   :  { %s13377_s24 = sld [smem:[%s15588_s0 + %s13270_s10]]   ;;  %s13272_s29 = smov 15   ;;  %v12400_v22 = vld [vmem:[%s13311_s14 + $0x58] sm:$0xff]   ;;  %v12401_v23 = vld [vmem:[%s13311_s14 + $0x50] sm:$0xff]   ;;  %v12402_v24 = vld [vmem:[%s13311_s14 + $0x48] sm:$0xff]  }
   0xe   :  { %s13383_s28 = sld [smem:[%s15588_s0 + %s13271_s25]]   ;;  %s13273_s5 = smov 16   ;;  %250 = vmatpush1.bf16.msra.mxu0 %v12393_v12  ;;  %v12403_v25 = vld [vmem:[%s13311_s14 + $0x40] sm:$0xff]  }
   0xf   :  { %s13389_s3 = sld [smem:[%s15588_s0 + %s13272_s29]]   ;;  %s13274_s12 = smov 17   ;;  %251 = vmatprep.subr.bf16.mxu0 %v15593_v0 }
  0x10   :  { %s13394_s11 = sld [smem:[%s15588_s0 + %s13273_s5]]   ;;  %s13275_s19 = smov 18  }
  0x11   :  { %s13399_s17 = sld [smem:[%s15588_s0 + %s13274_s12]]   ;;  %s13276_s25 = smov 19  }
  0x12   :  { %s13405_s23 = sld [smem:[%s15588_s0 + %s13275_s19]]   ;;  %s13277_s1 = smov 20   ;;  %252 = vmatpush1.bf16.msra.mxu0 %v12394_v13 }
  0x13   :  { %s13411_s29 = sld [smem:[%s15588_s0 + %s13276_s25]]   ;;  %s13278_s8 = smov 21   ;;  %253 = vmatprep.subr.bf16.mxu0 %v15593_v0 }
  0x14   :  { %s13416_s7 = sld [smem:[%s15588_s0 + %s13277_s1]]   ;;  %s13279_s19 = smov 22  }
  0x15   :  { %s13421_s16 = sld [smem:[%s15588_s0 + %s13278_s8]]   ;;  %s13280_s27 = smov 23  }
  0x16   :  { %s13427_s25 = sld [smem:[%s15588_s0 + %s13279_s19]]   ;;  %s13281_s5 = smov 24   ;;  %254 = vmatpush1.bf16.msra.mxu0 %v12395_v14 }
  0x17   :  { %s13433_s2 = sld [smem:[%s15588_s0 + %s13280_s27]]   ;;  %s13283_s21 = smov 26   ;;  %255 = vmatprep.subr.bf16.mxu0 %v15593_v0 }
  0x18   :  { %s13438_s13 = sld [smem:[%s15588_s0 + %s13281_s5]]   ;;  %s13284_s1 = smov 27  }
  0x19   :  { %15597 = sst [smem:[#allocation2_spill]] %s13411_s29  ;;  %s13285_s29 = smov 28  }
  0x1a   :  { %s13449_s27 = sld [smem:[%s15588_s0 + %s13283_s21]]   ;;  %256 = vmatpush1.bf16.msra.mxu0 %v12396_v15  ;;  %s13288_s12 = smov 31  }
  0x1b   :  { %15598 = sst [smem:[#allocation3_spill]] %s13421_s16  ;;  %s13282_s16 = smov 25   ;;  %257 = vmatprep.subr.bf16.mxu0 %v15593_v0 }
  0x1c   :  { %15599 = sst [smem:[#allocation4_spill]] %s13427_s25  ;;  %s13508_s14 = smov 0  }
  0x1d   :  { %15600 = sst [smem:[#allocation5_spill]] %s13433_s2  ;;  %s13289_s2 = smov 1  }
  0x1e   :  { %15601 = sst [smem:[#allocation6_spill]] %s13438_s13  ;;  %258 = vmatpush1.bf16.msra.mxu0 %v12397_v16 }
  0x1f   :  { %s13443_s19 = sld [smem:[%s15588_s0 + %s13282_s16]]   ;;  %259 = vmatprep.subr.bf16.mxu0 %v15593_v0 }
  0x20   :  { %15603 = sst [smem:[#allocation8_spill]] %s13449_s27  ;;  %s13287_s27 = smov 30  }
  0x21   :  { %s13455_s8 = sld [smem:[%s15588_s0 + %s13284_s1]]  }
  0x22   :  { %s13460_s13 = sld [smem:[%s15588_s0 + %s13285_s29]]   ;;  %260 = vmatpush1.bf16.msra.mxu0 %v12398_v17 }
  0x23   :  { %s13471_s1 = sld [smem:[%s15588_s0 + %s13287_s27]]   ;;  %261 = vmatprep.subr.bf16.mxu0 %v15593_v0 }
  0x24   :  { %s13477_s10 = sld [smem:[%s15588_s0 + %s13288_s12]]  }
  0x25   :  { %15602 = sst [smem:[#allocation7_spill]] %s13443_s19  ;;  %s13286_s19 = smov 29  }
  0x26   :  { %s13465_s6 = sld [smem:[%s15588_s0 + %s13286_s19]]   ;;  %262 = vmatpush1.bf16.msra.mxu0 %v12399_v18 }
  0x27   :  { %s1_s21 = sld [smem:[%s15588_s0]]   ;;  %271 = vmatprep.subr.bf16.mxu0 %v15593_v0 }
  0x28   :  { %s10545_s12 = sld [smem:[%s15588_s0 + %s13289_s2]]  }
  0x2a   :  { %272 = vmatpush2.bf16.msra.mxu0 %v12400_v22 }
  0x2b   :  { %273 = vmatprep.subr.bf16.mxu0 %v15593_v0 }
  0x2d   :  { %v142_v19 = vld [vmem:[%s1_s21 + $0x8] sm:$0xff]  ;;  %v144_v20 = vld [vmem:[%s1_s21 + $0x18] sm:$0xff]  ;;  %v141_v26 = vld [vmem:[%s1_s21] sm:$0xff] }
  0x2e   :  { %v146_v21 = vpack.c.bf16 %v144_v20, %v142_v19  ;;  %274 = vmatpush2.bf16.msra.mxu0 %v12401_v23  ;;  %v143_v27 = vld [vmem:[%s1_s21 + $0x10] sm:$0xff]  ;;  %v288_v29 = vld [vmem:[%s10545_s12] sm:$0xff]  ;;  %v289_v33 = vld [vmem:[%s10545_s12 + $0x8] sm:$0xff] }
  0x2f   :  { %275 = vmatprep.subr.bf16.mxu0 %v15593_v0  ;;  %v145_v28 = vpack.c.bf16 %v143_v27, %v141_v26 }
  0x30   :  { %10588 = vmatprep.mubr.msk.bf16.mxu0 %vm243_vm0, %v146_v21 }
  0x32   :  { %276 = vmatpush2.bf16.msra.mxu0 %v12402_v24 }
  0x33   :  { %277 = vmatprep.subr.bf16.mxu0 %v15593_v0 }
  0x36   :  { %278 = vmatpush2.bf16.msra.mxu0 %v12403_v25 }
  0x39   :  { %280 = vmatmul.mubr.bf16.vlgmr.msra.gmra.mxu0 %v145_v28 }
  0xf9   :  { %v13498_v30 = vpop.f32.mrf.mxu0  }
  0xfa   :  { %v290_v31 = vadd.f32 %v288_v29, %v13498_v30  }
  0xfb   :  { %v283_v32 = vpop.f32.mrf.mxu0 }
  0xfd   :  { %v13501_v34 = vpop.f32.mrf.mxu0  }
  0xfe   :  { %v291_v35 = vadd.f32 %v289_v33, %v13501_v34  }
  0xff   :  { %v286_v36 = vpop.f32.mrf.mxu0 }
 0x100 LB: > { %v13290_v37 = vmov 0.0   ;;  %s11423_s0 = sshll.u32 %s13244_s14, 6  ;;  %vm13291_vm1 = vmmov 0   ;;  %s11425_s16 = sshll.u32 %s13244_s14, 10  ;;  %v330_v42 = vpack.c.bf16 %v13236_v35, %v13240_v31  ;;  %vm349_vm2 = vcmask 261120   ;;  %s13244_s14 = sphi %s13508_s14, %s297_s14   ;;  %v13240_v31 = vphi %v290_v31, %v15605_v31   ;;  %v13236_v35 = vphi %v291_v35, %v15604_v35  }
 0x101   : > { %11930 = vmatprep.subr.bf16.mxu1 %v13290_v37  ;;  %11922 = vmatprep.subr.bf16.mxu0 %v13290_v37  ;;  %s13527_s29 = scalar_lea.vmem %s13316_s18, %s11423_s0  ;;  %s13539_s25 = scalar_lea.vmem %s13351_s9, %s11425_s16  ;;  %vm996_vm3 = vcmask 130048  }
 0x102   : > { %11934 = vmatprep.mubr.msk.bf16.mxu1 %vm13291_vm1, %v13290_v37  ;;  %11926 = vmatprep.mubr.msk.bf16.mxu0 %vm13291_vm1, %v13290_v37  ;;  %v12404_v38 = vld [vmem:[%s13527_s29 + $0x18] sm:$0xff]   ;;  %v12405_v39 = vld [vmem:[%s13527_s29 + $0x8] sm:$0xff]   ;;  %v12406_v40 = vld [vmem:[%s13527_s29 + $0x10] sm:$0xff]   ;;  %s10591_s19 = sshll.u32 %s13244_s14, 2  ;;  %s11424_s2 = sshll.u32 %s13244_s14, 8 }
 0x103   : > { %11931 = vmatpush3.bf16.msra.mxu1 %v12404_v38  ;;  %11923 = vmatpush3.bf16.msra.mxu0 %v12405_v39  ;;  %v12407_v41 = vld [vmem:[%s13527_s29] sm:$0xff]   ;;  %v12408_v43 = vld [vmem:[%s13527_s29 + $0x28] sm:$0xff]   ;;  %s13560_s21 = scalar_lea.vmem %s13321_s22, %s10591_s19  ;;  %s13902_s27 = scalar_lea.vmem %s13331_s30, %s11424_s2 }
 0x104   : > { %11932 = vmatprep.subr.bf16.mxu1 %v13290_v37  ;;  %11924 = vmatprep.subr.bf16.mxu0 %v13290_v37  ;;  %v12409_v44 = vld [vmem:[%s13527_s29 + $0x20] sm:$0xff]   ;;  %s13921_s5 = scalar_lea.vmem %s13326_s26, %s10591_s19  ;;  %s10589_s12 = sshll.u32 %s13244_s14, 4 }
 0x105   : > { %v10596_v47 = vld [vmem:[%s13560_s21 + $0x1] ss:$0 sm:$0xff]  ;;  %v10592_v49 = vld [vmem:[%s13560_s21] ss:$0 sm:$0xff]  ;;  %v10600_v39 = vld [vmem:[%s13560_s21 + $0x2] ss:$0 sm:$0xff]  ;;  %s14013_s0 = scalar_lea.vmem %s13340_s4, %s10589_s12 }
 0x107   : > { %11933 = vmatpush3.bf16.msra.mxu1 %v12406_v40  ;;  %11925 = vmatpush3.bf16.msra.mxu0 %v12407_v41 }
 0x108   : > { %11946 = vmatprep.subr.bf16.mxu1 %v13290_v37  ;;  %11938 = vmatprep.subr.bf16.mxu0 %v13290_v37 }
 0x10a   : > { %11935 = vmatmul.mubr.msk.bf16.vlgmr.msra.gmra.mxu1 %vm349_vm2, %v330_v42  ;;  %11927 = vmatmul.mubr.msk.bf16.vlgmr.msra.gmra.mxu0 %vm349_vm2, %v330_v42 }
 0x10b   : > { %11948 = vmatprep.mubr.msk.bf16.mxu1 %vm13291_vm1, %v13290_v37  ;;  %11942 = vmatprep.mubr.msk.bf16.mxu0 %vm13291_vm1, %v13290_v37 }
 0x10c   : > { %11939 = vmatpush3.bf16.msra.mxu0 %v12408_v43 }
 0x10d   : > { %11940 = vmatprep.subr.bf16.mxu0 %v13290_v37 }
 0x110   : > { %11941 = vmatpush3.bf16.msra.mxu0 %v12409_v44 }
 0x111   : > { %11952 = vmatprep.subr.bf16.mxu0 %v13290_v37 }
 0x113   : > { %11943 = vmatmul.mubr.msk.bf16.vlgmr.msra.gmra.mxu0 %vm349_vm2, %v330_v42 }
 0x114   : > { %11954 = vmatprep.mubr.msk.bf16.mxu0 %vm13291_vm1, %v13290_v37 }
 0x1ca   : > { %v446_v45 = vpop.f32.mrf.mxu1  ;;  %v387_v46 = vpop.f32.mrf.mxu0 }
 0x1cb   : > { %v447_v52 = vadd.f32 %v10596_v47, %v446_v45  ;;  %v388_v55 = vadd.f32 %v10592_v49, %v387_v46 }
 0x1cc   : > { %v11936_v48 = vpop.f32.mrf.mxu1  ;;  %v11928_v50 = vpop.f32.mrf.mxu0 }
 0x1cd   : > { %v560_v61 = vmul.f32 %v13333_v1, %v388_v55  ;;  %v562_v63 = vmul.f32 %v13335_v2, %v388_v55  ;;  %v564_v14 = vmul.f32 %v13342_v3, %v388_v55  ;;  %v566_v16 = vmul.f32 %v13344_v4, %v388_v55 }
 0x1ce   : > { %v449_v51 = vpop.f32.mrf.mxu1  ;;  %v390_v54 = vpop.f32.mrf.mxu0  ;;  %v568_v20 = vmul.f32 %v13353_v6, %v388_v55  ;;  %v570_v22 = vmul.f32 %v13355_v7, %v388_v55  ;;  %v572_v26 = vmul.f32 %v13364_v9, %v388_v55  ;;  %v574_v28 = vmul.f32 %v13366_v10, %v388_v55 }
 0x1cf   : > { %v450_v53 = vadd.f32 %v10596_v47, %v449_v51  ;;  %v391_v58 = vadd.f32 %v10592_v49, %v390_v54 }
 0x1d0   : > { %v11937_v56 = vpop.f32.mrf.mxu1  ;;  %v11929_v59 = vpop.f32.mrf.mxu0 }
 0x1d1   : > { %v608_v57 = vpack.c.bf16 %v450_v53, %v447_v52  ;;  %v561_v62 = vmul.f32 %v13333_v1, %v391_v58  ;;  %v563_v11 = vmul.f32 %v13335_v2, %v391_v58  ;;  %v565_v15 = vmul.f32 %v13342_v3, %v391_v58 }
 0x1d2   : > { %v567_v17 = vmul.f32 %v13344_v4, %v391_v58  ;;  %v569_v21 = vmul.f32 %v13353_v6, %v391_v58  ;;  %v571_v23 = vmul.f32 %v13355_v7, %v391_v58  ;;  %v573_v27 = vmul.f32 %v13364_v9, %v391_v58 }
 0x1d3   : > { %v613_v60 = vsel %vm349_vm2, %v608_v57, 0  ;;  %v576_v12 = vpack.c.bf16 %v561_v62, %v560_v61  ;;  %v577_v13 = vpack.c.bf16 %v563_v11, %v562_v63  ;;  %v578_v18 = vpack.c.bf16 %v565_v15, %v564_v14  ;;  %v505_v36 = vpop.f32.mrf.mxu0 }
 0x1d4   : > { %11947 = vmatpush3.bf16.xpose.msra.mxu1 %v613_v60  ;;  %11953 = vmatpush3.bf16.xpose.msra.mxu0 %v613_v60  ;;  %v579_v19 = vpack.c.bf16 %v567_v17, %v566_v16  ;;  %v580_v24 = vpack.c.bf16 %v569_v21, %v568_v20  ;;  %v581_v25 = vpack.c.bf16 %v571_v23, %v570_v22 }
 0x1d5   : > { %11958 = vmatprep.subr.bf16.mxu1 %v13290_v37  ;;  %11964 = vmatprep.subr.bf16.mxu0 %v13290_v37  ;;  %v575_v29 = vmul.f32 %v13366_v10, %v391_v58  ;;  %v582_v32 = vpack.c.bf16 %v573_v27, %v572_v26  ;;  %v11944_v38 = vpop.f32.mrf.mxu0  ;;  %v506_v42 = vadd.f32 %v10600_v39, %v505_v36 }
 0x1d7   : > { %v583_v33 = vpack.c.bf16 %v575_v29, %v574_v28  ;;  %v508_v40 = vpop.f32.mrf.mxu0  ;;  %v584_v44 = vmul.f32 %v13333_v1, %v506_v42  ;;  %v586_v46 = vmul.f32 %v13335_v2, %v506_v42  ;;  %v13619_v48 = vmul.f32 %v13342_v3, %v506_v42 }
 0x1d8   : > { %v509_v43 = vadd.f32 %v10600_v39, %v508_v40  ;;  %v13625_v50 = vmul.f32 %v13344_v4, %v506_v42  ;;  %v13631_v54 = vmul.f32 %v13353_v6, %v506_v42  ;;  %v13641_v58 = vmul.f32 %v13355_v7, %v506_v42 }
 0x1d9   : > { %v11945_v41 = vpop.f32.mrf.mxu0  ;;  %v13649_v61 = vmul.f32 %v13364_v9, %v506_v42  ;;  %v13659_v11 = vmul.f32 %v13366_v10, %v506_v42 }
 0x1da   : > { %v585_v45 = vmul.f32 %v13333_v1, %v509_v43  ;;  %v587_v47 = vmul.f32 %v13335_v2, %v509_v43  ;;  %v13622_v49 = vmul.f32 %v13342_v3, %v509_v43  ;;  %v13628_v51 = vmul.f32 %v13344_v4, %v509_v43 }
 0x1db   : > { %11949 = vmatmul.mubr.msk.bf16.vlgmr.msra.gmra.mxu1 %vm349_vm2, %v576_v12  ;;  %11955 = vmatmul.mubr.msk.bf16.vlgmr.msra.gmra.mxu0 %vm349_vm2, %v577_v13  ;;  %v13634_v55 = vmul.f32 %v13353_v6, %v509_v43  ;;  %v13644_v59 = vmul.f32 %v13355_v7, %v509_v43  ;;  %v13652_v62 = vmul.f32 %v13364_v9, %v509_v43 }
 0x1dc   : > { %11959 = vmatpush3.bf16.xpose.msra.mxu1 %v613_v60  ;;  %11965 = vmatpush3.bf16.xpose.msra.mxu0 %v613_v60  ;;  %v600_v52 = vpack.c.bf16 %v585_v45, %v584_v44  ;;  %v601_v53 = vpack.c.bf16 %v587_v47, %v586_v46  ;;  %v602_v56 = vpack.c.bf16 %v13622_v49, %v13619_v48 }
 0x1dd   : > { %11960 = vmatprep.mubr.msk.bf16.mxu1 %vm13291_vm1, %v13290_v37  ;;  %11966 = vmatprep.mubr.msk.bf16.mxu0 %vm13291_vm1, %v13290_v37  ;;  %v603_v57 = vpack.c.bf16 %v13628_v51, %v13625_v50  ;;  %v605_v63 = vpack.c.bf16 %v13644_v59, %v13641_v58  ;;  %v13662_v12 = vmul.f32 %v13366_v10, %v509_v43 }
 0x1de   : > { %11970 = vmatprep.subr.bf16.mxu1 %v13290_v37  ;;  %11976 = vmatprep.subr.bf16.mxu0 %v13290_v37  ;;  %v606_v13 = vpack.c.bf16 %v13652_v62, %v13649_v61 }
 0x1df   : > { %v607_v14 = vpack.c.bf16 %v13662_v12, %v13659_v11  ;;  %v12411_v11 = vld [vmem:[%s13527_s29 + $0x30] sm:$0xff]  }
 0x1e3   : > { %11961 = vmatmul.mubr.msk.bf16.vlgmr.msra.gmra.mxu1 %vm349_vm2, %v578_v18  ;;  %11967 = vmatmul.mubr.msk.bf16.vlgmr.msra.gmra.mxu0 %vm349_vm2, %v579_v19 }
 0x1e4   : > { %11971 = vmatpush3.bf16.xpose.msra.mxu1 %v613_v60  ;;  %11977 = vmatpush3.bf16.xpose.msra.mxu0 %v613_v60 }
 0x1e5   : > { %11972 = vmatprep.mubr.msk.bf16.mxu1 %vm13291_vm1, %v13290_v37  ;;  %11978 = vmatprep.mubr.msk.bf16.mxu0 %vm13291_vm1, %v13290_v37 }
 0x1e6   : > { %11982 = vmatprep.subr.bf16.mxu1 %v13290_v37  ;;  %11988 = vmatprep.subr.bf16.mxu0 %v13290_v37 }
 0x1eb   : > { %11973 = vmatmul.mubr.msk.bf16.vlgmr.msra.gmra.mxu1 %vm349_vm2, %v580_v24  ;;  %11979 = vmatmul.mubr.msk.bf16.vlgmr.msra.gmra.mxu0 %vm349_vm2, %v581_v25 }
 0x1ec   : > { %11983 = vmatpush3.bf16.xpose.msra.mxu1 %v613_v60  ;;  %11989 = vmatpush3.bf16.xpose.msra.mxu0 %v613_v60  ;;  %v604_v60 = vpack.c.bf16 %v13634_v55, %v13631_v54 }
 0x1ed   : > { %11984 = vmatprep.mubr.msk.bf16.mxu1 %vm13291_vm1, %v13290_v37  ;;  %11990 = vmatprep.mubr.msk.bf16.mxu0 %vm13291_vm1, %v13290_v37 }
 0x1ee   : > { %11994 = vmatprep.subr.bf16.mxu1 %v13290_v37  ;;  %12000 = vmatprep.subr.bf16.mxu0 %v13290_v37 }
 0x1f3   : > { %11985 = vmatmul.mubr.msk.bf16.vlgmr.msra.gmra.mxu1 %vm349_vm2, %v582_v32  ;;  %11991 = vmatmul.mubr.msk.bf16.vlgmr.msra.gmra.mxu0 %vm349_vm2, %v583_v33 }
 0x1f4   : > { %11996 = vmatprep.mubr.msk.bf16.mxu1 %vm13291_vm1, %v13290_v37  ;;  %12002 = vmatprep.mubr.msk.bf16.mxu0 %vm13291_vm1, %v13290_v37 }
 0x1f5   : > { %11995 = vmatpush3.bf16.msra.mxu1 %v600_v52  ;;  %12001 = vmatpush3.bf16.msra.mxu0 %v601_v53 }
 0x1f6   : > { %12006 = vmatprep.subr.bf16.mxu1 %v13290_v37  ;;  %12012 = vmatprep.subr.bf16.mxu0 %v13290_v37 }
 0x29b   : > { %v649_v15 = vpop.f32.mrf.mxu1  ;;  %v693_v16 = vpop.f32.mrf.mxu0 }
 0x29c   : > { %v964_v17 = vmul.f32 0.5, %v649_v15  ;;  %v966_v18 = vmul.f32 0.5, %v693_v16 }
 0x29d   : > { %v11950_v19 = vpop.f32.mrf.mxu1  ;;  %v11956_v20 = vpop.f32.mrf.mxu0 }
 0x29e   : > { %v13669_v21 = vadd.f32 %v964_v17, %v13346_v5  ;;  %v13672_v22 = vadd.f32 %v966_v18, %v13346_v5 }
 0x29f   : > { %v652_v23 = vpop.f32.mrf.mxu1  ;;  %v696_v24 = vpop.f32.mrf.mxu0 }
 0x2a0   : > { %v965_v25 = vmul.f32 0.5, %v652_v23  ;;  %v967_v26 = vmul.f32 0.5, %v696_v24  ;;  %v997_v27 = vsel %vm996_vm3, %v13669_v21, -inf  ;;  %v1003_v28 = vsel %vm996_vm3, %v13672_v22, -inf }
 0x2a1   : > { %998 = vmax.xlane.f32.xlu0 %v997_v27  ;;  %v11951_v29 = vpop.f32.mrf.mxu1  ;;  %1004 = vmax.xlane.f32.xlu1 %v1003_v28  ;;  %v11957_v32 = vpop.f32.mrf.mxu0 }
 0x2a2   : > { %v13679_v33 = vadd.f32 %v965_v25, %v13357_v8  ;;  %v13682_v36 = vadd.f32 %v967_v26, %v13357_v8 }
 0x2a3   : > { %v737_v38 = vpop.f32.mrf.mxu1  ;;  %v781_v39 = vpop.f32.mrf.mxu0 }
 0x2a4   : > { %v968_v40 = vmul.f32 0.5, %v737_v38  ;;  %v970_v41 = vmul.f32 0.5, %v781_v39  ;;  %v1000_v42 = vsel %vm996_vm3, %v13679_v33, -inf  ;;  %v1006_v43 = vsel %vm996_vm3, %v13682_v36, -inf }
 0x2a5   : > { %1001 = vmax.xlane.f32.xlu0 %v1000_v42  ;;  %v11962_v44 = vpop.f32.mrf.mxu1  ;;  %1007 = vmax.xlane.f32.xlu1 %v1006_v43  ;;  %v11968_v45 = vpop.f32.mrf.mxu0 }
 0x2a6   : > { %v13689_v46 = vadd.f32 %v968_v40, %v13346_v5  ;;  %v13692_v53 = vadd.f32 %v970_v41, %v13346_v5 }
 0x2a7   : > { %v740_v47 = vpop.f32.mrf.mxu1  ;;  %v784_v52 = vpop.f32.mrf.mxu0 }
 0x2a8   : > { %v969_v15 = vmul.f32 0.5, %v740_v47  ;;  %v971_v16 = vmul.f32 0.5, %v784_v52  ;;  %v1009_v17 = vsel %vm996_vm3, %v13689_v46, -inf  ;;  %v1015_v29 = vsel %vm996_vm3, %v13692_v53, -inf }
 0x2a9   : > { %1010 = vmax.xlane.f32.xlu0 %v1009_v17  ;;  %v11963_v18 = vpop.f32.mrf.mxu1  ;;  %v11969_v19 = vpop.f32.mrf.mxu0 }
 0x2aa   : > { %v13697_v20 = vadd.f32 %v969_v15, %v13357_v8  ;;  %v13700_v23 = vadd.f32 %v971_v16, %v13357_v8 }
 0x2ab   : > { %v825_v24 = vpop.f32.mrf.mxu1  ;;  %v869_v25 = vpop.f32.mrf.mxu0 }
 0x2ac   : > { %v972_v26 = vmul.f32 0.5, %v825_v24  ;;  %v974_v27 = vmul.f32 0.5, %v869_v25  ;;  %v1012_v28 = vsel %vm996_vm3, %v13697_v20, -inf  ;;  %v1018_v42 = vsel %vm996_vm3, %v13700_v23, -inf }
 0x2ad   : > { %v11974_v32 = vpop.f32.mrf.mxu1  ;;  %1013 = vmax.xlane.f32.xlu1 %v1012_v28  ;;  %1016 = vmax.xlane.f32.xlu0 %v1015_v29  ;;  %v11980_v38 = vpop.f32.mrf.mxu0 }
 0x2ae   : > { %v13707_v39 = vadd.f32 %v972_v26, %v13346_v5  ;;  %v13712_v43 = vadd.f32 %v974_v27, %v13346_v5 }
 0x2af   : > { %v828_v40 = vpop.f32.mrf.mxu1  ;;  %v872_v41 = vpop.f32.mrf.mxu0 }
 0x2b0   : > { %v973_v44 = vmul.f32 0.5, %v828_v40  ;;  %v975_v45 = vmul.f32 0.5, %v872_v41  ;;  %v1021_v47 = vsel %vm996_vm3, %v13707_v39, -inf  ;;  %v1027_v27 = vsel %vm996_vm3, %v13712_v43, -inf }
 0x2b1   : > { %v11975_v52 = vpop.f32.mrf.mxu1  ;;  %1022 = vmax.xlane.f32.xlu0 %v1021_v47  ;;  %1019 = vmax.xlane.f32.xlu1 %v1018_v42  ;;  %v11981_v15 = vpop.f32.mrf.mxu0 }
 0x2b2   : > { %v13717_v16 = vadd.f32 %v973_v44, %v13357_v8  ;;  %v13720_v17 = vadd.f32 %v975_v45, %v13357_v8 }
 0x2b3   : > { %v913_v18 = vpop.f32.mrf.mxu1  ;;  %v957_v19 = vpop.f32.mrf.mxu0 }
 0x2b4   : > { %v976_v24 = vmul.f32 0.5, %v913_v18  ;;  %v978_v25 = vmul.f32 0.5, %v957_v19  ;;  %v1024_v26 = vsel %vm996_vm3, %v13717_v16, -inf  ;;  %v1030_v41 = vsel %vm996_vm3, %v13720_v17, -inf }
 0x2b5   : > { %v11986_v28 = vpop.f32.mrf.mxu1  ;;  %1025 = vmax.xlane.f32.xlu1 %v1024_v26  ;;  %1028 = vmax.xlane.f32.xlu0 %v1027_v27  ;;  %v11992_v29 = vpop.f32.mrf.mxu0 }
 0x2b6   : > { %v13727_v32 = vadd.f32 %v976_v24, %v13346_v5  ;;  %v13732_v42 = vadd.f32 %v978_v25, %v13346_v5 }
 0x2b7   : > { %v916_v38 = vpop.f32.mrf.mxu1  ;;  %v960_v40 = vpop.f32.mrf.mxu0 }
 0x2b8   : > { %v977_v44 = vmul.f32 0.5, %v916_v38  ;;  %v979_v45 = vmul.f32 0.5, %v960_v40  ;;  %v1033_v47 = vsel %vm996_vm3, %v13727_v32, -inf  ;;  %v1039_v25 = vsel %vm996_vm3, %v13732_v42, -inf }
 0x2b9   : > { %v11987_v52 = vpop.f32.mrf.mxu1  ;;  %1034 = vmax.xlane.f32.xlu0 %v1033_v47  ;;  %1031 = vmax.xlane.f32.xlu1 %v1030_v41  ;;  %v11993_v15 = vpop.f32.mrf.mxu0 }
 0x2ba   : > { %v13737_v18 = vadd.f32 %v977_v44, %v13357_v8  ;;  %v13740_v19 = vadd.f32 %v979_v45, %v13357_v8 }
 0x2bc   : > { %v1036_v24 = vsel %vm996_vm3, %v13737_v18, -inf  ;;  %v1042_v26 = vsel %vm996_vm3, %v13740_v19, -inf }
 0x2bd   : > { %1037 = vmax.xlane.f32.xlu1 %v1036_v24  ;;  %1040 = vmax.xlane.f32.xlu0 %v1039_v25 }
 0x2c1   : > { %1043 = vmax.xlane.f32.xlu1 %v1042_v26 }
 0x32a   : > { %v999_v27 = vpop.xlane.xlu0 %998  ;;  %v1005_v28 = vpop.xlane.xlu1 %1004 }
 0x32b   : > { %v1045_v29 = vsub.f32 %v13669_v21, %v999_v27  ;;  %v1047_v38 = vsub.f32 %v13672_v22, %v1005_v28 }
 0x32d   : > { %v1061_v40 = vmul.f32 1.442695, %v1045_v29  ;;  %v1065_v41 = vmul.f32 1.442695, %v1047_v38 }
 0x32e   : > { %v1002_v44 = vpop.xlane.xlu0 %1001  ;;  %v1008_v45 = vpop.xlane.xlu1 %1007 }
 0x32f   : > { %12540 = vpow2.f32 %v1061_v40  ;;  %v1046_v47 = vsub.f32 %v13679_v33, %v1002_v44  ;;  %v1048_v52 = vsub.f32 %v13682_v36, %v1008_v45 }
 0x330   : > { %12542 = vpow2.f32 %v1065_v41 }
 0x331   : > { %v1063_v15 = vmul.f32 1.442695, %v1046_v47  ;;  %v1067_v24 = vmul.f32 1.442695, %v1048_v52 }
 0x332   : > { %v1011_v25 = vpop.xlane.xlu0 %1010 }
 0x333   : > { %12544 = vpow2.f32 %v1063_v15  ;;  %v1049_v26 = vsub.f32 %v13689_v46, %v1011_v25 }
 0x334   : > { %12546 = vpow2.f32 %v1067_v24 }
 0x335   : > { %v1069_v21 = vmul.f32 1.442695, %v1049_v26 }
 0x336   : > { %v1014_v27 = vpop.xlane.xlu1 %1013  ;;  %v1017_v22 = vpop.xlane.xlu0 %1016 }
 0x337   : > { %12548 = vpow2.f32 %v1069_v21  ;;  %v1050_v28 = vsub.f32 %v13697_v20, %v1014_v27  ;;  %v1051_v29 = vsub.f32 %v13692_v53, %v1017_v22 }
 0x339   : > { %v1071_v38 = vmul.f32 1.442695, %v1050_v28  ;;  %v1073_v33 = vmul.f32 1.442695, %v1051_v29 }
 0x33a   : > { %v1023_v40 = vpop.xlane.xlu0 %1022  ;;  %v1020_v36 = vpop.xlane.xlu1 %1019 }
 0x33b   : > { %12550 = vpow2.f32 %v1071_v38  ;;  %v1053_v41 = vsub.f32 %v13707_v39, %v1023_v40  ;;  %v1052_v44 = vsub.f32 %v13700_v23, %v1020_v36 }
 0x33c   : > { %v13757_v45 = vpop.eup %12540  ;;  %12552 = vpow2.f32 %v1073_v33 }
 0x33d   : > { %v1077_v46 = vmul.f32 1.442695, %v1053_v41  ;;  %v1075_v47 = vmul.f32 1.442695, %v1052_v44  ;;  %v1093_v52 = vsel %vm996_vm3, %v13757_v45, 0.0  ;;  %v13761_v20 = vpop.eup %12542 }
 0x33e   : > { %v1026_v53 = vpop.xlane.xlu1 %1025  ;;  %v1029_v15 = vpop.xlane.xlu0 %1028  ;;  %1094 = vadd.xlane.f32.xlu0 %v1093_v52  ;;  %v1099_v21 = vsel %vm996_vm3, %v13761_v20, 0.0 }
 0x33f   : > { %12554 = vpow2.f32 %v1077_v46  ;;  %v1054_v24 = vsub.f32 %v13717_v16, %v1026_v53  ;;  %v1055_v39 = vsub.f32 %v13712_v43, %v1029_v15 }
 0x340   : > { %v13765_v25 = vpop.eup %12544  ;;  %12556 = vpow2.f32 %v1075_v47 }
 0x341   : > { %v1079_v23 = vmul.f32 1.442695, %v1054_v24  ;;  %v1081_v26 = vmul.f32 1.442695, %v1055_v39  ;;  %v1096_v27 = vsel %vm996_vm3, %v13765_v25, 0.0  ;;  %v13771_v22 = vpop.eup %12546 }
 0x342   : > { %v1035_v28 = vpop.xlane.xlu0 %1034  ;;  %v1032_v29 = vpop.xlane.xlu1 %1031  ;;  %1100 = vadd.xlane.f32.xlu0 %v1099_v21  ;;  %1097 = vadd.xlane.f32.xlu1 %v1096_v27  ;;  %v1102_v41 = vsel %vm996_vm3, %v13771_v22, 0.0 }
 0x343   : > { %12558 = vpow2.f32 %v1079_v23  ;;  %v1057_v43 = vsub.f32 %v13727_v32, %v1035_v28  ;;  %v1056_v16 = vsub.f32 %v13720_v17, %v1032_v29 }
 0x344   : > { %v13775_v38 = vpop.eup %12548  ;;  %12560 = vpow2.f32 %v1081_v26 }
 0x345   : > { %v1085_v33 = vmul.f32 1.442695, %v1057_v43  ;;  %v1083_v40 = vmul.f32 1.442695, %v1056_v16  ;;  %v1105_v36 = vsel %vm996_vm3, %v13775_v38, 0.0 }
 0x346   : > { %v1038_v44 = vpop.xlane.xlu1 %1037  ;;  %1106 = vadd.xlane.f32.xlu0 %v1105_v36  ;;  %v1041_v46 = vpop.xlane.xlu0 %1040  ;;  %1103 = vadd.xlane.f32.xlu1 %v1102_v41 }
 0x347   : > { %12562 = vpow2.f32 %v1085_v33  ;;  %v1058_v32 = vsub.f32 %v13737_v18, %v1038_v44  ;;  %v1059_v17 = vsub.f32 %v13732_v42, %v1041_v46 }
 0x348   : > { %v13783_v47 = vpop.eup %12550  ;;  %12564 = vpow2.f32 %v1083_v40 }
 0x349   : > { %v13785_v52 = vpop.eup %12552  ;;  %v1087_v53 = vmul.f32 1.442695, %v1058_v32  ;;  %v1089_v15 = vmul.f32 1.442695, %v1059_v17  ;;  %v1108_v24 = vsel %vm996_vm3, %v13783_v47, 0.0 }
 0x34a   : > { %v1111_v39 = vsel %vm996_vm3, %v13785_v52, 0.0  ;;  %1109 = vadd.xlane.f32.xlu1 %v1108_v24  ;;  %v1044_v23 = vpop.xlane.xlu1 %1043 }
 0x34b   : > { %12566 = vpow2.f32 %v1087_v53  ;;  %1112 = vadd.xlane.f32.xlu0 %v1111_v39  ;;  %v1060_v18 = vsub.f32 %v13740_v19, %v1044_v23 }
 0x34c   : > { %v13792_v42 = vpop.eup %12554  ;;  %12568 = vpow2.f32 %v1089_v15 }
 0x34d   : > { %v13794_v26 = vpop.eup %12556  ;;  %v1091_v21 = vmul.f32 1.442695, %v1060_v18  ;;  %v1117_v27 = vsel %vm996_vm3, %v13792_v42, 0.0 }
 0x34e   : > { %v1114_v28 = vsel %vm996_vm3, %v13794_v26, 0.0 }
 0x34f   : > { %12570 = vpow2.f32 %v1091_v21  ;;  %1118 = vadd.xlane.f32.xlu0 %v1117_v27  ;;  %1115 = vadd.xlane.f32.xlu1 %v1114_v28 }
 0x350   : > { %v13800_v29 = vpop.eup %12558 }
 0x351   : > { %v13802_v43 = vpop.eup %12560  ;;  %v1120_v19 = vsel %vm996_vm3, %v13800_v29, 0.0 }
 0x352   : > { %v1123_v16 = vsel %vm996_vm3, %v13802_v43, 0.0 }
 0x353   : > { %1124 = vadd.xlane.f32.xlu0 %v1123_v16  ;;  %1121 = vadd.xlane.f32.xlu1 %v1120_v19 }
 0x354   : > { %v13808_v33 = vpop.eup %12562 }
 0x355   : > { %v13810_v40 = vpop.eup %12564  ;;  %v1129_v36 = vsel %vm996_vm3, %v13808_v33, 0.0 }
 0x356   : > { %v1126_v41 = vsel %vm996_vm3, %v13810_v40, 0.0 }
 0x357   : > { %1130 = vadd.xlane.f32.xlu0 %v1129_v36  ;;  %1127 = vadd.xlane.f32.xlu1 %v1126_v41 }
 0x358   : > { %v13816_v44 = vpop.eup %12566 }
 0x359   : > { %v13818_v46 = vpop.eup %12568  ;;  %v1132_v32 = vsel %vm996_vm3, %v13816_v44, 0.0 }
 0x35a   : > { %v1135_v17 = vsel %vm996_vm3, %v13818_v46, 0.0 }
 0x35b   : > { %1136 = vadd.xlane.f32.xlu0 %v1135_v17  ;;  %1133 = vadd.xlane.f32.xlu1 %v1132_v32 }
 0x35c   : > { %v13824_v53 = vpop.eup %12570 }
 0x35d   : > { %v1138_v15 = vsel %vm996_vm3, %v13824_v53, 0.0 }
 0x35f   : > { %1139 = vadd.xlane.f32.xlu1 %v1138_v15 }
 0x3c7   : > { %v1095_v24 = vpop.xlane.xlu0 %1094 }
 0x3c8   : > { %12572 = vrcp.f32 %v1095_v24 }
 0x3cb   : > { %v1101_v39 = vpop.xlane.xlu0 %1100  ;;  %v1098_v23 = vpop.xlane.xlu1 %1097 }
 0x3cc   : > { %12574 = vrcp.f32 %v1098_v23 }
 0x3cd   : > { %12576 = vrcp.f32 %v1101_v39 }
 0x3cf   : > { %v1107_v18 = vpop.xlane.xlu0 %1106  ;;  %v1104_v21 = vpop.xlane.xlu1 %1103 }
 0x3d0   : > { %12578 = vrcp.f32 %v1104_v21 }
 0x3d1   : > { %12580 = vrcp.f32 %v1107_v18 }
 0x3d3   : > { %v1110_v27 = vpop.xlane.xlu1 %1109 }
 0x3d4   : > { %v1113_v28 = vpop.xlane.xlu0 %1112  ;;  %12582 = vrcp.f32 %v1110_v27 }
 0x3d5   : > { %v12573_v19 = vpop.eup %12572  ;;  %12584 = vrcp.f32 %v1113_v28 }
 0x3d6   : > { %v1157_v32 = vmul.f32 %v12573_v19, %v13757_v45 }
 0x3d8   : > { %v1119_v16 = vpop.xlane.xlu0 %1118  ;;  %v1116_v36 = vpop.xlane.xlu1 %1115 }
 0x3d9   : > { %v12575_v41 = vpop.eup %12574  ;;  %12586 = vrcp.f32 %v1116_v36 }
 0x3da   : > { %v1158_v17 = vmul.f32 %v12575_v41, %v13765_v25  ;;  %v12577_v15 = vpop.eup %12576  ;;  %12588 = vrcp.f32 %v1119_v16 }
 0x3db   : > { %v1159_v27 = vmul.f32 %v12577_v15, %v13761_v20 }
 0x3dc   : > { %v1125_v24 = vpop.xlane.xlu0 %1124  ;;  %v1122_v39 = vpop.xlane.xlu1 %1121  ;;  %v1173_v23 = vpack.c.bf16 %v1158_v17, %v1157_v32 }
 0x3dd   : > { %v12579_v21 = vpop.eup %12578  ;;  %12590 = vrcp.f32 %v1122_v39 }
 0x3de   : > { %v12581_v18 = vpop.eup %12580  ;;  %11997 = vmatmul.mubr.msk.bf16.vlgmr.msra.gmra.mxu1 %vm996_vm3, %v1173_v23  ;;  %v1160_v28 = vmul.f32 %v12579_v21, %v13771_v22  ;;  %12592 = vrcp.f32 %v1125_v24 }
 0x3df   : > { %12007 = vmatpush3.bf16.msra.mxu1 %v602_v56  ;;  %12008 = vmatprep.mubr.msk.bf16.mxu1 %vm13291_vm1, %v13290_v37  ;;  %v1161_v36 = vmul.f32 %v12581_v18, %v13775_v38 }
 0x3e0   : > { %v1131_v45 = vpop.xlane.xlu0 %1130  ;;  %v1128_v25 = vpop.xlane.xlu1 %1127  ;;  %v1174_v16 = vpack.c.bf16 %v1160_v28, %v1159_v27  ;;  %12018 = vmatprep.subr.bf16.mxu1 %v13290_v37 }
 0x3e1   : > { %v12583_v19 = vpop.eup %12582  ;;  %12594 = vrcp.f32 %v1128_v25 }
 0x3e2   : > { %v1162_v20 = vmul.f32 %v12583_v19, %v13783_v47  ;;  %12003 = vmatmul.mubr.msk.bf16.vlgmr.msra.gmra.mxu0 %vm996_vm3, %v1174_v16  ;;  %12596 = vrcp.f32 %v1131_v45  ;;  %v12585_v22 = vpop.eup %12584 }
 0x3e3   : > { %12013 = vmatpush3.bf16.msra.mxu0 %v603_v57  ;;  %12014 = vmatprep.mubr.msk.bf16.mxu0 %vm13291_vm1, %v13290_v37  ;;  %v1163_v51 = vmul.f32 %v12585_v22, %v13785_v52 }
 0x3e4   : > { %v1137_v48 = vpop.xlane.xlu0 %1136  ;;  %v1134_v49 = vpop.xlane.xlu1 %1133  ;;  %v1175_v56 = vpack.c.bf16 %v1162_v20, %v1161_v36  ;;  %12024 = vmatprep.subr.bf16.mxu0 %v13290_v37 }
 0x3e5   : > { %12598 = vrcp.f32 %v1134_v49 }
 0x3e6   : > { %v12587_v38 = vpop.eup %12586  ;;  %12600 = vrcp.f32 %v1137_v48  ;;  %12009 = vmatmul.mubr.msk.bf16.vlgmr.msra.gmra.mxu1 %vm996_vm3, %v1175_v56 }
 0x3e7   : > { %12019 = vmatpush3.bf16.msra.mxu1 %v604_v60  ;;  %v1164_v57 = vmul.f32 %v12587_v38, %v13794_v26  ;;  %12020 = vmatprep.mubr.msk.bf16.mxu1 %vm13291_vm1, %v13290_v37  ;;  %v12589_v47 = vpop.eup %12588 }
 0x3e8   : > { %v1140_v50 = vpop.xlane.xlu1 %1139  ;;  %12030 = vmatprep.subr.bf16.mxu1 %v13290_v37  ;;  %v1165_v17 = vmul.f32 %v12589_v47, %v13792_v42 }
 0x3e9   : > { %12602 = vrcp.f32 %v1140_v50  ;;  %v1176_v41 = vpack.c.bf16 %v1164_v57, %v1163_v51 }
 0x3ea   : > { %v12591_v32 = vpop.eup %12590 }
 0x3eb   : > { %12015 = vmatmul.mubr.msk.bf16.vlgmr.msra.gmra.mxu0 %vm996_vm3, %v1176_v41  ;;  %v1166_v54 = vmul.f32 %v12591_v32, %v13800_v29  ;;  %v12593_v55 = vpop.eup %12592 }
 0x3ec   : > { %12025 = vmatpush3.bf16.msra.mxu0 %v605_v63  ;;  %12026 = vmatprep.mubr.msk.bf16.mxu0 %vm13291_vm1, %v13290_v37  ;;  %v1167_v26 = vmul.f32 %v12593_v55, %v13802_v43 }
 0x3ed   : > { %v1177_v60 = vpack.c.bf16 %v1166_v54, %v1165_v17  ;;  %12036 = vmatprep.subr.bf16.mxu0 %v13290_v37 }
 0x3ee   : > { %v12595_v52 = vpop.eup %12594 }
 0x3ef   : > { %12021 = vmatmul.mubr.msk.bf16.vlgmr.msra.gmra.mxu1 %vm996_vm3, %v1177_v60  ;;  %v1168_v42 = vmul.f32 %v12595_v52, %v13810_v40  ;;  %v12597_v15 = vpop.eup %12596 }
 0x3f0   : > { %12031 = vmatpush3.bf16.msra.mxu1 %v606_v13  ;;  %12032 = vmatprep.mubr.msk.bf16.mxu1 %vm13291_vm1, %v13290_v37  ;;  %v1169_v29 = vmul.f32 %v12597_v15, %v13808_v33  ;;  %v12410_v33 = vld [vmem:[%s13527_s29 + $0x38] sm:$0xff]   ;;  %s1952_s29 = scalar_lea.vmem %s13362_s15, %s13244_s14  ;;  %s297_s14 = sadd.s32 1, %s13244_s14  }
 0x3f1   : > { %v1178_v58 = vpack.c.bf16 %v1168_v42, %v1167_v26  ;;  %12042 = vmatprep.subr.bf16.mxu1 %v13290_v37  ;;  %p294_p0 = scmp.ge.s32.totalorder %s297_s14, 12  }
 0x3f2   : > { %v12599_v59 = vpop.eup %12598  ;;  %s14238_s18 = smov (%p294_p0), 0  }
 0x3f3   : > { %v12601_v63 = vpop.eup %12600  ;;  %12027 = vmatmul.mubr.msk.bf16.vlgmr.msra.gmra.mxu0 %vm996_vm3, %v1178_v58  ;;  %v1170_v43 = vmul.f32 %v12599_v59, %v13816_v44 }
 0x3f4   : > { %12037 = vmatpush3.bf16.msra.mxu0 %v607_v14  ;;  %12038 = vmatprep.mubr.msk.bf16.mxu0 %vm13291_vm1, %v13290_v37  ;;  %v1171_v13 = vmul.f32 %v12601_v63, %v13818_v46 }
 0x3f5   : > { %v1179_v62 = vpack.c.bf16 %v1170_v43, %v1169_v29 }
 0x3f6   : > { %v12603_v61 = vpop.eup %12602 }
 0x3f7   : > { %v1172_v40 = vmul.f32 %v12603_v61, %v13824_v53  ;;  %12033 = vmatmul.mubr.msk.bf16.vlgmr.msra.gmra.mxu1 %vm996_vm3, %v1179_v62 }
 0x3f8   : > { %12046 = vmatprep.mubr.msk.bf16.mxu1 %vm13291_vm1, %v13290_v37  ;;  %12043 = vmatpush3.bf16.msra.mxu1 %v12410_v33  ;;  %v10620_v33 = vld [vmem:[%s13560_s21 + $0x3] ss:$0 sm:$0xff] }
 0x3f9   : > { %v1180_v24 = vpack.c.bf16 %v1172_v40, %v1171_v13  ;;  %12044 = vmatprep.subr.bf16.mxu1 %v13290_v37 }
 0x3fb   : > { %12039 = vmatmul.mubr.msk.bf16.vlgmr.msra.gmra.mxu0 %vm996_vm3, %v1180_v24 }
 0x3fc   : > { %12045 = vmatpush3.bf16.msra.mxu1 %v12411_v11 }
 0x49e   : > { %v1218_v12 = vpop.f32.mrf.mxu1 }
 0x4a0   : > { %v11998_v14 = vpop.f32.mrf.mxu1 }
 0x4a2   : > { %v1221_v44 = vpop.f32.mrf.mxu1  ;;  %v1262_v46 = vpop.f32.mrf.mxu0 }
 0x4a3   : > { %v1533_v56 = vadd.f32 %v1262_v46, %v1218_v12 }
 0x4a4   : > { %v11999_v39 = vpop.f32.mrf.mxu1  ;;  %v12004_v53 = vpop.f32.mrf.mxu0 }
 0x4a6   : > { %v1265_v23 = vpop.f32.mrf.mxu0  ;;  %v1306_v21 = vpop.f32.mrf.mxu1 }
 0x4a7   : > { %v1534_v22 = vadd.f32 %v1265_v23, %v1221_v44  ;;  %v1535_v51 = vadd.f32 %v1533_v56, %v1306_v21 }
 0x4a8   : > { %v12005_v18 = vpop.f32.mrf.mxu0  ;;  %v12010_v27 = vpop.f32.mrf.mxu1 }
 0x4aa   : > { %v1309_v28 = vpop.f32.mrf.mxu1 }
 0x4ab   : > { %v1350_v45 = vpop.f32.mrf.mxu0  ;;  %v1536_v57 = vadd.f32 %v1534_v22, %v1309_v28  ;;  %v1683_v22 = vld [vmem:[%s13902_s27 + $0xc8] sm:$0xff] }
 0x4ac   : > { %v12011_v25 = vpop.f32.mrf.mxu1  ;;  %v1537_v32 = vadd.f32 %v1535_v51, %v1350_v45 }
 0x4ad   : > { %v12016_v19 = vpop.f32.mrf.mxu0 }
 0x4af   : > { %v1353_v16 = vpop.f32.mrf.mxu0  ;;  %v1394_v36 = vpop.f32.mrf.mxu1 }
 0x4b0   : > { %v1538_v17 = vadd.f32 %v1536_v57, %v1353_v16  ;;  %v1539_v60 = vadd.f32 %v1537_v32, %v1394_v36  ;;  %v1658_v57 = vld [vmem:[%s13902_s27] sm:$0xff] }
 0x4b1   : > { %v12017_v20 = vpop.f32.mrf.mxu0  ;;  %v12022_v37 = vpop.f32.mrf.mxu1 }
 0x4b3   : > { %v1397_v48 = vpop.f32.mrf.mxu1  ;;  %v1438_v49 = vpop.f32.mrf.mxu0 }
 0x4b4   : > { %v1540_v52 = vadd.f32 %v1538_v17, %v1397_v48  ;;  %v1541_v15 = vadd.f32 %v1539_v60, %v1438_v49  ;;  %v1682_v48 = vld [vmem:[%s13902_s27 + $0xc0] sm:$0xff]  ;;  %v1675_v49 = vld [vmem:[%s13902_s27 + $0x88] sm:$0xff] }
 0x4b5   : > { %v12023_v38 = vpop.f32.mrf.mxu1  ;;  %v12028_v50 = vpop.f32.mrf.mxu0  ;;  %v10649_v51 = vcombine.high %v1675_v49, %v1683_v22  ;;  %v1667_v17 = vld [vmem:[%s13902_s27 + $0x48] sm:$0xff] }
 0x4b6   : > { %v10648_v50 = vcombine.low %v1675_v49, %v1683_v22 }
 0x4b7   : > { %v1441_v47 = vpop.f32.mrf.mxu0  ;;  %v1482_v41 = vpop.f32.mrf.mxu1  ;;  %2255 = vmatprep.subr.bf16.mxu1 %v10649_v51  ;;  %v1663_v51 = vld [vmem:[%s13902_s27 + $0x28] sm:$0xff] }
 0x4b8   : > { %v1542_v58 = vadd.f32 %v1540_v52, %v1441_v47  ;;  %v1543_v29 = vadd.f32 %v1541_v15, %v1482_v41  ;;  %v1666_v47 = vld [vmem:[%s13902_s27 + $0x40] sm:$0xff]  ;;  %v1659_v41 = vld [vmem:[%s13902_s27 + $0x8] sm:$0xff]  ;;  %v1676_v52 = vld [vmem:[%s13902_s27 + $0x90] sm:$0xff]  ;;  %v13292_v15 = vmov 0  }
 0x4b9   : > { %v12029_v54 = vpop.f32.mrf.mxu0  ;;  %v12034_v55 = vpop.f32.mrf.mxu1  ;;  %v10631_v32 = vcombine.high %v1658_v57, %v1666_v47  ;;  %v10633_v60 = vcombine.high %v1659_v41, %v1667_v17  ;;  %2232 = vmatprep.mubr.bf16.mxu0 %v13292_v15 }
 0x4ba   : > { %v10630_v54 = vcombine.low %v1658_v57, %v1666_v47  ;;  %v10632_v55 = vcombine.low %v1659_v41, %v1667_v17  ;;  %v1671_v57 = vld [vmem:[%s13902_s27 + $0x68] sm:$0xff] }
 0x4bb   : > { %v1485_v26 = vpop.f32.mrf.mxu1  ;;  %v1526_v42 = vpop.f32.mrf.mxu0  ;;  %v10641_v17 = vcombine.high %v1663_v51, %v1671_v57 }
 0x4bc   : > { %v1544_v43 = vadd.f32 %v1542_v58, %v1485_v26  ;;  %v1545_v62 = vadd.f32 %v1543_v29, %v1526_v42  ;;  %v1684_v26 = vld [vmem:[%s13902_s27 + $0xd0] sm:$0xff]  ;;  %v1677_v42 = vld [vmem:[%s13902_s27 + $0x98] sm:$0xff] }
 0x4bd   : > { %v12035_v59 = vpop.f32.mrf.mxu1  ;;  %v12040_v63 = vpop.f32.mrf.mxu0  ;;  %v10651_v58 = vcombine.high %v1676_v52, %v1684_v26 }
 0x4be   : > { %v1685_v59 = vld [vmem:[%s13902_s27 + $0xd8] sm:$0xff]  ;;  %v10650_v63 = vcombine.low %v1676_v52, %v1684_v26 }
 0x4bf   : > { %v1529_v61 = vpop.f32.mrf.mxu0  ;;  %v10652_v29 = vcombine.low %v1677_v42, %v1685_v59  ;;  %v1689_v52 = vld [vmem:[%s13902_s27 + $0xf8] sm:$0xff] }
 0x4c0   : > { %v1546_v13 = vadd.f32 %v1544_v43, %v1529_v61  ;;  %v10653_v43 = vcombine.high %v1677_v42, %v1685_v59  ;;  %v10640_v42 = vcombine.low %v1663_v51, %v1671_v57  ;;  %v12437_v51 = vld [vmem:[%s13539_s25 + $0xc8] sm:$0xff]  }
 0x4c1   : > { %v12041_v40 = vpop.f32.mrf.mxu0  ;;  %v12438_v57 = vld [vmem:[%s13539_s25 + $0x8] sm:$0xff]  }
 0x4c2   : > { %v1547_v24 = vpack.c.bf16 %v1546_v13, %v1545_v62 }
 0x4c4   : > { %12047 = vmatmul.mubr.msk.bf16.vlgmr.msra.gmra.mxu1 %vm349_vm2, %v1547_v24 }
 0x4c5   : > { %2256 = vmatpush1.bf16.msra.mxu1 %v10648_v50  ;;  %2275 = vmatprep.mubr.bf16.mxu1 %v13292_v15  ;;  %v1670_v50 = vld [vmem:[%s13902_s27 + $0x60] sm:$0xff] }
 0x4c6   : > { %2257 = vmatprep.subr.bf16.mxu1 %v10633_v60  ;;  %v1681_v60 = vld [vmem:[%s13902_s27 + $0xb8] sm:$0xff] }
 0x4c7   : > { %v10661_v59 = vcombine.high %v1681_v60, %v1689_v52 }
 0x4c9   : > { %2258 = vmatpush1.bf16.msra.mxu1 %v10632_v55  ;;  %v1688_v55 = vld [vmem:[%s13902_s27 + $0xf0] sm:$0xff] }
 0x4ca   : > { %2341 = vmatprep.subr.bf16.mxu1 %v10653_v43  ;;  %v1665_v43 = vld [vmem:[%s13902_s27 + $0x38] sm:$0xff] }
 0x584   : > { %v1603_v11 = vpop.f32.mrf.mxu1 }
 0x585   : > { %v1604_v12 = vadd.f32 %v10620_v33, %v1603_v11 }
 0x586   : > { %v12048_v14 = vpop.f32.mrf.mxu1 }
 0x587   : > { %v1610_v44 = vadd.f32 %v13240_v31, %v1604_v12  ;;  %v10624_v14 = vld [vmem:[%s13921_s5] ss:$0 sm:$0xff] }
 0x588   : > { %v1606_v46 = vpop.f32.mrf.mxu1 }
 0x589   : > { %v1607_v39 = vadd.f32 %v10620_v33, %v1606_v46  ;;  %v1612_v53 = vsel %vm349_vm2, %v1610_v44, 0.0 }
 0x58a   : > { %1613 = vadd.xlane.f32.xlu0 %v1612_v53  ;;  %v12049_v23 = vpop.f32.mrf.mxu1  ;;  %v10625_v53 = vld [vmem:[%s13921_s5 + $0x1] ss:$0 sm:$0xff] }
 0x58b   : > { %v1611_v21 = vadd.f32 %v13236_v35, %v1607_v39  ;;  %v1674_v35 = vld [vmem:[%s13902_s27 + $0x80] sm:$0xff] }
 0x58c   : > { %v10647_v56 = vcombine.high %v1674_v35, %v1682_v48  ;;  %v10646_v38 = vcombine.low %v1674_v35, %v1682_v48  ;;  %v1687_v35 = vld [vmem:[%s13902_s27 + $0xe8] sm:$0xff] }
 0x58d   : > { %v1615_v18 = vsel %vm349_vm2, %v1611_v21, 0.0 }
 0x58e   : > { %1616 = vadd.xlane.f32.xlu1 %v1615_v18  ;;  %2212 = vmatprep.subr.bf16.mxu0 %v10647_v56  ;;  %v1668_v18 = vld [vmem:[%s13902_s27 + $0x50] sm:$0xff] }
 0x58f   : > { %2213 = vmatpush1.bf16.msra.mxu0 %v10646_v38  ;;  %v1662_v38 = vld [vmem:[%s13902_s27 + $0x20] sm:$0xff] }
 0x590   : > { %2214 = vmatprep.subr.bf16.mxu0 %v10631_v32  ;;  %v10639_v32 = vcombine.high %v1662_v38, %v1670_v50  ;;  %v10638_v26 = vcombine.low %v1662_v38, %v1670_v50  ;;  %v12435_v38 = vld [vmem:[%s13539_s25 + $0x90] sm:$0xff]   ;;  %v12436_v50 = vld [vmem:[%s13539_s25 + $0x48] sm:$0xff]  }
 0x593   : > { %2215 = vmatpush1.bf16.msra.mxu0 %v10630_v54  ;;  %v1680_v54 = vld [vmem:[%s13902_s27 + $0xb0] sm:$0xff] }
 0x594   : > { %2298 = vmatprep.subr.bf16.mxu0 %v10651_v58  ;;  %v10659_v58 = vcombine.high %v1680_v54, %v1688_v55 }
 0x613   : > { %v1614_v27 = vpop.xlane.xlu0 %1613 }
 0x614   : > { %v1619_v28 = vmul.f32 0.03125, %v1614_v27  ;;  %v1661_v27 = vld [vmem:[%s13902_s27 + $0x18] sm:$0xff] }
 0x616   : > { %v1621_v45 = vsub.f32 %v1610_v44, %v1619_v28  ;;  %v1669_v28 = vld [vmem:[%s13902_s27 + $0x58] sm:$0xff] }
 0x617   : > { %v1617_v25 = vpop.xlane.xlu1 %1616  ;;  %v10636_v49 = vcombine.low %v1661_v27, %v1669_v28 }
 0x618   : > { %v1620_v19 = vmul.f32 0.03125, %v1617_v25  ;;  %v1623_v16 = vmul.f32 %v1621_v45, %v1621_v45 }
 0x61a   : > { %v1622_v31 = vsub.f32 %v1611_v21, %v1620_v19  ;;  %v1625_v36 = vsel %vm349_vm2, %v1623_v16, 0.0  ;;  %v1660_v21 = vld [vmem:[%s13902_s27 + $0x10] sm:$0xff] }
 0x61b   : > { %1626 = vadd.xlane.f32.xlu0 %v1625_v36  ;;  %v10635_v16 = vcombine.high %v1660_v21, %v1668_v18  ;;  %v10637_v36 = vcombine.high %v1661_v27, %v1669_v28  ;;  %v10634_v48 = vcombine.low %v1660_v21, %v1668_v18  ;;  %v12420_v21 = vld [vmem:[%s13539_s25 + $0x68] sm:$0xff]  }
 0x61c   : > { %v1624_v20 = vmul.f32 %v1622_v31, %v1622_v31  ;;  %v12421_v18 = vld [vmem:[%s13539_s25 + $0xe8] sm:$0xff]  }
 0x61d   : > { %v12422_v27 = vld [vmem:[%s13539_s25 + $0x28] sm:$0xff]  }
 0x61e   : > { %v1628_v37 = vsel %vm349_vm2, %v1624_v20, 0.0  ;;  %v1678_v20 = vld [vmem:[%s13902_s27 + $0xa0] sm:$0xff]  ;;  %v12423_v28 = vld [vmem:[%s13539_s25 + $0xa8] sm:$0xff]  }
 0x61f   : > { %1629 = vadd.xlane.f32.xlu1 %v1628_v37  ;;  %v1686_v37 = vld [vmem:[%s13902_s27 + $0xe0] sm:$0xff] }
 0x620   : > { %v10655_v56 = vcombine.high %v1678_v20, %v1686_v37  ;;  %v10654_v47 = vcombine.low %v1678_v20, %v1686_v37  ;;  %v12427_v20 = vld [vmem:[%s13539_s25 + $0xa0] sm:$0xff]   ;;  %v12428_v37 = vld [vmem:[%s13539_s25 + $0x58] sm:$0xff]  }
 0x6a4   : > { %v1627_v61 = vpop.xlane.xlu0 %1626 }
 0x6a5   : > { %v1631_v62 = vmul.f32 0.03125, %v1627_v61  ;;  %v1673_v61 = vld [vmem:[%s13902_s27 + $0x78] sm:$0xff] }
 0x6a7   : > { %v1633_v13 = vadd.f32 1e-05, %v1631_v62  ;;  %v10658_v62 = vcombine.low %v1680_v54, %v1688_v55  ;;  %v12443_v54 = vld [vmem:[%s13539_s25 + $0x80] sm:$0xff]   ;;  %v12444_v55 = vld [vmem:[%s13539_s25 + $0x178] sm:$0xff]  }
 0x6a8   : > { %v1630_v40 = vpop.xlane.xlu1 %1629 }
 0x6a9   : > { %12604 = vrsqrt.f32 %v1633_v13  ;;  %v1632_v24 = vmul.f32 0.03125, %v1630_v40  ;;  %v10660_v13 = vcombine.low %v1681_v60, %v1689_v52  ;;  %v12445_v60 = vld [vmem:[%s13539_s25 + $0x1f8] sm:$0xff]   ;;  %v520_v52 = vlaneseq }
 0x6ab   : > { %v1634_v33 = vadd.f32 1e-05, %v1632_v24  ;;  %v10645_v24 = vcombine.high %v1665_v43, %v1673_v61 }
 0x6ad   : > { %12606 = vrsqrt.f32 %v1634_v33 }
 0x6b6   : > { %v12605_v11 = vpop.eup %12604 }
 0x6b7   : > { %v1637_v12 = vmul.f32 %v12605_v11, %v1621_v45  ;;  %v10644_v11 = vcombine.low %v1665_v43, %v1673_v61 }
 0x6b9   : > { %v1645_v46 = vmul.f32 %v10624_v14, %v1637_v12  ;;  %v12412_v12 = vld [vmem:[%s13539_s25 + $0x78] sm:$0xff]  }
 0x6ba   : > { %v12607_v44 = vpop.eup %12606 }
 0x6bb   : > { %v1638_v39 = vmul.f32 %v12607_v44, %v1622_v31  ;;  %v13929_v25 = vadd.f32 %v10625_v53, %v1645_v46  ;;  %v1679_v31 = vld [vmem:[%s13902_s27 + $0xa8] sm:$0xff]  ;;  %v12414_v44 = vld [vmem:[%s13539_s25 + $0x38] sm:$0xff]  }
 0x6bc   : > { %v10657_v22 = vcombine.high %v1679_v31, %v1687_v35  ;;  %v10656_v41 = vcombine.low %v1679_v31, %v1687_v35  ;;  %v12415_v46 = vld [vmem:[%s13539_s25 + $0xb8] sm:$0xff]  }
 0x6bd   : > { %v1646_v23 = vmul.f32 %v10624_v14, %v1638_v39  ;;  %v12413_v14 = vld [vmem:[%s13539_s25 + $0xf8] sm:$0xff]   ;;  %v12416_v39 = vld [vmem:[%s13539_s25 + $0x70] sm:$0xff]  }
 0x6be   : > { %v12429_v31 = vld [vmem:[%s13539_s25 + $0xd8] sm:$0xff]  }
 0x6bf   : > { %v13931_v19 = vadd.f32 %v10625_v53, %v1646_v23  ;;  %v12417_v53 = vld [vmem:[%s13539_s25 + $0xf0] sm:$0xff]   ;;  %v12430_v35 = vld [vmem:[%s13539_s25 + $0x18] sm:$0xff]  }
 0x6c0   : > { %v12419_v23 = vld [vmem:[%s13539_s25 + $0xb0] sm:$0xff]  }
 0x6c1   : > { %v13935_v45 = vpack.c.bf16 %v13931_v19, %v13929_v25 }
 0x6c3   : > { %10662 = vmatmul.mubr.msk.bf16.vlgmr.msra.gmra.mxu0 %vm349_vm2, %v13935_v45  ;;  %10663 = vmatmul.mubr.msk.bf16.vlgmr.msra.gmra.mxu1 %vm349_vm2, %v13935_v45 }
 0x6c4   : > { %2299 = vmatpush1.bf16.msra.mxu0 %v10650_v63  ;;  %2342 = vmatpush1.bf16.msra.mxu1 %v10652_v29  ;;  %v1664_v63 = vld [vmem:[%s13902_s27 + $0x30] sm:$0xff] }
 0x6c5   : > { %2300 = vmatprep.subr.bf16.mxu0 %v10635_v16  ;;  %2343 = vmatprep.subr.bf16.mxu1 %v10637_v36  ;;  %v1672_v29 = vld [vmem:[%s13902_s27 + $0x70] sm:$0xff]  ;;  %v12425_v16 = vld [vmem:[%s13539_s25 + $0xe0] sm:$0xff]  }
 0x6c6   : > { %2318 = vmatprep.mubr.bf16.mxu0 %v13292_v15  ;;  %2361 = vmatprep.mubr.bf16.mxu1 %v13292_v15  ;;  %v10643_v40 = vcombine.high %v1664_v63, %v1672_v29  ;;  %v10642_v33 = vcombine.low %v1664_v63, %v1672_v29  ;;  %v12426_v36 = vld [vmem:[%s13539_s25 + $0x20] sm:$0xff]  }
 0x6c7   : > { %v14028_v29 = vld [vmem:[%s14013_s0] sm:$0xff] }
 0x6c8   : > { %2301 = vmatpush1.bf16.msra.mxu0 %v10634_v48  ;;  %2344 = vmatpush1.bf16.msra.mxu1 %v10636_v49  ;;  %v12431_v48 = vld [vmem:[%s13539_s25 + $0x98] sm:$0xff]   ;;  %v12432_v49 = vld [vmem:[%s13539_s25 + $0x50] sm:$0xff]  }
 0x6c9   : > { %2384 = vmatprep.subr.bf16.mxu0 %v10655_v56  ;;  %2427 = vmatprep.subr.bf16.mxu1 %v10657_v22  ;;  %v12433_v56 = vld [vmem:[%s13539_s25 + $0xd0] sm:$0xff]  }
 0x6ca   : > { %v12434_v22 = vld [vmem:[%s13539_s25 + $0x10] sm:$0xff]  }
 0x6cb   : > { %10664 = vmatmul.mubr.msk.bf16.vlgmr.msra.gmra.mxu0 %vm349_vm2, %v13935_v45  ;;  %10665 = vmatmul.mubr.msk.bf16.vlgmr.msra.gmra.mxu1 %vm349_vm2, %v13935_v45 }
 0x6cc   : > { %2385 = vmatpush1.bf16.msra.mxu0 %v10654_v47  ;;  %2428 = vmatpush1.bf16.msra.mxu1 %v10656_v41  ;;  %v12439_v47 = vld [vmem:[%s13539_s25 + $0x88] sm:$0xff]   ;;  %v12440_v41 = vld [vmem:[%s13539_s25 + $0x40] sm:$0xff]  }
 0x6cd   : > { %2386 = vmatprep.subr.bf16.mxu0 %v10639_v32  ;;  %2429 = vmatprep.subr.bf16.mxu1 %v10641_v17  ;;  %v12441_v32 = vld [vmem:[%s13539_s25 + $0xc0] sm:$0xff]  }
 0x6ce   : > { %2404 = vmatprep.mubr.bf16.mxu0 %v13292_v15  ;;  %2447 = vmatprep.mubr.bf16.mxu1 %v13292_v15  ;;  %v12442_v17 = vld [vmem:[%s13539_s25] sm:$0xff]  }
 0x6d0   : > { %2387 = vmatpush1.bf16.msra.mxu0 %v10638_v26  ;;  %2430 = vmatpush1.bf16.msra.mxu1 %v10640_v42  ;;  %v14010_v26 = vshrl.u32 %v520_v52, 7 }
 0x6d1   : > { %2470 = vmatprep.subr.bf16.mxu0 %v10659_v58  ;;  %2513 = vmatprep.subr.bf16.mxu1 %v10661_v59 }
 0x6d2   : > { %v14016_v42 = vsub.s32 1, %v14010_v26  ;;  %v14019_v58 = vsub.s32 3, %v14010_v26  ;;  %v14022_v59 = vsub.s32 0, %v14010_v26  ;;  %v14025_v63 = vsub.s32 2, %v14010_v26 }
 0x6d3   : > { %10666 = vmatmul.mubr.msk.bf16.vlgmr.msra.gmra.mxu0 %vm349_vm2, %v13935_v45  ;;  %10667 = vmatmul.mubr.msk.bf16.vlgmr.msra.gmra.mxu1 %vm349_vm2, %v13935_v45 }
 0x6d4   : > { %2471 = vmatpush1.bf16.msra.mxu0 %v10658_v62  ;;  %2514 = vmatpush1.bf16.msra.mxu1 %v10660_v13  ;;  %v1964_v62 = vrot.slane %v14028_v29, %v14016_v42  ;;  %v1972_v13 = vrot.slane %v14028_v29, %v14019_v58 }
 0x6d5   : > { %2472 = vmatprep.subr.bf16.mxu0 %v10643_v40  ;;  %2515 = vmatprep.subr.bf16.mxu1 %v10645_v24  ;;  %v1960_v40 = vrot.slane %v14028_v29, %v14022_v59  ;;  %v1968_v24 = vrot.slane %v14028_v29, %v14025_v63 }
 0x6d6   : > { %2490 = vmatprep.mubr.bf16.mxu0 %v13292_v15  ;;  %2533 = vmatprep.mubr.bf16.mxu1 %v13292_v15  ;;  %v12418_v15 = vld [vmem:[%s13539_s25 + $0x30] sm:$0xff]  }
 0x6d8   : > { %2473 = vmatpush1.bf16.msra.mxu0 %v10642_v33  ;;  %2516 = vmatpush1.bf16.msra.mxu1 %v10644_v11 }
 0x6d9   : > { %11482 = vmatprep.subr.bf16.mxu0 %v12412_v12  ;;  %11504 = vmatprep.subr.bf16.mxu1 %v12413_v14 }
 0x6db   : > { %10668 = vmatmul.mubr.msk.bf16.vlgmr.msra.gmra.mxu0 %vm349_vm2, %v13935_v45  ;;  %10669 = vmatmul.mubr.msk.bf16.vlgmr.msra.gmra.mxu1 %vm349_vm2, %v13935_v45  ;;  %v12424_v45 = vld [vmem:[%s13539_s25 + $0x60] sm:$0xff]  }
 0x6dc   : > { %11483 = vmatpush3.bf16.msra.mxu0 %v12414_v44  ;;  %11505 = vmatpush3.bf16.msra.mxu1 %v12415_v46  ;;  %v14039_v44 = vsub.s32 5, %v14010_v26  ;;  %v14042_v46 = vsub.s32 7, %v14010_v26 }
 0x6dd   : > { %11484 = vmatprep.subr.bf16.mxu0 %v12416_v39  ;;  %11506 = vmatprep.subr.bf16.mxu1 %v12417_v53 }
 0x6e0   : > { %11485 = vmatpush3.bf16.msra.mxu0 %v12418_v15  ;;  %11507 = vmatpush3.bf16.msra.mxu1 %v12419_v23 }
 0x6e1   : > { %11486 = vmatprep.subr.bf16.mxu0 %v12420_v21  ;;  %11508 = vmatprep.subr.bf16.mxu1 %v12421_v18 }
 0x6e4   : > { %11487 = vmatpush3.bf16.msra.mxu0 %v12422_v27  ;;  %11509 = vmatpush3.bf16.msra.mxu1 %v12423_v28 }
 0x6e5   : > { %11488 = vmatprep.subr.bf16.mxu0 %v12424_v45  ;;  %11510 = vmatprep.subr.bf16.mxu1 %v12425_v16 }
 0x6e8   : > { %11489 = vmatpush3.bf16.msra.mxu0 %v12426_v36  ;;  %11511 = vmatpush3.bf16.msra.mxu1 %v12427_v20 }
 0x6e9   : > { %11490 = vmatprep.subr.bf16.mxu0 %v12428_v37  ;;  %11512 = vmatprep.subr.bf16.mxu1 %v12429_v31 }
 0x6ec   : > { %11491 = vmatpush3.bf16.msra.mxu0 %v12430_v35  ;;  %11513 = vmatpush3.bf16.msra.mxu1 %v12431_v48  ;;  %v1980_v35 = vrot.slane %v14028_v29, %v14039_v44  ;;  %v1988_v48 = vrot.slane %v14028_v29, %v14042_v46 }
 0x6ed   : > { %11492 = vmatprep.subr.bf16.mxu0 %v12432_v49  ;;  %11514 = vmatprep.subr.bf16.mxu1 %v12433_v56 }
 0x6f0   : > { %11493 = vmatpush3.bf16.msra.mxu0 %v12434_v22  ;;  %11515 = vmatpush3.bf16.msra.mxu1 %v12435_v38 }
 0x6f1   : > { %11494 = vmatprep.subr.bf16.mxu0 %v12436_v50  ;;  %11516 = vmatprep.subr.bf16.mxu1 %v12437_v51 }
 0x6f4   : > { %11495 = vmatpush3.bf16.msra.mxu0 %v12438_v57  ;;  %11517 = vmatpush3.bf16.msra.mxu1 %v12439_v47 }
 0x6f5   : > { %11496 = vmatprep.subr.bf16.mxu0 %v12440_v41  ;;  %11518 = vmatprep.subr.bf16.mxu1 %v12441_v32 }
 0x6f8   : > { %11497 = vmatpush3.bf16.msra.mxu0 %v12442_v17  ;;  %11519 = vmatpush3.bf16.msra.mxu1 %v12443_v54  ;;  %v12446_v17 = vld [vmem:[%s13539_s25 + $0x138] sm:$0xff]  }
 0x6f9   : > { %11526 = vmatprep.subr.bf16.mxu0 %v12444_v55  ;;  %11548 = vmatprep.subr.bf16.mxu1 %v12445_v60  ;;  %v12447_v54 = vld [vmem:[%s13539_s25 + $0x1b8] sm:$0xff]  }
 0x783   : > { %v2234_v43 = vpop.f32.mrf.mxu0  ;;  %v2277_v61 = vpop.f32.mrf.mxu1 }
 0x784   : > { %v2235_v21 = vadd.f32 %v2234_v43, %v1960_v40  ;;  %v2278_v18 = vadd.f32 %v2277_v61, %v1968_v24  ;;  %v12448_v61 = vld [vmem:[%s13539_s25 + $0x170] sm:$0xff]  }
 0x785   : > { %v2236_v33 = vpop.f32.mrf.mxu0  ;;  %v2279_v11 = vpop.f32.mrf.mxu1 }
 0x786   : > { %v2237_v39 = vadd.f32 %v2236_v33, %v1964_v62  ;;  %v2280_v53 = vadd.f32 %v2279_v11, %v1972_v13  ;;  %v2544_v50 = vmax.f32 %v2235_v21, 0.0  ;;  %v2546_v51 = vmax.f32 %v2278_v18, 0.0 }
 0x787   : > { %v2238_v12 = vpop.f32.mrf.mxu0  ;;  %v2281_v14 = vpop.f32.mrf.mxu1 }
 0x788   : > { %v2239_v15 = vadd.f32 %v2238_v12, %v1960_v40  ;;  %v2282_v23 = vadd.f32 %v2281_v14, %v1968_v24  ;;  %v2545_v49 = vmax.f32 %v2237_v39, 0.0  ;;  %v2547_v56 = vmax.f32 %v2280_v53, 0.0  ;;  %v12450_v14 = vld [vmem:[%s13539_s25 + $0x130] sm:$0xff]   ;;  %v12452_v53 = vld [vmem:[%s13539_s25 + $0x168] sm:$0xff]  }
 0x789   : > { %v2240_v27 = vpop.f32.mrf.mxu0  ;;  %v2283_v28 = vpop.f32.mrf.mxu1  ;;  %v12451_v39 = vld [vmem:[%s13539_s25 + $0x1b0] sm:$0xff]  }
 0x78a   : > { %v2241_v45 = vadd.f32 %v2240_v27, %v1964_v62  ;;  %v2284_v16 = vadd.f32 %v2283_v28, %v1972_v13  ;;  %v2560_v36 = vmax.f32 %v2239_v15, 0.0  ;;  %v2562_v20 = vmax.f32 %v2282_v23, 0.0  ;;  %v12449_v62 = vld [vmem:[%s13539_s25 + $0x1f0] sm:$0xff]   ;;  %v12453_v27 = vld [vmem:[%s13539_s25 + $0x1e8] sm:$0xff]  }
 0x78b   : > { %v14044_v37 = vpop.f32.mrf.mxu0  ;;  %v14046_v31 = vpop.f32.mrf.mxu1 }
 0x78c   : > { %v2561_v22 = vmax.f32 %v2241_v45, 0.0  ;;  %v2563_v38 = vmax.f32 %v2284_v16, 0.0  ;;  %v2576_v55 = vpack.c.bf16 %v2560_v36, %v2544_v50  ;;  %v2578_v60 = vpack.c.bf16 %v2562_v20, %v2546_v51  ;;  %v12454_v16 = vld [vmem:[%s13539_s25 + $0x128] sm:$0xff]   ;;  %v12456_v20 = vld [vmem:[%s13539_s25 + $0x160] sm:$0xff]   ;;  %v12461_v50 = vld [vmem:[%s13539_s25 + $0x1d8] sm:$0xff]  }
 0x78d   : > { %v2322_v57 = vpop.f32.mrf.mxu0  ;;  %v2365_v47 = vpop.f32.mrf.mxu1  ;;  %v12455_v36 = vld [vmem:[%s13539_s25 + $0x1a8] sm:$0xff]  }
 0x78e   : > { %v2577_v41 = vpack.c.bf16 %v2561_v22, %v2545_v49  ;;  %v2579_v32 = vpack.c.bf16 %v2563_v38, %v2547_v56  ;;  %v2323_v13 = vadd.f32 %v2322_v57, %v1980_v35  ;;  %v2366_v40 = vadd.f32 %v2365_v47, %v1988_v48  ;;  %v12458_v49 = vld [vmem:[%s13539_s25 + $0x120] sm:$0xff]   ;;  %v12460_v38 = vld [vmem:[%s13539_s25 + $0x158] sm:$0xff]  }
 0x78f   : > { %v14054_v52 = vpop.f32.mrf.mxu0  ;;  %v14056_v43 = vpop.f32.mrf.mxu1  ;;  %v12459_v22 = vld [vmem:[%s13539_s25 + $0x1a0] sm:$0xff]   ;;  %v12462_v57 = vld [vmem:[%s13539_s25 + $0x118] sm:$0xff]  }
 0x790   : > { %3398 = vmatprep.mubr.bf16.mxu0 %v2577_v41  ;;  %3439 = vmatprep.mubr.bf16.mxu1 %v2579_v32  ;;  %v2549_v15 = vmax.f32 %v2323_v13, 0.0  ;;  %v2551_v23 = vmax.f32 %v2366_v40, 0.0  ;;  %v12463_v41 = vld [vmem:[%s13539_s25 + $0x198] sm:$0xff]   ;;  %v12464_v32 = vld [vmem:[%s13539_s25 + $0x150] sm:$0xff]   ;;  %v12468_v40 = vld [vmem:[%s13539_s25 + $0x148] sm:$0xff]  }
 0x791   : > { %v2326_v24 = vpop.f32.mrf.mxu0  ;;  %v2369_v33 = vpop.f32.mrf.mxu1  ;;  %3399 = vmatmul.mubr.bf16.vlgmr.msra.gmra.mxu0 %v2576_v55  ;;  %3440 = vmatmul.mubr.bf16.vlgmr.msra.gmra.mxu1 %v2578_v60  ;;  %v14084_v55 = vsub.s32 6, %v14010_v26  ;;  %v12467_v13 = vld [vmem:[%s13539_s25 + $0x190] sm:$0xff]  }
 0x792   : > { %v2327_v11 = vadd.f32 %v2326_v24, %v1980_v35  ;;  %v2370_v12 = vadd.f32 %v2369_v33, %v1988_v48  ;;  %11527 = vmatpush3.bf16.msra.mxu0 %v12446_v17  ;;  %11549 = vmatpush3.bf16.msra.mxu1 %v12447_v54  ;;  %v12457_v35 = vld [vmem:[%s13539_s25 + $0x1e0] sm:$0xff]   ;;  %v12465_v17 = vld [vmem:[%s13539_s25 + $0x1d0] sm:$0xff]   ;;  %v14081_v54 = vsub.s32 4, %v14010_v26  ;;  %v12469_v24 = vld [vmem:[%s13539_s25 + $0x1c8] sm:$0xff]  }
 0x793   : > { %11528 = vmatprep.subr.bf16.mxu0 %v12448_v61  ;;  %11550 = vmatprep.subr.bf16.mxu1 %v12449_v62  ;;  %v14068_v48 = vpop.f32.mrf.mxu0  ;;  %v14071_v56 = vpop.f32.mrf.mxu1  ;;  %v12466_v61 = vld [vmem:[%s13539_s25 + $0x110] sm:$0xff]   ;;  %v1984_v26 = vrot.slane %v14028_v29, %v14084_v55 }
 0x794   : > { %v2565_v21 = vmax.f32 %v2327_v11, 0.0  ;;  %v2567_v18 = vmax.f32 %v2370_v12, 0.0  ;;  %v1976_v33 = vrot.slane %v14028_v29, %v14081_v54  ;;  %v14099_v11 = vld [vmem:[%s14013_s0 + $0x8] sm:$0xff] }
 0x795   : > { %v2408_v51 = vpop.f32.mrf.mxu0  ;;  %v2451_v47 = vpop.f32.mrf.mxu1  ;;  %v2368_v29 = vadd.f32 %v14056_v43, %v1984_v26  ;;  %v12475_v43 = vld [vmem:[%s13539_s25 + $0x180] sm:$0xff]  }
 0x796   : > { %v2581_v28 = vpack.c.bf16 %v2565_v21, %v2549_v15  ;;  %v2583_v45 = vpack.c.bf16 %v2567_v18, %v2551_v23  ;;  %11529 = vmatpush3.bf16.msra.mxu0 %v12450_v14  ;;  %11551 = vmatpush3.bf16.msra.mxu1 %v12451_v39  ;;  %v12470_v14 = vld [vmem:[%s13539_s25 + $0x108] sm:$0xff]   ;;  %v2325_v39 = vadd.f32 %v14054_v52, %v1976_v33  ;;  %v12472_v21 = vld [vmem:[%s13539_s25 + $0x140] sm:$0xff]  }
 0x797   : > { %11530 = vmatprep.subr.bf16.mxu0 %v12452_v53  ;;  %11552 = vmatprep.subr.bf16.mxu1 %v12453_v27  ;;  %v14086_v60 = vpop.f32.mrf.mxu0  ;;  %v14089_v62 = vpop.f32.mrf.mxu1  ;;  %v1996_v53 = vrot.slane %v14099_v11, %v14016_v42  ;;  %v12471_v23 = vld [vmem:[%s13539_s25 + $0x188] sm:$0xff]   ;;  %v2004_v18 = vrot.slane %v14099_v11, %v14019_v58  ;;  %v12473_v27 = vld [vmem:[%s13539_s25 + $0x1c0] sm:$0xff]   ;;  %v2321_v52 = vadd.f32 %v14044_v37, %v1976_v33  ;;  %v12481_v33 = vld [vmem:[%s13539_s25 + $0x2f0] sm:$0xff]  }
 0x798   : > { %3480 = vmatprep.mubr.bf16.mxu0 %v2581_v28  ;;  %3521 = vmatprep.mubr.bf16.mxu1 %v2583_v45  ;;  %v2364_v45 = vadd.f32 %v14046_v31, %v1984_v26 }
 0x799   : > { %v2412_v12 = vpop.f32.mrf.mxu0  ;;  %v2455_v15 = vpop.f32.mrf.mxu1  ;;  %v2548_v37 = vmax.f32 %v2321_v52, 0.0 }
 0x79a   : > { %11531 = vmatpush3.bf16.msra.mxu0 %v12454_v16  ;;  %11553 = vmatpush3.bf16.msra.mxu1 %v12455_v36  ;;  %v2413_v28 = vadd.f32 %v2412_v12, %v1996_v53  ;;  %v2456_v16 = vadd.f32 %v2455_v15, %v2004_v18  ;;  %v12474_v36 = vld [vmem:[%s13539_s25 + $0x100] sm:$0xff]   ;;  %v2550_v31 = vmax.f32 %v2364_v45, 0.0  ;;  %v12482_v12 = vld [vmem:[%s13539_s25 + $0x230] sm:$0xff]   ;;  %v12486_v15 = vld [vmem:[%s13539_s25 + $0x228] sm:$0xff]  }
 0x79b   : > { %11532 = vmatprep.subr.bf16.mxu0 %v12456_v20  ;;  %11554 = vmatprep.subr.bf16.mxu1 %v12457_v35  ;;  %v2564_v20 = vmax.f32 %v2325_v39, 0.0  ;;  %v2409_v35 = vadd.f32 %v2408_v51, %v1996_v53  ;;  %v12484_v39 = vld [vmem:[%s13539_s25 + $0x268] sm:$0xff]   ;;  %v14132_v52 = vpop.f32.mrf.mxu1  ;;  %v12492_v45 = vld [vmem:[%s13539_s25 + $0x258] sm:$0xff]  }
 0x79c   : > { %v12485_v53 = vld [vmem:[%s13539_s25 + $0x2e8] sm:$0xff]  }
 0x79d   : > { %v2553_v51 = vmax.f32 %v2409_v35, 0.0  ;;  %v2537_v35 = vpop.f32.mrf.mxu1 }
 0x79e   : > { %11533 = vmatpush3.bf16.msra.mxu0 %v12458_v49  ;;  %11555 = vmatpush3.bf16.msra.mxu1 %v12459_v22  ;;  %v12476_v49 = vld [vmem:[%s13539_s25 + $0x278] sm:$0xff]   ;;  %v2566_v22 = vmax.f32 %v2368_v29, 0.0  ;;  %v12489_v29 = vld [vmem:[%s13539_s25 + $0x2e0] sm:$0xff]  }
 0x79f   : > { %11534 = vmatprep.subr.bf16.mxu0 %v12460_v38  ;;  %11556 = vmatprep.subr.bf16.mxu1 %v12461_v50  ;;  %v2452_v38 = vadd.f32 %v2451_v47, %v2004_v18  ;;  %v12477_v50 = vld [vmem:[%s13539_s25 + $0x2f8] sm:$0xff]   ;;  %v14129_v18 = vpop.f32.mrf.mxu0 }
 0x7a1   : > { %v2555_v47 = vmax.f32 %v2452_v38, 0.0 }
 0x7a2   : > { %11535 = vmatpush3.bf16.msra.mxu0 %v12462_v57  ;;  %11557 = vmatpush3.bf16.msra.mxu1 %v12463_v41  ;;  %v2569_v57 = vmax.f32 %v2413_v28, 0.0  ;;  %v2571_v41 = vmax.f32 %v2456_v16, 0.0  ;;  %v12491_v28 = vld [vmem:[%s13539_s25 + $0x2a0] sm:$0xff]   ;;  %v12493_v16 = vld [vmem:[%s13539_s25 + $0x2d8] sm:$0xff]  }
 0x7a3   : > { %11536 = vmatprep.subr.bf16.mxu0 %v12464_v32  ;;  %11558 = vmatprep.subr.bf16.mxu1 %v12465_v17  ;;  %v12478_v32 = vld [vmem:[%s13539_s25 + $0x238] sm:$0xff]   ;;  %v2580_v17 = vpack.c.bf16 %v2564_v20, %v2548_v37  ;;  %v14144_v37 = vpop.f32.mrf.mxu1 }
 0x7a4   : > { %v2587_v26 = vpack.c.bf16 %v2571_v41, %v2555_v47  ;;  %v12494_v20 = vld [vmem:[%s13539_s25 + $0x218] sm:$0xff]   ;;  %v12501_v41 = vld [vmem:[%s13539_s25 + $0x2c8] sm:$0xff]   ;;  %v2012_v47 = vrot.slane %v14099_v11, %v14039_v44 }
 0x7a6   : > { %11537 = vmatpush3.bf16.msra.mxu0 %v12466_v61  ;;  %11559 = vmatpush3.bf16.msra.mxu1 %v12467_v13  ;;  %v12479_v61 = vld [vmem:[%s13539_s25 + $0x2b8] sm:$0xff]   ;;  %v2582_v13 = vpack.c.bf16 %v2566_v22, %v2550_v31  ;;  %v12497_v22 = vld [vmem:[%s13539_s25 + $0x2d0] sm:$0xff]   ;;  %v12500_v31 = vld [vmem:[%s13539_s25 + $0x248] sm:$0xff]  }
 0x7a7   : > { %11538 = vmatprep.subr.bf16.mxu0 %v12468_v40  ;;  %11560 = vmatprep.subr.bf16.mxu1 %v12469_v24  ;;  %v12480_v40 = vld [vmem:[%s13539_s25 + $0x270] sm:$0xff]   ;;  %v2585_v24 = vpack.c.bf16 %v2569_v57, %v2553_v51 }
 0x7a8   : > { %v12499_v57 = vld [vmem:[%s13539_s25 + $0x290] sm:$0xff]  }
 0x7aa   : > { %11539 = vmatpush3.bf16.msra.mxu0 %v12470_v14  ;;  %11561 = vmatpush3.bf16.msra.mxu1 %v12471_v23  ;;  %v12483_v14 = vld [vmem:[%s13539_s25 + $0x2b0] sm:$0xff]   ;;  %v12487_v23 = vld [vmem:[%s13539_s25 + $0x2a8] sm:$0xff]  }
 0x7ab   : > { %11540 = vmatprep.subr.bf16.mxu0 %v12472_v21  ;;  %11562 = vmatprep.subr.bf16.mxu1 %v12473_v27  ;;  %v12488_v21 = vld [vmem:[%s13539_s25 + $0x260] sm:$0xff]  }
 0x7ac   : > { %v12490_v27 = vld [vmem:[%s13539_s25 + $0x220] sm:$0xff]  }
 0x7ae   : > { %11541 = vmatpush3.bf16.msra.mxu0 %v12474_v36  ;;  %11563 = vmatpush3.bf16.msra.mxu1 %v12475_v43  ;;  %v2494_v36 = vpop.f32.mrf.mxu0  ;;  %v12495_v43 = vld [vmem:[%s13539_s25 + $0x298] sm:$0xff]  }
 0x7af   : > { %11570 = vmatprep.subr.bf16.mxu0 %v12476_v49  ;;  %11592 = vmatprep.subr.bf16.mxu1 %v12477_v50  ;;  %v12496_v49 = vld [vmem:[%s13539_s25 + $0x250] sm:$0xff]  }
 0x7b0   : > { %v14141_v38 = vpop.f32.mrf.mxu0  ;;  %v12498_v50 = vld [vmem:[%s13539_s25 + $0x210] sm:$0xff]  }
 0x7b1   : > { %3481 = vmatmul.mubr.bf16.vlgmr.msra.gmra.mxu0 %v2580_v17  ;;  %3522 = vmatmul.mubr.bf16.vlgmr.msra.gmra.mxu1 %v2582_v13  ;;  %v2000_v17 = vrot.slane %v14099_v11, %v14025_v63 }
 0x7b2   : > { %11571 = vmatpush3.bf16.msra.mxu0 %v12478_v32  ;;  %3562 = vmatprep.mubr.bf16.mxu0 %v2585_v24  ;;  %v1992_v32 = vrot.slane %v14099_v11, %v14022_v59  ;;  %v2498_v51 = vpop.f32.mrf.mxu0  ;;  %v12503_v24 = vld [vmem:[%s13539_s25 + $0x288] sm:$0xff]  }
 0x7b3   : > { %11593 = vmatpush3.bf16.msra.mxu1 %v12479_v61  ;;  %3603 = vmatprep.mubr.bf16.mxu1 %v2587_v26  ;;  %v12502_v61 = vld [vmem:[%s13539_s25 + $0x208] sm:$0xff]   ;;  %v2454_v26 = vadd.f32 %v14089_v62, %v2000_v17  ;;  %v12507_v62 = vld [vmem:[%s13539_s25 + $0x280] sm:$0xff]  }
 0x7b4   : > { %11572 = vmatprep.subr.bf16.mxu0 %v12480_v40  ;;  %11594 = vmatprep.subr.bf16.mxu1 %v12481_v33  ;;  %v2411_v13 = vadd.f32 %v14086_v60, %v1992_v32  ;;  %v2541_v40 = vpop.f32.mrf.mxu1  ;;  %v12504_v33 = vld [vmem:[%s13539_s25 + $0x240] sm:$0xff]   ;;  %v2407_v60 = vadd.f32 %v14068_v48, %v1992_v32  ;;  %v12513_v32 = vld [vmem:[%s13539_s25 + $0x3f0] sm:$0xff]  }
 0x7b6   : > { %11573 = vmatpush3.bf16.msra.mxu0 %v12482_v12  ;;  %v2020_v12 = vrot.slane %v14099_v11, %v14042_v46  ;;  %v2552_v48 = vmax.f32 %v2407_v60, 0.0  ;;  %v12524_v60 = vld [vmem:[%s13539_s25 + $0x358] sm:$0xff]  }
 0x7b7   : > { %11595 = vmatpush3.bf16.msra.mxu1 %v12483_v14  ;;  %11574 = vmatprep.subr.bf16.mxu0 %v12484_v39  ;;  %v12505_v14 = vld [vmem:[%s13539_s25 + $0x2c0] sm:$0xff]   ;;  %v2499_v39 = vadd.f32 %v2498_v51, %v2012_v47  ;;  %v12514_v51 = vld [vmem:[%s13539_s25 + $0x330] sm:$0xff]  }
 0x7b8   : > { %11596 = vmatprep.subr.bf16.mxu1 %v12485_v53  ;;  %v2450_v53 = vadd.f32 %v14071_v56, %v2000_v17 }
 0x7ba   : > { %11575 = vmatpush3.bf16.msra.mxu0 %v12486_v15  ;;  %v2542_v15 = vadd.f32 %v2541_v40, %v2020_v12  ;;  %v2554_v56 = vmax.f32 %v2450_v53, 0.0  ;;  %v12518_v40 = vld [vmem:[%s13539_s25 + $0x328] sm:$0xff]   ;;  %v12526_v53 = vld [vmem:[%s13539_s25 + $0x318] sm:$0xff]  }
 0x7bb   : > { %11597 = vmatpush3.bf16.msra.mxu1 %v12487_v23  ;;  %11576 = vmatprep.subr.bf16.mxu0 %v12488_v21  ;;  %v12506_v23 = vld [vmem:[%s13539_s25 + $0x200] sm:$0xff]   ;;  %v2568_v21 = vmax.f32 %v2411_v13, 0.0  ;;  %v12516_v13 = vld [vmem:[%s13539_s25 + $0x368] sm:$0xff]  }
 0x7bc   : > { %11598 = vmatprep.subr.bf16.mxu1 %v12489_v29  ;;  %v2495_v29 = vadd.f32 %v2494_v36, %v2012_v47  ;;  %v12517_v47 = vld [vmem:[%s13539_s25 + $0x3e8] sm:$0xff]  }
 0x7be   : > { %11577 = vmatpush3.bf16.msra.mxu0 %v12490_v27  ;;  %v12508_v27 = vld [vmem:[%s13539_s25 + $0x378] sm:$0xff]   ;;  %v2557_v36 = vmax.f32 %v2495_v29, 0.0  ;;  %v12530_v29 = vld [vmem:[%s13539_s25 + $0x310] sm:$0xff]  }
 0x7bf   : > { %11599 = vmatpush3.bf16.msra.mxu1 %v12491_v28  ;;  %11578 = vmatprep.subr.bf16.mxu0 %v12492_v45  ;;  %v2570_v28 = vmax.f32 %v2454_v26, 0.0  ;;  %v2538_v45 = vadd.f32 %v2537_v35, %v2020_v12  ;;  %v12521_v26 = vld [vmem:[%s13539_s25 + $0x3e0] sm:$0xff]  }
 0x7c0   : > { %11600 = vmatprep.subr.bf16.mxu1 %v12493_v16  ;;  %v12509_v16 = vld [vmem:[%s13539_s25 + $0x3f8] sm:$0xff]   ;;  %v12522_v12 = vld [vmem:[%s13539_s25 + $0x320] sm:$0xff]  }
 0x7c1   : > { %v2559_v35 = vmax.f32 %v2538_v45, 0.0  ;;  %v2008_v45 = vrot.slane %v14099_v11, %v14081_v54 }
 0x7c2   : > { %11579 = vmatpush3.bf16.msra.mxu0 %v12494_v20  ;;  %v2573_v20 = vmax.f32 %v2499_v39, 0.0  ;;  %v12525_v39 = vld [vmem:[%s13539_s25 + $0x3d8] sm:$0xff]  }
 0x7c3   : > { %11601 = vmatpush3.bf16.msra.mxu1 %v12495_v43  ;;  %11580 = vmatprep.subr.bf16.mxu0 %v12496_v49  ;;  %v2575_v43 = vmax.f32 %v2542_v15, 0.0  ;;  %v12510_v49 = vld [vmem:[%s13539_s25 + $0x338] sm:$0xff]  }
 0x7c4   : > { %11602 = vmatprep.subr.bf16.mxu1 %v12497_v22  ;;  %v2584_v22 = vpack.c.bf16 %v2568_v21, %v2552_v48  ;;  %v12527_v15 = vld [vmem:[%s13539_s25 + $0x398] sm:$0xff]   ;;  %v12529_v21 = vld [vmem:[%s13539_s25 + $0x3d0] sm:$0xff]   ;;  %v12534_v48 = vld [vmem:[%s13539_s25 + $0x308] sm:$0xff]  }
 0x7c5   : > { %v2591_v17 = vpack.c.bf16 %v2575_v43, %v2559_v35  ;;  %v12536_v43 = vld [vmem:[%s13539_s25 + $0x340] sm:$0xff]  }
 0x7c6   : > { %11581 = vmatpush3.bf16.msra.mxu0 %v12498_v50  ;;  %v12511_v50 = vld [vmem:[%s13539_s25 + $0x3b8] sm:$0xff]   ;;  %v12539_v35 = vld [vmem:[%s13539_s25 + $0x380] sm:$0xff]  }
 0x7c7   : > { %11603 = vmatpush3.bf16.msra.mxu1 %v12499_v57  ;;  %11582 = vmatprep.subr.bf16.mxu0 %v12500_v31  ;;  %v2586_v57 = vpack.c.bf16 %v2570_v28, %v2554_v56  ;;  %v12512_v31 = vld [vmem:[%s13539_s25 + $0x370] sm:$0xff]   ;;  %v12533_v28 = vld [vmem:[%s13539_s25 + $0x3c8] sm:$0xff]  }
 0x7c8   : > { %11604 = vmatprep.subr.bf16.mxu1 %v12501_v41  ;;  %v2589_v41 = vpack.c.bf16 %v2573_v20, %v2557_v36  ;;  %v2497_v20 = vadd.f32 %v14141_v38, %v2008_v45  ;;  %v12535_v56 = vld [vmem:[%s13539_s25 + $0x388] sm:$0xff]   ;;  %v2493_v36 = vadd.f32 %v14129_v18, %v2008_v45 }
 0x7ca   : > { %11583 = vmatpush3.bf16.msra.mxu0 %v12502_v61  ;;  %v12515_v61 = vld [vmem:[%s13539_s25 + $0x3b0] sm:$0xff]   ;;  %v2556_v38 = vmax.f32 %v2493_v36, 0.0 }
 0x7cb   : > { %11605 = vmatpush3.bf16.msra.mxu1 %v12503_v24  ;;  %11584 = vmatprep.subr.bf16.mxu0 %v12504_v33  ;;  %v12519_v24 = vld [vmem:[%s13539_s25 + $0x3a8] sm:$0xff]   ;;  %v12520_v33 = vld [vmem:[%s13539_s25 + $0x360] sm:$0xff]  }
 0x7cc   : > { %11606 = vmatprep.subr.bf16.mxu1 %v12505_v14  ;;  %v12523_v14 = vld [vmem:[%s13539_s25 + $0x3a0] sm:$0xff]  }
 0x7ce   : > { %11585 = vmatpush3.bf16.msra.mxu0 %v12506_v23  ;;  %v12528_v23 = vld [vmem:[%s13539_s25 + $0x350] sm:$0xff]  }
 0x7cf   : > { %11607 = vmatpush3.bf16.msra.mxu1 %v12507_v62  ;;  %11614 = vmatprep.subr.bf16.mxu0 %v12508_v27  ;;  %v12531_v62 = vld [vmem:[%s13539_s25 + $0x390] sm:$0xff]   ;;  %v12532_v27 = vld [vmem:[%s13539_s25 + $0x348] sm:$0xff]  }
 0x7d0   : > { %11636 = vmatprep.subr.bf16.mxu1 %v12509_v16  ;;  %v2016_v16 = vrot.slane %v14099_v11, %v14084_v55  ;;  %v2572_v11 = vmax.f32 %v2497_v20, 0.0 }
 0x7d1   : > { %3563 = vmatmul.mubr.bf16.vlgmr.msra.gmra.mxu0 %v2584_v22  ;;  %v12537_v22 = vld [vmem:[%s13539_s25 + $0x3c0] sm:$0xff]  }
 0x7d2   : > { %3604 = vmatmul.mubr.bf16.vlgmr.msra.gmra.mxu1 %v2586_v57  ;;  %11615 = vmatpush3.bf16.msra.mxu0 %v12510_v49  ;;  %v2540_v49 = vadd.f32 %v14144_v37, %v2016_v16  ;;  %v12538_v57 = vld [vmem:[%s13539_s25 + $0x300] sm:$0xff]  }
 0x7d3   : > { %3644 = vmatprep.mubr.bf16.mxu0 %v2589_v41  ;;  %11637 = vmatpush3.bf16.msra.mxu1 %v12511_v50  ;;  %v2536_v50 = vadd.f32 %v14132_v52, %v2016_v16 }
 0x7d4   : > { %3685 = vmatprep.mubr.bf16.mxu1 %v2591_v17  ;;  %11616 = vmatprep.subr.bf16.mxu0 %v12512_v31  ;;  %v2574_v31 = vmax.f32 %v2540_v49, 0.0 }
 0x7d5   : > { %11638 = vmatprep.subr.bf16.mxu1 %v12513_v32  ;;  %v2558_v41 = vmax.f32 %v2536_v50, 0.0  ;;  %v2588_v32 = vpack.c.bf16 %v2572_v11, %v2556_v38 }
 0x7d6   : > { %11617 = vmatpush3.bf16.msra.mxu0 %v12514_v51 }
 0x7d7   : > { %11639 = vmatpush3.bf16.msra.mxu1 %v12515_v61  ;;  %11618 = vmatprep.subr.bf16.mxu0 %v12516_v13  ;;  %v2590_v37 = vpack.c.bf16 %v2574_v31, %v2558_v41 }
 0x7d8   : > { %11640 = vmatprep.subr.bf16.mxu1 %v12517_v47 }
 0x7da   : > { %11619 = vmatpush3.bf16.msra.mxu0 %v12518_v40 }
 0x7db   : > { %11641 = vmatpush3.bf16.msra.mxu1 %v12519_v24  ;;  %11620 = vmatprep.subr.bf16.mxu0 %v12520_v33 }
 0x7dc   : > { %11642 = vmatprep.subr.bf16.mxu1 %v12521_v26 }
 0x7de   : > { %11621 = vmatpush3.bf16.msra.mxu0 %v12522_v12 }
 0x7df   : > { %11643 = vmatpush3.bf16.msra.mxu1 %v12523_v14  ;;  %11622 = vmatprep.subr.bf16.mxu0 %v12524_v60 }
 0x7e0   : > { %11644 = vmatprep.subr.bf16.mxu1 %v12525_v39 }
 0x7e2   : > { %11623 = vmatpush3.bf16.msra.mxu0 %v12526_v53 }
 0x7e3   : > { %11645 = vmatpush3.bf16.msra.mxu1 %v12527_v15  ;;  %11624 = vmatprep.subr.bf16.mxu0 %v12528_v23  ;;  %v10670_v15 = vld [vmem:[%s1952_s29] ss:$0 sm:$0xff] }
 0x7e4   : > { %11646 = vmatprep.subr.bf16.mxu1 %v12529_v21 }
 0x7e6   : > { %11625 = vmatpush3.bf16.msra.mxu0 %v12530_v29 }
 0x7e7   : > { %11647 = vmatpush3.bf16.msra.mxu1 %v12531_v62  ;;  %11626 = vmatprep.subr.bf16.mxu0 %v12532_v27 }
 0x7e8   : > { %11648 = vmatprep.subr.bf16.mxu1 %v12533_v28 }
 0x7ea   : > { %11627 = vmatpush3.bf16.msra.mxu0 %v12534_v48 }
 0x7eb   : > { %11649 = vmatpush3.bf16.msra.mxu1 %v12535_v56  ;;  %11628 = vmatprep.subr.bf16.mxu0 %v12536_v43 }
 0x7ec   : > { %11650 = vmatprep.subr.bf16.mxu1 %v12537_v22 }
 0x7ee   : > { %11629 = vmatpush3.bf16.msra.mxu0 %v12538_v57 }
 0x7ef   : > { %11651 = vmatpush3.bf16.msra.mxu1 %v12539_v35 }
 0x7f1   : > { %3645 = vmatmul.mubr.bf16.vlgmr.msra.gmra.mxu0 %v2588_v32 }
 0x7f2   : > { %3686 = vmatmul.mubr.bf16.vlgmr.msra.gmra.mxu1 %v2590_v37 }
 0x851   : > { %v11498_v18 = vpop.f32.mrf.mxu0  ;;  %v11520_v52 = vpop.f32.mrf.mxu1 }
 0x853   : > { %v11499_v17 = vpop.f32.mrf.mxu0  ;;  %v11521_v51 = vpop.f32.mrf.mxu1 }
 0x854   : > { %v11500_v53 = vadd.f32 %v11499_v17, %v11498_v18  ;;  %v11522_v45 = vadd.f32 %v11521_v51, %v11520_v52 }
 0x855   : > { %v11501_v61 = vpop.f32.mrf.mxu0  ;;  %v11523_v13 = vpop.f32.mrf.mxu1 }
 0x856   : > { %v3401_v29 = vadd.f32 %v11500_v53, %v10670_v15 }
 0x857   : > { %v11502_v47 = vpop.f32.mrf.mxu0  ;;  %v11524_v24 = vpop.f32.mrf.mxu1 }
 0x858   : > { %v11503_v62 = vadd.f32 %v11502_v47, %v11501_v61  ;;  %v3442_v48 = vadd.f32 %v11522_v45, %v3401_v29  ;;  %v11525_v49 = vadd.f32 %v11524_v24, %v11523_v13 }
 0x85a   : > { %v3404_v20 = vadd.f32 %v11503_v62, %v10670_v15 }
 0x85c   : > { %v3445_v50 = vadd.f32 %v11525_v49, %v3404_v20 }
 0x871   : > { %v11542_v40 = vpop.f32.mrf.mxu0  ;;  %v11564_v33 = vpop.f32.mrf.mxu1 }
 0x873   : > { %v11543_v26 = vpop.f32.mrf.mxu0  ;;  %v11565_v12 = vpop.f32.mrf.mxu1 }
 0x874   : > { %v11544_v16 = vadd.f32 %v11543_v26, %v11542_v40  ;;  %v11566_v57 = vadd.f32 %v11565_v12, %v11564_v33 }
 0x875   : > { %v11545_v14 = vpop.f32.mrf.mxu0  ;;  %v11567_v60 = vpop.f32.mrf.mxu1 }
 0x876   : > { %v3483_v22 = vadd.f32 %v11544_v16, %v3442_v48 }
 0x877   : > { %v11546_v39 = vpop.f32.mrf.mxu0  ;;  %v11568_v21 = vpop.f32.mrf.mxu1 }
 0x878   : > { %v11547_v36 = vadd.f32 %v11546_v39, %v11545_v14  ;;  %v3524_v38 = vadd.f32 %v11566_v57, %v3483_v22  ;;  %v11569_v32 = vadd.f32 %v11568_v21, %v11567_v60 }
 0x87a   : > { %v3486_v41 = vadd.f32 %v11547_v36, %v3445_v50 }
 0x87c   : > { %v3527_v51 = vadd.f32 %v11569_v32, %v3486_v41 }
 0x891   : > { %v11586_v23 = vpop.f32.mrf.mxu0 }
 0x892   : > { %v11608_v27 = vpop.f32.mrf.mxu1 }
 0x893   : > { %v11587_v28 = vpop.f32.mrf.mxu0 }
 0x894   : > { %v11609_v56 = vpop.f32.mrf.mxu1  ;;  %v11588_v11 = vadd.f32 %v11587_v28, %v11586_v23 }
 0x895   : > { %v11589_v43 = vpop.f32.mrf.mxu0  ;;  %v11610_v61 = vadd.f32 %v11609_v56, %v11608_v27 }
 0x896   : > { %v11611_v35 = vpop.f32.mrf.mxu1  ;;  %v3565_v37 = vadd.f32 %v11588_v11, %v3524_v38 }
 0x897   : > { %v11590_v31 = vpop.f32.mrf.mxu0 }
 0x898   : > { %v11591_v18 = vadd.f32 %v11590_v31, %v11589_v43  ;;  %v11612_v17 = vpop.f32.mrf.mxu1  ;;  %v3606_v26 = vadd.f32 %v11610_v61, %v3565_v37  ;;  %v10800_v61 = vld [vmem:[%s13921_s5 + $0x3] ss:$0 sm:$0xff] }
 0x899   : > { %v11613_v33 = vadd.f32 %v11612_v17, %v11611_v35 }
 0x89a   : > { %v3568_v13 = vadd.f32 %v11591_v18, %v3527_v51 }
 0x89c   : > { %v3609_v29 = vadd.f32 %v11613_v33, %v3568_v13 }
 0x8b1   : > { %v11630_v52 = vpop.f32.mrf.mxu0 }
 0x8b2   : > { %v11652_v47 = vpop.f32.mrf.mxu1 }
 0x8b3   : > { %v11631_v40 = vpop.f32.mrf.mxu0 }
 0x8b4   : > { %v11632_v24 = vadd.f32 %v11631_v40, %v11630_v52  ;;  %v11653_v14 = vpop.f32.mrf.mxu1  ;;  %v10799_v52 = vld [vmem:[%s13921_s5 + $0x2] ss:$0 sm:$0xff] }
 0x8b5   : > { %v11633_v39 = vpop.f32.mrf.mxu0  ;;  %v11654_v53 = vadd.f32 %v11653_v14, %v11652_v47 }
 0x8b6   : > { %v3647_v12 = vadd.f32 %v11632_v24, %v3606_v26  ;;  %v11655_v15 = vpop.f32.mrf.mxu1 }
 0x8b7   : > { %v11634_v23 = vpop.f32.mrf.mxu0 }
 0x8b8   : > { %v3688_v60 = vadd.f32 %v11654_v53, %v3647_v12  ;;  %v11635_v21 = vadd.f32 %v11634_v23, %v11633_v39  ;;  %v11656_v62 = vpop.f32.mrf.mxu1 }
 0x8b9   : > { %v11657_v45 = vadd.f32 %v11656_v62, %v11655_v15 }
 0x8ba   : > { %v3650_v28 = vadd.f32 %v11635_v21, %v3609_v29  ;;  %v3694_v27 = vadd.f32 %v3688_v60, %v13929_v25 }
 0x8bc   : > { %v3691_v16 = vadd.f32 %v11657_v45, %v3650_v28  ;;  %v3696_v48 = vsel %vm349_vm2, %v3694_v27, 0.0 }
 0x8bd   : > { %3697 = vadd.xlane.f32.xlu0 %v3696_v48 }
 0x8be   : > { %v3695_v20 = vadd.f32 %v3691_v16, %v13931_v19 }
 0x8c0   : > { %v3699_v56 = vsel %vm349_vm2, %v3695_v20, 0.0 }
 0x8c1   : > { %3700 = vadd.xlane.f32.xlu1 %v3699_v56 }
 0x946   : > { %v3698_v43 = vpop.xlane.xlu0 %3697 }
 0x947   : > { %v3702_v49 = vmul.f32 0.03125, %v3698_v43 }
 0x949   : > { %v3704_v22 = vsub.f32 %v3694_v27, %v3702_v49 }
 0x94a   : > { %v3701_v36 = vpop.xlane.xlu1 %3700 }
 0x94b   : > { %v3703_v50 = vmul.f32 0.03125, %v3701_v36  ;;  %v3706_v57 = vmul.f32 %v3704_v22, %v3704_v22  ;;  %v10802_v36 = vld [vmem:[%s13372_s20] ss:$0 sm:$0xff] (%p294_p0) }
 0x94d   : > { %v3705_v11 = vsub.f32 %v3695_v20, %v3703_v50  ;;  %v3708_v35 = vsel %vm349_vm2, %v3706_v57, 0.0 }
 0x94e   : > { %3709 = vadd.xlane.f32.xlu0 %v3708_v35 }
 0x94f   : > { %v3707_v25 = vmul.f32 %v3705_v11, %v3705_v11 }
 0x951   : > { %v3711_v31 = vsel %vm349_vm2, %v3707_v25, 0.0 }
 0x952   : > { %3712 = vadd.xlane.f32.xlu1 %v3711_v31 }
 0x9d7   : > { %v3710_v19 = vpop.xlane.xlu0 %3709 }
 0x9d8   : > { %v3714_v38 = vmul.f32 0.03125, %v3710_v19 }
 0x9da   : > { %v3716_v41 = vadd.f32 1e-05, %v3714_v38 }
 0x9db   : > { %v3713_v32 = vpop.xlane.xlu1 %3712 }
 0x9dc   : > { %12608 = vrsqrt.f32 %v3716_v41  ;;  %v3715_v37 = vmul.f32 0.03125, %v3713_v32 }
 0x9de   : > { %v3717_v18 = vadd.f32 1e-05, %v3715_v37 }
 0x9e0   : > { %12610 = vrsqrt.f32 %v3717_v18 }
 0x9e9   : > { %v12609_v17 = vpop.eup %12608 }
 0x9ea   : > { %v3720_v51 = vmul.f32 %v12609_v17, %v3704_v22 }
 0x9ec   : > { %v3728_v47 = vmul.f32 %v10799_v52, %v3720_v51 }
 0x9ed   : > { %v12611_v40 = vpop.eup %12610 }
 0x9ee   : > { %v3736_v26 = vadd.f32 %v10800_v61, %v3728_v47   ;;  %v3721_v13 = vmul.f32 %v12611_v40, %v3705_v11 }
 0x9f0   : > { %v3729_v24 = vmul.f32 %v10799_v52, %v3721_v13  ;;  %v15605_v31 = vmov %v3736_v26  ;;  %296 = sbr.rel (!%p294_p0) target bundleno = 256 (0x100), region = 219  ;;  %v3742_v39 = vsel (%p294_p0), %vm349_vm2, %v3736_v26, 0.0 }
 0x9f1   :  { %3743 = vadd.xlane.f32.xlu0 (%p294_p0), %v3742_v39 }
 0x9f2   : > { %v3737_v14 = vadd.f32 %v10800_v61, %v3729_v24  }
 0x9f4   : > { %v15604_v35 = vmov %v3737_v14  ;;  %v3745_v33 = vsel (%p294_p0), %vm349_vm2, %v3737_v14, 0.0 }
 0x9f5   :  { %3746 = vadd.xlane.f32.xlu0 %v3745_v33  ;;  %v10803_v35 = vld [vmem:[%s13372_s20 + $0x1] ss:$0 sm:$0xff] }
 0xa7a   :  { %v3744_v12 = vpop.xlane.xlu0 %3743 }
 0xa7b   :  { %v3749_v53 = vmul.f32 0.03125, %v3744_v12 }
 0xa7d   :  { %v3751_v15 = vsub.f32 %v3736_v26, %v3749_v53 }
 0xa7e   :  { %v3747_v23 = vpop.xlane.xlu0 %3746 }
 0xa7f   :  { %v3750_v29 = vmul.f32 0.03125, %v3747_v23  ;;  %v3753_v60 = vmul.f32 %v3751_v15, %v3751_v15 }
 0xa81   :  { %v3752_v21 = vsub.f32 %v3737_v14, %v3750_v29  ;;  %v3755_v62 = vsel %vm349_vm2, %v3753_v60, 0.0 }
 0xa82   :  { %3756 = vadd.xlane.f32.xlu1 %v3755_v62 }
 0xa83   :  { %v3754_v28 = vmul.f32 %v3752_v21, %v3752_v21 }
 0xa85   :  { %v3758_v45 = vsel %vm349_vm2, %v3754_v28, 0.0 }
 0xa86   :  { %3759 = vadd.xlane.f32.xlu1 %v3758_v45 }
 0xb0b   :  { %v3757_v27 = vpop.xlane.xlu1 %3756 }
 0xb0c   :  { %v3761_v16 = vmul.f32 0.03125, %v3757_v27 }
 0xb0e   :  { %v3763_v48 = vadd.f32 1e-05, %v3761_v16 }
 0xb0f   :  { %v3760_v20 = vpop.xlane.xlu1 %3759 }
 0xb10   :  { %12612 = vrsqrt.f32 %v3763_v48  ;;  %v3762_v56 = vmul.f32 0.03125, %v3760_v20 }
 0xb12   :  { %v3764_v43 = vadd.f32 1e-05, %v3762_v56 }
 0xb14   :  { %12614 = vrsqrt.f32 %v3764_v43 }
 0xb1d   :  { %v12613_v49 = vpop.eup %12612 }
 0xb1e   :  { %v3767_v22 = vmul.f32 %v12613_v49, %v3751_v15 }
 0xb20   :  { %v3775_v57 = vmul.f32 %v10802_v36, %v3767_v22 }
 0xb21   :  { %v12615_v50 = vpop.eup %12614 }
 0xb22   :  { %v3768_v11 = vmul.f32 %v12615_v50, %v3752_v21  ;;  %v3783_v31 = vadd.f32 %v10803_v35, %v3775_v57 }
 0xb24   :  { %v3776_v25 = vmul.f32 %v10802_v36, %v3768_v11 }
 0xb26   :  { %v3784_v19 = vadd.f32 %v10803_v35, %v3776_v25 }
 0xb28   :  { %v14230_v38 = vpack.c.bf16 %v3784_v19, %v3783_v31 }
 0xb29 LB: > { %v15595_v41 = vmov 0.0   ;;  %s11426_s22 = sshll.u32 %s13256_s18, 6  ;;  %vm13294_vm4 = vmmov 0   ;;  %s11429_s30 = sshll.u32 %s13256_s18, 10  ;;  %v3850_v52 = vpack.c.bf16 %v13248_v34, %v13252_v30  ;;  %s13256_s18 = sphi %s14238_s18, %s3791_s18   ;;  %v13252_v30 = vphi %v13498_v30, %v15621_v30   ;;  %v13248_v34 = vphi %v13501_v34, %v15620_v34  }
 0xb2a   : > { %12058 = vmatprep.subr.bf16.mxu1 %v15595_v41  ;;  %12050 = vmatprep.subr.bf16.mxu0 %v15595_v41  ;;  %s14257_s26 = scalar_lea.vmem %s13377_s24, %s11426_s22  ;;  %s14269_s4 = scalar_lea.vmem %s13389_s3, %s11426_s22 }
 0xb2b   : > { %12062 = vmatprep.mubr.msk.bf16.mxu1 %vm13294_vm4, %v15595_v41  ;;  %12054 = vmatprep.mubr.msk.bf16.mxu0 %vm13294_vm4, %v15595_v41  ;;  %v12616_v32 = vld [vmem:[%s14257_s26 + $0x18] sm:$0xff]   ;;  %v12617_v37 = vld [vmem:[%s14257_s26 + $0x8] sm:$0xff]   ;;  %v12618_v18 = vld [vmem:[%s14257_s26 + $0x10] sm:$0xff]   ;;  %s14278_s9 = scalar_lea.vmem %s13416_s7, %s11429_s30  ;;  %s10806_s15 = sshll.u32 %s13256_s18, 2 }
 0xb2c   : > { %12059 = vmatpush3.bf16.msra.mxu1 %v12616_v32  ;;  %12051 = vmatpush3.bf16.msra.mxu0 %v12617_v37  ;;  %v12619_v17 = vld [vmem:[%s14257_s26] sm:$0xff]   ;;  %v12620_v51 = vld [vmem:[%s14257_s26 + $0x28] sm:$0xff]   ;;  %s14293_s20 = scalar_lea.vmem %s13383_s28, %s10806_s15  ;;  %s3842_s14 = smul.u32 6, %s13256_s18 }
 0xb2d   : > { %12060 = vmatprep.subr.bf16.mxu1 %v15595_v41  ;;  %12052 = vmatprep.subr.bf16.mxu0 %v15595_v41  ;;  %v12621_v61 = vld [vmem:[%s14257_s26 + $0x20] sm:$0xff]   ;;  %s14677_s25 = scalar_lea.vmem %s13394_s11, %s10806_s15  ;;  %s11428_s19 = sshll.u32 %s13256_s18, 8 }
 0xb2e   : > { %v10812_v26 = vld [vmem:[%s14293_s20 + $0x1] ss:$0 sm:$0xff]  ;;  %v10808_v24 = vld [vmem:[%s14293_s20] ss:$0 sm:$0xff]  ;;  %s14661_s16 = scalar_lea.vmem %s13399_s17, %s3842_s14  ;;  %s15025_s21 = scalar_lea.vmem %s13405_s23, %s11428_s19 }
 0xb2f   : > { %s15618_s2 = sld [smem:[#allocation2_spill]]  ;;  %s10804_s27 = sshll.u32 %s13256_s18, 4 }
 0xb30   : > { %12061 = vmatpush3.bf16.msra.mxu1 %v12618_v18  ;;  %12053 = vmatpush3.bf16.msra.mxu0 %v12619_v17  ;;  %s15619_s12 = sld [smem:[#allocation3_spill]] }
 0xb31   : > { %12074 = vmatprep.subr.bf16.mxu1 %v15595_v41  ;;  %12066 = vmatprep.subr.bf16.mxu0 %v15595_v41 }
 0xb33   : > { %12063 = vmatmul.mubr.msk.bf16.vlgmr.msra.gmra.mxu1 %vm349_vm2, %v3850_v52  ;;  %12055 = vmatmul.mubr.msk.bf16.vlgmr.msra.gmra.mxu0 %vm349_vm2, %v3850_v52 }
 0xb34   : > { %12076 = vmatprep.mubr.msk.bf16.mxu1 %vm13294_vm4, %v15595_v41  ;;  %12070 = vmatprep.mubr.msk.bf16.mxu0 %vm13294_vm4, %v15595_v41 }
 0xb35   : > { %12067 = vmatpush3.bf16.msra.mxu0 %v12620_v51  ;;  %s15129_s5 = scalar_lea.vmem %s15618_s2, %s10804_s27 }
 0xb36   : > { %12068 = vmatprep.subr.bf16.mxu0 %v15595_v41  ;;  %s6747_s0 = scalar_lea.vmem %s15619_s12, %s13256_s18  ;;  %s3791_s18 = sadd.s32 1, %s13256_s18  }
 0xb37   : > { %p3788_p1 = scmp.ge.s32.totalorder %s3791_s18, 12  }
 0xb38   :  { %s15623_s29 = sld [smem:[#allocation5_spill]] (%p3788_p1)  ;;  %vm10486_vm5 = vcmask (%p3788_p1), 48128  }
 0xb39   : > { %12069 = vmatpush3.bf16.msra.mxu0 %v12621_v61  ;;  %s15624_s24 = sld [smem:[#allocation7_spill]] (%p3788_p1) }
 0xb3a   : > { %12080 = vmatprep.subr.bf16.mxu0 %v15595_v41  ;;  %s15625_s28 = sld [smem:[#allocation4_spill]] (%p3788_p1) }
 0xb3b   :  { %s15626_s3 = sld [smem:[#allocation6_spill]] (%p3788_p1) }
 0xb3c   : > { %12071 = vmatmul.mubr.msk.bf16.vlgmr.msra.gmra.mxu0 %vm349_vm2, %v3850_v52  ;;  %s15627_s11 = sld [smem:[#allocation8_spill]] (%p3788_p1) }
 0xb3d   : > { %12082 = vmatprep.mubr.msk.bf16.mxu0 %vm13294_vm4, %v15595_v41 }
 0xbf3   : > { %v3965_v47 = vpop.f32.mrf.mxu1  ;;  %v3906_v40 = vpop.f32.mrf.mxu0 }
 0xbf4   : > { %v3966_v33 = vadd.f32 %v10812_v26, %v3965_v47  ;;  %v3907_v15 = vadd.f32 %v10808_v24, %v3906_v40  ;;  %v10816_v40 = vld [vmem:[%s14293_s20 + $0x2] ss:$0 sm:$0xff] }
 0xbf5   : > { %v12064_v13 = vpop.f32.mrf.mxu1  ;;  %v12056_v14 = vpop.f32.mrf.mxu0 }
 0xbf6   : > { %v4079_v28 = vmul.f32 %v13333_v1, %v3907_v15  ;;  %v4081_v27 = vmul.f32 %v13335_v2, %v3907_v15  ;;  %v4083_v56 = vmul.f32 %v13342_v3, %v3907_v15  ;;  %v4085_v49 = vmul.f32 %v13344_v4, %v3907_v15 }
 0xbf7   : > { %v3968_v39 = vpop.f32.mrf.mxu1  ;;  %v3909_v53 = vpop.f32.mrf.mxu0  ;;  %v4087_v57 = vmul.f32 %v13353_v6, %v3907_v15  ;;  %v4089_v35 = vmul.f32 %v13355_v7, %v3907_v15  ;;  %v4091_v32 = vmul.f32 %v13364_v9, %v3907_v15  ;;  %v4093_v18 = vmul.f32 %v13366_v10, %v3907_v15 }
 0xbf8   : > { %v3969_v12 = vadd.f32 %v10812_v26, %v3968_v39  ;;  %v3910_v60 = vadd.f32 %v10808_v24, %v3909_v53 }
 0xbf9   : > { %v12065_v23 = vpop.f32.mrf.mxu1  ;;  %v12057_v21 = vpop.f32.mrf.mxu0 }
 0xbfa   : > { %v4127_v29 = vpack.c.bf16 %v3969_v12, %v3966_v33  ;;  %v4080_v45 = vmul.f32 %v13333_v1, %v3910_v60  ;;  %v4082_v16 = vmul.f32 %v13335_v2, %v3910_v60  ;;  %v4084_v43 = vmul.f32 %v13342_v3, %v3910_v60 }
 0xbfb   : > { %v4086_v22 = vmul.f32 %v13344_v4, %v3910_v60  ;;  %v4088_v11 = vmul.f32 %v13353_v6, %v3910_v60  ;;  %v4090_v25 = vmul.f32 %v13355_v7, %v3910_v60  ;;  %v4092_v37 = vmul.f32 %v13364_v9, %v3910_v60 }
 0xbfc   : > { %v4132_v62 = vsel %vm349_vm2, %v4127_v29, 0  ;;  %v4095_v48 = vpack.c.bf16 %v4080_v45, %v4079_v28  ;;  %v4096_v20 = vpack.c.bf16 %v4082_v16, %v4081_v27  ;;  %v4097_v36 = vpack.c.bf16 %v4084_v43, %v4083_v56  ;;  %v4024_v61 = vpop.f32.mrf.mxu0 }
 0xbfd   : > { %12075 = vmatpush3.bf16.xpose.msra.mxu1 %v4132_v62  ;;  %12081 = vmatpush3.bf16.xpose.msra.mxu0 %v4132_v62  ;;  %v4098_v50 = vpack.c.bf16 %v4086_v22, %v4085_v49  ;;  %v4099_v31 = vpack.c.bf16 %v4088_v11, %v4087_v57  ;;  %v4100_v19 = vpack.c.bf16 %v4090_v25, %v4089_v35 }
 0xbfe   : > { %12086 = vmatprep.subr.bf16.mxu1 %v15595_v41  ;;  %12092 = vmatprep.subr.bf16.mxu0 %v15595_v41  ;;  %v4094_v17 = vmul.f32 %v13366_v10, %v3910_v60  ;;  %v4101_v52 = vpack.c.bf16 %v4092_v37, %v4091_v32  ;;  %v12072_v47 = vpop.f32.mrf.mxu0  ;;  %v4025_v24 = vadd.f32 %v10816_v40, %v4024_v61 }
 0xc00   : > { %v4102_v51 = vpack.c.bf16 %v4094_v17, %v4093_v18  ;;  %v4027_v26 = vpop.f32.mrf.mxu0  ;;  %v4103_v39 = vmul.f32 %v13333_v1, %v4025_v24  ;;  %v4105_v12 = vmul.f32 %v13335_v2, %v4025_v24  ;;  %v14352_v15 = vmul.f32 %v13342_v3, %v4025_v24 }
 0xc01   : > { %v4028_v14 = vadd.f32 %v10816_v40, %v4027_v26  ;;  %v14358_v29 = vmul.f32 %v13344_v4, %v4025_v24  ;;  %v14364_v28 = vmul.f32 %v13353_v6, %v4025_v24  ;;  %v14382_v43 = vmul.f32 %v13364_v9, %v4025_v24 }
 0xc02   : > { %v12073_v13 = vpop.f32.mrf.mxu0 }
 0xc03   : > { %v4104_v33 = vmul.f32 %v13333_v1, %v4028_v14  ;;  %v4106_v53 = vmul.f32 %v13335_v2, %v4028_v14  ;;  %v14355_v23 = vmul.f32 %v13342_v3, %v4028_v14  ;;  %v14361_v60 = vmul.f32 %v13344_v4, %v4028_v14 }
 0xc04   : > { %12077 = vmatmul.mubr.msk.bf16.vlgmr.msra.gmra.mxu1 %vm349_vm2, %v4095_v48  ;;  %12083 = vmatmul.mubr.msk.bf16.vlgmr.msra.gmra.mxu0 %vm349_vm2, %v4096_v20  ;;  %v14367_v45 = vmul.f32 %v13353_v6, %v4028_v14  ;;  %v14374_v48 = vmul.f32 %v13355_v7, %v4025_v24  ;;  %v14377_v20 = vmul.f32 %v13355_v7, %v4028_v14 }
 0xc05   : > { %12087 = vmatpush3.bf16.xpose.msra.mxu1 %v4132_v62  ;;  %12093 = vmatpush3.bf16.xpose.msra.mxu0 %v4132_v62  ;;  %v4119_v21 = vpack.c.bf16 %v4104_v33, %v4103_v39  ;;  %v4121_v27 = vpack.c.bf16 %v14355_v23, %v14352_v15  ;;  %v14385_v49 = vmul.f32 %v13364_v9, %v4028_v14 }
 0xc06   : > { %12088 = vmatprep.mubr.msk.bf16.mxu1 %vm13294_vm4, %v15595_v41  ;;  %12094 = vmatprep.mubr.msk.bf16.mxu0 %vm13294_vm4, %v15595_v41  ;;  %v15607_v15 = vpack.c.bf16 %v14361_v60, %v14358_v29 }
 0xc07   : > { %12098 = vmatprep.subr.bf16.mxu1 %v15595_v41  ;;  %12104 = vmatprep.subr.bf16.mxu0 %v15595_v41 }
 0xc0c   : > { %12089 = vmatmul.mubr.msk.bf16.vlgmr.msra.gmra.mxu1 %vm349_vm2, %v4097_v36  ;;  %12095 = vmatmul.mubr.msk.bf16.vlgmr.msra.gmra.mxu0 %vm349_vm2, %v4098_v50  ;;  %v14392_v36 = vmul.f32 %v13366_v10, %v4025_v24  ;;  %v14395_v50 = vmul.f32 %v13366_v10, %v4028_v14 }
 0xc0d   : > { %12099 = vmatpush3.bf16.xpose.msra.mxu1 %v4132_v62  ;;  %12105 = vmatpush3.bf16.xpose.msra.mxu0 %v4132_v62 }
 0xc0e   : > { %12100 = vmatprep.mubr.msk.bf16.mxu1 %vm13294_vm4, %v15595_v41  ;;  %12106 = vmatprep.mubr.msk.bf16.mxu0 %vm13294_vm4, %v15595_v41 }
 0xc0f   : > { %12110 = vmatprep.subr.bf16.mxu1 %v15595_v41  ;;  %12116 = vmatprep.subr.bf16.mxu0 %v15595_v41 }
 0xc14   : > { %12101 = vmatmul.mubr.msk.bf16.vlgmr.msra.gmra.mxu1 %vm349_vm2, %v4099_v31  ;;  %12107 = vmatmul.mubr.msk.bf16.vlgmr.msra.gmra.mxu0 %vm349_vm2, %v4100_v19 }
 0xc15   : > { %12111 = vmatpush3.bf16.xpose.msra.mxu1 %v4132_v62  ;;  %12117 = vmatpush3.bf16.xpose.msra.mxu0 %v4132_v62  ;;  %v4120_v62 = vpack.c.bf16 %v4106_v53, %v4105_v12 }
 0xc16   : > { %12112 = vmatprep.mubr.msk.bf16.mxu1 %vm13294_vm4, %v15595_v41  ;;  %12118 = vmatprep.mubr.msk.bf16.mxu0 %vm13294_vm4, %v15595_v41 }
 0xc17   : > { %12122 = vmatprep.subr.bf16.mxu1 %v15595_v41  ;;  %12128 = vmatprep.subr.bf16.mxu0 %v15595_v41 }
 0xc1c   : > { %12113 = vmatmul.mubr.msk.bf16.vlgmr.msra.gmra.mxu1 %vm349_vm2, %v4101_v52  ;;  %12119 = vmatmul.mubr.msk.bf16.vlgmr.msra.gmra.mxu0 %vm349_vm2, %v4102_v51 }
 0xc1d   : > { %12124 = vmatprep.mubr.msk.bf16.mxu1 %vm13294_vm4, %v15595_v41  ;;  %12130 = vmatprep.mubr.msk.bf16.mxu0 %vm13294_vm4, %v15595_v41 }
 0xc1e   : > { %12123 = vmatpush3.bf16.msra.mxu1 %v4119_v21  ;;  %12129 = vmatpush3.bf16.msra.mxu0 %v4120_v62 }
 0xc1f   : > { %12134 = vmatprep.subr.bf16.mxu1 %v15595_v41  ;;  %12140 = vmatprep.subr.bf16.mxu0 %v15595_v41 }
 0xcc4   : > { %v4168_v35 = vpop.f32.mrf.mxu1  ;;  %v4212_v25 = vpop.f32.mrf.mxu0 }
 0xcc5   : > { %v4483_v31 = vmul.f32 0.5, %v4168_v35  ;;  %v4485_v19 = vmul.f32 0.5, %v4212_v25 }
 0xcc6   : > { %v12078_v32 = vpop.f32.mrf.mxu1  ;;  %v12084_v37 = vpop.f32.mrf.mxu0 }
 0xcc7   : > { %v14402_v18 = vadd.f32 %v4483_v31, %v13346_v5  ;;  %v14405_v17 = vadd.f32 %v4485_v19, %v13346_v5 }
 0xcc8   : > { %v4171_v52 = vpop.f32.mrf.mxu1  ;;  %v4215_v51 = vpop.f32.mrf.mxu0 }
 0xcc9   : > { %v4484_v61 = vmul.f32 0.5, %v4171_v52  ;;  %v4486_v47 = vmul.f32 0.5, %v4215_v51  ;;  %v4516_v40 = vsel %vm996_vm3, %v14402_v18, -inf  ;;  %v4522_v26 = vsel %vm996_vm3, %v14405_v17, -inf }
 0xcca   : > { %4517 = vmax.xlane.f32.xlu0 %v4516_v40  ;;  %v12079_v13 = vpop.f32.mrf.mxu1  ;;  %4523 = vmax.xlane.f32.xlu1 %v4522_v26  ;;  %v12085_v24 = vpop.f32.mrf.mxu0 }
 0xccb   : > { %v14412_v14 = vadd.f32 %v4484_v61, %v13357_v8  ;;  %v14415_v39 = vadd.f32 %v4486_v47, %v13357_v8 }
 0xccc   : > { %v4256_v33 = vpop.f32.mrf.mxu1  ;;  %v4300_v12 = vpop.f32.mrf.mxu0 }
 0xccd   : > { %v4487_v53 = vmul.f32 0.5, %v4256_v33  ;;  %v4489_v21 = vmul.f32 0.5, %v4300_v12  ;;  %v4519_v62 = vsel %vm996_vm3, %v14412_v14, -inf  ;;  %v4525_v35 = vsel %vm996_vm3, %v14415_v39, -inf }
 0xcce   : > { %4520 = vmax.xlane.f32.xlu0 %v4519_v62  ;;  %v12090_v25 = vpop.f32.mrf.mxu1  ;;  %4526 = vmax.xlane.f32.xlu1 %v4525_v35  ;;  %v12096_v31 = vpop.f32.mrf.mxu0 }
 0xccf   : > { %v14422_v19 = vadd.f32 %v4487_v53, %v13346_v5  ;;  %v14425_v52 = vadd.f32 %v4489_v21, %v13346_v5 }
 0xcd0   : > { %v4259_v32 = vpop.f32.mrf.mxu1  ;;  %v4303_v37 = vpop.f32.mrf.mxu0 }
 0xcd1   : > { %v4488_v51 = vmul.f32 0.5, %v4259_v32  ;;  %v4490_v61 = vmul.f32 0.5, %v4303_v37  ;;  %v4528_v47 = vsel %vm996_vm3, %v14422_v19, -inf  ;;  %v4534_v35 = vsel %vm996_vm3, %v14425_v52, -inf }
 0xcd2   : > { %4529 = vmax.xlane.f32.xlu0 %v4528_v47  ;;  %v12091_v40 = vpop.f32.mrf.mxu1  ;;  %v12097_v26 = vpop.f32.mrf.mxu0 }
 0xcd3   : > { %v14430_v13 = vadd.f32 %v4488_v51, %v13357_v8  ;;  %v14433_v24 = vadd.f32 %v4490_v61, %v13357_v8 }
 0xcd4   : > { %v4344_v33 = vpop.f32.mrf.mxu1  ;;  %v4388_v12 = vpop.f32.mrf.mxu0 }
 0xcd5   : > { %v4491_v53 = vmul.f32 0.5, %v4344_v33  ;;  %v4493_v62 = vmul.f32 0.5, %v4388_v12  ;;  %v4531_v21 = vsel %vm996_vm3, %v14430_v13, -inf  ;;  %v4537_v61 = vsel %vm996_vm3, %v14433_v24, -inf }
 0xcd6   : > { %v12102_v25 = vpop.f32.mrf.mxu1  ;;  %4532 = vmax.xlane.f32.xlu1 %v4531_v21  ;;  %4535 = vmax.xlane.f32.xlu0 %v4534_v35  ;;  %v12108_v31 = vpop.f32.mrf.mxu0 }
 0xcd7   : > { %v14440_v32 = vadd.f32 %v4491_v53, %v13346_v5  ;;  %v14445_v47 = vadd.f32 %v4493_v62, %v13346_v5 }
 0xcd8   : > { %v4347_v37 = vpop.f32.mrf.mxu1  ;;  %v4391_v51 = vpop.f32.mrf.mxu0 }
 0xcd9   : > { %v4492_v40 = vmul.f32 0.5, %v4347_v37  ;;  %v4494_v26 = vmul.f32 0.5, %v4391_v51  ;;  %v4540_v33 = vsel %vm996_vm3, %v14440_v32, -inf  ;;  %v4546_v51 = vsel %vm996_vm3, %v14445_v47, -inf }
 0xcda   : > { %v12103_v12 = vpop.f32.mrf.mxu1  ;;  %4541 = vmax.xlane.f32.xlu0 %v4540_v33  ;;  %4538 = vmax.xlane.f32.xlu1 %v4537_v61  ;;  %v12109_v21 = vpop.f32.mrf.mxu0 }
 0xcdb   : > { %v14450_v53 = vadd.f32 %v4492_v40, %v13357_v8  ;;  %v14453_v35 = vadd.f32 %v4494_v26, %v13357_v8 }
 0xcdc   : > { %v4432_v25 = vpop.f32.mrf.mxu1  ;;  %v4476_v31 = vpop.f32.mrf.mxu0 }
 0xcdd   : > { %v4495_v0 = vmul.f32 0.5, %v4432_v25  ;;  %v4497_v62 = vmul.f32 0.5, %v4476_v31  ;;  %v4543_v37 = vsel %vm996_vm3, %v14450_v53, -inf  ;;  %v4549_v21 = vsel %vm996_vm3, %v14453_v35, -inf }
 0xcde   : > { %v12114_v12 = vpop.f32.mrf.mxu1  ;;  %4544 = vmax.xlane.f32.xlu1 %v4543_v37  ;;  %4547 = vmax.xlane.f32.xlu0 %v4546_v51  ;;  %v12120_v61 = vpop.f32.mrf.mxu0 }
 0xcdf   : > { %v14460_v40 = vadd.f32 %v4495_v0, %v13346_v5  ;;  %v14465_v25 = vadd.f32 %v4497_v62, %v13346_v5 }
 0xce0   : > { %v4435_v33 = vpop.f32.mrf.mxu1  ;;  %v4479_v26 = vpop.f32.mrf.mxu0 }
 0xce1   : > { %v4496_v31 = vmul.f32 0.5, %v4435_v33  ;;  %v4498_v11 = vmul.f32 0.5, %v4479_v26  ;;  %v4552_v57 = vsel %vm996_vm3, %v14460_v40, -inf  ;;  %v4558_v62 = vsel %vm996_vm3, %v14465_v25, -inf }
 0xce2   : > { %v12115_v12 = vpop.f32.mrf.mxu1  ;;  %4553 = vmax.xlane.f32.xlu0 %v4552_v57  ;;  %4550 = vmax.xlane.f32.xlu1 %v4549_v21  ;;  %v12121_v37 = vpop.f32.mrf.mxu0 }
 0xce3   : > { %v14470_v0 = vadd.f32 %v4496_v31, %v13357_v8  ;;  %v14473_v51 = vadd.f32 %v4498_v11, %v13357_v8 }
 0xce5   : > { %v4555_v61 = vsel %vm996_vm3, %v14470_v0, -inf  ;;  %v4561_v33 = vsel %vm996_vm3, %v14473_v51, -inf }
 0xce6   : > { %4556 = vmax.xlane.f32.xlu1 %v4555_v61  ;;  %4559 = vmax.xlane.f32.xlu0 %v4558_v62 }
 0xcea   : > { %4562 = vmax.xlane.f32.xlu1 %v4561_v33 }
 0xd53   : > { %v4518_v57 = vpop.xlane.xlu0 %4517  ;;  %v4524_v26 = vpop.xlane.xlu1 %4523 }
 0xd54   : > { %v4564_v21 = vsub.f32 %v14402_v18, %v4518_v57  ;;  %v4566_v31 = vsub.f32 %v14405_v17, %v4524_v26 }
 0xd56   : > { %v4580_v11 = vmul.f32 1.442695, %v4564_v21  ;;  %v4584_v12 = vmul.f32 1.442695, %v4566_v31 }
 0xd57   : > { %v4521_v37 = vpop.xlane.xlu0 %4520  ;;  %v4527_v22 = vpop.xlane.xlu1 %4526 }
 0xd58   : > { %12760 = vpow2.f32 %v4580_v11  ;;  %v4565_v56 = vsub.f32 %v14412_v14, %v4521_v37  ;;  %v4567_v61 = vsub.f32 %v14415_v39, %v4527_v22 }
 0xd59   : > { %12762 = vpow2.f32 %v4584_v12 }
 0xd5a   : > { %v4582_v62 = vmul.f32 1.442695, %v4565_v56  ;;  %v4586_v16 = vmul.f32 1.442695, %v4567_v61 }
 0xd5b   : > { %v4530_v41 = vpop.xlane.xlu0 %4529 }
 0xd5c   : > { %12764 = vpow2.f32 %v4582_v62  ;;  %v4568_v33 = vsub.f32 %v14422_v19, %v4530_v41 }
 0xd5d   : > { %12766 = vpow2.f32 %v4586_v16 }
 0xd5e   : > { %v4588_v18 = vmul.f32 1.442695, %v4568_v33 }
 0xd5f   : > { %v4533_v57 = vpop.xlane.xlu1 %4532  ;;  %v4536_v17 = vpop.xlane.xlu0 %4535 }
 0xd60   : > { %12768 = vpow2.f32 %v4588_v18  ;;  %v4569_v26 = vsub.f32 %v14430_v13, %v4533_v57  ;;  %v4570_v21 = vsub.f32 %v14425_v52, %v4536_v17 }
 0xd62   : > { %v4590_v31 = vmul.f32 1.442695, %v4569_v26  ;;  %v4592_v14 = vmul.f32 1.442695, %v4570_v21 }
 0xd63   : > { %v4542_v11 = vpop.xlane.xlu0 %4541  ;;  %v4539_v22 = vpop.xlane.xlu1 %4538 }
 0xd64   : > { %12770 = vpow2.f32 %v4590_v31  ;;  %v4572_v56 = vsub.f32 %v14440_v32, %v4542_v11  ;;  %v4571_v39 = vsub.f32 %v14433_v24, %v4539_v22 }
 0xd65   : > { %v14490_v12 = vpop.eup %12760  ;;  %12772 = vpow2.f32 %v4592_v14 }
 0xd66   : > { %v4596_v41 = vmul.f32 1.442695, %v4572_v56  ;;  %v4594_v16 = vmul.f32 1.442695, %v4571_v39  ;;  %v4612_v19 = vsel %vm996_vm3, %v14490_v12, 0.0  ;;  %v14494_v13 = vpop.eup %12762 }
 0xd67   : > { %v4545_v52 = vpop.xlane.xlu1 %4544  ;;  %v4548_v37 = vpop.xlane.xlu0 %4547  ;;  %4613 = vadd.xlane.f32.xlu0 %v4612_v19  ;;  %v4618_v18 = vsel %vm996_vm3, %v14494_v13, 0.0 }
 0xd68   : > { %12774 = vpow2.f32 %v4596_v41  ;;  %v4573_v61 = vsub.f32 %v14450_v53, %v4545_v52  ;;  %v4574_v32 = vsub.f32 %v14445_v47, %v4548_v37 }
 0xd69   : > { %v14498_v62 = vpop.eup %12764  ;;  %12776 = vpow2.f32 %v4594_v16 }
 0xd6a   : > { %v4598_v24 = vmul.f32 1.442695, %v4573_v61  ;;  %v4600_v33 = vmul.f32 1.442695, %v4574_v32  ;;  %v4615_v57 = vsel %vm996_vm3, %v14498_v62, 0.0  ;;  %v14504_v17 = vpop.eup %12766 }
 0xd6b   : > { %v4554_v26 = vpop.xlane.xlu0 %4553  ;;  %v4551_v21 = vpop.xlane.xlu1 %4550  ;;  %4619 = vadd.xlane.f32.xlu0 %v4618_v18  ;;  %4616 = vadd.xlane.f32.xlu1 %v4615_v57  ;;  %v4621_v56 = vsel %vm996_vm3, %v14504_v17, 0.0 }
 0xd6c   : > { %12778 = vpow2.f32 %v4598_v24  ;;  %v4576_v47 = vsub.f32 %v14460_v40, %v4554_v26  ;;  %v4575_v53 = vsub.f32 %v14453_v35, %v4551_v21 }
 0xd6d   : > { %v14508_v31 = vpop.eup %12768  ;;  %12780 = vpow2.f32 %v4600_v33 }
 0xd6e   : > { %v4604_v14 = vmul.f32 1.442695, %v4576_v47  ;;  %v4602_v11 = vmul.f32 1.442695, %v4575_v53  ;;  %v4624_v22 = vsel %vm996_vm3, %v14508_v31, 0.0 }
 0xd6f   : > { %v4557_v39 = vpop.xlane.xlu1 %4556  ;;  %4625 = vadd.xlane.f32.xlu0 %v4624_v22  ;;  %v4560_v41 = vpop.xlane.xlu0 %4559  ;;  %4622 = vadd.xlane.f32.xlu1 %v4621_v56 }
 0xd70   : > { %12782 = vpow2.f32 %v4604_v14  ;;  %v4577_v40 = vsub.f32 %v14470_v0, %v4557_v39  ;;  %v4578_v35 = vsub.f32 %v14465_v25, %v4560_v41 }
 0xd71   : > { %v14516_v16 = vpop.eup %12770  ;;  %12784 = vpow2.f32 %v4602_v11 }
 0xd72   : > { %v14518_v19 = vpop.eup %12772  ;;  %v4606_v52 = vmul.f32 1.442695, %v4577_v40  ;;  %v4608_v37 = vmul.f32 1.442695, %v4578_v35  ;;  %v4627_v61 = vsel %vm996_vm3, %v14516_v16, 0.0 }
 0xd73   : > { %v4630_v32 = vsel %vm996_vm3, %v14518_v19, 0.0  ;;  %4628 = vadd.xlane.f32.xlu1 %v4627_v61  ;;  %v4563_v24 = vpop.xlane.xlu1 %4562 }
 0xd74   : > { %12786 = vpow2.f32 %v4606_v52  ;;  %4631 = vadd.xlane.f32.xlu0 %v4630_v32  ;;  %v4579_v0 = vsub.f32 %v14473_v51, %v4563_v24 }
 0xd75   : > { %v14525_v25 = vpop.eup %12774  ;;  %12788 = vpow2.f32 %v4608_v37 }
 0xd76   : > { %v14527_v33 = vpop.eup %12776  ;;  %v4610_v18 = vmul.f32 1.442695, %v4579_v0  ;;  %v4636_v57 = vsel %vm996_vm3, %v14525_v25, 0.0 }
 0xd77   : > { %v4633_v26 = vsel %vm996_vm3, %v14527_v33, 0.0 }
 0xd78   : > { %12790 = vpow2.f32 %v4610_v18  ;;  %4637 = vadd.xlane.f32.xlu0 %v4636_v57  ;;  %4634 = vadd.xlane.f32.xlu1 %v4633_v26 }
 0xd79   : > { %v14533_v21 = vpop.eup %12778 }
 0xd7a   : > { %v14535_v47 = vpop.eup %12780  ;;  %v4639_v51 = vsel %vm996_vm3, %v14533_v21, 0.0 }
 0xd7b   : > { %v4642_v53 = vsel %vm996_vm3, %v14535_v47, 0.0 }
 0xd7c   : > { %4643 = vadd.xlane.f32.xlu0 %v4642_v53  ;;  %4640 = vadd.xlane.f32.xlu1 %v4639_v51 }
 0xd7d   : > { %v14541_v14 = vpop.eup %12782 }
 0xd7e   : > { %v14543_v11 = vpop.eup %12784  ;;  %v4648_v22 = vsel %vm996_vm3, %v14541_v14, 0.0 }
 0xd7f   : > { %v4645_v56 = vsel %vm996_vm3, %v14543_v11, 0.0 }
 0xd80   : > { %4649 = vadd.xlane.f32.xlu0 %v4648_v22  ;;  %4646 = vadd.xlane.f32.xlu1 %v4645_v56 }
 0xd81   : > { %v14549_v39 = vpop.eup %12786 }
 0xd82   : > { %v14551_v41 = vpop.eup %12788  ;;  %v4651_v40 = vsel %vm996_vm3, %v14549_v39, 0.0 }
 0xd83   : > { %v4654_v35 = vsel %vm996_vm3, %v14551_v41, 0.0 }
 0xd84   : > { %4655 = vadd.xlane.f32.xlu0 %v4654_v35  ;;  %4652 = vadd.xlane.f32.xlu1 %v4651_v40 }
 0xd85   : > { %v14557_v52 = vpop.eup %12790 }
 0xd86   : > { %v4657_v37 = vsel %vm996_vm3, %v14557_v52, 0.0 }
 0xd88   : > { %4658 = vadd.xlane.f32.xlu1 %v4657_v37 }
 0xdf0   : > { %v4614_v61 = vpop.xlane.xlu0 %4613 }
 0xdf1   : > { %12792 = vrcp.f32 %v4614_v61 }
 0xdf4   : > { %v4620_v32 = vpop.xlane.xlu0 %4619  ;;  %v4617_v24 = vpop.xlane.xlu1 %4616 }
 0xdf5   : > { %12794 = vrcp.f32 %v4617_v24 }
 0xdf6   : > { %12796 = vrcp.f32 %v4620_v32 }
 0xdf8   : > { %v4626_v0 = vpop.xlane.xlu0 %4625  ;;  %v4623_v18 = vpop.xlane.xlu1 %4622 }
 0xdf9   : > { %12798 = vrcp.f32 %v4623_v18 }
 0xdfa   : > { %12800 = vrcp.f32 %v4626_v0 }
 0xdfc   : > { %v4629_v57 = vpop.xlane.xlu1 %4628 }
 0xdfd   : > { %v4632_v26 = vpop.xlane.xlu0 %4631  ;;  %12802 = vrcp.f32 %v4629_v57 }
 0xdfe   : > { %v12793_v51 = vpop.eup %12792  ;;  %12804 = vrcp.f32 %v4632_v26 }
 0xdff   : > { %v4676_v40 = vmul.f32 %v12793_v51, %v14490_v12  ;;  %v15606_v51 = vmov 0.0  }
 0xe01   : > { %v4638_v53 = vpop.xlane.xlu0 %4637  ;;  %v4635_v22 = vpop.xlane.xlu1 %4634 }
 0xe02   : > { %v12795_v56 = vpop.eup %12794  ;;  %12806 = vrcp.f32 %v4635_v22 }
 0xe03   : > { %v4677_v35 = vmul.f32 %v12795_v56, %v14498_v62  ;;  %v12797_v37 = vpop.eup %12796  ;;  %12808 = vrcp.f32 %v4638_v53 }
 0xe04   : > { %v4678_v57 = vmul.f32 %v12797_v37, %v14494_v13 }
 0xe05   : > { %v4644_v61 = vpop.xlane.xlu0 %4643  ;;  %v4641_v32 = vpop.xlane.xlu1 %4640  ;;  %v4692_v24 = vpack.c.bf16 %v4677_v35, %v4676_v40 }
 0xe06   : > { %v12799_v18 = vpop.eup %12798  ;;  %12810 = vrcp.f32 %v4641_v32 }
 0xe07   : > { %v12801_v0 = vpop.eup %12800  ;;  %12125 = vmatmul.mubr.msk.bf16.vlgmr.msra.gmra.mxu1 %vm996_vm3, %v4692_v24  ;;  %v4679_v26 = vmul.f32 %v12799_v18, %v14504_v17  ;;  %12812 = vrcp.f32 %v4644_v61 }
 0xe08   : > { %12135 = vmatpush3.bf16.msra.mxu1 %v4121_v27  ;;  %12136 = vmatprep.mubr.msk.bf16.mxu1 %vm13294_vm4, %v15606_v51  ;;  %v4680_v56 = vmul.f32 %v12801_v0, %v14508_v31 }
 0xe09   : > { %v4650_v12 = vpop.xlane.xlu0 %4649  ;;  %v4647_v62 = vpop.xlane.xlu1 %4646  ;;  %v4693_v22 = vpack.c.bf16 %v4679_v26, %v4678_v57  ;;  %12146 = vmatprep.subr.bf16.mxu1 %v15606_v51 }
 0xe0a   : > { %v12803_v53 = vpop.eup %12802  ;;  %12814 = vrcp.f32 %v4647_v62 }
 0xe0b   : > { %v4681_v13 = vmul.f32 %v12803_v53, %v14516_v16  ;;  %12131 = vmatmul.mubr.msk.bf16.vlgmr.msra.gmra.mxu0 %vm996_vm3, %v4693_v22  ;;  %12816 = vrcp.f32 %v4650_v12  ;;  %v12805_v40 = vpop.eup %12804  ;;  %v15608_v16 = vpack.c.bf16 %v14367_v45, %v14364_v28  ;;  %v15611_v12 = vpack.c.bf16 %v14395_v50, %v14392_v36  ;;  %v12622_v36 = vld [vmem:[%s14257_s26 + $0x38] sm:$0xff]   ;;  %v12623_v50 = vld [vmem:[%s14257_s26 + $0x30] sm:$0xff]  }
 0xe0c   : > { %12141 = vmatpush3.bf16.msra.mxu0 %v15607_v15  ;;  %12142 = vmatprep.mubr.msk.bf16.mxu0 %vm13294_vm4, %v15606_v51  ;;  %v4682_v60 = vmul.f32 %v12805_v40, %v14518_v19  ;;  %v15609_v19 = vpack.c.bf16 %v14377_v20, %v14374_v48 }
 0xe0d   : > { %v4656_v23 = vpop.xlane.xlu0 %4655  ;;  %v4653_v27 = vpop.xlane.xlu1 %4652  ;;  %v4694_v17 = vpack.c.bf16 %v4681_v13, %v4680_v56  ;;  %12152 = vmatprep.subr.bf16.mxu0 %v15606_v51 }
 0xe0e   : > { %12818 = vrcp.f32 %v4653_v27 }
 0xe0f   : > { %v12807_v31 = vpop.eup %12806  ;;  %12820 = vrcp.f32 %v4656_v23  ;;  %12137 = vmatmul.mubr.msk.bf16.vlgmr.msra.gmra.mxu1 %vm996_vm3, %v4694_v17 }
 0xe10   : > { %12147 = vmatpush3.bf16.msra.mxu1 %v15608_v16  ;;  %v4683_v35 = vmul.f32 %v12807_v31, %v14527_v33  ;;  %12148 = vmatprep.mubr.msk.bf16.mxu1 %vm13294_vm4, %v15606_v51  ;;  %v12809_v37 = vpop.eup %12808 }
 0xe11   : > { %v4659_v29 = vpop.xlane.xlu1 %4658  ;;  %12158 = vmatprep.subr.bf16.mxu1 %v15606_v51  ;;  %v4684_v24 = vmul.f32 %v12809_v37, %v14525_v25 }
 0xe12   : > { %12822 = vrcp.f32 %v4659_v29  ;;  %v4695_v61 = vpack.c.bf16 %v4683_v35, %v4682_v60 }
 0xe13   : > { %v12811_v32 = vpop.eup %12810 }
 0xe14   : > { %12143 = vmatmul.mubr.msk.bf16.vlgmr.msra.gmra.mxu0 %vm996_vm3, %v4695_v61  ;;  %v4685_v28 = vmul.f32 %v12811_v32, %v14533_v21  ;;  %v12813_v45 = vpop.eup %12812  ;;  %v15610_v21 = vpack.c.bf16 %v14385_v49, %v14382_v43 }
 0xe15   : > { %12153 = vmatpush3.bf16.msra.mxu0 %v15609_v19  ;;  %12154 = vmatprep.mubr.msk.bf16.mxu0 %vm13294_vm4, %v15606_v51  ;;  %v4686_v0 = vmul.f32 %v12813_v45, %v14535_v47 }
 0xe16   : > { %v4696_v33 = vpack.c.bf16 %v4685_v28, %v4684_v24  ;;  %12164 = vmatprep.subr.bf16.mxu0 %v15606_v51 }
 0xe17   : > { %v12815_v18 = vpop.eup %12814 }
 0xe18   : > { %12149 = vmatmul.mubr.msk.bf16.vlgmr.msra.gmra.mxu1 %vm996_vm3, %v4696_v33  ;;  %v4687_v25 = vmul.f32 %v12815_v18, %v14543_v11  ;;  %v12817_v57 = vpop.eup %12816 }
 0xe19   : > { %12159 = vmatpush3.bf16.msra.mxu1 %v15610_v21  ;;  %12160 = vmatprep.mubr.msk.bf16.mxu1 %vm13294_vm4, %v15606_v51  ;;  %v4688_v47 = vmul.f32 %v12817_v57, %v14541_v14 }
 0xe1a   : > { %v4697_v48 = vpack.c.bf16 %v4687_v25, %v4686_v0  ;;  %12170 = vmatprep.subr.bf16.mxu1 %v15606_v51 }
 0xe1b   : > { %v12819_v20 = vpop.eup %12818 }
 0xe1c   : > { %v12821_v26 = vpop.eup %12820  ;;  %12155 = vmatmul.mubr.msk.bf16.vlgmr.msra.gmra.mxu0 %vm996_vm3, %v4697_v48  ;;  %v4689_v11 = vmul.f32 %v12819_v20, %v14549_v39 }
 0xe1d   : > { %12165 = vmatpush3.bf16.msra.mxu0 %v15611_v12  ;;  %12166 = vmatprep.mubr.msk.bf16.mxu0 %vm13294_vm4, %v15606_v51  ;;  %v4690_v62 = vmul.f32 %v12821_v26, %v14551_v41 }
 0xe1e   : > { %v4698_v49 = vpack.c.bf16 %v4689_v11, %v4688_v47  ;;  %12178 = vmatprep.subr.bf16.mxu0 %v15606_v51 }
 0xe1f   : > { %v12823_v43 = vpop.eup %12822 }
 0xe20   : > { %v4691_v53 = vmul.f32 %v12823_v43, %v14557_v52  ;;  %12161 = vmatmul.mubr.msk.bf16.vlgmr.msra.gmra.mxu1 %vm996_vm3, %v4698_v49 }
 0xe21   : > { %12174 = vmatprep.mubr.msk.bf16.mxu1 %vm13294_vm4, %v15606_v51  ;;  %12171 = vmatpush3.bf16.msra.mxu1 %v12622_v36 }
 0xe22   : > { %v4699_v14 = vpack.c.bf16 %v4691_v53, %v4690_v62  ;;  %12172 = vmatprep.subr.bf16.mxu1 %v15606_v51 }
 0xe24   : > { %12167 = vmatmul.mubr.msk.bf16.vlgmr.msra.gmra.mxu0 %vm996_vm3, %v4699_v14 }
 0xe25   : > { %12182 = vmatprep.mubr.msk.bf16.mxu0 %vm13294_vm4, %v15606_v51  ;;  %12173 = vmatpush3.bf16.msra.mxu1 %v12623_v50 }
 0xe26   : > { %12186 = vmatprep.subr.bf16.mxu1 %v15606_v51 }
 0xec7   : > { %v4737_v39 = vpop.f32.mrf.mxu1 }
 0xec9   : > { %v12126_v41 = vpop.f32.mrf.mxu1 }
 0xecb   : > { %v4740_v52 = vpop.f32.mrf.mxu1  ;;  %v4781_v22 = vpop.f32.mrf.mxu0 }
 0xecc   : > { %v5052_v28 = vadd.f32 %v4781_v22, %v4737_v39 }
 0xecd   : > { %v12127_v56 = vpop.f32.mrf.mxu1  ;;  %v12132_v13 = vpop.f32.mrf.mxu0 }
 0xece   : > { %v10836_v13 = vld [vmem:[%s14293_s20 + $0x3] ss:$0 sm:$0xff] }
 0xecf   : > { %v4784_v15 = vpop.f32.mrf.mxu0  ;;  %v4825_v23 = vpop.f32.mrf.mxu1 }
 0xed0   : > { %v5053_v45 = vadd.f32 %v4784_v15, %v4740_v52  ;;  %v5054_v18 = vadd.f32 %v5052_v28, %v4825_v23 }
 0xed1   : > { %v12133_v27 = vpop.f32.mrf.mxu0  ;;  %v12138_v17 = vpop.f32.mrf.mxu1 }
 0xed3   : > { %v4828_v40 = vpop.f32.mrf.mxu1 }
 0xed4   : > { %v4869_v31 = vpop.f32.mrf.mxu0  ;;  %v5055_v0 = vadd.f32 %v5053_v45, %v4828_v40 }
 0xed5   : > { %v12139_v16 = vpop.f32.mrf.mxu1  ;;  %v5056_v21 = vadd.f32 %v5054_v18, %v4869_v31 }
 0xed6   : > { %v12144_v29 = vpop.f32.mrf.mxu0 }
 0xed8   : > { %v4872_v60 = vpop.f32.mrf.mxu0  ;;  %v4913_v35 = vpop.f32.mrf.mxu1 }
 0xed9   : > { %v5057_v48 = vadd.f32 %v5055_v0, %v4872_v60  ;;  %v5058_v47 = vadd.f32 %v5056_v21, %v4913_v35  ;;  %v12625_v0 = vld [vmem:[%s14269_s4 + $0x10] sm:$0xff]   ;;  %v12628_v21 = vld [vmem:[%s14269_s4 + $0x28] sm:$0xff]  }
 0xeda   : > { %v12145_v37 = vpop.f32.mrf.mxu0  ;;  %v12150_v61 = vpop.f32.mrf.mxu1 }
 0xedc   : > { %v4916_v32 = vpop.f32.mrf.mxu1  ;;  %v4957_v24 = vpop.f32.mrf.mxu0 }
 0xedd   : > { %v5059_v11 = vadd.f32 %v5057_v48, %v4916_v32  ;;  %v5060_v49 = vadd.f32 %v5058_v47, %v4957_v24  ;;  %v12629_v48 = vld [vmem:[%s14269_s4 + $0x20] sm:$0xff]  }
 0xede   : > { %v12151_v19 = vpop.f32.mrf.mxu1  ;;  %v12156_v33 = vpop.f32.mrf.mxu0 }
 0xee0   : > { %v4960_v25 = vpop.f32.mrf.mxu0  ;;  %v5001_v57 = vpop.f32.mrf.mxu1 }
 0xee1   : > { %v5061_v62 = vadd.f32 %v5059_v11, %v4960_v25  ;;  %v5062_v36 = vadd.f32 %v5060_v49, %v5001_v57  ;;  %v12626_v25 = vld [vmem:[%s14269_s4 + $0x8] sm:$0xff]   ;;  %v12627_v57 = vld [vmem:[%s14269_s4] sm:$0xff]  }
 0xee2   : > { %v12157_v20 = vpop.f32.mrf.mxu0  ;;  %v12162_v26 = vpop.f32.mrf.mxu1 }
 0xee4   : > { %v5004_v12 = vpop.f32.mrf.mxu1  ;;  %v5045_v43 = vpop.f32.mrf.mxu0 }
 0xee5   : > { %v5063_v50 = vadd.f32 %v5061_v62, %v5004_v12  ;;  %v5064_v41 = vadd.f32 %v5062_v36, %v5045_v43 }
 0xee6   : > { %v12163_v53 = vpop.f32.mrf.mxu1  ;;  %v12168_v14 = vpop.f32.mrf.mxu0 }
 0xee7   : > { %v10840_v53 = vld [vmem:[%s14661_s16] ss:$0 sm:$0xff] }
 0xee8   : > { %v5048_v39 = vpop.f32.mrf.mxu0 }
 0xee9   : > { %v5065_v52 = vadd.f32 %v5063_v50, %v5048_v39  ;;  %v10841_v39 = vld [vmem:[%s14661_s16 + $0x1] ss:$0 sm:$0xff] }
 0xeea   : > { %v12169_v22 = vpop.f32.mrf.mxu0 }
 0xeeb   : > { %v5066_v56 = vpack.c.bf16 %v5065_v52, %v5064_v41 }
 0xeed   : > { %12175 = vmatmul.mubr.msk.bf16.vlgmr.msra.gmra.mxu1 %vm349_vm2, %v5066_v56 }
 0xeee   : > { %12190 = vmatprep.mubr.msk.bf16.mxu1 %vm13294_vm4, %v15606_v51  ;;  %12187 = vmatpush3.bf16.msra.mxu1 %v12628_v21 }
 0xeef   : > { %12188 = vmatprep.subr.bf16.mxu1 %v15606_v51 }
 0xef2   : > { %12189 = vmatpush3.bf16.msra.mxu1 %v12629_v48 }
 0xef3   : > { %12202 = vmatprep.subr.bf16.mxu1 %v15606_v51 }
 0xef5   : > { %12191 = vmatmul.mubr.msk.bf16.vlgmr.msra.gmra.mxu1 %vm349_vm2, %v14230_v38 }
 0xef6   : > { %12204 = vmatprep.mubr.msk.bf16.mxu1 %vm13294_vm4, %v15606_v51 }
 0xfad   : > { %v5122_v15 = vpop.f32.mrf.mxu1 }
 0xfae   : > { %v5123_v23 = vadd.f32 %v10836_v13, %v5122_v15 }
 0xfaf   : > { %v12176_v27 = vpop.f32.mrf.mxu1 }
 0xfb0   : > { %v5129_v17 = vadd.f32 %v13252_v30, %v5123_v23 }
 0xfb1   : > { %v5125_v40 = vpop.f32.mrf.mxu1 }
 0xfb2   : > { %v5126_v31 = vadd.f32 %v10836_v13, %v5125_v40  ;;  %v5131_v16 = vsel %vm349_vm2, %v5129_v17, 0.0  ;;  %v10842_v13 = vld [vmem:[%s14677_s25 + $0x1] ss:$0 sm:$0xff] }
 0xfb3   : > { %5132 = vadd.xlane.f32.xlu0 %v5131_v16  ;;  %v12177_v29 = vpop.f32.mrf.mxu1 }
 0xfb4   : > { %v5130_v60 = vadd.f32 %v13248_v34, %v5126_v31  ;;  %v12624_v34 = vld [vmem:[%s14269_s4 + $0x18] sm:$0xff]  }
 0xfb5   : > { %12179 = vmatpush3.bf16.msra.mxu0 %v12624_v34 }
 0xfb6   : > { %v5134_v35 = vsel %vm349_vm2, %v5130_v60, 0.0  ;;  %12180 = vmatprep.subr.bf16.mxu0 %v15606_v51 }
 0xfb7   : > { %5135 = vadd.xlane.f32.xlu1 %v5134_v35 }
 0xfb9   : > { %12181 = vmatpush3.bf16.msra.mxu0 %v12625_v0 }
 0xfba   : > { %12194 = vmatprep.subr.bf16.mxu0 %v15606_v51 }
 0xfbc   : > { %12183 = vmatmul.mubr.msk.bf16.vlgmr.msra.gmra.mxu0 %vm349_vm2, %v14230_v38  ;;  %v12917_v38 = vld [vmem:[%s15624_s24 + $0x40] ss:$8 sps:$4 sm:$0xff] (%p3788_p1)  }
 0xfbd   : > { %12195 = vmatpush3.bf16.msra.mxu0 %v12626_v25  ;;  %12198 = vmatprep.mubr.msk.bf16.mxu0 %vm13294_vm4, %v15606_v51 }
 0xfbe   : > { %12196 = vmatprep.subr.bf16.mxu0 %v15606_v51 }
 0xfc1   : > { %12197 = vmatpush3.bf16.msra.mxu0 %v12627_v57 }
 0xfc2   : > { %12208 = vmatprep.subr.bf16.mxu0 %v15606_v51 }
0x103c   : > { %v5133_v37 = vpop.xlane.xlu0 %5132 }
0x103d   : > { %v5137_v61 = vmul.f32 0.03125, %v5133_v37 }
0x103f   : > { %v5139_v32 = vsub.f32 %v5129_v17, %v5137_v61 }
0x1040   : > { %v5136_v24 = vpop.xlane.xlu1 %5135 }
0x1041   : > { %v5138_v28 = vmul.f32 0.03125, %v5136_v24  ;;  %v5141_v30 = vmul.f32 %v5139_v32, %v5139_v32 }
0x1043   : > { %v5140_v45 = vsub.f32 %v5130_v60, %v5138_v28  ;;  %v5143_v19 = vsel %vm349_vm2, %v5141_v30, 0.0  ;;  %v14683_v60 = vpop.f32.mrf.mxu1 }
0x1044   : > { %5144 = vadd.xlane.f32.xlu0 %v5143_v19 }
0x1045   : > { %v5142_v33 = vmul.f32 %v5140_v45, %v5140_v45  ;;  %v12192_v35 = vpop.f32.mrf.mxu1 }
0x1047   : > { %v5146_v18 = vsel %vm349_vm2, %v5142_v33, 0.0  ;;  %v14685_v37 = vpop.f32.mrf.mxu1 }
0x1048   : > { %5147 = vadd.xlane.f32.xlu1 %v5146_v18 }
0x1049   : > { %v12193_v61 = vpop.f32.mrf.mxu1 }
0x107c   : > { %v5228_v15 = vpop.f32.mrf.mxu0 }
0x107d   : > { %v5229_v27 = vadd.f32 %v10842_v13, %v5228_v15 }
0x107e   : > { %v12184_v23 = vpop.f32.mrf.mxu0 }
0x107f   : > { %v10846_v23 = vld [vmem:[%s14677_s25 + $0x2] ss:$0 sm:$0xff] }
0x1080   : > { %v5231_v17 = vpop.f32.mrf.mxu0 }
0x1081   : > { %v5232_v40 = vadd.f32 %v10842_v13, %v5231_v17  ;;  %v5291_v17 = vadd.f32 %v10846_v23, %v14685_v37 }
0x1082   : > { %v12185_v31 = vpop.f32.mrf.mxu0 }
0x1083   : > { %v5405_v16 = vpack.c.bf16 %v5232_v40, %v5229_v27  ;;  %v5288_v27 = vadd.f32 %v10846_v23, %v14683_v60  ;;  %v5382_v31 = vmul.f32 %v13333_v1, %v5291_v17  ;;  %v14745_v61 = vmul.f32 %v13342_v3, %v5291_v17 }
0x1084   : > { %v14751_v60 = vmul.f32 %v13344_v4, %v5291_v17 }
0x1085   : > { %v5410_v29 = vsel %vm349_vm2, %v5405_v16, 0  ;;  %v5381_v40 = vmul.f32 %v13333_v1, %v5288_v27  ;;  %v5383_v16 = vmul.f32 %v13335_v2, %v5288_v27  ;;  %v14742_v35 = vmul.f32 %v13342_v3, %v5288_v27 }
0x1086   : > { %12203 = vmatpush3.bf16.xpose.msra.mxu1 %v5410_v29 }
0x1087   : > { %12214 = vmatprep.subr.bf16.mxu1 %v15606_v51  ;;  %v5397_v37 = vpack.c.bf16 %v5382_v31, %v5381_v40 }
0x10cd   : > { %v5145_v20 = vpop.xlane.xlu0 %5144 }
0x10ce   : > { %v5149_v26 = vmul.f32 0.03125, %v5145_v20 }
0x10d0   : > { %v5151_v47 = vadd.f32 1e-05, %v5149_v26 }
0x10d1   : > { %v5148_v11 = vpop.xlane.xlu1 %5147 }
0x10d2   : > { %12824 = vrsqrt.f32 %v5151_v47  ;;  %v5150_v12 = vmul.f32 0.03125, %v5148_v11 }
0x10d4   : > { %v5152_v43 = vadd.f32 1e-05, %v5150_v12 }
0x10d6   : > { %12826 = vrsqrt.f32 %v5152_v43 }
0x10df   : > { %v12825_v49 = vpop.eup %12824 }
0x10e0   : > { %v5155_v62 = vmul.f32 %v12825_v49, %v5139_v32  ;;  %v10850_v32 = vld [vmem:[%s14677_s25] ss:$0 sm:$0xff] }
0x10e2   : > { %v5163_v50 = vmul.f32 %v10840_v53, %v5155_v62 }
0x10e3   : > { %v12827_v14 = vpop.eup %12826 }
0x10e4   : > { %v5156_v36 = vmul.f32 %v12827_v14, %v5140_v45  ;;  %v14665_v52 = vadd.f32 %v10841_v39, %v5163_v50 }
0x10e6   : > { %v5164_v41 = vmul.f32 %v10840_v53, %v5156_v36 }
0x10e8   : > { %v14667_v22 = vadd.f32 %v10841_v39, %v5164_v41 }
0x10ea   : > { %v5294_v56 = vpack.c.bf16 %v14667_v22, %v14665_v52 }
0x10ec   : > { %12199 = vmatmul.mubr.msk.bf16.vlgmr.msra.gmra.mxu0 %vm349_vm2, %v5294_v56 }
0x10ed   : > { %12210 = vmatprep.mubr.msk.bf16.mxu0 %vm13294_vm4, %v15606_v51  ;;  %12209 = vmatpush3.bf16.xpose.msra.mxu0 %v5410_v29 }
0x10ee   : > { %12220 = vmatprep.subr.bf16.mxu0 %v15606_v51 }
0x11ac   : > { %v5350_v24 = vpop.f32.mrf.mxu0 }
0x11ad   : > { %v5351_v30 = vadd.f32 %v10850_v32, %v5350_v24 }
0x11ae   : > { %v12200_v28 = vpop.f32.mrf.mxu0 }
0x11af   : > { %v5357_v18 = vmul.f32 %v13333_v1, %v5351_v30  ;;  %v5359_v0 = vmul.f32 %v13335_v2, %v5351_v30  ;;  %v5361_v26 = vmul.f32 %v13342_v3, %v5351_v30  ;;  %v5363_v47 = vmul.f32 %v13344_v4, %v5351_v30 }
0x11b0   : > { %v5353_v45 = vpop.f32.mrf.mxu0  ;;  %v5365_v62 = vmul.f32 %v13353_v6, %v5351_v30  ;;  %v5367_v53 = vmul.f32 %v13355_v7, %v5351_v30  ;;  %v5369_v41 = vmul.f32 %v13364_v9, %v5351_v30  ;;  %v5371_v56 = vmul.f32 %v13366_v10, %v5351_v30 }
0x11b1   : > { %v5354_v19 = vadd.f32 %v10850_v32, %v5353_v45  ;;  %v14748_v32 = vmul.f32 %v13344_v4, %v5288_v27  ;;  %v14754_v28 = vmul.f32 %v13353_v6, %v5288_v27  ;;  %v14757_v30 = vmul.f32 %v13353_v6, %v5291_v17 }
0x11b2   : > { %v12201_v33 = vpop.f32.mrf.mxu0 }
0x11b3   : > { %v5358_v34 = vmul.f32 %v13333_v1, %v5354_v19  ;;  %v5360_v25 = vmul.f32 %v13335_v2, %v5354_v19  ;;  %v5362_v48 = vmul.f32 %v13342_v3, %v5354_v19  ;;  %v5364_v20 = vmul.f32 %v13344_v4, %v5354_v19 }
0x11b4   : > { %v5366_v43 = vmul.f32 %v13353_v6, %v5354_v19  ;;  %v5368_v49 = vmul.f32 %v13355_v7, %v5354_v19  ;;  %v5370_v50 = vmul.f32 %v13364_v9, %v5354_v19  ;;  %v5372_v39 = vmul.f32 %v13366_v10, %v5354_v19  ;;  %v12900_v6 = vld [vmem:[%s15623_s29 + $0x14] ss:$8 sps:$4 sm:$0xff] (%p3788_p1)  }
0x11b5   : > { %v5373_v57 = vpack.c.bf16 %v5358_v34, %v5357_v18  ;;  %v5374_v21 = vpack.c.bf16 %v5360_v25, %v5359_v0  ;;  %v5375_v11 = vpack.c.bf16 %v5362_v48, %v5361_v26  ;;  %v5376_v12 = vpack.c.bf16 %v5364_v20, %v5363_v47 }
0x11b6   : > { %v5377_v14 = vpack.c.bf16 %v5366_v43, %v5365_v62  ;;  %v5378_v36 = vpack.c.bf16 %v5368_v49, %v5367_v53  ;;  %v5379_v13 = vpack.c.bf16 %v5370_v50, %v5369_v41  ;;  %v5380_v15 = vpack.c.bf16 %v5372_v39, %v5371_v56 }
0x11b7   : > { %12205 = vmatmul.mubr.msk.bf16.vlgmr.msra.gmra.mxu1 %vm349_vm2, %v5373_v57  ;;  %12211 = vmatmul.mubr.msk.bf16.vlgmr.msra.gmra.mxu0 %vm349_vm2, %v5374_v21  ;;  %v14764_v33 = vmul.f32 %v13355_v7, %v5288_v27  ;;  %v14767_v18 = vmul.f32 %v13355_v7, %v5291_v17  ;;  %v14772_v0 = vmul.f32 %v13364_v9, %v5288_v27  ;;  %v12902_v7 = vld [vmem:[%s15623_s29 + $0x10] ss:$8 sps:$4 sm:$0xff] (%p3788_p1)  }
0x11b8   : > { %12215 = vmatpush3.bf16.xpose.msra.mxu1 %v5410_v29  ;;  %12221 = vmatpush3.bf16.xpose.msra.mxu0 %v5410_v29  ;;  %v14775_v25 = vmul.f32 %v13364_v9, %v5291_v17  ;;  %v14782_v21 = vmul.f32 %v13366_v10, %v5288_v27  ;;  %v14785_v48 = vmul.f32 %v13366_v10, %v5291_v17  ;;  %v12905_v9 = vld [vmem:[%s15623_s29] ss:$8 sps:$4 sm:$0xff] (%p3788_p1)   ;;  %v12906_v10 = vld [vmem:[%s15624_s24 + $0x74] ss:$8 sps:$4 sm:$0xff] (%p3788_p1)  }
0x11b9   : > { %12216 = vmatprep.mubr.msk.bf16.mxu1 %vm13294_vm4, %v15606_v51  ;;  %12222 = vmatprep.mubr.msk.bf16.mxu0 %vm13294_vm4, %v15606_v51 }
0x11ba   : > { %12226 = vmatprep.subr.bf16.mxu1 %v15606_v51  ;;  %12232 = vmatprep.subr.bf16.mxu0 %v15606_v51 }
0x11bf   : > { %12217 = vmatmul.mubr.msk.bf16.vlgmr.msra.gmra.mxu1 %vm349_vm2, %v5375_v11  ;;  %12223 = vmatmul.mubr.msk.bf16.vlgmr.msra.gmra.mxu0 %vm349_vm2, %v5376_v12 }
0x11c0   : > { %12227 = vmatpush3.bf16.xpose.msra.mxu1 %v5410_v29  ;;  %12233 = vmatpush3.bf16.xpose.msra.mxu0 %v5410_v29 }
0x11c1   : > { %12228 = vmatprep.mubr.msk.bf16.mxu1 %vm13294_vm4, %v15606_v51  ;;  %12234 = vmatprep.mubr.msk.bf16.mxu0 %vm13294_vm4, %v15606_v51 }
0x11c2   : > { %12238 = vmatprep.subr.bf16.mxu1 %v15606_v51  ;;  %12244 = vmatprep.subr.bf16.mxu0 %v15606_v51 }
0x11c7   : > { %12229 = vmatmul.mubr.msk.bf16.vlgmr.msra.gmra.mxu1 %vm349_vm2, %v5377_v14  ;;  %12235 = vmatmul.mubr.msk.bf16.vlgmr.msra.gmra.mxu0 %vm349_vm2, %v5378_v36 }
0x11c8   : > { %12239 = vmatpush3.bf16.xpose.msra.mxu1 %v5410_v29  ;;  %12245 = vmatpush3.bf16.xpose.msra.mxu0 %v5410_v29  ;;  %v5384_v29 = vmul.f32 %v13335_v2, %v5291_v17 }
0x11c9   : > { %12240 = vmatprep.mubr.msk.bf16.mxu1 %vm13294_vm4, %v15606_v51  ;;  %12246 = vmatprep.mubr.msk.bf16.mxu0 %vm13294_vm4, %v15606_v51 }
0x11ca   : > { %12250 = vmatprep.subr.bf16.mxu1 %v15606_v51  ;;  %12256 = vmatprep.subr.bf16.mxu0 %v15606_v51  ;;  %v5398_v24 = vpack.c.bf16 %v5384_v29, %v5383_v16 }
0x11cf   : > { %12241 = vmatmul.mubr.msk.bf16.vlgmr.msra.gmra.mxu1 %vm349_vm2, %v5379_v13  ;;  %12247 = vmatmul.mubr.msk.bf16.vlgmr.msra.gmra.mxu0 %vm349_vm2, %v5380_v15 }
0x11d0   : > { %12252 = vmatprep.mubr.msk.bf16.mxu1 %vm13294_vm4, %v15606_v51  ;;  %12258 = vmatprep.mubr.msk.bf16.mxu0 %vm13294_vm4, %v15606_v51 }
0x11d1   : > { %12251 = vmatpush3.bf16.msra.mxu1 %v5397_v37  ;;  %12257 = vmatpush3.bf16.msra.mxu0 %v5398_v24 }
0x11d2   : > { %12262 = vmatprep.subr.bf16.mxu1 %v15606_v51  ;;  %12268 = vmatprep.subr.bf16.mxu0 %v15606_v51 }
0x1277   : > { %v5446_v47 = vpop.f32.mrf.mxu1  ;;  %v5490_v11 = vpop.f32.mrf.mxu0 }
0x1278   : > { %v5761_v12 = vmul.f32 0.5, %v5446_v47  ;;  %v5763_v43 = vmul.f32 0.5, %v5490_v11 }
0x1279   : > { %v12206_v49 = vpop.f32.mrf.mxu1  ;;  %v12212_v62 = vpop.f32.mrf.mxu0 }
0x127a   : > { %v14792_v53 = vadd.f32 %v5761_v12, %v13346_v5  ;;  %v14795_v50 = vadd.f32 %v5763_v43, %v13346_v5 }
0x127b   : > { %v5449_v14 = vpop.f32.mrf.mxu1  ;;  %v5493_v36 = vpop.f32.mrf.mxu0 }
0x127c   : > { %v5762_v39 = vmul.f32 0.5, %v5449_v14  ;;  %v5764_v41 = vmul.f32 0.5, %v5493_v36  ;;  %v5793_v56 = vsel %vm996_vm3, %v14792_v53, -inf  ;;  %v5799_v37 = vsel %vm996_vm3, %v14795_v50, -inf }
0x127d   : > { %5794 = vmax.xlane.f32.xlu0 %v5793_v56  ;;  %v12207_v13 = vpop.f32.mrf.mxu1  ;;  %v12213_v15 = vpop.f32.mrf.mxu0 }
0x127e   : > { %v14800_v23 = vadd.f32 %v5762_v39, %v13357_v8  ;;  %v14803_v27 = vadd.f32 %v5764_v41, %v13357_v8 }
0x127f   : > { %v5534_v17 = vpop.f32.mrf.mxu1  ;;  %v5578_v40 = vpop.f32.mrf.mxu0 }
0x1280   : > { %v5765_v31 = vmul.f32 0.5, %v5534_v17  ;;  %v5767_v16 = vmul.f32 0.5, %v5578_v40  ;;  %v5796_v29 = vsel %vm996_vm3, %v14800_v23, -inf  ;;  %v5802_v49 = vsel %vm996_vm3, %v14803_v27, -inf }
0x1281   : > { %5797 = vmax.xlane.f32.xlu1 %v5796_v29  ;;  %v12218_v24 = vpop.f32.mrf.mxu1  ;;  %5800 = vmax.xlane.f32.xlu0 %v5799_v37  ;;  %v12224_v47 = vpop.f32.mrf.mxu0 }
0x1282   : > { %v14810_v11 = vadd.f32 %v5765_v31, %v13346_v5  ;;  %v14815_v62 = vadd.f32 %v5767_v16, %v13346_v5 }
0x1283   : > { %v5537_v12 = vpop.f32.mrf.mxu1  ;;  %v5581_v43 = vpop.f32.mrf.mxu0 }
0x1284   : > { %v5766_v14 = vmul.f32 0.5, %v5537_v12  ;;  %v5768_v36 = vmul.f32 0.5, %v5581_v43  ;;  %v5805_v39 = vsel %vm996_vm3, %v14810_v11, -inf  ;;  %v5811_v37 = vsel %vm996_vm3, %v14815_v62, -inf }
0x1285   : > { %v12219_v41 = vpop.f32.mrf.mxu1  ;;  %5806 = vmax.xlane.f32.xlu0 %v5805_v39  ;;  %5803 = vmax.xlane.f32.xlu1 %v5802_v49  ;;  %v12225_v56 = vpop.f32.mrf.mxu0 }
0x1286   : > { %v14820_v13 = vadd.f32 %v5766_v14, %v13357_v8  ;;  %v14823_v15 = vadd.f32 %v5768_v36, %v13357_v8 }
0x1287   : > { %v5622_v17 = vpop.f32.mrf.mxu1  ;;  %v5666_v40 = vpop.f32.mrf.mxu0 }
0x1288   : > { %v5769_v31 = vmul.f32 0.5, %v5622_v17  ;;  %v5771_v16 = vmul.f32 0.5, %v5666_v40  ;;  %v5808_v29 = vsel %vm996_vm3, %v14820_v13, -inf  ;;  %v5814_v14 = vsel %vm996_vm3, %v14823_v15, -inf }
0x1289   : > { %v12230_v24 = vpop.f32.mrf.mxu1  ;;  %5809 = vmax.xlane.f32.xlu1 %v5808_v29  ;;  %5812 = vmax.xlane.f32.xlu0 %v5811_v37  ;;  %v12236_v47 = vpop.f32.mrf.mxu0 }
0x128a   : > { %v14830_v12 = vadd.f32 %v5769_v31, %v13346_v5  ;;  %v14835_v36 = vadd.f32 %v5771_v16, %v13346_v5 }
0x128b   : > { %v5625_v43 = vpop.f32.mrf.mxu1  ;;  %v5669_v49 = vpop.f32.mrf.mxu0 }
0x128c   : > { %v5770_v39 = vmul.f32 0.5, %v5625_v43  ;;  %v5772_v41 = vmul.f32 0.5, %v5669_v49  ;;  %v5817_v56 = vsel %vm996_vm3, %v14830_v12, -inf  ;;  %v5823_v49 = vsel %vm996_vm3, %v14835_v36, -inf }
0x128d   : > { %v12231_v17 = vpop.f32.mrf.mxu1  ;;  %5818 = vmax.xlane.f32.xlu0 %v5817_v56  ;;  %5815 = vmax.xlane.f32.xlu1 %v5814_v14  ;;  %v12237_v40 = vpop.f32.mrf.mxu0 }
0x128e   : > { %v14840_v31 = vadd.f32 %v5770_v39, %v13357_v8  ;;  %v14843_v29 = vadd.f32 %v5772_v41, %v13357_v8 }
0x128f   : > { %v5710_v37 = vpop.f32.mrf.mxu1  ;;  %v5754_v24 = vpop.f32.mrf.mxu0 }
0x1290   : > { %v5773_v47 = vmul.f32 0.5, %v5710_v37  ;;  %v5775_v16 = vmul.f32 0.5, %v5754_v24  ;;  %v5820_v43 = vsel %vm996_vm3, %v14840_v31, -inf  ;;  %v5826_v40 = vsel %vm996_vm3, %v14843_v29, -inf }
0x1291   : > { %v12242_v17 = vpop.f32.mrf.mxu1  ;;  %5821 = vmax.xlane.f32.xlu1 %v5820_v43  ;;  %5824 = vmax.xlane.f32.xlu0 %v5823_v49  ;;  %v12248_v14 = vpop.f32.mrf.mxu0 }
0x1292   : > { %v14850_v39 = vadd.f32 %v5773_v47, %v13346_v5  ;;  %v14855_v37 = vadd.f32 %v5775_v16, %v13346_v5 }
0x1293   : > { %v5713_v56 = vpop.f32.mrf.mxu1  ;;  %v5757_v41 = vpop.f32.mrf.mxu0 }
0x1294   : > { %v5774_v24 = vmul.f32 0.5, %v5713_v56  ;;  %v5776_v26 = vmul.f32 0.5, %v5757_v41  ;;  %v5829_v20 = vsel %vm996_vm3, %v14850_v39, -inf  ;;  %v5835_v16 = vsel %vm996_vm3, %v14855_v37, -inf }
0x1295   : > { %v12243_v17 = vpop.f32.mrf.mxu1  ;;  %5830 = vmax.xlane.f32.xlu0 %v5829_v20  ;;  %5827 = vmax.xlane.f32.xlu1 %v5826_v40  ;;  %v12249_v43 = vpop.f32.mrf.mxu0 }
0x1296   : > { %v14860_v47 = vadd.f32 %v5774_v24, %v13357_v8  ;;  %v14863_v49 = vadd.f32 %v5776_v26, %v13357_v8  ;;  %v12903_v8 = vld [vmem:[%s15623_s29 + $0x4] ss:$8 sps:$4 sm:$0xff] (%p3788_p1)  }
0x1298   : > { %v5832_v14 = vsel %vm996_vm3, %v14860_v47, -inf  ;;  %v5838_v56 = vsel %vm996_vm3, %v14863_v49, -inf }
0x1299   : > { %5833 = vmax.xlane.f32.xlu1 %v5832_v14  ;;  %5836 = vmax.xlane.f32.xlu0 %v5835_v16 }
0x129d   : > { %5839 = vmax.xlane.f32.xlu1 %v5838_v56 }
0x1306   : > { %v5795_v20 = vpop.xlane.xlu0 %5794 }
0x1307   : > { %v5841_v41 = vsub.f32 %v14792_v53, %v5795_v20 }
0x1309   : > { %v5857_v40 = vmul.f32 1.442695, %v5841_v41 }
0x130a   : > { %v5798_v24 = vpop.xlane.xlu1 %5797  ;;  %v5801_v17 = vpop.xlane.xlu0 %5800 }
0x130b   : > { %12828 = vpow2.f32 %v5857_v40  ;;  %v5842_v26 = vsub.f32 %v14800_v23, %v5798_v24  ;;  %v5843_v43 = vsub.f32 %v14795_v50, %v5801_v17 }
0x130d   : > { %v5859_v57 = vmul.f32 1.442695, %v5842_v26  ;;  %v5861_v34 = vmul.f32 1.442695, %v5843_v43 }
0x130e   : > { %v5807_v19 = vpop.xlane.xlu0 %5806  ;;  %v5804_v14 = vpop.xlane.xlu1 %5803 }
0x130f   : > { %12830 = vpow2.f32 %v5859_v57  ;;  %v5845_v16 = vsub.f32 %v14810_v11, %v5807_v19  ;;  %v5844_v56 = vsub.f32 %v14803_v27, %v5804_v14 }
0x1310   : > { %12832 = vpow2.f32 %v5861_v34 }
0x1311   : > { %v5865_v45 = vmul.f32 1.442695, %v5845_v16  ;;  %v5863_v53 = vmul.f32 1.442695, %v5844_v56 }
0x1312   : > { %v5810_v20 = vpop.xlane.xlu1 %5809  ;;  %v5813_v41 = vpop.xlane.xlu0 %5812 }
0x1313   : > { %12834 = vpow2.f32 %v5865_v45  ;;  %v5846_v40 = vsub.f32 %v14820_v13, %v5810_v20  ;;  %v5847_v23 = vsub.f32 %v14815_v62, %v5813_v41 }
0x1314   : > { %12836 = vpow2.f32 %v5863_v53 }
0x1315   : > { %v5867_v50 = vmul.f32 1.442695, %v5846_v40  ;;  %v5869_v24 = vmul.f32 1.442695, %v5847_v23 }
0x1316   : > { %v5819_v17 = vpop.xlane.xlu0 %5818  ;;  %v5816_v26 = vpop.xlane.xlu1 %5815 }
0x1317   : > { %12838 = vpow2.f32 %v5867_v50  ;;  %v5849_v19 = vsub.f32 %v14830_v12, %v5819_v17  ;;  %v5848_v57 = vsub.f32 %v14823_v15, %v5816_v26 }
0x1318   : > { %v14880_v34 = vpop.eup %12828  ;;  %12840 = vpow2.f32 %v5869_v24 }
0x1319   : > { %v5873_v27 = vmul.f32 1.442695, %v5849_v19  ;;  %v5871_v11 = vmul.f32 1.442695, %v5848_v57  ;;  %v5889_v45 = vsel %vm996_vm3, %v14880_v34, 0.0 }
0x131a   : > { %v5822_v13 = vpop.xlane.xlu1 %5821  ;;  %v5825_v62 = vpop.xlane.xlu0 %5824  ;;  %5890 = vadd.xlane.f32.xlu0 %v5889_v45 }
0x131b   : > { %12842 = vpow2.f32 %v5873_v27  ;;  %v5850_v43 = vsub.f32 %v14840_v31, %v5822_v13  ;;  %v5851_v14 = vsub.f32 %v14835_v36, %v5825_v62 }
0x131c   : > { %v14886_v16 = vpop.eup %12830  ;;  %12844 = vpow2.f32 %v5871_v11 }
0x131d   : > { %v14888_v15 = vpop.eup %12832  ;;  %v5875_v12 = vmul.f32 1.442695, %v5850_v43  ;;  %v5877_v56 = vmul.f32 1.442695, %v5851_v14  ;;  %v5892_v53 = vsel %vm996_vm3, %v14886_v16, 0.0 }
0x131e   : > { %v5831_v20 = vpop.xlane.xlu0 %5830  ;;  %v5828_v41 = vpop.xlane.xlu1 %5827  ;;  %v5895_v40 = vsel %vm996_vm3, %v14888_v15, 0.0  ;;  %5893 = vadd.xlane.f32.xlu1 %v5892_v53 }
0x131f   : > { %12846 = vpow2.f32 %v5875_v12  ;;  %v5853_v31 = vsub.f32 %v14850_v39, %v5831_v20  ;;  %v5852_v36 = vsub.f32 %v14843_v29, %v5828_v41  ;;  %5896 = vadd.xlane.f32.xlu0 %v5895_v40 }
0x1320   : > { %v14896_v23 = vpop.eup %12834  ;;  %12848 = vpow2.f32 %v5877_v56 }
0x1321   : > { %v14898_v50 = vpop.eup %12836  ;;  %v5881_v24 = vmul.f32 1.442695, %v5853_v31  ;;  %v5879_v17 = vmul.f32 1.442695, %v5852_v36  ;;  %v5901_v26 = vsel %vm996_vm3, %v14896_v23, 0.0 }
0x1322   : > { %v5834_v19 = vpop.xlane.xlu1 %5833  ;;  %v5837_v57 = vpop.xlane.xlu0 %5836  ;;  %v5898_v27 = vsel %vm996_vm3, %v14898_v50, 0.0 }
0x1323   : > { %12850 = vpow2.f32 %v5881_v24  ;;  %v5854_v39 = vsub.f32 %v14860_v47, %v5834_v19  ;;  %5902 = vadd.xlane.f32.xlu0 %v5901_v26  ;;  %v5855_v29 = vsub.f32 %v14855_v37, %v5837_v57  ;;  %5899 = vadd.xlane.f32.xlu1 %v5898_v27 }
0x1324   : > { %v14906_v11 = vpop.eup %12838  ;;  %12852 = vpow2.f32 %v5879_v17 }
0x1325   : > { %v14908_v45 = vpop.eup %12840  ;;  %v5883_v13 = vmul.f32 1.442695, %v5854_v39  ;;  %v5885_v62 = vmul.f32 1.442695, %v5855_v29  ;;  %v5904_v43 = vsel %vm996_vm3, %v14906_v11, 0.0 }
0x1326   : > { %v5907_v14 = vsel %vm996_vm3, %v14908_v45, 0.0  ;;  %v5840_v12 = vpop.xlane.xlu1 %5839 }
0x1327   : > { %12854 = vpow2.f32 %v5883_v13  ;;  %5908 = vadd.xlane.f32.xlu0 %v5907_v14  ;;  %5905 = vadd.xlane.f32.xlu1 %v5904_v43  ;;  %v5856_v37 = vsub.f32 %v14863_v49, %v5840_v12 }
0x1328   : > { %v14915_v47 = vpop.eup %12842  ;;  %12856 = vpow2.f32 %v5885_v62 }
0x1329   : > { %v14917_v56 = vpop.eup %12844  ;;  %v5887_v53 = vmul.f32 1.442695, %v5856_v37  ;;  %v5913_v20 = vsel %vm996_vm3, %v14915_v47, 0.0 }
0x132a   : > { %v5910_v41 = vsel %vm996_vm3, %v14917_v56, 0.0 }
0x132b   : > { %12858 = vpow2.f32 %v5887_v53  ;;  %5914 = vadd.xlane.f32.xlu0 %v5913_v20  ;;  %5911 = vadd.xlane.f32.xlu1 %v5910_v41 }
0x132c   : > { %v14923_v40 = vpop.eup %12846 }
0x132d   : > { %v14925_v31 = vpop.eup %12848  ;;  %v5916_v49 = vsel %vm996_vm3, %v14923_v40, 0.0 }
0x132e   : > { %v5919_v36 = vsel %vm996_vm3, %v14925_v31, 0.0 }
0x132f   : > { %5920 = vadd.xlane.f32.xlu0 %v5919_v36  ;;  %5917 = vadd.xlane.f32.xlu1 %v5916_v49 }
0x1330   : > { %v14931_v24 = vpop.eup %12850 }
0x1331   : > { %v14933_v17 = vpop.eup %12852  ;;  %v5925_v26 = vsel %vm996_vm3, %v14931_v24, 0.0 }
0x1332   : > { %v5922_v19 = vsel %vm996_vm3, %v14933_v17, 0.0 }
0x1333   : > { %5926 = vadd.xlane.f32.xlu0 %v5925_v26  ;;  %5923 = vadd.xlane.f32.xlu1 %v5922_v19 }
0x1334   : > { %v14939_v57 = vpop.eup %12854 }
0x1335   : > { %v14941_v27 = vpop.eup %12856  ;;  %v5928_v39 = vsel %vm996_vm3, %v14939_v57, 0.0 }
0x1336   : > { %v5931_v29 = vsel %vm996_vm3, %v14941_v27, 0.0 }
0x1337   : > { %5932 = vadd.xlane.f32.xlu0 %v5931_v29  ;;  %5929 = vadd.xlane.f32.xlu1 %v5928_v39 }
0x1338   : > { %v14947_v13 = vpop.eup %12858 }
0x1339   : > { %v5934_v62 = vsel %vm996_vm3, %v14947_v13, 0.0 }
0x133b   : > { %5935 = vadd.xlane.f32.xlu1 %v5934_v62 }
0x13a3   : > { %v5891_v43 = vpop.xlane.xlu0 %5890 }
0x13a4   : > { %12860 = vrcp.f32 %v5891_v43 }
0x13a7   : > { %v5894_v14 = vpop.xlane.xlu1 %5893 }
0x13a8   : > { %v5897_v12 = vpop.xlane.xlu0 %5896  ;;  %12862 = vrcp.f32 %v5894_v14 }
0x13a9   : > { %12864 = vrcp.f32 %v5897_v12 }
0x13ac   : > { %v5903_v37 = vpop.xlane.xlu0 %5902  ;;  %v5900_v53 = vpop.xlane.xlu1 %5899 }
0x13ad   : > { %12866 = vrcp.f32 %v5900_v53  ;;  %v15612_v53 = vpack.c.bf16 %v14745_v61, %v14742_v35 }
0x13ae   : > { %12868 = vrcp.f32 %v5903_v37 }
0x13b0   : > { %v5909_v20 = vpop.xlane.xlu0 %5908  ;;  %v5906_v41 = vpop.xlane.xlu1 %5905 }
0x13b1   : > { %12870 = vrcp.f32 %v5906_v41  ;;  %v12861_v49 = vpop.eup %12860 }
0x13b2   : > { %12872 = vrcp.f32 %v5909_v20  ;;  %v5953_v39 = vmul.f32 %v12861_v49, %v14880_v34 }
0x13b4   : > { %v5915_v36 = vpop.xlane.xlu0 %5914  ;;  %v5912_v26 = vpop.xlane.xlu1 %5911 }
0x13b5   : > { %v12863_v19 = vpop.eup %12862  ;;  %12874 = vrcp.f32 %v5912_v26 }
0x13b6   : > { %v5954_v29 = vmul.f32 %v12863_v19, %v14886_v16  ;;  %12876 = vrcp.f32 %v5915_v36  ;;  %v12865_v12 = vpop.eup %12864 }
0x13b7   : > { %v5955_v16 = vmul.f32 %v12865_v12, %v14888_v15  ;;  %v15613_v15 = vpack.c.bf16 %v14751_v60, %v14748_v32  ;;  %v15614_v32 = vpack.c.bf16 %v14757_v30, %v14754_v28 }
0x13b8   : > { %v5921_v62 = vpop.xlane.xlu0 %5920  ;;  %v5918_v43 = vpop.xlane.xlu1 %5917  ;;  %v5969_v14 = vpack.c.bf16 %v5954_v29, %v5953_v39 }
0x13b9   : > { %12878 = vrcp.f32 %v5918_v43 }
0x13ba   : > { %12253 = vmatmul.mubr.msk.bf16.vlgmr.msra.gmra.mxu1 %vm996_vm3, %v5969_v14  ;;  %v12867_v37 = vpop.eup %12866  ;;  %12880 = vrcp.f32 %v5921_v62 }
0x13bb   : > { %12263 = vmatpush3.bf16.msra.mxu1 %v15612_v53  ;;  %12264 = vmatprep.mubr.msk.bf16.mxu1 %vm13294_vm4, %v15606_v51  ;;  %v5956_v41 = vmul.f32 %v12867_v37, %v14898_v50  ;;  %v12869_v49 = vpop.eup %12868  ;;  %v15615_v53 = vpack.c.bf16 %v14767_v18, %v14764_v33 }
0x13bc   : > { %v5927_v34 = vpop.xlane.xlu0 %5926  ;;  %v5924_v20 = vpop.xlane.xlu1 %5923  ;;  %12274 = vmatprep.subr.bf16.mxu1 %v15606_v51  ;;  %v5957_v19 = vmul.f32 %v12869_v49, %v14896_v23 }
0x13bd   : > { %12882 = vrcp.f32 %v5924_v20  ;;  %v5970_v36 = vpack.c.bf16 %v5956_v41, %v5955_v16 }
0x13be   : > { %v12871_v26 = vpop.eup %12870  ;;  %12884 = vrcp.f32 %v5927_v34 }
0x13bf   : > { %12259 = vmatmul.mubr.msk.bf16.vlgmr.msra.gmra.mxu0 %vm996_vm3, %v5970_v36  ;;  %v5958_v39 = vmul.f32 %v12871_v26, %v14906_v11  ;;  %v12873_v29 = vpop.eup %12872 }
0x13c0   : > { %v5933_v35 = vpop.xlane.xlu0 %5932  ;;  %v5930_v61 = vpop.xlane.xlu1 %5929  ;;  %12269 = vmatpush3.bf16.msra.mxu0 %v15613_v15  ;;  %12270 = vmatprep.mubr.msk.bf16.mxu0 %vm13294_vm4, %v15606_v51  ;;  %v5959_v23 = vmul.f32 %v12873_v29, %v14908_v45 }
0x13c1   : > { %12886 = vrcp.f32 %v5930_v61  ;;  %v5971_v50 = vpack.c.bf16 %v5958_v39, %v5957_v19  ;;  %12280 = vmatprep.subr.bf16.mxu0 %v15606_v51 }
0x13c2   : > { %v12875_v62 = vpop.eup %12874  ;;  %12888 = vrcp.f32 %v5933_v35 }
0x13c3   : > { %12265 = vmatmul.mubr.msk.bf16.vlgmr.msra.gmra.mxu1 %vm996_vm3, %v5971_v50  ;;  %v5960_v11 = vmul.f32 %v12875_v62, %v14917_v56  ;;  %v12877_v14 = vpop.eup %12876 }
0x13c4   : > { %v5936_v43 = vpop.xlane.xlu1 %5935  ;;  %12275 = vmatpush3.bf16.msra.mxu1 %v15614_v32  ;;  %12276 = vmatprep.mubr.msk.bf16.mxu1 %vm13294_vm4, %v15606_v51  ;;  %v5961_v37 = vmul.f32 %v12877_v14, %v14915_v47 }
0x13c5   : > { %12890 = vrcp.f32 %v5936_v43  ;;  %v5972_v60 = vpack.c.bf16 %v5960_v11, %v5959_v23  ;;  %12286 = vmatprep.subr.bf16.mxu1 %v15606_v51 }
0x13c6   : > { %v12879_v12 = vpop.eup %12878 }
0x13c7   : > { %12271 = vmatmul.mubr.msk.bf16.vlgmr.msra.gmra.mxu0 %vm996_vm3, %v5972_v60  ;;  %v5962_v45 = vmul.f32 %v12879_v12, %v14923_v40  ;;  %v12881_v56 = vpop.eup %12880  ;;  %v15616_v40 = vpack.c.bf16 %v14775_v25, %v14772_v0  ;;  %v15617_v0 = vpack.c.bf16 %v14785_v48, %v14782_v21  ;;  %v12631_v21 = vld [vmem:[%s14269_s4 + $0x30] sm:$0xff]  }
0x13c8   : > { %12281 = vmatpush3.bf16.msra.mxu0 %v15615_v53  ;;  %12282 = vmatprep.mubr.msk.bf16.mxu0 %vm13294_vm4, %v15606_v51  ;;  %v5963_v34 = vmul.f32 %v12881_v56, %v14925_v31 }
0x13c9   : > { %v5973_v28 = vpack.c.bf16 %v5962_v45, %v5961_v37  ;;  %12292 = vmatprep.subr.bf16.mxu0 %v15606_v51 }
0x13ca   : > { %v12883_v30 = vpop.eup %12882 }
0x13cb   : > { %12277 = vmatmul.mubr.msk.bf16.vlgmr.msra.gmra.mxu1 %vm996_vm3, %v5973_v28  ;;  %v5964_v47 = vmul.f32 %v12883_v30, %v14933_v17  ;;  %v12885_v20 = vpop.eup %12884 }
0x13cc   : > { %12287 = vmatpush3.bf16.msra.mxu1 %v15616_v40  ;;  %12288 = vmatprep.mubr.msk.bf16.mxu1 %vm13294_vm4, %v15606_v51  ;;  %v5965_v31 = vmul.f32 %v12885_v20, %v14931_v24  ;;  %v12630_v24 = vld [vmem:[%s14269_s4 + $0x38] sm:$0xff]  }
0x13cd   : > { %v5974_v33 = vpack.c.bf16 %v5964_v47, %v5963_v34  ;;  %12298 = vmatprep.subr.bf16.mxu1 %v15606_v51 }
0x13ce   : > { %v12887_v18 = vpop.eup %12886 }
0x13cf   : > { %v12889_v16 = vpop.eup %12888  ;;  %12283 = vmatmul.mubr.msk.bf16.vlgmr.msra.gmra.mxu0 %vm996_vm3, %v5974_v33  ;;  %v5966_v17 = vmul.f32 %v12887_v18, %v14939_v57 }
0x13d0   : > { %12293 = vmatpush3.bf16.msra.mxu0 %v15617_v0  ;;  %12294 = vmatprep.mubr.msk.bf16.mxu0 %vm13294_vm4, %v15606_v51  ;;  %v5967_v49 = vmul.f32 %v12889_v16, %v14941_v27 }
0x13d1   : > { %v5975_v41 = vpack.c.bf16 %v5966_v17, %v5965_v31 }
0x13d2   : > { %v12891_v25 = vpop.eup %12890 }
0x13d3   : > { %v5968_v36 = vmul.f32 %v12891_v25, %v14947_v13  ;;  %12289 = vmatmul.mubr.msk.bf16.vlgmr.msra.gmra.mxu1 %vm996_vm3, %v5975_v41 }
0x13d4   : > { %12302 = vmatprep.mubr.msk.bf16.mxu1 %vm13294_vm4, %v15606_v51  ;;  %12299 = vmatpush3.bf16.msra.mxu1 %v12630_v24 }
0x13d5   : > { %v5976_v26 = vpack.c.bf16 %v5968_v36, %v5967_v49  ;;  %12300 = vmatprep.subr.bf16.mxu1 %v15606_v51 }
0x13d7   : > { %12295 = vmatmul.mubr.msk.bf16.vlgmr.msra.gmra.mxu0 %vm996_vm3, %v5976_v26 }
0x13d8   : > { %12301 = vmatpush3.bf16.msra.mxu1 %v12631_v21 }
0x147a   : > { %v6014_v48 = vpop.f32.mrf.mxu1 }
0x147c   : > { %v12254_v57 = vpop.f32.mrf.mxu1 }
0x147e   : > { %v6017_v35 = vpop.f32.mrf.mxu1 }
0x147f   : > { %v6058_v27 = vpop.f32.mrf.mxu0 }
0x1480   : > { %v12255_v61 = vpop.f32.mrf.mxu1  ;;  %v6329_v37 = vadd.f32 %v6058_v27, %v6014_v48 }
0x1481   : > { %v12260_v13 = vpop.f32.mrf.mxu0  ;;  %v10870_v61 = vld [vmem:[%s14677_s25 + $0x3] ss:$0 sm:$0xff] }
0x1483   : > { %v6061_v19 = vpop.f32.mrf.mxu0  ;;  %v6102_v39 = vpop.f32.mrf.mxu1 }
0x1484   : > { %v6330_v45 = vadd.f32 %v6061_v19, %v6017_v35  ;;  %v6331_v28 = vadd.f32 %v6329_v37, %v6102_v39 }
0x1485   : > { %v12261_v29 = vpop.f32.mrf.mxu0  ;;  %v12266_v15 = vpop.f32.mrf.mxu1 }
0x1487   : > { %v6105_v50 = vpop.f32.mrf.mxu1  ;;  %v6146_v62 = vpop.f32.mrf.mxu0 }
0x1488   : > { %v6332_v30 = vadd.f32 %v6330_v45, %v6105_v50  ;;  %v6333_v20 = vadd.f32 %v6331_v28, %v6146_v62  ;;  %v6477_v28 = vld [vmem:[%s15025_s21 + $0xc0] sm:$0xff] }
0x1489   : > { %v12267_v43 = vpop.f32.mrf.mxu1  ;;  %v12272_v23 = vpop.f32.mrf.mxu0 }
0x148b   : > { %v6149_v11 = vpop.f32.mrf.mxu0  ;;  %v6190_v14 = vpop.f32.mrf.mxu1 }
0x148c   : > { %v6334_v40 = vadd.f32 %v6332_v30, %v6149_v11  ;;  %v6335_v16 = vadd.f32 %v6333_v20, %v6190_v14  ;;  %v6470_v30 = vld [vmem:[%s15025_s21 + $0x88] sm:$0xff] }
0x148d   : > { %v12273_v32 = vpop.f32.mrf.mxu0  ;;  %v12278_v51 = vpop.f32.mrf.mxu1 }
0x148f   : > { %v6193_v60 = vpop.f32.mrf.mxu1  ;;  %v6234_v12 = vpop.f32.mrf.mxu0 }
0x1490   : > { %v6336_v31 = vadd.f32 %v6334_v40, %v6193_v60  ;;  %v6337_v25 = vadd.f32 %v6335_v16, %v6234_v12  ;;  %v6461_v16 = vld [vmem:[%s15025_s21 + $0x40] sm:$0xff] }
0x1491   : > { %v12279_v56 = vpop.f32.mrf.mxu1  ;;  %v12284_v53 = vpop.f32.mrf.mxu0 }
0x1493   : > { %v6237_v34 = vpop.f32.mrf.mxu0  ;;  %v6278_v47 = vpop.f32.mrf.mxu1 }
0x1494   : > { %v6338_v41 = vadd.f32 %v6336_v31, %v6237_v34  ;;  %v6339_v26 = vadd.f32 %v6337_v25, %v6278_v47  ;;  %v6478_v47 = vld [vmem:[%s15025_s21 + $0xc8] sm:$0xff] }
0x1495   : > { %v12285_v33 = vpop.f32.mrf.mxu0  ;;  %v12290_v18 = vpop.f32.mrf.mxu1  ;;  %v10898_v40 = vcombine.low %v6470_v30, %v6478_v47  ;;  %v6454_v31 = vld [vmem:[%s15025_s21 + $0x8] sm:$0xff] }
0x1496   : > { %v10899_v33 = vcombine.high %v6470_v30, %v6478_v47  ;;  %v6453_v18 = vld [vmem:[%s15025_s21] sm:$0xff] }
0x1497   : > { %v6281_v17 = vpop.f32.mrf.mxu1  ;;  %v6322_v0 = vpop.f32.mrf.mxu0  ;;  %v10880_v25 = vcombine.low %v6453_v18, %v6461_v16  ;;  %v6473_v47 = vld [vmem:[%s15025_s21 + $0xa0] sm:$0xff] }
0x1498   : > { %v6340_v24 = vadd.f32 %v6338_v41, %v6281_v17  ;;  %v6341_v48 = vadd.f32 %v6339_v26, %v6322_v0  ;;  %7050 = vmatprep.subr.bf16.mxu1 %v10899_v33  ;;  %v10881_v17 = vcombine.high %v6453_v18, %v6461_v16  ;;  %v6462_v0 = vld [vmem:[%s15025_s21 + $0x48] sm:$0xff]  ;;  %v6479_v26 = vld [vmem:[%s15025_s21 + $0xd0] sm:$0xff] }
0x1499   : > { %v12291_v49 = vpop.f32.mrf.mxu1  ;;  %v12296_v36 = vpop.f32.mrf.mxu0  ;;  %v10882_v41 = vcombine.low %v6454_v31, %v6462_v0 }
0x149a   : > { %v10883_v49 = vcombine.high %v6454_v31, %v6462_v0  ;;  %v6471_v36 = vld [vmem:[%s15025_s21 + $0x90] sm:$0xff]  ;;  %v6465_v0 = vld [vmem:[%s15025_s21 + $0x60] sm:$0xff] }
0x149b   : > { %v6325_v21 = vpop.f32.mrf.mxu0 }
0x149c   : > { %v6342_v57 = vadd.f32 %v6340_v24, %v6325_v21  ;;  %v6472_v24 = vld [vmem:[%s15025_s21 + $0x98] sm:$0xff]  ;;  %v13295_v21 = vmov 0  }
0x149d   : > { %v12297_v35 = vpop.f32.mrf.mxu0  ;;  %7027 = vmatprep.mubr.bf16.mxu0 %v13295_v21 }
0x149e   : > { %v6343_v27 = vpack.c.bf16 %v6342_v57, %v6341_v48  ;;  %v10901_v48 = vcombine.high %v6471_v36, %v6479_v26  ;;  %v6480_v57 = vld [vmem:[%s15025_s21 + $0xd8] sm:$0xff]  ;;  %v10900_v35 = vcombine.low %v6471_v36, %v6479_v26 }
0x14a0   : > { %12303 = vmatmul.mubr.msk.bf16.vlgmr.msra.gmra.mxu1 %vm349_vm2, %v6343_v27  ;;  %v10902_v27 = vcombine.low %v6472_v24, %v6480_v57 }
0x14a1   : > { %7051 = vmatpush1.bf16.msra.mxu1 %v10898_v40  ;;  %7070 = vmatprep.mubr.bf16.mxu1 %v13295_v21  ;;  %v6482_v40 = vld [vmem:[%s15025_s21 + $0xe8] sm:$0xff] }
0x14a2   : > { %7052 = vmatprep.subr.bf16.mxu1 %v10883_v49 }
0x14a5   : > { %7053 = vmatpush1.bf16.msra.mxu1 %v10882_v41  ;;  %v6466_v41 = vld [vmem:[%s15025_s21 + $0x68] sm:$0xff] }
0x1560   : > { %v6399_v13 = vpop.f32.mrf.mxu1 }
0x1561   : > { %v6400_v19 = vadd.f32 %v10870_v61, %v6399_v13 }
0x1562   : > { %v12304_v39 = vpop.f32.mrf.mxu1 }
0x1563   : > { %v6406_v29 = vadd.f32 %v6400_v19, %v14665_v52 }
0x1564   : > { %v6402_v15 = vpop.f32.mrf.mxu1 }
0x1565   : > { %v6403_v50 = vadd.f32 %v10870_v61, %v6402_v15  ;;  %v6408_v62 = vsel %vm349_vm2, %v6406_v29, 0.0  ;;  %v10903_v61 = vcombine.high %v6472_v24, %v6480_v57  ;;  %v6483_v57 = vld [vmem:[%s15025_s21 + $0xf0] sm:$0xff] }
0x1566   : > { %6409 = vadd.xlane.f32.xlu0 %v6408_v62  ;;  %v12305_v43 = vpop.f32.mrf.mxu1 }
0x1567   : > { %v6407_v23 = vadd.f32 %v6403_v50, %v14667_v22  ;;  %v6469_v22 = vld [vmem:[%s15025_s21 + $0x80] sm:$0xff]  ;;  %7136 = vmatprep.subr.bf16.mxu1 %v10903_v61 }
0x1568   : > { %v10897_v34 = vcombine.high %v6469_v22, %v6477_v28  ;;  %v10896_v20 = vcombine.low %v6469_v22, %v6477_v28 }
0x1569   : > { %v6411_v11 = vsel %vm349_vm2, %v6407_v23, 0.0 }
0x156a   : > { %6412 = vadd.xlane.f32.xlu1 %v6411_v11  ;;  %7007 = vmatprep.subr.bf16.mxu0 %v10897_v34 }
0x156b   : > { %7008 = vmatpush1.bf16.msra.mxu0 %v10896_v20  ;;  %v6481_v20 = vld [vmem:[%s15025_s21 + $0xe0] sm:$0xff] }
0x156c   : > { %7009 = vmatprep.subr.bf16.mxu0 %v10881_v17  ;;  %v10905_v16 = vcombine.high %v6473_v47, %v6481_v20  ;;  %v6457_v17 = vld [vmem:[%s15025_s21 + $0x20] sm:$0xff]  ;;  %v10904_v49 = vcombine.low %v6473_v47, %v6481_v20  ;;  %v12640_v47 = vld [vmem:[%s14278_s9 + $0x68] sm:$0xff]  }
0x156d   : > { %v10889_v26 = vcombine.high %v6457_v17, %v6465_v0  ;;  %v10888_v61 = vcombine.low %v6457_v17, %v6465_v0  ;;  %v12641_v20 = vld [vmem:[%s14278_s9 + $0xe8] sm:$0xff]   ;;  %v12649_v17 = vld [vmem:[%s14278_s9 + $0xd8] sm:$0xff]  }
0x156e   : > { %v12650_v0 = vld [vmem:[%s14278_s9 + $0x18] sm:$0xff]  }
0x156f   : > { %7010 = vmatpush1.bf16.msra.mxu0 %v10880_v25  ;;  %v6458_v25 = vld [vmem:[%s15025_s21 + $0x28] sm:$0xff] }
0x1570   : > { %7093 = vmatprep.subr.bf16.mxu0 %v10901_v48  ;;  %v10891_v24 = vcombine.high %v6458_v25, %v6466_v41  ;;  %v6475_v48 = vld [vmem:[%s15025_s21 + $0xb0] sm:$0xff] }
0x15ef   : > { %v6410_v14 = vpop.xlane.xlu0 %6409 }
0x15f0   : > { %v6414_v32 = vmul.f32 0.03125, %v6410_v14 }
0x15f2   : > { %v6416_v51 = vsub.f32 %v6406_v29, %v6414_v32 }
0x15f3   : > { %v6413_v60 = vpop.xlane.xlu1 %6412 }
0x15f4   : > { %v6415_v12 = vmul.f32 0.03125, %v6413_v60  ;;  %v6418_v37 = vmul.f32 %v6416_v51, %v6416_v51  ;;  %v10875_v60 = vld [vmem:[%s14661_s16 + $0x3] ss:$0 sm:$0xff] }
0x15f6   : > { %v6417_v52 = vsub.f32 %v6407_v23, %v6415_v12  ;;  %v6420_v45 = vsel %vm349_vm2, %v6418_v37, 0.0  ;;  %v10874_v23 = vld [vmem:[%s14661_s16 + $0x2] ss:$0 sm:$0xff]  ;;  %v6455_v37 = vld [vmem:[%s15025_s21 + $0x10] sm:$0xff] }
0x15f7   : > { %6421 = vadd.xlane.f32.xlu0 %v6420_v45  ;;  %v6463_v45 = vld [vmem:[%s15025_s21 + $0x50] sm:$0xff] }
0x15f8   : > { %v6419_v56 = vmul.f32 %v6417_v52, %v6417_v52  ;;  %v10885_v30 = vcombine.high %v6455_v37, %v6463_v45  ;;  %v10884_v33 = vcombine.low %v6455_v37, %v6463_v45  ;;  %v12633_v37 = vld [vmem:[%s14278_s9 + $0xf8] sm:$0xff]  }
0x15f9   : > { %v12634_v45 = vld [vmem:[%s14278_s9 + $0x38] sm:$0xff]  }
0x15fa   : > { %v6423_v53 = vsel %vm349_vm2, %v6419_v56, 0.0  ;;  %v6456_v56 = vld [vmem:[%s15025_s21 + $0x18] sm:$0xff] }
0x15fb   : > { %6424 = vadd.xlane.f32.xlu1 %v6423_v53  ;;  %v6464_v53 = vld [vmem:[%s15025_s21 + $0x58] sm:$0xff] }
0x15fc   : > { %v10887_v34 = vcombine.high %v6456_v56, %v6464_v53  ;;  %v10886_v18 = vcombine.low %v6456_v56, %v6464_v53  ;;  %v12635_v56 = vld [vmem:[%s14278_s9 + $0xb8] sm:$0xff]   ;;  %v12636_v53 = vld [vmem:[%s14278_s9 + $0x70] sm:$0xff]  }
0x1680   : > { %v6422_v13 = vpop.xlane.xlu0 %6421 }
0x1681   : > { %v6426_v19 = vmul.f32 0.03125, %v6422_v13  ;;  %v10890_v13 = vcombine.low %v6458_v25, %v6466_v41  ;;  %v12651_v25 = vld [vmem:[%s14278_s9 + $0x98] sm:$0xff]   ;;  %v12652_v41 = vld [vmem:[%s14278_s9 + $0x50] sm:$0xff]  }
0x1683   : > { %v6428_v39 = vadd.f32 1e-05, %v6426_v19  ;;  %v10909_v19 = vcombine.high %v6475_v48, %v6483_v57 }
0x1684   : > { %v6425_v29 = vpop.xlane.xlu1 %6424 }
0x1685   : > { %12892 = vrsqrt.f32 %v6428_v39  ;;  %v6427_v15 = vmul.f32 0.03125, %v6425_v29  ;;  %v6459_v29 = vld [vmem:[%s15025_s21 + $0x30] sm:$0xff] }
0x1687   : > { %v6429_v50 = vadd.f32 1e-05, %v6427_v15  ;;  %v6467_v15 = vld [vmem:[%s15025_s21 + $0x70] sm:$0xff] }
0x1689   : > { %12894 = vrsqrt.f32 %v6429_v50  ;;  %v6460_v50 = vld [vmem:[%s15025_s21 + $0x38] sm:$0xff] }
0x1692   : > { %v12893_v62 = vpop.eup %12892 }
0x1693   : > { %v6432_v43 = vmul.f32 %v12893_v62, %v6416_v51  ;;  %v6468_v62 = vld [vmem:[%s15025_s21 + $0x78] sm:$0xff] }
0x1695   : > { %v6440_v14 = vmul.f32 %v10874_v23, %v6432_v43  ;;  %v10908_v43 = vcombine.low %v6475_v48, %v6483_v57  ;;  %v12657_v48 = vld [vmem:[%s14278_s9 + $0xc8] sm:$0xff]  }
0x1696   : > { %v12895_v11 = vpop.eup %12894  ;;  %v12658_v57 = vld [vmem:[%s14278_s9 + $0x8] sm:$0xff]  }
0x1697   : > { %v6433_v32 = vmul.f32 %v12895_v11, %v6417_v52  ;;  %v15047_v22 = vadd.f32 %v10875_v60, %v6440_v14  ;;  %v6474_v52 = vld [vmem:[%s15025_s21 + $0xa8] sm:$0xff]  ;;  %v10893_v11 = vcombine.high %v6459_v29, %v6467_v15  ;;  %v10895_v14 = vcombine.high %v6460_v50, %v6468_v62 }
0x1698   : > { %v10907_v31 = vcombine.high %v6474_v52, %v6482_v40  ;;  %v10906_v36 = vcombine.low %v6474_v52, %v6482_v40  ;;  %v12642_v52 = vld [vmem:[%s14278_s9 + $0x28] sm:$0xff]  }
0x1699   : > { %v6441_v12 = vmul.f32 %v10874_v23, %v6433_v32  ;;  %v10892_v32 = vcombine.low %v6459_v29, %v6467_v15  ;;  %v12643_v40 = vld [vmem:[%s14278_s9 + $0xa8] sm:$0xff]   ;;  %v12665_v29 = vld [vmem:[%s14278_s9 + $0x1f8] sm:$0xff]   ;;  %v15132_v15 = vld [vmem:[%s15129_s5] sm:$0xff] }
0x169b   : > { %v15049_v28 = vadd.f32 %v10875_v60, %v6441_v12  ;;  %v10894_v60 = vcombine.low %v6460_v50, %v6468_v62  ;;  %v12632_v12 = vld [vmem:[%s14278_s9 + $0x78] sm:$0xff]  }
0x169d   : > { %v15053_v51 = vpack.c.bf16 %v15049_v28, %v15047_v22 }
0x169f   : > { %10912 = vmatmul.mubr.msk.bf16.vlgmr.msra.gmra.mxu0 %vm349_vm2, %v15053_v51  ;;  %10913 = vmatmul.mubr.msk.bf16.vlgmr.msra.gmra.mxu1 %vm349_vm2, %v15053_v51 }
0x16a0   : > { %7094 = vmatpush1.bf16.msra.mxu0 %v10900_v35  ;;  %7137 = vmatpush1.bf16.msra.mxu1 %v10902_v27  ;;  %v6476_v35 = vld [vmem:[%s15025_s21 + $0xb8] sm:$0xff] }
0x16a1   : > { %7095 = vmatprep.subr.bf16.mxu0 %v10885_v30  ;;  %7138 = vmatprep.subr.bf16.mxu1 %v10887_v34  ;;  %v6484_v27 = vld [vmem:[%s15025_s21 + $0xf8] sm:$0xff]  ;;  %v12637_v30 = vld [vmem:[%s14278_s9 + $0xf0] sm:$0xff]  }
0x16a2   : > { %7113 = vmatprep.mubr.bf16.mxu0 %v13295_v21  ;;  %7156 = vmatprep.mubr.bf16.mxu1 %v13295_v21  ;;  %v10911_v39 = vcombine.high %v6476_v35, %v6484_v27  ;;  %v10910_v23 = vcombine.low %v6476_v35, %v6484_v27  ;;  %v12639_v34 = vld [vmem:[%s14278_s9 + $0xb0] sm:$0xff]   ;;  %v12659_v35 = vld [vmem:[%s14278_s9 + $0x88] sm:$0xff]   ;;  %v12660_v27 = vld [vmem:[%s14278_s9 + $0x40] sm:$0xff]  }
0x16a4   : > { %7096 = vmatpush1.bf16.msra.mxu0 %v10884_v33  ;;  %7139 = vmatpush1.bf16.msra.mxu1 %v10886_v18  ;;  %v12645_v33 = vld [vmem:[%s14278_s9 + $0xe0] sm:$0xff]  }
0x16a5   : > { %7179 = vmatprep.subr.bf16.mxu0 %v10905_v16  ;;  %7222 = vmatprep.subr.bf16.mxu1 %v10907_v31  ;;  %v12646_v18 = vld [vmem:[%s14278_s9 + $0x20] sm:$0xff]   ;;  %v12648_v31 = vld [vmem:[%s14278_s9 + $0x58] sm:$0xff]  }
0x16a6   : > { %v12647_v16 = vld [vmem:[%s14278_s9 + $0xa0] sm:$0xff]  }
0x16a7   : > { %10914 = vmatmul.mubr.msk.bf16.vlgmr.msra.gmra.mxu0 %vm349_vm2, %v15053_v51  ;;  %10915 = vmatmul.mubr.msk.bf16.vlgmr.msra.gmra.mxu1 %vm349_vm2, %v15053_v51 }
0x16a8   : > { %7180 = vmatpush1.bf16.msra.mxu0 %v10904_v49  ;;  %7223 = vmatpush1.bf16.msra.mxu1 %v10906_v36  ;;  %v12653_v49 = vld [vmem:[%s14278_s9 + $0xd0] sm:$0xff]  }
0x16a9   : > { %7181 = vmatprep.subr.bf16.mxu0 %v10889_v26  ;;  %7224 = vmatprep.subr.bf16.mxu1 %v10891_v24  ;;  %v12654_v36 = vld [vmem:[%s14278_s9 + $0x10] sm:$0xff]   ;;  %v12656_v24 = vld [vmem:[%s14278_s9 + $0x48] sm:$0xff]  }
0x16aa   : > { %7199 = vmatprep.mubr.bf16.mxu0 %v13295_v21  ;;  %7242 = vmatprep.mubr.bf16.mxu1 %v13295_v21  ;;  %v12655_v26 = vld [vmem:[%s14278_s9 + $0x90] sm:$0xff]  }
0x16ac   : > { %7182 = vmatpush1.bf16.msra.mxu0 %v10888_v61  ;;  %7225 = vmatpush1.bf16.msra.mxu1 %v10890_v13  ;;  %v12661_v61 = vld [vmem:[%s14278_s9 + $0xc0] sm:$0xff]  }
0x16ad   : > { %7265 = vmatprep.subr.bf16.mxu0 %v10909_v19  ;;  %7308 = vmatprep.subr.bf16.mxu1 %v10911_v39  ;;  %v12662_v13 = vld [vmem:[%s14278_s9] sm:$0xff]   ;;  %v12664_v39 = vld [vmem:[%s14278_s9 + $0x178] sm:$0xff]  }
0x16ae   : > { %v12663_v19 = vld [vmem:[%s14278_s9 + $0x80] sm:$0xff]  }
0x16af   : > { %10916 = vmatmul.mubr.msk.bf16.vlgmr.msra.gmra.mxu0 %vm349_vm2, %v15053_v51  ;;  %10917 = vmatmul.mubr.msk.bf16.vlgmr.msra.gmra.mxu1 %vm349_vm2, %v15053_v51 }
0x16b0   : > { %7266 = vmatpush1.bf16.msra.mxu0 %v10908_v43  ;;  %7309 = vmatpush1.bf16.msra.mxu1 %v10910_v23  ;;  %v6759_v43 = vrot.slane %v15132_v15, %v14016_v42  ;;  %v6767_v23 = vrot.slane %v15132_v15, %v14019_v58 }
0x16b1   : > { %7267 = vmatprep.subr.bf16.mxu0 %v10893_v11  ;;  %7310 = vmatprep.subr.bf16.mxu1 %v10895_v14  ;;  %v6755_v11 = vrot.slane %v15132_v15, %v14022_v59  ;;  %v6763_v14 = vrot.slane %v15132_v15, %v14025_v63 }
0x16b2   : > { %7285 = vmatprep.mubr.bf16.mxu0 %v13295_v21  ;;  %7328 = vmatprep.mubr.bf16.mxu1 %v13295_v21  ;;  %v12638_v21 = vld [vmem:[%s14278_s9 + $0x30] sm:$0xff]  }
0x16b4   : > { %7268 = vmatpush1.bf16.msra.mxu0 %v10892_v32  ;;  %7311 = vmatpush1.bf16.msra.mxu1 %v10894_v60 }
0x16b5   : > { %11746 = vmatprep.subr.bf16.mxu0 %v12632_v12  ;;  %11768 = vmatprep.subr.bf16.mxu1 %v12633_v37 }
0x16b7   : > { %10918 = vmatmul.mubr.msk.bf16.vlgmr.msra.gmra.mxu0 %vm349_vm2, %v15053_v51  ;;  %10919 = vmatmul.mubr.msk.bf16.vlgmr.msra.gmra.mxu1 %vm349_vm2, %v15053_v51  ;;  %v12644_v51 = vld [vmem:[%s14278_s9 + $0x60] sm:$0xff]  }
0x16b8   : > { %11747 = vmatpush3.bf16.msra.mxu0 %v12634_v45  ;;  %11769 = vmatpush3.bf16.msra.mxu1 %v12635_v56 }
0x16b9   : > { %11748 = vmatprep.subr.bf16.mxu0 %v12636_v53  ;;  %11770 = vmatprep.subr.bf16.mxu1 %v12637_v30 }
0x16bc   : > { %11749 = vmatpush3.bf16.msra.mxu0 %v12638_v21  ;;  %11771 = vmatpush3.bf16.msra.mxu1 %v12639_v34 }
0x16bd   : > { %11750 = vmatprep.subr.bf16.mxu0 %v12640_v47  ;;  %11772 = vmatprep.subr.bf16.mxu1 %v12641_v20 }
0x16c0   : > { %11751 = vmatpush3.bf16.msra.mxu0 %v12642_v52  ;;  %11773 = vmatpush3.bf16.msra.mxu1 %v12643_v40 }
0x16c1   : > { %11752 = vmatprep.subr.bf16.mxu0 %v12644_v51  ;;  %11774 = vmatprep.subr.bf16.mxu1 %v12645_v33 }
0x16c4   : > { %11753 = vmatpush3.bf16.msra.mxu0 %v12646_v18  ;;  %11775 = vmatpush3.bf16.msra.mxu1 %v12647_v16 }
0x16c5   : > { %11754 = vmatprep.subr.bf16.mxu0 %v12648_v31  ;;  %11776 = vmatprep.subr.bf16.mxu1 %v12649_v17  ;;  %v6775_v31 = vrot.slane %v15132_v15, %v14039_v44  ;;  %v6783_v17 = vrot.slane %v15132_v15, %v14042_v46 }
0x16c8   : > { %11755 = vmatpush3.bf16.msra.mxu0 %v12650_v0  ;;  %11777 = vmatpush3.bf16.msra.mxu1 %v12651_v25 }
0x16c9   : > { %11756 = vmatprep.subr.bf16.mxu0 %v12652_v41  ;;  %11778 = vmatprep.subr.bf16.mxu1 %v12653_v49 }
0x16cc   : > { %11757 = vmatpush3.bf16.msra.mxu0 %v12654_v36  ;;  %11779 = vmatpush3.bf16.msra.mxu1 %v12655_v26 }
0x16cd   : > { %11758 = vmatprep.subr.bf16.mxu0 %v12656_v24  ;;  %11780 = vmatprep.subr.bf16.mxu1 %v12657_v48 }
0x16d0   : > { %11759 = vmatpush3.bf16.msra.mxu0 %v12658_v57  ;;  %11781 = vmatpush3.bf16.msra.mxu1 %v12659_v35 }
0x16d1   : > { %11760 = vmatprep.subr.bf16.mxu0 %v12660_v27  ;;  %11782 = vmatprep.subr.bf16.mxu1 %v12661_v61  ;;  %v12666_v27 = vld [vmem:[%s14278_s9 + $0x138] sm:$0xff]  }
0x16d2   : > { %v12667_v61 = vld [vmem:[%s14278_s9 + $0x1b8] sm:$0xff]  }
0x16d4   : > { %11761 = vmatpush3.bf16.msra.mxu0 %v12662_v13  ;;  %11783 = vmatpush3.bf16.msra.mxu1 %v12663_v19 }
0x16d5   : > { %11790 = vmatprep.subr.bf16.mxu0 %v12664_v39  ;;  %11812 = vmatprep.subr.bf16.mxu1 %v12665_v29 }
0x175f   : > { %v7029_v50 = vpop.f32.mrf.mxu0  ;;  %v7072_v62 = vpop.f32.mrf.mxu1 }
0x1760   : > { %v7030_v21 = vadd.f32 %v7029_v50, %v6755_v11  ;;  %v7073_v34 = vadd.f32 %v7072_v62, %v6763_v14  ;;  %v12668_v50 = vld [vmem:[%s14278_s9 + $0x170] sm:$0xff]  }
0x1761   : > { %v7031_v32 = vpop.f32.mrf.mxu0  ;;  %v7074_v60 = vpop.f32.mrf.mxu1  ;;  %v12669_v62 = vld [vmem:[%s14278_s9 + $0x1f0] sm:$0xff]  }
0x1762   : > { %v7032_v45 = vadd.f32 %v7031_v32, %v6759_v43  ;;  %v7075_v56 = vadd.f32 %v7074_v60, %v6767_v23  ;;  %v7339_v36 = vmax.f32 %v7030_v21, 0.0  ;;  %v7341_v26 = vmax.f32 %v7073_v34, 0.0  ;;  %v12673_v34 = vld [vmem:[%s14278_s9 + $0x1e8] sm:$0xff]  }
0x1763   : > { %v7033_v12 = vpop.f32.mrf.mxu0  ;;  %v7076_v37 = vpop.f32.mrf.mxu1 }
0x1764   : > { %v7034_v53 = vadd.f32 %v7033_v12, %v6755_v11  ;;  %v7077_v30 = vadd.f32 %v7076_v37, %v6763_v14  ;;  %v7340_v0 = vmax.f32 %v7032_v45, 0.0  ;;  %v7342_v25 = vmax.f32 %v7075_v56, 0.0  ;;  %v12670_v12 = vld [vmem:[%s14278_s9 + $0x130] sm:$0xff]   ;;  %v12672_v45 = vld [vmem:[%s14278_s9 + $0x168] sm:$0xff]  }
0x1765   : > { %v7035_v47 = vpop.f32.mrf.mxu0  ;;  %v7078_v20 = vpop.f32.mrf.mxu1  ;;  %v12671_v37 = vld [vmem:[%s14278_s9 + $0x1b0] sm:$0xff]  }
0x1766   : > { %v7036_v52 = vadd.f32 %v7035_v47, %v6759_v43  ;;  %v7079_v40 = vadd.f32 %v7078_v20, %v6767_v23  ;;  %v7355_v51 = vmax.f32 %v7034_v53, 0.0  ;;  %v7357_v33 = vmax.f32 %v7077_v30, 0.0 }
0x1767   : > { %v15142_v18 = vpop.f32.mrf.mxu0  ;;  %v15144_v16 = vpop.f32.mrf.mxu1 }
0x1768   : > { %v7356_v41 = vmax.f32 %v7036_v52, 0.0  ;;  %v7358_v49 = vmax.f32 %v7079_v40, 0.0  ;;  %v7371_v13 = vpack.c.bf16 %v7355_v51, %v7339_v36  ;;  %v7373_v19 = vpack.c.bf16 %v7357_v33, %v7341_v26  ;;  %v12674_v52 = vld [vmem:[%s14278_s9 + $0x128] sm:$0xff]   ;;  %v12676_v51 = vld [vmem:[%s14278_s9 + $0x160] sm:$0xff]   ;;  %v12682_v26 = vld [vmem:[%s14278_s9 + $0x118] sm:$0xff]  }
0x1769   : > { %v7117_v24 = vpop.f32.mrf.mxu0  ;;  %v7160_v48 = vpop.f32.mrf.mxu1  ;;  %v12675_v40 = vld [vmem:[%s14278_s9 + $0x1a8] sm:$0xff]   ;;  %v12677_v33 = vld [vmem:[%s14278_s9 + $0x1e0] sm:$0xff]  }
0x176a   : > { %v7372_v57 = vpack.c.bf16 %v7356_v41, %v7340_v0  ;;  %v7374_v35 = vpack.c.bf16 %v7358_v49, %v7342_v25  ;;  %v7118_v43 = vadd.f32 %v7117_v24, %v6775_v31  ;;  %v7161_v23 = vadd.f32 %v7160_v48, %v6783_v17  ;;  %v12679_v25 = vld [vmem:[%s14278_s9 + $0x1a0] sm:$0xff]   ;;  %v12680_v41 = vld [vmem:[%s14278_s9 + $0x158] sm:$0xff]  }
0x176b   : > { %v15152_v39 = vpop.f32.mrf.mxu0  ;;  %v15154_v29 = vpop.f32.mrf.mxu1  ;;  %v12681_v49 = vld [vmem:[%s14278_s9 + $0x1d8] sm:$0xff]  }
0x176c   : > { %8193 = vmatprep.mubr.bf16.mxu0 %v7372_v57  ;;  %8234 = vmatprep.mubr.bf16.mxu1 %v7374_v35  ;;  %v7344_v56 = vmax.f32 %v7118_v43, 0.0  ;;  %v7346_v53 = vmax.f32 %v7161_v23, 0.0  ;;  %v12683_v48 = vld [vmem:[%s14278_s9 + $0x198] sm:$0xff]   ;;  %v12684_v57 = vld [vmem:[%s14278_s9 + $0x150] sm:$0xff]   ;;  %v6771_v43 = vrot.slane %v15132_v15, %v14081_v54  ;;  %v6779_v23 = vrot.slane %v15132_v15, %v14084_v55 }
0x176d   : > { %v7121_v11 = vpop.f32.mrf.mxu0  ;;  %v7164_v14 = vpop.f32.mrf.mxu1  ;;  %8194 = vmatmul.mubr.bf16.vlgmr.msra.gmra.mxu0 %v7371_v13  ;;  %8235 = vmatmul.mubr.bf16.vlgmr.msra.gmra.mxu1 %v7373_v19  ;;  %v12685_v35 = vld [vmem:[%s14278_s9 + $0x1d0] sm:$0xff]  }
0x176e   : > { %v7122_v32 = vadd.f32 %v7121_v11, %v6775_v31  ;;  %v7165_v60 = vadd.f32 %v7164_v14, %v6783_v17  ;;  %11791 = vmatpush3.bf16.msra.mxu0 %v12666_v27  ;;  %11813 = vmatpush3.bf16.msra.mxu1 %v12667_v61  ;;  %v12678_v17 = vld [vmem:[%s14278_s9 + $0x120] sm:$0xff]   ;;  %v12686_v61 = vld [vmem:[%s14278_s9 + $0x110] sm:$0xff]   ;;  %v15191_v11 = vld [vmem:[%s15129_s5 + $0x8] sm:$0xff]  ;;  %v7163_v15 = vadd.f32 %v15154_v29, %v6779_v23 }
0x176f   : > { %11792 = vmatprep.subr.bf16.mxu0 %v12668_v50  ;;  %11814 = vmatprep.subr.bf16.mxu1 %v12669_v62  ;;  %v15166_v31 = vpop.f32.mrf.mxu0  ;;  %v15169_v0 = vpop.f32.mrf.mxu1  ;;  %v12687_v19 = vld [vmem:[%s14278_s9 + $0x190] sm:$0xff]   ;;  %v12688_v50 = vld [vmem:[%s14278_s9 + $0x148] sm:$0xff]   ;;  %v12695_v29 = vld [vmem:[%s14278_s9 + $0x180] sm:$0xff]  }
0x1770   : > { %v7360_v30 = vmax.f32 %v7122_v32, 0.0  ;;  %v7362_v21 = vmax.f32 %v7165_v60, 0.0  ;;  %v12689_v62 = vld [vmem:[%s14278_s9 + $0x1c8] sm:$0xff]   ;;  %v7120_v60 = vadd.f32 %v15152_v39, %v6771_v43  ;;  %v7116_v39 = vadd.f32 %v15142_v18, %v6771_v43  ;;  %v12702_v43 = vld [vmem:[%s14278_s9 + $0x230] sm:$0xff]  }
0x1771   : > { %v7203_v36 = vpop.f32.mrf.mxu0  ;;  %v7246_v24 = vpop.f32.mrf.mxu1  ;;  %v12690_v32 = vld [vmem:[%s14278_s9 + $0x108] sm:$0xff]  }
0x1772   : > { %v7376_v47 = vpack.c.bf16 %v7360_v30, %v7344_v56  ;;  %v7378_v20 = vpack.c.bf16 %v7362_v21, %v7346_v53  ;;  %11793 = vmatpush3.bf16.msra.mxu0 %v12670_v12  ;;  %11815 = vmatpush3.bf16.msra.mxu1 %v12671_v37  ;;  %v6791_v12 = vrot.slane %v15191_v11, %v14016_v42  ;;  %v12692_v56 = vld [vmem:[%s14278_s9 + $0x140] sm:$0xff]   ;;  %v7343_v18 = vmax.f32 %v7116_v39, 0.0  ;;  %v12712_v39 = vld [vmem:[%s14278_s9 + $0x258] sm:$0xff]  }
0x1773   : > { %11794 = vmatprep.subr.bf16.mxu0 %v12672_v45  ;;  %11816 = vmatprep.subr.bf16.mxu1 %v12673_v34  ;;  %v15178_v27 = vpop.f32.mrf.mxu0  ;;  %v15181_v13 = vpop.f32.mrf.mxu1  ;;  %v12691_v45 = vld [vmem:[%s14278_s9 + $0x188] sm:$0xff]   ;;  %v6799_v53 = vrot.slane %v15191_v11, %v14019_v58  ;;  %v12693_v30 = vld [vmem:[%s14278_s9 + $0x1c0] sm:$0xff]   ;;  %v7159_v34 = vadd.f32 %v15144_v16, %v6779_v23  ;;  %v12703_v23 = vld [vmem:[%s14278_s9 + $0x2b0] sm:$0xff]  }
0x1774   : > { %8275 = vmatprep.mubr.bf16.mxu0 %v7376_v47  ;;  %8316 = vmatprep.mubr.bf16.mxu1 %v7378_v20  ;;  %v12694_v20 = vld [vmem:[%s14278_s9 + $0x100] sm:$0xff]   ;;  %v12908_v58 = vld [vmem:[%s15624_s24 + $0x70] ss:$8 sps:$4 sm:$0xff] (%p3788_p1)  }
0x1775   : > { %v7207_v14 = vpop.f32.mrf.mxu0  ;;  %v7250_v37 = vpop.f32.mrf.mxu1  ;;  %v7345_v16 = vmax.f32 %v7159_v34, 0.0 }
0x1776   : > { %11795 = vmatpush3.bf16.msra.mxu0 %v12674_v52  ;;  %11817 = vmatpush3.bf16.msra.mxu1 %v12675_v40  ;;  %v7208_v21 = vadd.f32 %v7207_v14, %v6791_v12  ;;  %v7251_v47 = vadd.f32 %v7250_v37, %v6799_v53  ;;  %v7359_v52 = vmax.f32 %v7120_v60, 0.0  ;;  %v7204_v40 = vadd.f32 %v7203_v36, %v6791_v12  ;;  %v12704_v14 = vld [vmem:[%s14278_s9 + $0x268] sm:$0xff]   ;;  %v12708_v37 = vld [vmem:[%s14278_s9 + $0x260] sm:$0xff]  }
0x1777   : > { %11796 = vmatprep.subr.bf16.mxu0 %v12676_v51  ;;  %11818 = vmatprep.subr.bf16.mxu1 %v12677_v33  ;;  %v12696_v51 = vld [vmem:[%s14278_s9 + $0x278] sm:$0xff]   ;;  %v7361_v33 = vmax.f32 %v7163_v15, 0.0  ;;  %v12706_v60 = vld [vmem:[%s14278_s9 + $0x228] sm:$0xff]   ;;  %v12710_v15 = vld [vmem:[%s14278_s9 + $0x220] sm:$0xff]  }
0x1778   : > { %v7348_v36 = vmax.f32 %v7204_v40, 0.0  ;;  %v12707_v12 = vld [vmem:[%s14278_s9 + $0x2a8] sm:$0xff]   ;;  %v12716_v40 = vld [vmem:[%s14278_s9 + $0x250] sm:$0xff]  }
0x177a   : > { %11797 = vmatpush3.bf16.msra.mxu0 %v12678_v17  ;;  %11819 = vmatpush3.bf16.msra.mxu1 %v12679_v25  ;;  %v7247_v17 = vadd.f32 %v7246_v24, %v6799_v53  ;;  %v12697_v25 = vld [vmem:[%s14278_s9 + $0x2f8] sm:$0xff]   ;;  %v15224_v53 = vpop.f32.mrf.mxu1 }
0x177b   : > { %11798 = vmatprep.subr.bf16.mxu0 %v12680_v41  ;;  %11820 = vmatprep.subr.bf16.mxu1 %v12681_v49  ;;  %v7364_v41 = vmax.f32 %v7208_v21, 0.0  ;;  %v7366_v49 = vmax.f32 %v7251_v47, 0.0  ;;  %v12713_v21 = vld [vmem:[%s14278_s9 + $0x2d8] sm:$0xff]  }
0x177c   : > { %v7350_v24 = vmax.f32 %v7247_v17, 0.0  ;;  %v12714_v47 = vld [vmem:[%s14278_s9 + $0x218] sm:$0xff]  }
0x177e   : > { %11799 = vmatpush3.bf16.msra.mxu0 %v12682_v26  ;;  %11821 = vmatpush3.bf16.msra.mxu1 %v12683_v48  ;;  %v12698_v26 = vld [vmem:[%s14278_s9 + $0x238] sm:$0xff]   ;;  %v7375_v48 = vpack.c.bf16 %v7359_v52, %v7343_v18  ;;  %v12720_v18 = vld [vmem:[%s14278_s9 + $0x248] sm:$0xff]  }
0x177f   : > { %11800 = vmatprep.subr.bf16.mxu0 %v12684_v57  ;;  %11822 = vmatprep.subr.bf16.mxu1 %v12685_v35  ;;  %v12699_v57 = vld [vmem:[%s14278_s9 + $0x2b8] sm:$0xff]   ;;  %v7377_v35 = vpack.c.bf16 %v7361_v33, %v7345_v16  ;;  %v12718_v33 = vld [vmem:[%s14278_s9 + $0x210] sm:$0xff]   ;;  %v6787_v16 = vrot.slane %v15191_v11, %v14022_v59 }
0x1780   : > { %v12715_v52 = vld [vmem:[%s14278_s9 + $0x298] sm:$0xff]  }
0x1782   : > { %11801 = vmatpush3.bf16.msra.mxu0 %v12686_v61  ;;  %11823 = vmatpush3.bf16.msra.mxu1 %v12687_v19  ;;  %v12700_v61 = vld [vmem:[%s14278_s9 + $0x270] sm:$0xff]   ;;  %v7380_v19 = vpack.c.bf16 %v7364_v41, %v7348_v36  ;;  %v12721_v41 = vld [vmem:[%s14278_s9 + $0x2c8] sm:$0xff]   ;;  %v7206_v36 = vadd.f32 %v15178_v27, %v6787_v16  ;;  %v7202_v27 = vadd.f32 %v15166_v31, %v6787_v16 }
0x1783   : > { %11802 = vmatprep.subr.bf16.mxu0 %v12688_v50  ;;  %11824 = vmatprep.subr.bf16.mxu1 %v12689_v62  ;;  %v12701_v50 = vld [vmem:[%s14278_s9 + $0x2f0] sm:$0xff]   ;;  %v7382_v62 = vpack.c.bf16 %v7366_v49, %v7350_v24  ;;  %v6795_v49 = vrot.slane %v15191_v11, %v14025_v63  ;;  %v12723_v24 = vld [vmem:[%s14278_s9 + $0x288] sm:$0xff]  }
0x1784   : > { %v7347_v31 = vmax.f32 %v7202_v27, 0.0  ;;  %v12734_v16 = vld [vmem:[%s14278_s9 + $0x330] sm:$0xff]   ;;  %v12746_v27 = vld [vmem:[%s14278_s9 + $0x318] sm:$0xff]   ;;  %v12909_v63 = vld [vmem:[%s15624_s24 + $0x64] ss:$8 sps:$4 sm:$0xff] (%p3788_p1)  }
0x1786   : > { %11803 = vmatpush3.bf16.msra.mxu0 %v12690_v32  ;;  %11825 = vmatpush3.bf16.msra.mxu1 %v12691_v45  ;;  %v12705_v32 = vld [vmem:[%s14278_s9 + $0x2e8] sm:$0xff]   ;;  %v12709_v45 = vld [vmem:[%s14278_s9 + $0x2e0] sm:$0xff]  }
0x1787   : > { %11804 = vmatprep.subr.bf16.mxu0 %v12692_v56  ;;  %11826 = vmatprep.subr.bf16.mxu1 %v12693_v30  ;;  %v15221_v56 = vpop.f32.mrf.mxu0  ;;  %v12711_v30 = vld [vmem:[%s14278_s9 + $0x2a0] sm:$0xff]  }
0x1789   : > { %v7289_v34 = vpop.f32.mrf.mxu0 }
0x178a   : > { %11805 = vmatpush3.bf16.msra.mxu0 %v12694_v20  ;;  %11827 = vmatpush3.bf16.msra.mxu1 %v12695_v29  ;;  %v7332_v20 = vpop.f32.mrf.mxu1  ;;  %v12717_v29 = vld [vmem:[%s14278_s9 + $0x2d0] sm:$0xff]  }
0x178b   : > { %11834 = vmatprep.subr.bf16.mxu0 %v12696_v51  ;;  %11856 = vmatprep.subr.bf16.mxu1 %v12697_v25  ;;  %v15233_v51 = vpop.f32.mrf.mxu0  ;;  %v12719_v25 = vld [vmem:[%s14278_s9 + $0x290] sm:$0xff]  }
0x178c   : > { %v15236_v17 = vpop.f32.mrf.mxu1 }
0x178d   : > { %8276 = vmatmul.mubr.bf16.vlgmr.msra.gmra.mxu0 %v7375_v48  ;;  %8317 = vmatmul.mubr.bf16.vlgmr.msra.gmra.mxu1 %v7377_v35  ;;  %v12722_v48 = vld [vmem:[%s14278_s9 + $0x208] sm:$0xff]  }
0x178e   : > { %11835 = vmatpush3.bf16.msra.mxu0 %v12698_v26  ;;  %8357 = vmatprep.mubr.bf16.mxu0 %v7380_v19  ;;  %v7293_v26 = vpop.f32.mrf.mxu0  ;;  %v7336_v35 = vpop.f32.mrf.mxu1  ;;  %v7249_v19 = vadd.f32 %v15181_v13, %v6795_v49  ;;  %v12727_v13 = vld [vmem:[%s14278_s9 + $0x280] sm:$0xff]  }
0x178f   : > { %11857 = vmatpush3.bf16.msra.mxu1 %v12699_v57  ;;  %8398 = vmatprep.mubr.bf16.mxu1 %v7382_v62  ;;  %v6807_v57 = vrot.slane %v15191_v11, %v14039_v44  ;;  %v12725_v62 = vld [vmem:[%s14278_s9 + $0x2c0] sm:$0xff]  }
0x1790   : > { %11836 = vmatprep.subr.bf16.mxu0 %v12700_v61  ;;  %11858 = vmatprep.subr.bf16.mxu1 %v12701_v50  ;;  %v12724_v61 = vld [vmem:[%s14278_s9 + $0x240] sm:$0xff]   ;;  %v6815_v50 = vrot.slane %v15191_v11, %v14042_v46  ;;  %v12912_v46 = vld [vmem:[%s15624_s24 + $0x54] ss:$8 sps:$4 sm:$0xff] (%p3788_p1)  }
0x1791   :  { %v12911_v44 = vld [vmem:[%s15624_s24 + $0x60] ss:$8 sps:$4 sm:$0xff] (%p3788_p1)  }
0x1792   : > { %11837 = vmatpush3.bf16.msra.mxu0 %v12702_v43  ;;  %v7294_v43 = vadd.f32 %v7293_v26, %v6807_v57  ;;  %v12736_v26 = vld [vmem:[%s14278_s9 + $0x368] sm:$0xff]  }
0x1793   : > { %11859 = vmatpush3.bf16.msra.mxu1 %v12703_v23  ;;  %11838 = vmatprep.subr.bf16.mxu0 %v12704_v14  ;;  %v7245_v23 = vadd.f32 %v15169_v0, %v6795_v49  ;;  %v7337_v14 = vadd.f32 %v7336_v35, %v6815_v50  ;;  %v12735_v49 = vld [vmem:[%s14278_s9 + $0x3b0] sm:$0xff]   ;;  %v12740_v35 = vld [vmem:[%s14278_s9 + $0x360] sm:$0xff]  }
0x1794   : > { %11860 = vmatprep.subr.bf16.mxu1 %v12705_v32  ;;  %v12726_v32 = vld [vmem:[%s14278_s9 + $0x200] sm:$0xff]  }
0x1795   : > { %v7349_v0 = vmax.f32 %v7245_v23, 0.0  ;;  %v12748_v23 = vld [vmem:[%s14278_s9 + $0x350] sm:$0xff]  }
0x1796   : > { %11839 = vmatpush3.bf16.msra.mxu0 %v12706_v60  ;;  %v7363_v60 = vmax.f32 %v7206_v36, 0.0  ;;  %v12738_v36 = vld [vmem:[%s14278_s9 + $0x328] sm:$0xff]  }
0x1797   : > { %11861 = vmatpush3.bf16.msra.mxu1 %v12707_v12  ;;  %11840 = vmatprep.subr.bf16.mxu0 %v12708_v37  ;;  %v7290_v12 = vadd.f32 %v7289_v34, %v6807_v57  ;;  %v12728_v37 = vld [vmem:[%s14278_s9 + $0x378] sm:$0xff]   ;;  %v12739_v57 = vld [vmem:[%s14278_s9 + $0x3a8] sm:$0xff]  }
0x1798   : > { %11862 = vmatprep.subr.bf16.mxu1 %v12709_v45  ;;  %v7365_v45 = vmax.f32 %v7249_v19, 0.0  ;;  %v12743_v19 = vld [vmem:[%s14278_s9 + $0x3a0] sm:$0xff]  }
0x1799   : > { %v7352_v34 = vmax.f32 %v7290_v12, 0.0  ;;  %v12752_v12 = vld [vmem:[%s14278_s9 + $0x348] sm:$0xff]  }
0x179a   : > { %11841 = vmatpush3.bf16.msra.mxu0 %v12710_v15  ;;  %v7333_v15 = vadd.f32 %v7332_v20, %v6815_v50  ;;  %v12744_v50 = vld [vmem:[%s14278_s9 + $0x358] sm:$0xff]  }
0x179b   : > { %11863 = vmatpush3.bf16.msra.mxu1 %v12711_v30  ;;  %11842 = vmatprep.subr.bf16.mxu0 %v12712_v39  ;;  %v12729_v30 = vld [vmem:[%s14278_s9 + $0x3f8] sm:$0xff]   ;;  %v7368_v39 = vmax.f32 %v7294_v43, 0.0 }
0x179c   : > { %11864 = vmatprep.subr.bf16.mxu1 %v12713_v21  ;;  %v7370_v21 = vmax.f32 %v7337_v14, 0.0  ;;  %v7354_v20 = vmax.f32 %v7333_v15, 0.0  ;;  %v12747_v43 = vld [vmem:[%s14278_s9 + $0x398] sm:$0xff]   ;;  %v12749_v14 = vld [vmem:[%s14278_s9 + $0x3d0] sm:$0xff]   ;;  %v12754_v15 = vld [vmem:[%s14278_s9 + $0x308] sm:$0xff]  }
0x179e   : > { %11843 = vmatpush3.bf16.msra.mxu0 %v12714_v47  ;;  %v12730_v47 = vld [vmem:[%s14278_s9 + $0x338] sm:$0xff]  }
0x179f   : > { %11865 = vmatpush3.bf16.msra.mxu1 %v12715_v52  ;;  %11844 = vmatprep.subr.bf16.mxu0 %v12716_v40  ;;  %v7379_v52 = vpack.c.bf16 %v7363_v60, %v7347_v31  ;;  %v12731_v40 = vld [vmem:[%s14278_s9 + $0x3b8] sm:$0xff]   ;;  %v12751_v60 = vld [vmem:[%s14278_s9 + $0x390] sm:$0xff]   ;;  %v12755_v31 = vld [vmem:[%s14278_s9 + $0x388] sm:$0xff]  }
0x17a0   : > { %11866 = vmatprep.subr.bf16.mxu1 %v12717_v29  ;;  %v7381_v29 = vpack.c.bf16 %v7365_v45, %v7349_v0  ;;  %v6811_v45 = vrot.slane %v15191_v11, %v14084_v55  ;;  %v12915_v55 = vld [vmem:[%s15624_s24 + $0x44] ss:$8 sps:$4 sm:$0xff] (%p3788_p1)  }
0x17a2   : > { %11845 = vmatpush3.bf16.msra.mxu0 %v12718_v33  ;;  %v12732_v33 = vld [vmem:[%s14278_s9 + $0x370] sm:$0xff]   ;;  %v7335_v0 = vadd.f32 %v15236_v17, %v6811_v45 }
0x17a3   : > { %11867 = vmatpush3.bf16.msra.mxu1 %v12719_v25  ;;  %11846 = vmatprep.subr.bf16.mxu0 %v12720_v18  ;;  %v7384_v25 = vpack.c.bf16 %v7368_v39, %v7352_v34  ;;  %v12733_v18 = vld [vmem:[%s14278_s9 + $0x3f0] sm:$0xff]   ;;  %v12756_v39 = vld [vmem:[%s14278_s9 + $0x340] sm:$0xff]  }
0x17a4   : > { %11868 = vmatprep.subr.bf16.mxu1 %v12721_v41  ;;  %v7386_v41 = vpack.c.bf16 %v7370_v21, %v7354_v20  ;;  %v12757_v21 = vld [vmem:[%s14278_s9 + $0x3c0] sm:$0xff]  }
0x17a5   : > { %v12758_v34 = vld [vmem:[%s14278_s9 + $0x300] sm:$0xff]  }
0x17a6   : > { %11847 = vmatpush3.bf16.msra.mxu0 %v12722_v48  ;;  %v12737_v48 = vld [vmem:[%s14278_s9 + $0x3e8] sm:$0xff]  }
0x17a7   : > { %11869 = vmatpush3.bf16.msra.mxu1 %v12723_v24  ;;  %11848 = vmatprep.subr.bf16.mxu0 %v12724_v61  ;;  %v12741_v24 = vld [vmem:[%s14278_s9 + $0x3e0] sm:$0xff]  }
0x17a8   : > { %11870 = vmatprep.subr.bf16.mxu1 %v12725_v62  ;;  %v12742_v61 = vld [vmem:[%s14278_s9 + $0x320] sm:$0xff]   ;;  %v12745_v62 = vld [vmem:[%s14278_s9 + $0x3d8] sm:$0xff]  }
0x17aa   : > { %11849 = vmatpush3.bf16.msra.mxu0 %v12726_v32  ;;  %v12750_v32 = vld [vmem:[%s14278_s9 + $0x310] sm:$0xff]  }
0x17ab   : > { %11871 = vmatpush3.bf16.msra.mxu1 %v12727_v13  ;;  %11878 = vmatprep.subr.bf16.mxu0 %v12728_v37  ;;  %v12753_v13 = vld [vmem:[%s14278_s9 + $0x3c8] sm:$0xff]   ;;  %v6803_v37 = vrot.slane %v15191_v11, %v14081_v54  ;;  %v12914_v54 = vld [vmem:[%s15624_s24 + $0x50] ss:$8 sps:$4 sm:$0xff] (%p3788_p1)  }
0x17ac   : > { %11900 = vmatprep.subr.bf16.mxu1 %v12729_v30 }
0x17ad   : > { %8358 = vmatmul.mubr.bf16.vlgmr.msra.gmra.mxu0 %v7379_v52  ;;  %v7292_v30 = vadd.f32 %v15233_v51, %v6803_v37  ;;  %v7331_v52 = vadd.f32 %v15224_v53, %v6811_v45 }
0x17ae   : > { %8399 = vmatmul.mubr.bf16.vlgmr.msra.gmra.mxu1 %v7381_v29  ;;  %11879 = vmatpush3.bf16.msra.mxu0 %v12730_v47  ;;  %v7288_v47 = vadd.f32 %v15221_v56, %v6803_v37  ;;  %v7369_v29 = vmax.f32 %v7335_v0, 0.0 }
0x17af   : > { %8439 = vmatprep.mubr.bf16.mxu0 %v7384_v25  ;;  %11901 = vmatpush3.bf16.msra.mxu1 %v12731_v40  ;;  %v7367_v11 = vmax.f32 %v7292_v30, 0.0  ;;  %v12759_v40 = vld [vmem:[%s14278_s9 + $0x380] sm:$0xff]   ;;  %v7353_v20 = vmax.f32 %v7331_v52, 0.0 }
0x17b0   : > { %8480 = vmatprep.mubr.bf16.mxu1 %v7386_v41  ;;  %11880 = vmatprep.subr.bf16.mxu0 %v12732_v33  ;;  %v7351_v51 = vmax.f32 %v7288_v47, 0.0 }
0x17b1   : > { %11902 = vmatprep.subr.bf16.mxu1 %v12733_v18  ;;  %v7385_v17 = vpack.c.bf16 %v7369_v29, %v7353_v20 }
0x17b2   : > { %11881 = vmatpush3.bf16.msra.mxu0 %v12734_v16  ;;  %v7383_v33 = vpack.c.bf16 %v7367_v11, %v7351_v51 }
0x17b3   : > { %11903 = vmatpush3.bf16.msra.mxu1 %v12735_v49  ;;  %11882 = vmatprep.subr.bf16.mxu0 %v12736_v26 }
0x17b4   : > { %11904 = vmatprep.subr.bf16.mxu1 %v12737_v48 }
0x17b6   : > { %11883 = vmatpush3.bf16.msra.mxu0 %v12738_v36 }
0x17b7   : > { %11905 = vmatpush3.bf16.msra.mxu1 %v12739_v57  ;;  %11884 = vmatprep.subr.bf16.mxu0 %v12740_v35 }
0x17b8   : > { %11906 = vmatprep.subr.bf16.mxu1 %v12741_v24 }
0x17ba   : > { %11885 = vmatpush3.bf16.msra.mxu0 %v12742_v61 }
0x17bb   : > { %11907 = vmatpush3.bf16.msra.mxu1 %v12743_v19  ;;  %11886 = vmatprep.subr.bf16.mxu0 %v12744_v50 }
0x17bc   : > { %11908 = vmatprep.subr.bf16.mxu1 %v12745_v62  ;;  %v10920_v62 = vld [vmem:[%s6747_s0] ss:$0 sm:$0xff] }
0x17be   : > { %11887 = vmatpush3.bf16.msra.mxu0 %v12746_v27 }
0x17bf   : > { %11909 = vmatpush3.bf16.msra.mxu1 %v12747_v43  ;;  %11888 = vmatprep.subr.bf16.mxu0 %v12748_v23 }
0x17c0   : > { %11910 = vmatprep.subr.bf16.mxu1 %v12749_v14 }
0x17c2   : > { %11889 = vmatpush3.bf16.msra.mxu0 %v12750_v32 }
0x17c3   : > { %11911 = vmatpush3.bf16.msra.mxu1 %v12751_v60  ;;  %11890 = vmatprep.subr.bf16.mxu0 %v12752_v12 }
0x17c4   : > { %11912 = vmatprep.subr.bf16.mxu1 %v12753_v13 }
0x17c6   : > { %11891 = vmatpush3.bf16.msra.mxu0 %v12754_v15 }
0x17c7   : > { %11913 = vmatpush3.bf16.msra.mxu1 %v12755_v31  ;;  %11892 = vmatprep.subr.bf16.mxu0 %v12756_v39 }
0x17c8   : > { %11914 = vmatprep.subr.bf16.mxu1 %v12757_v21 }
0x17ca   : > { %11893 = vmatpush3.bf16.msra.mxu0 %v12758_v34 }
0x17cb   : > { %11915 = vmatpush3.bf16.msra.mxu1 %v12759_v40  ;;  %8630 = vmatprep.subr.bf16.mxu0 (%p3788_p1), %v12900_v6  ;;  %v12968_v6 = vld [vmem:[%s15624_s24 + $0x174] ss:$8 sps:$4 sm:$0xff] (%p3788_p1)  }
0x17cc   :  { %8822 = vmatprep.subr.bf16.mxu1 (%p3788_p1), %v12906_v10 }
0x17cd   : > { %8440 = vmatmul.mubr.bf16.vlgmr.msra.gmra.mxu0 %v7383_v33 }
0x17ce   : > { %8481 = vmatmul.mubr.bf16.vlgmr.msra.gmra.mxu1 %v7385_v17  ;;  %8631 = vmatpush1.bf16.msra.mxu0 (%p3788_p1), %v12902_v7  ;;  %v12966_v7 = vld [vmem:[%s15624_s24 + $0x170] ss:$8 sps:$4 sm:$0xff] (%p3788_p1)  }
0x17cf   :  { %8632 = vmatprep.subr.bf16.mxu0 (%p3788_p1), %v12903_v8  ;;  %8823 = vmatpush1.bf16.msra.mxu1 (%p3788_p1), %v12908_v58 }
0x17d0   :  { %8824 = vmatprep.subr.bf16.mxu1 (%p3788_p1), %v12909_v63 }
0x17d2   :  { %8633 = vmatpush1.bf16.msra.mxu0 (%p3788_p1), %v12905_v9  ;;  %v8582_v9 = vld [vmem:[%s15626_s3] sm:$0x3] (%p3788_p1) }
0x17d3   :  { %8825 = vmatpush1.bf16.msra.mxu1 (%p3788_p1), %v12911_v44  ;;  %v8592_v58 = vrot.slane (%p3788_p1), %v8582_v9, %v14016_v42  ;;  %v8588_v63 = vrot.slane (%p3788_p1), %v8582_v9, %v14022_v59  ;;  %v13019_v9 = vld [vmem:[%s15624_s24 + $0x2a4] ss:$8 sps:$4 sm:$0xff] (%p3788_p1)  }
0x17d4   :  { %8826 = vmatprep.subr.bf16.mxu1 (%p3788_p1), %v12912_v46 }
0x17d7   :  { %8827 = vmatpush1.bf16.msra.mxu1 (%p3788_p1), %v12914_v54 }
0x17d8   :  { %8828 = vmatprep.subr.bf16.mxu1 (%p3788_p1), %v12915_v55 }
0x17db   :  { %8829 = vmatpush1.bf16.msra.mxu1 (%p3788_p1), %v12917_v38 }
0x182d   : > { %v11762_v56 = vpop.f32.mrf.mxu0  ;;  %v11784_v53 = vpop.f32.mrf.mxu1 }
0x182f   : > { %v11763_v25 = vpop.f32.mrf.mxu0  ;;  %v11785_v18 = vpop.f32.mrf.mxu1 }
0x1830   : > { %v11764_v50 = vadd.f32 %v11763_v25, %v11762_v56  ;;  %v11786_v12 = vadd.f32 %v11785_v18, %v11784_v53 }
0x1831   : > { %v11765_v41 = vpop.f32.mrf.mxu0  ;;  %v11787_v16 = vpop.f32.mrf.mxu1 }
0x1832   : > { %v8196_v23 = vadd.f32 %v11764_v50, %v10920_v62 }
0x1833   : > { %v11766_v49 = vpop.f32.mrf.mxu0  ;;  %v11788_v48 = vpop.f32.mrf.mxu1 }
0x1834   : > { %v11767_v14 = vadd.f32 %v11766_v49, %v11765_v41  ;;  %v8237_v37 = vadd.f32 %v11786_v12, %v8196_v23  ;;  %v11789_v31 = vadd.f32 %v11788_v48, %v11787_v16 }
0x1836   : > { %v8199_v45 = vadd.f32 %v11767_v14, %v10920_v62 }
0x1838   : > { %v8240_v21 = vadd.f32 %v11789_v31, %v8199_v45 }
0x184d   : > { %v11806_v26 = vpop.f32.mrf.mxu0  ;;  %v11828_v36 = vpop.f32.mrf.mxu1 }
0x184f   : > { %v11807_v57 = vpop.f32.mrf.mxu0  ;;  %v11829_v35 = vpop.f32.mrf.mxu1 }
0x1850   : > { %v11808_v13 = vadd.f32 %v11807_v57, %v11806_v26  ;;  %v11830_v47 = vadd.f32 %v11829_v35, %v11828_v36 }
0x1851   : > { %v11809_v24 = vpop.f32.mrf.mxu0  ;;  %v11831_v61 = vpop.f32.mrf.mxu1 }
0x1852   : > { %v8278_v39 = vadd.f32 %v11808_v13, %v8237_v37 }
0x1853   : > { %v11810_v19 = vpop.f32.mrf.mxu0  ;;  %v11832_v43 = vpop.f32.mrf.mxu1 }
0x1854   : > { %v11811_v0 = vadd.f32 %v11810_v19, %v11809_v24  ;;  %v8319_v40 = vadd.f32 %v11830_v47, %v8278_v39  ;;  %v11833_v51 = vadd.f32 %v11832_v43, %v11831_v61 }
0x1856   : > { %v8281_v29 = vadd.f32 %v11811_v0, %v8240_v21 }
0x1858   : > { %v8322_v53 = vadd.f32 %v11833_v51, %v8281_v29 }
0x186d   : > { %v11850_v27 = vpop.f32.mrf.mxu0 }
0x186e   : > { %v11872_v32 = vpop.f32.mrf.mxu1 }
0x186f   : > { %v11851_v60 = vpop.f32.mrf.mxu0 }
0x1870   : > { %v11873_v15 = vpop.f32.mrf.mxu1  ;;  %v11852_v52 = vadd.f32 %v11851_v60, %v11850_v27 }
0x1871   : > { %v11853_v30 = vpop.f32.mrf.mxu0  ;;  %v11874_v25 = vadd.f32 %v11873_v15, %v11872_v32 }
0x1872   : > { %v11875_v34 = vpop.f32.mrf.mxu1  ;;  %v8360_v20 = vadd.f32 %v11852_v52, %v8319_v40 }
0x1873   : > { %v11854_v11 = vpop.f32.mrf.mxu0 }
0x1874   : > { %v11855_v33 = vadd.f32 %v11854_v11, %v11853_v30  ;;  %v11876_v17 = vpop.f32.mrf.mxu1  ;;  %v8401_v49 = vadd.f32 %v11874_v25, %v8360_v20 }
0x1875   : > { %v11877_v36 = vadd.f32 %v11876_v17, %v11875_v34 }
0x1876   : > { %v8363_v16 = vadd.f32 %v11855_v33, %v8322_v53  ;;  %v11049_v33 = vld [vmem:[%s14661_s16 + $0x4] ss:$0 sm:$0xff] }
0x1878   : > { %v8404_v62 = vadd.f32 %v11877_v36, %v8363_v16 }
0x188d   : > { %v11894_v56 = vpop.f32.mrf.mxu0 }
0x188e   : > { %v11916_v18 = vpop.f32.mrf.mxu1 }
0x188f   : > { %v11895_v41 = vpop.f32.mrf.mxu0 }
0x1890   : > { %v11896_v26 = vadd.f32 %v11895_v41, %v11894_v56  ;;  %v11917_v48 = vpop.f32.mrf.mxu1  ;;  %v11050_v56 = vld [vmem:[%s14661_s16 + $0x5] ss:$0 sm:$0xff] }
0x1891   : > { %v11897_v57 = vpop.f32.mrf.mxu0  ;;  %v11918_v24 = vadd.f32 %v11917_v48, %v11916_v18  ;;  %v15622_v48 = vmov (%p3788_p1), 0  }
0x1892   : > { %v8442_v35 = vadd.f32 %v11896_v26, %v8401_v49  ;;  %v11919_v19 = vpop.f32.mrf.mxu1  ;;  %8650 = vmatprep.mubr.bf16.mxu0 (%p3788_p1), %v15622_v48 }
0x1893   : > { %v11898_v50 = vpop.f32.mrf.mxu0 }
0x1894   : > { %v8483_v61 = vadd.f32 %v11918_v24, %v8442_v35  ;;  %v11899_v27 = vadd.f32 %v11898_v50, %v11897_v57  ;;  %v11920_v43 = vpop.f32.mrf.mxu1 }
0x1895   : > { %v11921_v14 = vadd.f32 %v11920_v43, %v11919_v19  ;;  %v12923_v43 = vld [vmem:[%s15624_s24 + $0x20] ss:$8 sps:$4 sm:$0xff] (%p3788_p1)  }
0x1896   : > { %v8445_v23 = vadd.f32 %v11899_v27, %v8404_v62  ;;  %v8489_v32 = vadd.f32 %v8483_v61, %v15047_v22  ;;  %v12918_v62 = vld [vmem:[%s15624_s24 + $0x34] ss:$8 sps:$4 sm:$0xff] (%p3788_p1)   ;;  %v12920_v61 = vld [vmem:[%s15624_s24 + $0x30] ss:$8 sps:$4 sm:$0xff] (%p3788_p1)   ;;  %v12921_v27 = vld [vmem:[%s15624_s24 + $0x24] ss:$8 sps:$4 sm:$0xff] (%p3788_p1)  }
0x1897   :  { %8830 = vmatprep.subr.bf16.mxu1 (%p3788_p1), %v12918_v62 }
0x1898   : > { %v8486_v60 = vadd.f32 %v11921_v14, %v8445_v23  ;;  %v8491_v12 = vsel %vm349_vm2, %v8489_v32, 0.0  ;;  %8831 = vmatpush1.bf16.msra.mxu1 (%p3788_p1), %v12920_v61  ;;  %v12924_v23 = vld [vmem:[%s15624_s24 + $0x14] ss:$8 sps:$4 sm:$0xff] (%p3788_p1)   ;;  %v12926_v14 = vld [vmem:[%s15624_s24 + $0x10] ss:$8 sps:$4 sm:$0xff] (%p3788_p1)  }
0x1899   : > { %8492 = vadd.xlane.f32.xlu0 %v8491_v12  ;;  %8832 = vmatprep.subr.bf16.mxu1 (%p3788_p1), %v12921_v27  ;;  %v12930_v12 = vld [vmem:[%s15624_s24 + $0xb4] ss:$8 sps:$4 sm:$0xff] (%p3788_p1)  }
0x189a   : > { %v8490_v13 = vadd.f32 %v8486_v60, %v15049_v28  ;;  %v12929_v60 = vld [vmem:[%s15624_s24] ss:$8 sps:$4 sm:$0xff] (%p3788_p1)  }
0x189c   : > { %v8494_v37 = vsel %vm349_vm2, %v8490_v13, 0.0  ;;  %8833 = vmatpush1.bf16.msra.mxu1 (%p3788_p1), %v12923_v43  ;;  %v12971_v43 = vld [vmem:[%s15624_s24 + $0x164] ss:$8 sps:$4 sm:$0xff] (%p3788_p1)  }
0x189d   : > { %8495 = vadd.xlane.f32.xlu1 %v8494_v37  ;;  %8834 = vmatprep.subr.bf16.mxu1 (%p3788_p1), %v12924_v23  ;;  %v12969_v23 = vld [vmem:[%s15624_s24 + $0x160] ss:$8 sps:$4 sm:$0xff] (%p3788_p1)  }
0x18a0   :  { %8835 = vmatpush1.bf16.msra.mxu1 (%p3788_p1), %v12926_v14  ;;  %v12974_v14 = vld [vmem:[%s15624_s24 + $0x154] ss:$8 sps:$4 sm:$0xff] (%p3788_p1)  }
0x1922   : > { %v8493_v45 = vpop.xlane.xlu0 %8492 }
0x1923   : > { %v8497_v15 = vmul.f32 0.03125, %v8493_v45 }
0x1925   : > { %v8499_v30 = vsub.f32 %v8489_v32, %v8497_v15  ;;  %v12927_v32 = vld [vmem:[%s15624_s24 + $0x4] ss:$8 sps:$4 sm:$0xff] (%p3788_p1)  }
0x1926   : > { %v8496_v31 = vpop.xlane.xlu1 %8495  ;;  %8836 = vmatprep.subr.bf16.mxu1 (%p3788_p1), %v12927_v32  ;;  %v12972_v32 = vld [vmem:[%s15624_s24 + $0x150] ss:$8 sps:$4 sm:$0xff] (%p3788_p1)  }
0x1927   : > { %v8498_v39 = vmul.f32 0.03125, %v8496_v31  ;;  %v8501_v0 = vmul.f32 %v8499_v30, %v8499_v30  ;;  %8837 = vmatpush1.bf16.msra.mxu1 (%p3788_p1), %v12929_v60  ;;  %v12977_v60 = vld [vmem:[%s15624_s24 + $0x144] ss:$8 sps:$4 sm:$0xff] (%p3788_p1)  }
0x1928   :  { %8846 = vmatprep.subr.bf16.mxu1 (%p3788_p1), %v12930_v12  ;;  %v12975_v12 = vld [vmem:[%s15624_s24 + $0x140] ss:$8 sps:$4 sm:$0xff] (%p3788_p1)  }
0x1929   : > { %v8500_v21 = vsub.f32 %v8490_v13, %v8498_v39  ;;  %v8503_v47 = vsel %vm349_vm2, %v8501_v0, 0.0  ;;  %v12932_v13 = vld [vmem:[%s15624_s24 + $0xb0] ss:$8 sps:$4 sm:$0xff] (%p3788_p1)  }
0x192a   : > { %8504 = vadd.xlane.f32.xlu0 %v8503_v47  ;;  %v11052_v47 = vld [vmem:[%s15625_s28] ss:$0 sm:$0xff] (%p3788_p1) }
0x192b   : > { %v8502_v22 = vmul.f32 %v8500_v21, %v8500_v21  ;;  %8847 = vmatpush2.bf16.msra.mxu1 (%p3788_p1), %v12932_v13  ;;  %v12978_v13 = vld [vmem:[%s15624_s24 + $0x1f0] ss:$8 sps:$4 sm:$0xff] (%p3788_p1)  }
0x192d   : > { %v8506_v52 = vsel %vm349_vm2, %v8502_v22, 0.0 }
0x192e   : > { %8507 = vadd.xlane.f32.xlu1 %v8506_v52 }
0x19b3   : > { %v8505_v28 = vpop.xlane.xlu0 %8504 }
0x19b4   : > { %v8509_v34 = vmul.f32 0.03125, %v8505_v28 }
0x19b6   : > { %v8511_v11 = vadd.f32 1e-05, %v8509_v34 }
0x19b7   : > { %v8508_v40 = vpop.xlane.xlu1 %8507 }
0x19b8   : > { %12896 = vrsqrt.f32 %v8511_v11  ;;  %v8510_v29 = vmul.f32 0.03125, %v8508_v40 }
0x19ba   : > { %v8512_v51 = vadd.f32 1e-05, %v8510_v29 }
0x19bc   : > { %12898 = vrsqrt.f32 %v8512_v51 }
0x19c5   : > { %v12897_v20 = vpop.eup %12896 }
0x19c6   : > { %v8515_v17 = vmul.f32 %v12897_v20, %v8499_v30  ;;  %v12933_v20 = vld [vmem:[%s15624_s24 + $0xa4] ss:$8 sps:$4 sm:$0xff] (%p3788_p1)  }
0x19c7   :  { %8848 = vmatprep.subr.bf16.mxu1 (%p3788_p1), %v12933_v20  ;;  %v8685_v20 = vld [vmem:[%s15627_s11] sm:$0x3] (%p3788_p1) }
0x19c8   : > { %v8523_v53 = vmul.f32 %v11049_v33, %v8515_v17  ;;  %v12936_v17 = vld [vmem:[%s15624_s24 + $0x94] ss:$8 sps:$4 sm:$0xff] (%p3788_p1)  }
0x19c9   : > { %v12899_v25 = vpop.eup %12898 }
0x19ca   : > { %v8531_v18 = vadd.f32 %v11050_v56, %v8523_v53   ;;  %v8516_v41 = vmul.f32 %v12899_v25, %v8500_v21  ;;  %v12939_v53 = vld [vmem:[%s15624_s24 + $0x84] ss:$8 sps:$4 sm:$0xff] (%p3788_p1)   ;;  %v12941_v25 = vld [vmem:[%s15624_s24 + $0x80] ss:$8 sps:$4 sm:$0xff] (%p3788_p1)  }
0x19cc   : > { %v8524_v49 = vmul.f32 %v11049_v33, %v8516_v41  ;;  %v15621_v30 = vmov %v8531_v18  ;;  %3790 = sbr.rel (!%p3788_p1) target bundleno = 2857 (0xb29), region = 230  ;;  %v8536_v26 = vsel (%p3788_p1), %vm349_vm2, %v8531_v18, 0.0  ;;  %v12935_v33 = vld [vmem:[%s15624_s24 + $0xa0] ss:$8 sps:$4 sm:$0xff] (%p3788_p1)   ;;  %v12944_v41 = vld [vmem:[%s15624_s24 + $0x134] ss:$8 sps:$4 sm:$0xff] (%p3788_p1)  }
0x19cd   :  { %8537 = vadd.xlane.f32.xlu0 (%p3788_p1), %v8536_v26  ;;  %8849 = vmatpush2.bf16.msra.mxu1 (%p3788_p1), %v12935_v33  ;;  %v12950_v26 = vld [vmem:[%s15624_s24 + $0x114] ss:$8 sps:$4 sm:$0xff] (%p3788_p1)  }
0x19ce   : > { %v8532_v16 = vadd.f32 %v11050_v56, %v8524_v49   ;;  %v12938_v56 = vld [vmem:[%s15624_s24 + $0x90] ss:$8 sps:$4 sm:$0xff] (%p3788_p1)   ;;  %8850 = vmatprep.subr.bf16.mxu1 (%p3788_p1), %v12936_v17  ;;  %v12947_v49 = vld [vmem:[%s15624_s24 + $0x124] ss:$8 sps:$4 sm:$0xff] (%p3788_p1)   ;;  %9032 = vmatprep.subr.bf16.mxu0 (%p3788_p1), %v12944_v41  ;;  %v8696_v17 = vrot.slane (%p3788_p1), %v8685_v20, %v14016_v42 }
0x19d0   : > { %v15620_v34 = vmov %v8532_v16  ;;  %v8539_v57 = vsel (%p3788_p1), %vm349_vm2, %v8532_v16, 0.0 }
0x19d1   :  { %8540 = vadd.xlane.f32.xlu0 %v8539_v57  ;;  %v11053_v34 = vld [vmem:[%s15625_s28 + $0x1] ss:$0 sm:$0xff]  ;;  %8851 = vmatpush2.bf16.msra.mxu1 %v12938_v56  ;;  %v12948_v57 = vld [vmem:[%s15624_s24 + $0x110] ss:$8 sps:$4 sm:$0xff]   ;;  %v8692_v56 = vrot.slane %v8685_v20, %v14022_v59 }
0x19d2   :  { %8852 = vmatprep.subr.bf16.mxu1 %v12939_v53  ;;  %v13044_v20 = vld [vmem:[%s15624_s24 + $0x2d0] ss:$8 sps:$4 sm:$0xff]  }
0x19d5   :  { %8853 = vmatpush2.bf16.msra.mxu1 %v12941_v25 }
0x1a56   :  { %v8538_v36 = vpop.xlane.xlu0 %8537 }
0x1a57   :  { %v8542_v35 = vmul.f32 0.03125, %v8538_v36  ;;  %v12953_v36 = vld [vmem:[%s15624_s24 + $0x104] ss:$8 sps:$4 sm:$0xff]  }
0x1a59   :  { %v15319_v24 = vsub.f32 %v8531_v18, %v8542_v35  ;;  %v12942_v18 = vld [vmem:[%s15624_s24 + $0x130] ss:$8 sps:$4 sm:$0xff]   ;;  %v12951_v35 = vld [vmem:[%s15624_s24 + $0x100] ss:$8 sps:$4 sm:$0xff]  }
0x1a5a   :  { %v8541_v19 = vpop.xlane.xlu0 %8540 }
0x1a5b   :  { %v8543_v50 = vmul.f32 0.03125, %v8541_v19  ;;  %v8546_v1 = vmul.f32 %v15319_v24, %v15319_v24  ;;  %v12954_v19 = vld [vmem:[%s15624_s24 + $0xf0] ss:$8 sps:$4 sm:$0xff]  }
0x1a5d   :  { %v8545_v2 = vsub.f32 %v8532_v16, %v8543_v50  ;;  %v8548_v3 = vsel %vm349_vm2, %v8546_v1, 0.0  ;;  %v12945_v16 = vld [vmem:[%s15624_s24 + $0x120] ss:$8 sps:$4 sm:$0xff]   ;;  %v12959_v50 = vld [vmem:[%s15624_s24 + $0xe4] ss:$8 sps:$4 sm:$0xff]  }
0x1a5e   :  { %8549 = vadd.xlane.f32.xlu1 %v8548_v3  ;;  %v12957_v1 = vld [vmem:[%s15624_s24 + $0xe0] ss:$8 sps:$4 sm:$0xff]   ;;  %v12960_v3 = vld [vmem:[%s15624_s24 + $0xd0] ss:$8 sps:$4 sm:$0xff]  }
0x1a5f   :  { %v8547_v4 = vmul.f32 %v8545_v2, %v8545_v2 }
0x1a61   :  { %v8551_v5 = vsel %vm349_vm2, %v8547_v4, 0.0  ;;  %v12965_v4 = vld [vmem:[%s15624_s24 + $0xc4] ss:$8 sps:$4 sm:$0xff]  }
0x1a62   :  { %8552 = vadd.xlane.f32.xlu1 %v8551_v5  ;;  %v12963_v5 = vld [vmem:[%s15624_s24 + $0xc0] ss:$8 sps:$4 sm:$0xff]  }
0x1ae7   :  { %v8550_v37 = vpop.xlane.xlu1 %8549 }
0x1ae8   :  { %v8554_v45 = vmul.f32 0.03125, %v8550_v37  ;;  %v12980_v37 = vld [vmem:[%s15624_s24 + $0x1f4] ss:$8 sps:$4 sm:$0xff]  }
0x1ae9   :  { %9242 = vmatprep.subr.bf16.mxu1 %v12980_v37 }
0x1aea   :  { %v8556_v15 = vadd.f32 1e-05, %v8554_v45  ;;  %v12983_v45 = vld [vmem:[%s15624_s24 + $0x1e4] ss:$8 sps:$4 sm:$0xff]  }
0x1aeb   :  { %v8553_v30 = vpop.xlane.xlu1 %8552 }
0x1aec   :  { %13206 = vrsqrt.f32 %v8556_v15  ;;  %v8555_v31 = vmul.f32 0.03125, %v8553_v30  ;;  %v12981_v15 = vld [vmem:[%s15624_s24 + $0x1e0] ss:$8 sps:$4 sm:$0xff]   ;;  %v12986_v30 = vld [vmem:[%s15624_s24 + $0x1d4] ss:$8 sps:$4 sm:$0xff]  }
0x1aee   :  { %v8557_v39 = vadd.f32 1e-05, %v8555_v31  ;;  %v12984_v31 = vld [vmem:[%s15624_s24 + $0x1d0] ss:$8 sps:$4 sm:$0xff]  }
0x1af0   :  { %13208 = vrsqrt.f32 %v8557_v39  ;;  %v12989_v39 = vld [vmem:[%s15624_s24 + $0x1c4] ss:$8 sps:$4 sm:$0xff]  }
0x1af9   :  { %v13207_v0 = vpop.eup %13206 }
0x1afa   :  { %v8560_v21 = vmul.f32 %v13207_v0, %v15319_v24  ;;  %v12956_v24 = vld [vmem:[%s15624_s24 + $0xf4] ss:$8 sps:$4 sm:$0xff]   ;;  %v12987_v0 = vld [vmem:[%s15624_s24 + $0x1c0] ss:$8 sps:$4 sm:$0xff]  }
0x1afc   :  { %v8568_v28 = vmul.f32 %v11052_v47, %v8560_v21  ;;  %v12992_v21 = vld [vmem:[%s15624_s24 + $0x1b4] ss:$8 sps:$4 sm:$0xff]  }
0x1afd   :  { %v13209_v22 = vpop.eup %13208 }
0x1afe   :  { %v8561_v52 = vmul.f32 %v13209_v22, %v8545_v2  ;;  %v8576_v40 = vadd.f32 %v11053_v34, %v8568_v28  ;;  %v12962_v2 = vld [vmem:[%s15624_s24 + $0xd4] ss:$8 sps:$4 sm:$0xff]   ;;  %v12995_v22 = vld [vmem:[%s15624_s24 + $0x1a4] ss:$8 sps:$4 sm:$0xff]  }
0x1aff   :  { %v12998_v28 = vld [vmem:[%s15624_s24 + $0x194] ss:$8 sps:$4 sm:$0xff]  }
0x1b00   :  { %v8569_v11 = vmul.f32 %v11052_v47, %v8561_v52  ;;  %v12990_v47 = vld [vmem:[%s15624_s24 + $0x1b0] ss:$8 sps:$4 sm:$0xff]   ;;  %v12993_v52 = vld [vmem:[%s15624_s24 + $0x1a0] ss:$8 sps:$4 sm:$0xff]  }
0x1b02   :  { %v8577_v29 = vadd.f32 %v11053_v34, %v8569_v11  ;;  %v12996_v34 = vld [vmem:[%s15624_s24 + $0x190] ss:$8 sps:$4 sm:$0xff]   ;;  %v13001_v11 = vld [vmem:[%s15624_s24 + $0x184] ss:$8 sps:$4 sm:$0xff]  }
0x1b04   :  { %v8583_v51 = vpack.c.bf16 %v8577_v29, %v8576_v40  ;;  %v12999_v40 = vld [vmem:[%s15624_s24 + $0x180] ss:$8 sps:$4 sm:$0xff]   ;;  %v13004_v29 = vld [vmem:[%s15624_s24 + $0x234] ss:$8 sps:$4 sm:$0xff]  }
0x1b06   :  { %11058 = vmatmul.mubr.msk.bf16.vlgmr.msra.gmra.mxu0 %vm349_vm2, %v8583_v51  ;;  %v13002_v51 = vld [vmem:[%s15624_s24 + $0x230] ss:$8 sps:$4 sm:$0xff]  }
0x1b07   :  { %9033 = vmatpush1.bf16.msra.mxu0 %v12942_v18 }
0x1b08   :  { %9034 = vmatprep.subr.bf16.mxu0 %v12947_v49 }
0x1b0b   :  { %9035 = vmatpush1.bf16.msra.mxu0 %v12945_v16 }
0x1b0c   :  { %9036 = vmatprep.subr.bf16.mxu0 %v12950_v26 }
0x1b0f   :  { %9037 = vmatpush1.bf16.msra.mxu0 %v12948_v57 }
0x1b10   :  { %9038 = vmatprep.subr.bf16.mxu0 %v12953_v36 }
0x1b13   :  { %9039 = vmatpush1.bf16.msra.mxu0 %v12951_v35 }
0x1b14   :  { %9040 = vmatprep.subr.bf16.mxu0 %v12956_v24 }
0x1b17   :  { %9041 = vmatpush1.bf16.msra.mxu0 %v12954_v19 }
0x1b18   :  { %9042 = vmatprep.subr.bf16.mxu0 %v12959_v50 }
0x1b1b   :  { %9043 = vmatpush1.bf16.msra.mxu0 %v12957_v1  ;;  %v13007_v1 = vld [vmem:[%s15624_s24 + $0x224] ss:$8 sps:$4 sm:$0xff]  }
0x1b1c   :  { %9044 = vmatprep.subr.bf16.mxu0 %v12962_v2  ;;  %v13005_v2 = vld [vmem:[%s15624_s24 + $0x220] ss:$8 sps:$4 sm:$0xff]  }
0x1b1f   :  { %9045 = vmatpush1.bf16.msra.mxu0 %v12960_v3  ;;  %v13010_v3 = vld [vmem:[%s15624_s24 + $0x214] ss:$8 sps:$4 sm:$0xff]  }
0x1b20   :  { %9046 = vmatprep.subr.bf16.mxu0 %v12965_v4  ;;  %v13008_v4 = vld [vmem:[%s15624_s24 + $0x210] ss:$8 sps:$4 sm:$0xff]  }
0x1b23   :  { %9047 = vmatpush1.bf16.msra.mxu0 %v12963_v5  ;;  %v13013_v5 = vld [vmem:[%s15624_s24 + $0x204] ss:$8 sps:$4 sm:$0xff]  }
0x1b24   :  { %9056 = vmatprep.subr.bf16.mxu0 %v12968_v6  ;;  %v13011_v6 = vld [vmem:[%s15624_s24 + $0x200] ss:$8 sps:$4 sm:$0xff]  }
0x1b27   :  { %9057 = vmatpush2.bf16.msra.mxu0 %v12966_v7  ;;  %v13014_v7 = vld [vmem:[%s15624_s24 + $0x2b0] ss:$8 sps:$4 sm:$0xff]  }
0x1b28   :  { %9058 = vmatprep.subr.bf16.mxu0 %v12971_v43  ;;  %v13037_v43 = vld [vmem:[%s15624_s24 + $0x244] ss:$8 sps:$4 sm:$0xff]  }
0x1b2b   :  { %9059 = vmatpush2.bf16.msra.mxu0 %v12969_v23  ;;  %v13035_v23 = vld [vmem:[%s15624_s24 + $0x240] ss:$8 sps:$4 sm:$0xff]  }
0x1b2c   :  { %9060 = vmatprep.subr.bf16.mxu0 %v12974_v14  ;;  %v13040_v14 = vld [vmem:[%s15624_s24 + $0x2f4] ss:$8 sps:$4 sm:$0xff]  }
0x1b2f   :  { %9061 = vmatpush2.bf16.msra.mxu0 %v12972_v32  ;;  %v13038_v32 = vld [vmem:[%s15624_s24 + $0x2f0] ss:$8 sps:$4 sm:$0xff]  }
0x1b30   :  { %9062 = vmatprep.subr.bf16.mxu0 %v12977_v60  ;;  %v11108_v60 = vld [vmem:[%s15627_s11 + $0x2] sm:$0x3] }
0x1b31   :  { %v8902_v37 = vrot.slane %v11108_v60, %v14022_v59 }
0x1b33   :  { %9063 = vmatpush2.bf16.msra.mxu0 %v12975_v12 }
0x1bc6   :  { %v8652_v8 = vpop.f32.mrf.mxu0 }
0x1bc7   :  { %v8653_v62 = vadd.f32 %v8652_v8, %v8588_v63  ;;  %v13016_v8 = vld [vmem:[%s15624_s24 + $0x2b4] ss:$8 sps:$4 sm:$0xff]  }
0x1bc8   :  { %v8654_v10 = vpop.f32.mrf.mxu0  ;;  %9452 = vmatprep.subr.bf16.mxu0 %v13016_v8 }
0x1bc9   :  { %v8655_v55 = vadd.f32 %v8654_v10, %v8592_v58  ;;  %v13017_v10 = vld [vmem:[%s15624_s24 + $0x2a0] ss:$8 sps:$4 sm:$0xff]  }
0x1bca   :  { %v8656_v44 = vpop.f32.mrf.mxu0 }
0x1bcb   :  { %v8657_v46 = vadd.f32 %v8656_v44, %v8588_v63  ;;  %v13020_v63 = vld [vmem:[%s15624_s24 + $0x290] ss:$8 sps:$4 sm:$0xff]   ;;  %v13025_v44 = vld [vmem:[%s15624_s24 + $0x284] ss:$8 sps:$4 sm:$0xff]  }
0x1bcc   :  { %v8658_v54 = vpop.f32.mrf.mxu0 }
0x1bcd   :  { %v8659_v38 = vadd.f32 %v8658_v54, %v8592_v58  ;;  %v8686_v27 = vpack.c.bf16 %v8657_v46, %v8653_v62  ;;  %v13022_v58 = vld [vmem:[%s15624_s24 + $0x294] ss:$8 sps:$4 sm:$0xff]   ;;  %v13023_v46 = vld [vmem:[%s15624_s24 + $0x280] ss:$8 sps:$4 sm:$0xff]  }
0x1bce   :  { %v13028_v54 = vld [vmem:[%s15624_s24 + $0x274] ss:$8 sps:$4 sm:$0xff]   ;;  %v13029_v62 = vld [vmem:[%s15624_s24 + $0x260] ss:$8 sps:$4 sm:$0xff]  }
0x1bcf   :  { %v8687_v61 = vpack.c.bf16 %v8659_v38, %v8655_v55  ;;  %v13026_v55 = vld [vmem:[%s15624_s24 + $0x270] ss:$8 sps:$4 sm:$0xff]   ;;  %v13031_v38 = vld [vmem:[%s15624_s24 + $0x264] ss:$8 sps:$4 sm:$0xff]  }
0x1bd1   :  { %11083 = vmatprep.mubr.msk.bf16.mxu1 %vm243_vm0, %v8687_v61  ;;  %v13034_v61 = vld [vmem:[%s15624_s24 + $0x254] ss:$8 sps:$4 sm:$0xff]  }
0x1bd2   :  { %8855 = vmatmul.mubr.bf16.vlgmr.msra.gmra.mxu1 %v8686_v27  ;;  %v13032_v27 = vld [vmem:[%s15624_s24 + $0x250] ss:$8 sps:$4 sm:$0xff]  }
0x1bd3   :  { %9243 = vmatpush1.bf16.msra.mxu1 %v12978_v13  ;;  %v8906_v13 = vrot.slane %v11108_v60, %v14016_v42  ;;  %v13080_v60 = vld [vmem:[%s13455_s8 + $0x90] ss:$8 sps:$4 sm:$0xff]  }
0x1bd4   :  { %9244 = vmatprep.subr.bf16.mxu1 %v12983_v45 }
0x1bd7   :  { %9245 = vmatpush1.bf16.msra.mxu1 %v12981_v15 }
0x1bd8   :  { %9246 = vmatprep.subr.bf16.mxu1 %v12986_v30 }
0x1bdb   :  { %9247 = vmatpush1.bf16.msra.mxu1 %v12984_v31 }
0x1bdc   :  { %9248 = vmatprep.subr.bf16.mxu1 %v12989_v39 }
0x1bdf   :  { %9249 = vmatpush1.bf16.msra.mxu1 %v12987_v0 }
0x1be0   :  { %9250 = vmatprep.subr.bf16.mxu1 %v12992_v21 }
0x1be3   :  { %9251 = vmatpush1.bf16.msra.mxu1 %v12990_v47 }
0x1be4   :  { %9252 = vmatprep.subr.bf16.mxu1 %v12995_v22 }
0x1be7   :  { %9253 = vmatpush1.bf16.msra.mxu1 %v12993_v52 }
0x1be8   :  { %9254 = vmatprep.subr.bf16.mxu1 %v12998_v28 }
0x1beb   :  { %9255 = vmatpush1.bf16.msra.mxu1 %v12996_v34 }
0x1bec   :  { %9256 = vmatprep.subr.bf16.mxu1 %v13001_v11 }
0x1bef   :  { %9257 = vmatpush1.bf16.msra.mxu1 %v12999_v40  ;;  %v13043_v40 = vld [vmem:[%s15624_s24 + $0x2e4] ss:$8 sps:$4 sm:$0xff]  }
0x1bf0   :  { %9266 = vmatprep.subr.bf16.mxu1 %v13004_v29  ;;  %v13041_v29 = vld [vmem:[%s15624_s24 + $0x2e0] ss:$8 sps:$4 sm:$0xff]  }
0x1bf3   :  { %9267 = vmatpush2.bf16.msra.mxu1 %v13002_v51  ;;  %v13046_v51 = vld [vmem:[%s15624_s24 + $0x2d4] ss:$8 sps:$4 sm:$0xff]  }
0x1bf4   :  { %9268 = vmatprep.subr.bf16.mxu1 %v13007_v1  ;;  %v13073_v1 = vld [vmem:[%s13455_s8 + $0x4] ss:$8 sps:$4 sm:$0xff]  }
0x1bf7   :  { %9269 = vmatpush2.bf16.msra.mxu1 %v13005_v2  ;;  %v13071_v2 = vld [vmem:[%s13455_s8] ss:$8 sps:$4 sm:$0xff]  }
0x1bf8   :  { %9270 = vmatprep.subr.bf16.mxu1 %v13010_v3  ;;  %v13076_v3 = vld [vmem:[%s13455_s8 + $0xb4] ss:$8 sps:$4 sm:$0xff]  }
0x1bfb   :  { %9271 = vmatpush2.bf16.msra.mxu1 %v13008_v4  ;;  %v13074_v4 = vld [vmem:[%s13455_s8 + $0xb0] ss:$8 sps:$4 sm:$0xff]  }
0x1bfc   :  { %9272 = vmatprep.subr.bf16.mxu1 %v13013_v5  ;;  %v11158_v5 = vld [vmem:[%s15627_s11 + $0x4] sm:$0x3] }
0x1bfd   :  { %v9112_v8 = vrot.slane %v11158_v5, %v14022_v59 }
0x1bff   :  { %9273 = vmatpush2.bf16.msra.mxu1 %v13011_v6 }
0x1c92   :  { %v8856_v33 = vpop.f32.mrf.mxu1 }
0x1c93   :  { %v8857_v49 = vadd.f32 %v8856_v33, %v8692_v56  ;;  %v13049_v33 = vld [vmem:[%s15624_s24 + $0x2c4] ss:$8 sps:$4 sm:$0xff]  }
0x1c94   :  { %v8858_v53 = vpop.f32.mrf.mxu1 }
0x1c95   :  { %v8859_v18 = vadd.f32 %v8858_v53, %v8696_v17  ;;  %v8865_v24 = vmax.f32 %v8857_v49, 0.0  ;;  %v13052_v53 = vld [vmem:[%s13455_s8 + $0x74] ss:$8 sps:$4 sm:$0xff]   ;;  %v13056_v49 = vld [vmem:[%s13455_s8 + $0x50] ss:$8 sps:$4 sm:$0xff]  }
0x1c96   :  { %v8860_v25 = vpop.f32.mrf.mxu1  ;;  %9660 = vmatprep.subr.bf16.mxu1 %v13052_v53 }
0x1c97   :  { %v8861_v41 = vadd.f32 %v8860_v25, %v8692_v56  ;;  %v8866_v36 = vmax.f32 %v8859_v18, 0.0  ;;  %v13050_v56 = vld [vmem:[%s13455_s8 + $0x70] ss:$8 sps:$4 sm:$0xff]   ;;  %v13055_v25 = vld [vmem:[%s13455_s8 + $0x64] ss:$8 sps:$4 sm:$0xff]  }
0x1c98   :  { %v8862_v16 = vpop.f32.mrf.mxu1  ;;  %v13053_v18 = vld [vmem:[%s13455_s8 + $0x60] ss:$8 sps:$4 sm:$0xff]  }
0x1c99   :  { %v8863_v26 = vadd.f32 %v8862_v16, %v8696_v17  ;;  %v8867_v57 = vmax.f32 %v8861_v41, 0.0  ;;  %v13047_v17 = vld [vmem:[%s15624_s24 + $0x2c0] ss:$8 sps:$4 sm:$0xff]   ;;  %v13058_v41 = vld [vmem:[%s13455_s8 + $0x54] ss:$8 sps:$4 sm:$0xff]  }
0x1c9a   :  { %v13061_v16 = vld [vmem:[%s13455_s8 + $0x44] ss:$8 sps:$4 sm:$0xff]  }
0x1c9b   :  { %v8868_v35 = vmax.f32 %v8863_v26, 0.0  ;;  %v8896_v50 = vpack.c.bf16 %v8867_v57, %v8865_v24  ;;  %v13059_v26 = vld [vmem:[%s13455_s8 + $0x40] ss:$8 sps:$4 sm:$0xff]   ;;  %v13064_v57 = vld [vmem:[%s13455_s8 + $0x34] ss:$8 sps:$4 sm:$0xff]  }
0x1c9c   :  { %v13065_v24 = vld [vmem:[%s13455_s8 + $0x20] ss:$8 sps:$4 sm:$0xff]  }
0x1c9d   :  { %v8897_v19 = vpack.c.bf16 %v8868_v35, %v8866_v36  ;;  %v13062_v36 = vld [vmem:[%s13455_s8 + $0x30] ss:$8 sps:$4 sm:$0xff]   ;;  %v13067_v35 = vld [vmem:[%s13455_s8 + $0x24] ss:$8 sps:$4 sm:$0xff]  }
0x1c9f   :  { %11133 = vmatprep.mubr.msk.bf16.mxu0 %vm243_vm0, %v8897_v19  ;;  %v13070_v19 = vld [vmem:[%s13455_s8 + $0x14] ss:$8 sps:$4 sm:$0xff]  }
0x1ca0   :  { %9065 = vmatmul.mubr.bf16.vlgmr.msra.gmra.mxu0 %v8896_v50  ;;  %v13068_v50 = vld [vmem:[%s13455_s8 + $0x10] ss:$8 sps:$4 sm:$0xff]  }
0x1ca1   :  { %9453 = vmatpush1.bf16.msra.mxu0 %v13014_v7  ;;  %v9116_v7 = vrot.slane %v11158_v5, %v14016_v42  ;;  %v13116_v5 = vld [vmem:[%s13455_s8 + $0x150] ss:$8 sps:$4 sm:$0xff]  }
0x1ca2   :  { %9454 = vmatprep.subr.bf16.mxu0 %v13019_v9 }
0x1ca5   :  { %9455 = vmatpush1.bf16.msra.mxu0 %v13017_v10 }
0x1ca6   :  { %9456 = vmatprep.subr.bf16.mxu0 %v13022_v58 }
0x1ca9   :  { %9457 = vmatpush1.bf16.msra.mxu0 %v13020_v63 }
0x1caa   :  { %9458 = vmatprep.subr.bf16.mxu0 %v13025_v44 }
0x1cad   :  { %9459 = vmatpush1.bf16.msra.mxu0 %v13023_v46 }
0x1cae   :  { %9460 = vmatprep.subr.bf16.mxu0 %v13028_v54 }
0x1cb1   :  { %9461 = vmatpush1.bf16.msra.mxu0 %v13026_v55 }
0x1cb2   :  { %9462 = vmatprep.subr.bf16.mxu0 %v13031_v38 }
0x1cb5   :  { %9463 = vmatpush1.bf16.msra.mxu0 %v13029_v62 }
0x1cb6   :  { %9464 = vmatprep.subr.bf16.mxu0 %v13034_v61 }
0x1cb9   :  { %9465 = vmatpush1.bf16.msra.mxu0 %v13032_v27 }
0x1cba   :  { %9466 = vmatprep.subr.bf16.mxu0 %v13037_v43 }
0x1cbd   :  { %9467 = vmatpush1.bf16.msra.mxu0 %v13035_v23  ;;  %v13079_v23 = vld [vmem:[%s13455_s8 + $0xa4] ss:$8 sps:$4 sm:$0xff]  }
0x1cbe   :  { %9476 = vmatprep.subr.bf16.mxu0 %v13040_v14  ;;  %v13077_v14 = vld [vmem:[%s13455_s8 + $0xa0] ss:$8 sps:$4 sm:$0xff]  }
0x1cc1   :  { %9477 = vmatpush2.bf16.msra.mxu0 %v13038_v32  ;;  %v13082_v32 = vld [vmem:[%s13455_s8 + $0x94] ss:$8 sps:$4 sm:$0xff]  }
0x1cc2   :  { %9478 = vmatprep.subr.bf16.mxu0 %v13043_v40  ;;  %v13109_v40 = vld [vmem:[%s13455_s8 + $0xc4] ss:$8 sps:$4 sm:$0xff]  }
0x1cc5   :  { %9479 = vmatpush2.bf16.msra.mxu0 %v13041_v29  ;;  %v13107_v29 = vld [vmem:[%s13455_s8 + $0xc0] ss:$8 sps:$4 sm:$0xff]  }
0x1cc6   :  { %9480 = vmatprep.subr.bf16.mxu0 %v13046_v51  ;;  %v13112_v51 = vld [vmem:[%s13455_s8 + $0x174] ss:$8 sps:$4 sm:$0xff]  }
0x1cc9   :  { %9481 = vmatpush2.bf16.msra.mxu0 %v13044_v20  ;;  %v13110_v20 = vld [vmem:[%s13455_s8 + $0x170] ss:$8 sps:$4 sm:$0xff]  }
0x1cca   :  { %9482 = vmatprep.subr.bf16.mxu0 %v13049_v33  ;;  %v11208_v33 = vld [vmem:[%s15627_s11 + $0x6] sm:$0x3] }
0x1ccb   :  { %v9322_v53 = vrot.slane %v11208_v33, %v14022_v59 }
0x1ccd   :  { %9483 = vmatpush2.bf16.msra.mxu0 %v13047_v17 }
0x1d60   :  { %v9066_v12 = vpop.f32.mrf.mxu0 }
0x1d61   :  { %v9067_v39 = vadd.f32 %v9066_v12, %v8902_v37  ;;  %v13085_v12 = vld [vmem:[%s13455_s8 + $0x84] ss:$8 sps:$4 sm:$0xff]  }
0x1d62   :  { %v9068_v45 = vpop.f32.mrf.mxu0 }
0x1d63   :  { %v9069_v30 = vadd.f32 %v9068_v45, %v8906_v13  ;;  %v9075_v28 = vmax.f32 %v9067_v39, 0.0  ;;  %v13088_v45 = vld [vmem:[%s13455_s8 + $0x134] ss:$8 sps:$4 sm:$0xff]   ;;  %v13092_v39 = vld [vmem:[%s13455_s8 + $0x110] ss:$8 sps:$4 sm:$0xff]  }
0x1d64   :  { %v9070_v15 = vpop.f32.mrf.mxu0  ;;  %9870 = vmatprep.subr.bf16.mxu0 %v13088_v45 }
0x1d65   :  { %v9071_v31 = vadd.f32 %v9070_v15, %v8902_v37  ;;  %v9076_v22 = vmax.f32 %v9069_v30, 0.0  ;;  %v13086_v37 = vld [vmem:[%s13455_s8 + $0x130] ss:$8 sps:$4 sm:$0xff]   ;;  %v13091_v15 = vld [vmem:[%s13455_s8 + $0x124] ss:$8 sps:$4 sm:$0xff]  }
0x1d66   :  { %v9072_v0 = vpop.f32.mrf.mxu0  ;;  %v13089_v30 = vld [vmem:[%s13455_s8 + $0x120] ss:$8 sps:$4 sm:$0xff]  }
0x1d67   :  { %v9073_v21 = vadd.f32 %v9072_v0, %v8906_v13  ;;  %v9077_v47 = vmax.f32 %v9071_v31, 0.0  ;;  %v13083_v13 = vld [vmem:[%s13455_s8 + $0x80] ss:$8 sps:$4 sm:$0xff]   ;;  %v13094_v31 = vld [vmem:[%s13455_s8 + $0x114] ss:$8 sps:$4 sm:$0xff]  }
0x1d68   :  { %v13097_v0 = vld [vmem:[%s13455_s8 + $0x104] ss:$8 sps:$4 sm:$0xff]  }
0x1d69   :  { %v9078_v52 = vmax.f32 %v9073_v21, 0.0  ;;  %v9106_v11 = vpack.c.bf16 %v9077_v47, %v9075_v28  ;;  %v13095_v21 = vld [vmem:[%s13455_s8 + $0x100] ss:$8 sps:$4 sm:$0xff]   ;;  %v13100_v47 = vld [vmem:[%s13455_s8 + $0xf4] ss:$8 sps:$4 sm:$0xff]  }
0x1d6a   :  { %v13101_v28 = vld [vmem:[%s13455_s8 + $0xe0] ss:$8 sps:$4 sm:$0xff]  }
0x1d6b   :  { %v9107_v34 = vpack.c.bf16 %v9078_v52, %v9076_v22  ;;  %v13098_v22 = vld [vmem:[%s13455_s8 + $0xf0] ss:$8 sps:$4 sm:$0xff]   ;;  %v13103_v52 = vld [vmem:[%s13455_s8 + $0xe4] ss:$8 sps:$4 sm:$0xff]  }
0x1d6d   :  { %11183 = vmatprep.mubr.msk.bf16.mxu1 %vm243_vm0, %v9107_v34  ;;  %v13106_v34 = vld [vmem:[%s13455_s8 + $0xd4] ss:$8 sps:$4 sm:$0xff]  }
0x1d6e   :  { %9275 = vmatmul.mubr.bf16.vlgmr.msra.gmra.mxu1 %v9106_v11  ;;  %v13104_v11 = vld [vmem:[%s13455_s8 + $0xd0] ss:$8 sps:$4 sm:$0xff]  }
0x1d6f   :  { %9661 = vmatpush1.bf16.msra.mxu1 %v13050_v56  ;;  %v9326_v56 = vrot.slane %v11208_v33, %v14016_v42  ;;  %v13152_v33 = vld [vmem:[%s13455_s8 + $0x210] ss:$8 sps:$4 sm:$0xff]  }
0x1d70   :  { %9662 = vmatprep.subr.bf16.mxu1 %v13055_v25 }
0x1d73   :  { %9663 = vmatpush1.bf16.msra.mxu1 %v13053_v18 }
0x1d74   :  { %9664 = vmatprep.subr.bf16.mxu1 %v13058_v41 }
0x1d77   :  { %9665 = vmatpush1.bf16.msra.mxu1 %v13056_v49 }
0x1d78   :  { %9666 = vmatprep.subr.bf16.mxu1 %v13061_v16 }
0x1d7b   :  { %9667 = vmatpush1.bf16.msra.mxu1 %v13059_v26 }
0x1d7c   :  { %9668 = vmatprep.subr.bf16.mxu1 %v13064_v57 }
0x1d7f   :  { %9669 = vmatpush1.bf16.msra.mxu1 %v13062_v36 }
0x1d80   :  { %9670 = vmatprep.subr.bf16.mxu1 %v13067_v35 }
0x1d83   :  { %9671 = vmatpush1.bf16.msra.mxu1 %v13065_v24 }
0x1d84   :  { %9672 = vmatprep.subr.bf16.mxu1 %v13070_v19 }
0x1d87   :  { %9673 = vmatpush1.bf16.msra.mxu1 %v13068_v50 }
0x1d88   :  { %9674 = vmatprep.subr.bf16.mxu1 %v13073_v1 }
0x1d8b   :  { %9675 = vmatpush1.bf16.msra.mxu1 %v13071_v2  ;;  %v13115_v2 = vld [vmem:[%s13455_s8 + $0x164] ss:$8 sps:$4 sm:$0xff]  }
0x1d8c   :  { %9684 = vmatprep.subr.bf16.mxu1 %v13076_v3  ;;  %v13113_v3 = vld [vmem:[%s13455_s8 + $0x160] ss:$8 sps:$4 sm:$0xff]  }
0x1d8f   :  { %9685 = vmatpush2.bf16.msra.mxu1 %v13074_v4  ;;  %v13118_v4 = vld [vmem:[%s13455_s8 + $0x154] ss:$8 sps:$4 sm:$0xff]  }
0x1d90   :  { %9686 = vmatprep.subr.bf16.mxu1 %v13079_v23  ;;  %v13145_v23 = vld [vmem:[%s13455_s8 + $0x184] ss:$8 sps:$4 sm:$0xff]  }
0x1d93   :  { %9687 = vmatpush2.bf16.msra.mxu1 %v13077_v14  ;;  %v13143_v14 = vld [vmem:[%s13455_s8 + $0x180] ss:$8 sps:$4 sm:$0xff]  }
0x1d94   :  { %9688 = vmatprep.subr.bf16.mxu1 %v13082_v32  ;;  %v13148_v32 = vld [vmem:[%s13455_s8 + $0x234] ss:$8 sps:$4 sm:$0xff]  }
0x1d97   :  { %9689 = vmatpush2.bf16.msra.mxu1 %v13080_v60  ;;  %v13146_v60 = vld [vmem:[%s13455_s8 + $0x230] ss:$8 sps:$4 sm:$0xff]  }
0x1d98   :  { %9690 = vmatprep.subr.bf16.mxu1 %v13085_v12  ;;  %v9523_v12 = vld [vmem:[%s13460_s13] sm:$0x3] }
0x1d99   :  { %v9530_v45 = vrot.slane %v9523_v12, %v14022_v59 }
0x1d9b   :  { %9691 = vmatpush2.bf16.msra.mxu1 %v13083_v13 }
0x1e2e   :  { %v9276_v6 = vpop.f32.mrf.mxu1 }
0x1e2f   :  { %v9277_v44 = vadd.f32 %v9276_v6, %v9112_v8  ;;  %v13121_v6 = vld [vmem:[%s13455_s8 + $0x144] ss:$8 sps:$4 sm:$0xff]  }
0x1e30   :  { %v9278_v9 = vpop.f32.mrf.mxu1 }
0x1e31   :  { %v9279_v58 = vadd.f32 %v9278_v9, %v9116_v7  ;;  %v9285_v61 = vmax.f32 %v9277_v44, 0.0  ;;  %v13124_v9 = vld [vmem:[%s13455_s8 + $0x1f4] ss:$8 sps:$4 sm:$0xff]   ;;  %v13128_v44 = vld [vmem:[%s13455_s8 + $0x1d0] ss:$8 sps:$4 sm:$0xff]  }
0x1e32   :  { %v9280_v10 = vpop.f32.mrf.mxu1  ;;  %10080 = vmatprep.subr.bf16.mxu1 %v13124_v9 }
0x1e33   :  { %v9281_v63 = vadd.f32 %v9280_v10, %v9112_v8  ;;  %v9286_v38 = vmax.f32 %v9279_v58, 0.0  ;;  %v13122_v8 = vld [vmem:[%s13455_s8 + $0x1f0] ss:$8 sps:$4 sm:$0xff]   ;;  %v13127_v10 = vld [vmem:[%s13455_s8 + $0x1e4] ss:$8 sps:$4 sm:$0xff]  }
0x1e34   :  { %v9282_v46 = vpop.f32.mrf.mxu1  ;;  %v13125_v58 = vld [vmem:[%s13455_s8 + $0x1e0] ss:$8 sps:$4 sm:$0xff]  }
0x1e35   :  { %v9283_v54 = vadd.f32 %v9282_v46, %v9116_v7  ;;  %v9287_v55 = vmax.f32 %v9281_v63, 0.0  ;;  %v13119_v7 = vld [vmem:[%s13455_s8 + $0x140] ss:$8 sps:$4 sm:$0xff]   ;;  %v13130_v63 = vld [vmem:[%s13455_s8 + $0x1d4] ss:$8 sps:$4 sm:$0xff]  }
0x1e36   :  { %v13133_v46 = vld [vmem:[%s13455_s8 + $0x1c4] ss:$8 sps:$4 sm:$0xff]  }
0x1e37   :  { %v9288_v62 = vmax.f32 %v9283_v54, 0.0  ;;  %v9316_v43 = vpack.c.bf16 %v9287_v55, %v9285_v61  ;;  %v13131_v54 = vld [vmem:[%s13455_s8 + $0x1c0] ss:$8 sps:$4 sm:$0xff]   ;;  %v13136_v55 = vld [vmem:[%s13455_s8 + $0x1b4] ss:$8 sps:$4 sm:$0xff]  }
0x1e38   :  { %v13137_v61 = vld [vmem:[%s13455_s8 + $0x1a0] ss:$8 sps:$4 sm:$0xff]  }
0x1e39   :  { %v9317_v27 = vpack.c.bf16 %v9288_v62, %v9286_v38  ;;  %v13134_v38 = vld [vmem:[%s13455_s8 + $0x1b0] ss:$8 sps:$4 sm:$0xff]   ;;  %v13139_v62 = vld [vmem:[%s13455_s8 + $0x1a4] ss:$8 sps:$4 sm:$0xff]  }
0x1e3b   :  { %11233 = vmatprep.mubr.msk.bf16.mxu0 %vm243_vm0, %v9317_v27  ;;  %v13142_v27 = vld [vmem:[%s13455_s8 + $0x194] ss:$8 sps:$4 sm:$0xff]  }
0x1e3c   :  { %9485 = vmatmul.mubr.bf16.vlgmr.msra.gmra.mxu0 %v9316_v43  ;;  %v13140_v43 = vld [vmem:[%s13455_s8 + $0x190] ss:$8 sps:$4 sm:$0xff]  }
0x1e3d   :  { %9871 = vmatpush1.bf16.msra.mxu0 %v13086_v37  ;;  %v9534_v37 = vrot.slane %v9523_v12, %v14016_v42  ;;  %v13188_v12 = vld [vmem:[%s13455_s8 + $0x2d0] ss:$8 sps:$4 sm:$0xff]  }
0x1e3e   :  { %9872 = vmatprep.subr.bf16.mxu0 %v13091_v15 }
0x1e41   :  { %9873 = vmatpush1.bf16.msra.mxu0 %v13089_v30 }
0x1e42   :  { %9874 = vmatprep.subr.bf16.mxu0 %v13094_v31 }
0x1e45   :  { %9875 = vmatpush1.bf16.msra.mxu0 %v13092_v39 }
0x1e46   :  { %9876 = vmatprep.subr.bf16.mxu0 %v13097_v0 }
0x1e49   :  { %9877 = vmatpush1.bf16.msra.mxu0 %v13095_v21 }
0x1e4a   :  { %9878 = vmatprep.subr.bf16.mxu0 %v13100_v47 }
0x1e4d   :  { %9879 = vmatpush1.bf16.msra.mxu0 %v13098_v22 }
0x1e4e   :  { %9880 = vmatprep.subr.bf16.mxu0 %v13103_v52 }
0x1e51   :  { %9881 = vmatpush1.bf16.msra.mxu0 %v13101_v28 }
0x1e52   :  { %9882 = vmatprep.subr.bf16.mxu0 %v13106_v34 }
0x1e55   :  { %9883 = vmatpush1.bf16.msra.mxu0 %v13104_v11 }
0x1e56   :  { %9884 = vmatprep.subr.bf16.mxu0 %v13109_v40 }
0x1e59   :  { %9885 = vmatpush1.bf16.msra.mxu0 %v13107_v29  ;;  %v13151_v29 = vld [vmem:[%s13455_s8 + $0x224] ss:$8 sps:$4 sm:$0xff]  }
0x1e5a   :  { %9894 = vmatprep.subr.bf16.mxu0 %v13112_v51  ;;  %v13149_v51 = vld [vmem:[%s13455_s8 + $0x220] ss:$8 sps:$4 sm:$0xff]  }
0x1e5d   :  { %9895 = vmatpush2.bf16.msra.mxu0 %v13110_v20  ;;  %v13154_v20 = vld [vmem:[%s13455_s8 + $0x214] ss:$8 sps:$4 sm:$0xff]  }
0x1e5e   :  { %9896 = vmatprep.subr.bf16.mxu0 %v13115_v2  ;;  %v13181_v2 = vld [vmem:[%s13455_s8 + $0x244] ss:$8 sps:$4 sm:$0xff]  }
0x1e61   :  { %9897 = vmatpush2.bf16.msra.mxu0 %v13113_v3  ;;  %v13179_v3 = vld [vmem:[%s13455_s8 + $0x240] ss:$8 sps:$4 sm:$0xff]  }
0x1e62   :  { %9898 = vmatprep.subr.bf16.mxu0 %v13118_v4  ;;  %v13184_v4 = vld [vmem:[%s13455_s8 + $0x2f4] ss:$8 sps:$4 sm:$0xff]  }
0x1e65   :  { %9899 = vmatpush2.bf16.msra.mxu0 %v13116_v5  ;;  %v13182_v5 = vld [vmem:[%s13455_s8 + $0x2f0] ss:$8 sps:$4 sm:$0xff]  }
0x1e66   :  { %9900 = vmatprep.subr.bf16.mxu0 %v13121_v6  ;;  %v11283_v6 = vld [vmem:[%s13460_s13 + $0x2] sm:$0x3] }
0x1e67   :  { %v9740_v9 = vrot.slane %v11283_v6, %v14022_v59 }
0x1e69   :  { %9901 = vmatpush2.bf16.msra.mxu0 %v13119_v7 }
0x1efc   :  { %v9486_v17 = vpop.f32.mrf.mxu0 }
0x1efd   :  { %v9487_v16 = vadd.f32 %v9486_v17, %v9322_v53  ;;  %v13157_v17 = vld [vmem:[%s13455_s8 + $0x204] ss:$8 sps:$4 sm:$0xff]  }
0x1efe   :  { %v9488_v25 = vpop.f32.mrf.mxu0 }
0x1eff   :  { %v9489_v41 = vadd.f32 %v9488_v25, %v9326_v56  ;;  %v9495_v19 = vmax.f32 %v9487_v16, 0.0  ;;  %v13160_v25 = vld [vmem:[%s13455_s8 + $0x2b4] ss:$8 sps:$4 sm:$0xff]   ;;  %v13164_v16 = vld [vmem:[%s13455_s8 + $0x290] ss:$8 sps:$4 sm:$0xff]  }
0x1f00   :  { %v9490_v18 = vpop.f32.mrf.mxu0  ;;  %10290 = vmatprep.subr.bf16.mxu0 %v13160_v25 }
0x1f01   :  { %v9491_v49 = vadd.f32 %v9490_v18, %v9322_v53  ;;  %v9496_v35 = vmax.f32 %v9489_v41, 0.0  ;;  %v13158_v53 = vld [vmem:[%s13455_s8 + $0x2b0] ss:$8 sps:$4 sm:$0xff]   ;;  %v13163_v18 = vld [vmem:[%s13455_s8 + $0x2a4] ss:$8 sps:$4 sm:$0xff]  }
0x1f02   :  { %v9492_v26 = vpop.f32.mrf.mxu0  ;;  %v13161_v41 = vld [vmem:[%s13455_s8 + $0x2a0] ss:$8 sps:$4 sm:$0xff]  }
0x1f03   :  { %v9493_v57 = vadd.f32 %v9492_v26, %v9326_v56  ;;  %v9497_v36 = vmax.f32 %v9491_v49, 0.0  ;;  %v13155_v56 = vld [vmem:[%s13455_s8 + $0x200] ss:$8 sps:$4 sm:$0xff]   ;;  %v13166_v49 = vld [vmem:[%s13455_s8 + $0x294] ss:$8 sps:$4 sm:$0xff]  }
0x1f04   :  { %v13169_v26 = vld [vmem:[%s13455_s8 + $0x284] ss:$8 sps:$4 sm:$0xff]  }
0x1f05   :  { %v9498_v24 = vmax.f32 %v9493_v57, 0.0  ;;  %v9524_v1 = vpack.c.bf16 %v9497_v36, %v9495_v19  ;;  %v13167_v57 = vld [vmem:[%s13455_s8 + $0x280] ss:$8 sps:$4 sm:$0xff]   ;;  %v13172_v36 = vld [vmem:[%s13455_s8 + $0x274] ss:$8 sps:$4 sm:$0xff]  }
0x1f06   :  { %v13173_v19 = vld [vmem:[%s13455_s8 + $0x260] ss:$8 sps:$4 sm:$0xff]  }
0x1f07   :  { %v9525_v50 = vpack.c.bf16 %v9498_v24, %v9496_v35  ;;  %v13170_v35 = vld [vmem:[%s13455_s8 + $0x270] ss:$8 sps:$4 sm:$0xff]   ;;  %v13175_v24 = vld [vmem:[%s13455_s8 + $0x264] ss:$8 sps:$4 sm:$0xff]  }
0x1f09   :  { %11258 = vmatprep.mubr.msk.bf16.mxu1 %vm243_vm0, %v9525_v50  ;;  %v13178_v50 = vld [vmem:[%s13455_s8 + $0x254] ss:$8 sps:$4 sm:$0xff]  }
0x1f0a   :  { %9693 = vmatmul.mubr.bf16.vlgmr.msra.gmra.mxu1 %v9524_v1  ;;  %v13176_v1 = vld [vmem:[%s13455_s8 + $0x250] ss:$8 sps:$4 sm:$0xff]  }
0x1f0b   :  { %10081 = vmatpush1.bf16.msra.mxu1 %v13122_v8  ;;  %v9744_v8 = vrot.slane %v11283_v6, %v14016_v42 }
0x1f0c   :  { %10082 = vmatprep.subr.bf16.mxu1 %v13127_v10 }
0x1f0f   :  { %10083 = vmatpush1.bf16.msra.mxu1 %v13125_v58 }
0x1f10   :  { %10084 = vmatprep.subr.bf16.mxu1 %v13130_v63 }
0x1f13   :  { %10085 = vmatpush1.bf16.msra.mxu1 %v13128_v44 }
0x1f14   :  { %10086 = vmatprep.subr.bf16.mxu1 %v13133_v46 }
0x1f17   :  { %10087 = vmatpush1.bf16.msra.mxu1 %v13131_v54 }
0x1f18   :  { %10088 = vmatprep.subr.bf16.mxu1 %v13136_v55 }
0x1f1b   :  { %10089 = vmatpush1.bf16.msra.mxu1 %v13134_v38 }
0x1f1c   :  { %10090 = vmatprep.subr.bf16.mxu1 %v13139_v62 }
0x1f1f   :  { %10091 = vmatpush1.bf16.msra.mxu1 %v13137_v61 }
0x1f20   :  { %10092 = vmatprep.subr.bf16.mxu1 %v13142_v27 }
0x1f23   :  { %10093 = vmatpush1.bf16.msra.mxu1 %v13140_v43 }
0x1f24   :  { %10094 = vmatprep.subr.bf16.mxu1 %v13145_v23 }
0x1f27   :  { %10095 = vmatpush1.bf16.msra.mxu1 %v13143_v14  ;;  %v13187_v14 = vld [vmem:[%s13455_s8 + $0x2e4] ss:$8 sps:$4 sm:$0xff]  }
0x1f28   :  { %10104 = vmatprep.subr.bf16.mxu1 %v13148_v32  ;;  %v13185_v32 = vld [vmem:[%s13455_s8 + $0x2e0] ss:$8 sps:$4 sm:$0xff]  }
0x1f2b   :  { %10105 = vmatpush2.bf16.msra.mxu1 %v13146_v60  ;;  %v13190_v60 = vld [vmem:[%s13455_s8 + $0x2d4] ss:$8 sps:$4 sm:$0xff]  }
0x1f2c   :  { %10106 = vmatprep.subr.bf16.mxu1 %v13151_v29 }
0x1f2f   :  { %10107 = vmatpush2.bf16.msra.mxu1 %v13149_v51 }
0x1f30   :  { %10108 = vmatprep.subr.bf16.mxu1 %v13154_v20 }
0x1f33   :  { %10109 = vmatpush2.bf16.msra.mxu1 %v13152_v33 }
0x1f34   :  { %10110 = vmatprep.subr.bf16.mxu1 %v13157_v17 }
0x1f37   :  { %10111 = vmatpush2.bf16.msra.mxu1 %v13155_v56 }
0x1f38   :  { %10445 = vmatprep.subr.bf16.mxu1 %v15622_v48 }
0x1fca   :  { %v9694_v13 = vpop.f32.mrf.mxu1 }
0x1fcb   :  { %v9695_v0 = vadd.f32 %v9694_v13, %v9530_v45  ;;  %v13193_v13 = vld [vmem:[%s13455_s8 + $0x2c4] ss:$8 sps:$4 sm:$0xff]  }
0x1fcc   :  { %v9696_v15 = vpop.f32.mrf.mxu1 }
0x1fcd   :  { %v9697_v31 = vadd.f32 %v9696_v15, %v9534_v37  ;;  %v9703_v34 = vmax.f32 %v9695_v0, 0.0  ;;  %v13195_v15 = vld [vmem:[%s13465_s6 + $0x30] sm:$0xff]  }
0x1fce   :  { %v9698_v30 = vpop.f32.mrf.mxu1  ;;  %v13199_v0 = vld [vmem:[%s13465_s6 + $0x10] sm:$0xff]  }
0x1fcf   :  { %v9699_v39 = vadd.f32 %v9698_v30, %v9530_v45  ;;  %v9704_v52 = vmax.f32 %v9697_v31, 0.0  ;;  %v13194_v45 = vld [vmem:[%s13465_s6 + $0x38] sm:$0xff]   ;;  %v13196_v30 = vld [vmem:[%s13465_s6 + $0x28] sm:$0xff]   ;;  %v13197_v31 = vld [vmem:[%s13465_s6 + $0x20] sm:$0xff]  }
0x1fd0   :  { %v9700_v21 = vpop.f32.mrf.mxu1 }
0x1fd1   :  { %v9701_v47 = vadd.f32 %v9700_v21, %v9534_v37  ;;  %v9705_v22 = vmax.f32 %v9699_v39, 0.0  ;;  %v13191_v37 = vld [vmem:[%s13455_s8 + $0x2c0] ss:$8 sps:$4 sm:$0xff]   ;;  %v13198_v39 = vld [vmem:[%s13465_s6 + $0x18] sm:$0xff]  }
0x1fd2   :  { %v13200_v21 = vld [vmem:[%s13465_s6 + $0x8] sm:$0xff]  }
0x1fd3   :  { %v9706_v28 = vmax.f32 %v9701_v47, 0.0  ;;  %v9734_v40 = vpack.c.bf16 %v9705_v22, %v9703_v34  ;;  %v13201_v47 = vld [vmem:[%s13465_s6] sm:$0xff]   ;;  %v13202_v22 = vld [vmem:[%s13465_s6 + $0x58] sm:$0xff]  }
0x1fd5   :  { %v9735_v11 = vpack.c.bf16 %v9706_v28, %v9704_v52  ;;  %v11333_v52 = vld [vmem:[%s13460_s13 + $0x4] sm:$0x3] }
0x1fd6   :  { %v9954_v34 = vrot.slane %v11333_v52, %v14016_v42 }
0x1fd7   :  { %11308 = vmatprep.mubr.msk.bf16.mxu0 %vm243_vm0, %v9735_v11  ;;  %v9950_v11 = vrot.slane %v11333_v52, %v14022_v59 }
0x1fd8   :  { %9903 = vmatmul.mubr.bf16.vlgmr.msra.gmra.mxu0 %v9734_v40 }
0x1fd9   :  { %10291 = vmatpush1.bf16.msra.mxu0 %v13158_v53 }
0x1fda   :  { %10292 = vmatprep.subr.bf16.mxu0 %v13163_v18 }
0x1fdd   :  { %10293 = vmatpush1.bf16.msra.mxu0 %v13161_v41 }
0x1fde   :  { %10294 = vmatprep.subr.bf16.mxu0 %v13166_v49 }
0x1fe1   :  { %10295 = vmatpush1.bf16.msra.mxu0 %v13164_v16 }
0x1fe2   :  { %10296 = vmatprep.subr.bf16.mxu0 %v13169_v26  ;;  %v13203_v26 = vld [vmem:[%s13465_s6 + $0x50] sm:$0xff]  }
0x1fe5   :  { %10297 = vmatpush1.bf16.msra.mxu0 %v13167_v57  ;;  %v13204_v57 = vld [vmem:[%s13465_s6 + $0x48] sm:$0xff]  }
0x1fe6   :  { %10298 = vmatprep.subr.bf16.mxu0 %v13172_v36  ;;  %v13205_v36 = vld [vmem:[%s13465_s6 + $0x40] sm:$0xff]  }
0x1fe9   :  { %10299 = vmatpush1.bf16.msra.mxu0 %v13170_v35  ;;  %v11383_v35 = vld [vmem:[%s13460_s13 + $0x6] sm:$0x3] }
0x1fea   :  { %10300 = vmatprep.subr.bf16.mxu0 %v13175_v24 }
0x1fed   :  { %10301 = vmatpush1.bf16.msra.mxu0 %v13173_v19  ;;  %v10164_v19 = vrot.slane %v11383_v35, %v14016_v42  ;;  %v11409_v42 = vld [vmem:[%s13471_s1] ss:$0 sm:$0xff] }
0x1fee   :  { %10302 = vmatprep.subr.bf16.mxu0 %v13178_v50  ;;  %v10160_v50 = vrot.slane %v11383_v35, %v14022_v59 }
0x1ff1   :  { %10303 = vmatpush1.bf16.msra.mxu0 %v13176_v1 }
0x1ff2   :  { %10304 = vmatprep.subr.bf16.mxu0 %v13181_v2 }
0x1ff5   :  { %10305 = vmatpush1.bf16.msra.mxu0 %v13179_v3 }
0x1ff6   :  { %10314 = vmatprep.subr.bf16.mxu0 %v13184_v4 }
0x1ff9   :  { %10315 = vmatpush2.bf16.msra.mxu0 %v13182_v5 }
0x1ffa   :  { %10316 = vmatprep.subr.bf16.mxu0 %v13187_v14 }
0x1ffd   :  { %10317 = vmatpush2.bf16.msra.mxu0 %v13185_v32 }
0x1ffe   :  { %10318 = vmatprep.subr.bf16.mxu0 %v13190_v60 }
0x2001   :  { %10319 = vmatpush2.bf16.msra.mxu0 %v13188_v12 }
0x2002   :  { %10320 = vmatprep.subr.bf16.mxu0 %v13193_v13 }
0x2005   :  { %10321 = vmatpush2.bf16.msra.mxu0 %v13191_v37 }
0x2098   :  { %v9904_v7 = vpop.f32.mrf.mxu0 }
0x2099   :  { %v9905_v46 = vadd.f32 %v9904_v7, %v9740_v9 }
0x209a   :  { %v9906_v10 = vpop.f32.mrf.mxu0 }
0x209b   :  { %v9907_v63 = vadd.f32 %v9906_v10, %v9744_v8  ;;  %v9913_v27 = vmax.f32 %v9905_v46, 0.0 }
0x209c   :  { %v9908_v58 = vpop.f32.mrf.mxu0 }
0x209d   :  { %v9909_v44 = vadd.f32 %v9908_v58, %v9740_v9  ;;  %v9914_v62 = vmax.f32 %v9907_v63, 0.0 }
0x209e   :  { %v9910_v54 = vpop.f32.mrf.mxu0 }
0x209f   :  { %v9911_v55 = vadd.f32 %v9910_v54, %v9744_v8  ;;  %v9915_v38 = vmax.f32 %v9909_v44, 0.0 }
0x20a1   :  { %v9916_v61 = vmax.f32 %v9911_v55, 0.0  ;;  %v9944_v23 = vpack.c.bf16 %v9915_v38, %v9913_v27 }
0x20a3   :  { %v9945_v43 = vpack.c.bf16 %v9916_v61, %v9914_v62 }
0x20a5   :  { %11358 = vmatprep.mubr.msk.bf16.mxu1 %vm243_vm0, %v9945_v43 }
0x20a6   :  { %10113 = vmatmul.mubr.bf16.vlgmr.msra.gmra.mxu1 %v9944_v23 }
0x20a7   :  { %10446 = vmatpush1.bf16.msra.mxu1 %v13194_v45 }
0x20a8   :  { %10447 = vmatprep.subr.bf16.mxu1 %v15622_v48 }
0x20ab   :  { %10448 = vmatpush1.bf16.msra.mxu1 %v13195_v15 }
0x20ac   :  { %10449 = vmatprep.subr.bf16.mxu1 %v15622_v48 }
0x20af   :  { %10450 = vmatpush1.bf16.msra.mxu1 %v13196_v30 }
0x20b0   :  { %10451 = vmatprep.subr.bf16.mxu1 %v15622_v48 }
0x20b3   :  { %10452 = vmatpush1.bf16.msra.mxu1 %v13197_v31 }
0x20b4   :  { %10453 = vmatprep.subr.bf16.mxu1 %v15622_v48 }
0x20b7   :  { %10454 = vmatpush1.bf16.msra.mxu1 %v13198_v39 }
0x20b8   :  { %10455 = vmatprep.subr.bf16.mxu1 %v15622_v48 }
0x20bb   :  { %10456 = vmatpush1.bf16.msra.mxu1 %v13199_v0 }
0x20bc   :  { %10457 = vmatprep.subr.bf16.mxu1 %v15622_v48 }
0x20bf   :  { %10458 = vmatpush1.bf16.msra.mxu1 %v13200_v21 }
0x20c0   :  { %10459 = vmatprep.subr.bf16.mxu1 %v15622_v48 }
0x20c3   :  { %10460 = vmatpush1.bf16.msra.mxu1 %v13201_v47 }
0x20c4   :  { %10469 = vmatprep.subr.bf16.mxu1 %v15622_v48 }
0x20c7   :  { %10470 = vmatpush2.bf16.msra.mxu1 %v13202_v22 }
0x20c8   :  { %10471 = vmatprep.subr.bf16.mxu1 %v15622_v48 }
0x20cb   :  { %10472 = vmatpush2.bf16.msra.mxu1 %v13203_v26 }
0x20cc   :  { %10473 = vmatprep.subr.bf16.mxu1 %v15622_v48 }
0x20cf   :  { %10474 = vmatpush2.bf16.msra.mxu1 %v13204_v57 }
0x20d0   :  { %10475 = vmatprep.subr.bf16.mxu1 %v15622_v48 }
0x20d3   :  { %10476 = vmatpush2.bf16.msra.mxu1 %v13205_v36 }
0x2166   :  { %v10114_v28 = vpop.f32.mrf.mxu1 }
0x2167   :  { %v10115_v33 = vadd.f32 %v10114_v28, %v9950_v11 }
0x2168   :  { %v10116_v40 = vpop.f32.mrf.mxu1 }
0x2169   :  { %v10117_v51 = vadd.f32 %v10116_v40, %v9954_v34  ;;  %v10123_v41 = vmax.f32 %v10115_v33, 0.0 }
0x216a   :  { %v10118_v29 = vpop.f32.mrf.mxu1 }
0x216b   :  { %v10119_v20 = vadd.f32 %v10118_v29, %v9950_v11  ;;  %v10124_v25 = vmax.f32 %v10117_v51, 0.0 }
0x216c   :  { %v10120_v17 = vpop.f32.mrf.mxu1 }
0x216d   :  { %v10121_v56 = vadd.f32 %v10120_v17, %v9954_v34  ;;  %v10125_v53 = vmax.f32 %v10119_v20, 0.0 }
0x216f   :  { %v10126_v18 = vmax.f32 %v10121_v56, 0.0  ;;  %v10154_v16 = vpack.c.bf16 %v10125_v53, %v10123_v41 }
0x2171   :  { %v10155_v49 = vpack.c.bf16 %v10126_v18, %v10124_v25 }
0x2173   :  { %11408 = vmatprep.mubr.msk.bf16.mxu0 %vm243_vm0, %v10155_v49 }
0x2174   :  { %10323 = vmatmul.mubr.bf16.vlgmr.msra.gmra.mxu0 %v10154_v16 }
0x2234   :  { %v10324_v24 = vpop.f32.mrf.mxu0 }
0x2235   :  { %v10325_v5 = vadd.f32 %v10324_v24, %v10160_v50 }
0x2236   :  { %v10326_v1 = vpop.f32.mrf.mxu0 }
0x2237   :  { %v10327_v3 = vadd.f32 %v10326_v1, %v10164_v19  ;;  %v10333_v10 = vmax.f32 %v10325_v5, 0.0 }
0x2238   :  { %v10328_v2 = vpop.f32.mrf.mxu0 }
0x2239   :  { %v10329_v4 = vadd.f32 %v10328_v2, %v10160_v50  ;;  %v10334_v9 = vmax.f32 %v10327_v3, 0.0 }
0x223a   :  { %v10330_v6 = vpop.f32.mrf.mxu0 }
0x223b   :  { %v10331_v7 = vadd.f32 %v10330_v6, %v10164_v19  ;;  %v10335_v8 = vmax.f32 %v10329_v4, 0.0 }
0x223d   :  { %v10336_v48 = vmax.f32 %v10331_v7, 0.0  ;;  %v10362_v63 = vpack.c.bf16 %v10335_v8, %v10333_v10 }
0x223f   :  { %v10363_v58 = vpack.c.bf16 %v10336_v48, %v10334_v9 }
0x2241   :  { %11422 = vmatprep.mubr.msk.bf16.mxu1 %vm243_vm0, %v10363_v58 }
0x2242   :  { %10478 = vmatmul.mubr.bf16.vlgmr.msra.gmra.mxu1 %v10362_v63 }
0x2302   :  { %v10479_v59 = vpop.f32.mrf.mxu1 }
0x2303   :  { %v10480_v44 = vadd.f32 %v11409_v42, %v10479_v59 }
0x2304   :  { %v10481_v46 = vpop.f32.mrf.mxu1 }
0x2305   :  { %10487 = vst.msk [vmem:[%s13477_s10] sm:$0xff] %vm10486_vm5, %v10480_v44 }
0x2306   :  { %v10482_v54 = vpop.f32.mrf.mxu1 }
0x2307   :  { %v10483_v55 = vadd.f32 %v11409_v42, %v10482_v54 }
0x2308   :  { %v10484_v38 = vpop.f32.mrf.mxu1 }
0x2309   :  { %10488 = vst.msk [vmem:[%s13477_s10 + $0x8] sm:$0xff] %vm10486_vm5, %v10483_v55 }

</bundles_post_ra>
